<compile_context>
chip_gen: v6e
topology: v6e:2x2x1
jax: 0.10.0
libtpu: 0.0.40
codegen_flags: <defaults>
</compile_context>

<pallas_src>
import functools

import jax
import jax.numpy as jnp
from jax.experimental import pallas as pl
from jax.experimental.pallas import tpu as pltpu


# ----------------------------------------------------------------------------
# Fused SAFFB kernel (per batch element).
# ----------------------------------------------------------------------------
def _saffb_kernel(xcm_ref, xhwc_ref, wc1_ref, bc1_ref, wc2_ref, bc2_ref,
                  wc3_ref, bc3_ref, w1_ref, b1_ref, w2_ref, b2_ref,
                  o_ref, pad_ref, col_ref, *, h, w):
    # xcm_ref : (1, c, h*w)   channel-major input (residual + final store)
    # xhwc_ref: (1, h, w, c)  same input, HWC view (conv halo fill)
    # wc1/wc2 : (9c, c)  conv weights in im2col order, bc1/bc2: (1, c)
    # wc3     : (2nc, c) 1x1 conv weight,               bc3    : (2nc, 1)
    # w1      : (n, c, c//2)  b1: (n, 1, c//2)   w2: (n, c, c//2)  b2: (n, c, 1)
    # o_ref   : (1, c, h*w)
    # pad_ref : (h+2, w+2, c) VMEM zero-halo scratch
    # col_ref : (h*w, 9c)     VMEM im2col scratch
    c = xcm_ref.shape[1]
    hw = h * w
    n = w1_ref.shape[0]
    f32, bf16 = jnp.float32, jnp.bfloat16

    def conv3x3(w_mat, b_row):
        xp = pad_ref[...]                                       # (h+2, w+2, c)
        for t in range(9):                                      # im2col build
            dy, dx = divmod(t, 3)
            col_ref[:, t * c:(t + 1) * c] = (
                xp[dy:dy + h, dx:dx + w, :].reshape(hw, c))
        # single MXU matmul, K = 9c, bf16 operands, f32 accumulation
        return jnp.dot(col_ref[...].astype(bf16), w_mat.astype(bf16),
                       preferred_element_type=f32) + b_row      # (hw, c)

    # conv1 + ReLU: halo padding lives in VMEM (no HBM pad round trip).
    pad_ref[...] = jnp.zeros_like(pad_ref)
    pad_ref[1:h + 1, 1:w + 1, :] = xhwc_ref[0].astype(f32)
    h1 = jnp.maximum(conv3x3(wc1_ref[...], bc1_ref[...]), 0.0)  # (hw, c)

    # conv2 (reuse halo scratch; border stays zero).
    pad_ref[1:h + 1, 1:w + 1, :] = h1.reshape(h, w, c)
    h2 = conv3x3(wc2_ref[...], bc2_ref[...])                    # (hw, c)

    # 1x1 conv straight into channel-major (2nc, hw): lane-dense from here on.
    n2 = jax.lax.dot_general(
        wc3_ref[...].astype(bf16), h2.astype(bf16),
        dimension_numbers=(((1,), (1,)), ((), ())),
        preferred_element_type=f32) + bc3_ref[...]              # (2nc, hw)

    # Global average pool of every channel at once (one lane reduction).
    gaps = jnp.sum(n2, axis=1, keepdims=True) * (1.0 / float(hw))  # (2nc, 1)

    # n AFF branches; accumulator starts from the residual input.
    acc = xcm_ref[0].astype(f32)                                # (c, hw)
    for i in range(n):
        l = n2[2 * i * c:(2 * i + 1) * c, :]                    # (c, hw)
        r = n2[(2 * i + 1) * c:(2 * i + 2) * c, :]              # (c, hw)
        g = (gaps[2 * i * c:(2 * i + 1) * c, :]
             + gaps[(2 * i + 1) * c:(2 * i + 2) * c, :])        # (c, 1)
        # tiny MLP on the VPU/XLU (no degenerate N=1 matmuls, f32 throughout)
        hmid = jnp.maximum(
            jnp.sum(w1_ref[i] * g, axis=0, keepdims=True) + b1_ref[i],
            0.0)                                                # (1, c//2)
        gate = jax.nn.sigmoid(
            jnp.sum(w2_ref[i] * hmid, axis=1, keepdims=True) + b2_ref[i])
        # gate*l + (1-gate)*r with the (1-gate) broadcast hoisted away
        acc = acc + r + gate * (l - r)

    o_ref[...] = acc[None].astype(o_ref.dtype)                  # lane-dense vst


def saffb_forward(x_cm, p, h, w):
    """x_cm: (B, c, h*w) channel-major. Returns (B, c, h*w)."""
    B, c, hw = x_cm.shape
    n = p["w1"].shape[0]
    cm = c // 2
    # HWC view of the input for the conv halo fill (layout plumbing in XLA).
    x_hwc = jnp.transpose(x_cm.reshape(B, c, h, w), (0, 2, 3, 1))
    wc1 = p["wc1"].reshape(9 * c, c)          # HWIO -> im2col (9c, c)
    wc2 = p["wc2"].reshape(9 * c, c)
    bc1 = p["bc1"].reshape(1, c)
    bc2 = p["bc2"].reshape(1, c)
    wc3 = p["wc3"].T                          # (2nc, c)
    bc3 = p["bc3"].reshape(2 * n * c, 1)

    def _b2(bi):  # broadcast 2-D weight blocks
        return (0, 0)

    def _b3(bi):  # broadcast 3-D weight blocks
        return (0, 0, 0)

    kern = functools.partial(_saffb_kernel, h=h, w=w)
    return pl.pallas_call(
        kern,
        out_shape=jax.ShapeDtypeStruct((B, c, hw), x_cm.dtype),
        grid_spec=pltpu.PrefetchScalarGridSpec(
            num_scalar_prefetch=0,
            grid=(B,),
            in_specs=[
                pl.BlockSpec((1, c, hw), lambda bi: (bi, 0, 0)),
                pl.BlockSpec((1, h, w, c), lambda bi: (bi, 0, 0, 0)),
                pl.BlockSpec((9 * c, c), _b2),
                pl.BlockSpec((1, c), _b2),
                pl.BlockSpec((9 * c, c), _b2),
                pl.BlockSpec((1, c), _b2),
                pl.BlockSpec((2 * n * c, c), _b2),
                pl.BlockSpec((2 * n * c, 1), _b2),
                pl.BlockSpec((n, c, cm), _b3),
                pl.BlockSpec((n, 1, cm), _b3),
                pl.BlockSpec((n, c, cm), _b3),
                pl.BlockSpec((n, c, 1), _b3),
            ],
            out_specs=pl.BlockSpec((1, c, hw), lambda bi: (bi, 0, 0)),
            scratch_shapes=[
                pltpu.VMEM((h + 2, w + 2, c), jnp.float32),   # zero-halo pad
                pltpu.VMEM((hw, 9 * c), jnp.float32),         # im2col
            ],
        ),
        compiler_params=pltpu.CompilerParams(
            dimension_semantics=("parallel",)),
    )(x_cm, x_hwc, wc1, bc1, wc2, bc2, wc3, bc3,
      p["w1"], p["b1"], p["w2"], p["b2"])


# ----------------------------------------------------------------------------
# Fused RFAB aggregation: 1x1 conv over concat(out1,out2,out3) + bias + input.
# Implemented as 3 channel-major matmuls (no HBM concat), lane-dense output.
# ----------------------------------------------------------------------------
def _rfab_aggr_kernel(x_ref, o1_ref, o2_ref, o3_ref, w_ref, b_ref, out_ref):
    # x/o*/out: (1, c, hw)   w: (3, c, c)   b: (c, 1)
    f32, bf16 = jnp.float32, jnp.bfloat16
    acc = x_ref[0].astype(f32) + b_ref[...]
    for k, oref in enumerate((o1_ref, o2_ref, o3_ref)):
        acc = acc + jnp.dot(w_ref[k].astype(bf16), oref[0].astype(bf16),
                            preferred_element_type=f32)
    out_ref[...] = acc[None].astype(out_ref.dtype)


def rfab_aggr(x_cm, o1, o2, o3, w_aggr, b_aggr):
    B, c, hw = x_cm.shape
    # w_aggr is (3c, c) with rows ordered [out1 | out2 | out3].
    w_k = jnp.stack([w_aggr[k * c:(k + 1) * c, :].T for k in range(3)], axis=0)
    b_k = b_aggr.reshape(c, 1)
    pix = pl.BlockSpec((1, c, hw), lambda bi: (bi, 0, 0))
    return pl.pallas_call(
        _rfab_aggr_kernel,
        out_shape=jax.ShapeDtypeStruct((B, c, hw), x_cm.dtype),
        grid_spec=pltpu.PrefetchScalarGridSpec(
            num_scalar_prefetch=0,
            grid=(B,),
            in_specs=[pix, pix, pix, pix,
                      pl.BlockSpec((3, c, c), lambda bi: (0, 0, 0)),
                      pl.BlockSpec((c, 1), lambda bi: (0, 0))],
            out_specs=pix,
        ),
        compiler_params=pltpu.CompilerParams(
            dimension_semantics=("parallel",)),
    )(x_cm, o1, o2, o3, w_k, b_k)


def rfab_forward(x_cm, p, h, w):
    o1 = saffb_forward(x_cm, p["saffbs"][0], h, w)
    o2 = saffb_forward(o1 + x_cm, p["saffbs"][1], h, w)
    o3 = saffb_forward(o2 + o1 + x_cm, p["saffbs"][2], h, w)
    return rfab_aggr(x_cm, o1, o2, o3, p["w_aggr"], p["b_aggr"])


def pixel_shuffle(x_nchw, r):
    # Pure data relayout (PyTorch nn.PixelShuffle semantics), done in XLA.
    B, C, H, W = x_nchw.shape
    co = C // (r * r)
    y = x_nchw.reshape(B, co, r, r, H, W)
    y = jnp.transpose(y, (0, 1, 4, 2, 5, 3))
    return y.reshape(B, co, H * r, W * r)


@functools.partial(jax.jit, static_argnames=("upscale",))
def upsampling_forward(x_nchw, params, *, upscale=2):
    B, C, H, W = x_nchw.shape
    y = x_nchw.reshape(B, C, H * W)          # channel-major, lane-dense layout
    for p in params:                          # t RFAB blocks
        y = rfab_forward(y, p, H, W)
    return pixel_shuffle(y.reshape(B, C, H, W), upscale)


# ----------------------------------------------------------------------------
# Deterministic synthetic parameters.
# ----------------------------------------------------------------------------
def init_saffb_params(key, c, n):
    ks = jax.random.split(key, 10)
    cm = c // 2
    s = 0.1
    nrm = jax.random.normal
    return {
        "wc1": s * nrm(ks[0], (3, 3, c, c), jnp.float32),      # HWIO
        "bc1": s * nrm(ks[1], (c,), jnp.float32),
        "wc2": s * nrm(ks[2], (3, 3, c, c), jnp.float32),
        "bc2": s * nrm(ks[3], (c,), jnp.float32),
        "wc3": s * nrm(ks[4], (c, 2 * n * c), jnp.float32),    # (Cin, Cout)
        "bc3": s * nrm(ks[5], (2 * n * c,), jnp.float32),
        "w1": s * nrm(ks[6], (n, c, cm), jnp.float32),         # Linear1.T
        "b1": s * nrm(ks[7], (n, 1, cm), jnp.float32),
        "w2": s * nrm(ks[8], (n, c, cm), jnp.float32),         # Linear2 (out,in)
        "b2": s * nrm(ks[9], (n, c, 1), jnp.float32),
    }


def init_rfab_params(key, c, n):
    ks = jax.random.split(key, 5)
    return {
        "saffbs": [init_saffb_params(ks[i], c, n) for i in range(3)],
        "w_aggr": 0.1 * jax.random.normal(ks[3], (3 * c, c), jnp.float32),
        "b_aggr": 0.1 * jax.random.normal(ks[4], (c,), jnp.float32),
    }


def init_upsampling_params(key, c, t, n):
    ks = jax.random.split(key, t)
    return [init_rfab_params(ks[i], c, n) for i in range(t)]


# ----------------------------------------------------------------------------
# Pure-JAX reference (mirrors the kernel's bf16-operand / f32-accum matmuls).
# ----------------------------------------------------------------------------
def _ref_conv3x3(x_nhwc, w_hwio, b):
    return jax.lax.conv_general_dilated(
        x_nhwc.astype(jnp.bfloat16), w_hwio.astype(jnp.bfloat16),
        window_strides=(1, 1), padding="SAME",
        dimension_numbers=("NHWC", "HWIO", "NHWC"),
        preferred_element_type=jnp.float32) + b


def _ref_saffb(x_nhwc, p):
    c = x_nhwc.shape[-1]
    n = p["w1"].shape[0]
    h = jnp.maximum(_ref_conv3x3(x_nhwc, p["wc1"], p["bc1"]), 0.0)
    h = _ref_conv3x3(h, p["wc2"], p["bc2"])
    n2 = jnp.einsum("bhwc,cd->bhwd", h.astype(jnp.bfloat16),
                    p["wc3"].astype(jnp.bfloat16),
                    preferred_element_type=jnp.float32) + p["bc3"]
    out = x_nhwc
    for i in range(n):
        l = n2[..., 2 * i * c:(2 * i + 1) * c]
        r = n2[..., (2 * i + 1) * c:(2 * i + 2) * c]
        gap = jnp.mean(l + r, axis=(1, 2))                       # (B, c)
        hmid = jnp.maximum(gap @ p["w1"][i] + p["b1"][i], 0.0)   # (B, c//2)
        gate = jax.nn.sigmoid(hmid @ p["w2"][i].T + p["b2"][i][:, 0])
        gate = gate[:, None, None, :]
        out = out + gate * l + (1.0 - gate) * r
    return out


def _ref_rfab(x_nhwc, p):
    o1 = _ref_saffb(x_nhwc, p["saffbs"][0])
    o2 = _ref_saffb(o1 + x_nhwc, p["saffbs"][1])
    o3 = _ref_saffb(o2 + o1 + x_nhwc, p["saffbs"][2])
    cat = jnp.concatenate([o1, o2, o3], axis=-1)
    agg = jnp.einsum("bhwc,cd->bhwd", cat.astype(jnp.bfloat16),
                     p["w_aggr"].astype(jnp.bfloat16),
                     preferred_element_type=jnp.float32) + p["b_aggr"]
    return agg + x_nhwc


def upsampling_reference(x_nchw, params, upscale=2):
    y = jnp.transpose(x_nchw, (0, 2, 3, 1))
    for p in params:
        y = _ref_rfab(y, p)
    y = jnp.transpose(y, (0, 3, 1, 2))
    return pixel_shuffle(y, upscale)


if __name__ == "__main__":
    # UpsamplingBlock(c=4, t=2, upscale=2); RFAB uses SAFFB(c, n=6).
    B, C, H, W = 2, 4, 16, 16
    T, N_BRANCH, UPSCALE = 2, 6, 2

    key = jax.random.PRNGKey(0)
    k_x, k_p = jax.random.split(key)
    x = jax.random.normal(k_x, (B, C, H, W), jnp.float32)      # NCHW like PyTorch
    params = init_upsampling_params(k_p, C, T, N_BRANCH)

    out = jax.block_until_ready(upsampling_forward(x, params, upscale=UPSCALE))
    ref = jax.block_until_ready(upsampling_reference(x, params, upscale=UPSCALE))

    assert out.shape == (B, C // (UPSCALE * UPSCALE), H * UPSCALE, W * UPSCALE)
    max_err = float(jnp.max(jnp.abs(out - ref)))
    assert jnp.allclose(out, ref, rtol=1e-2, atol=1e-2), (
        f"mismatch vs pure-JAX reference (max abs err {max_err})")

    print("KERNEL_OK")
</pallas_src>

<mosaic_0001>
module attributes {stable_mosaic.version = 11 : i64} {
  func.func @_saffb_kernel(%arg0: i32, %arg1: memref<1x4x256xf32, #tpu.memory_space<vmem>>, %arg2: memref<1x16x16x4xf32, #tpu.memory_space<vmem>>, %arg3: memref<36x4xf32, #tpu.memory_space<vmem>>, %arg4: memref<1x4xf32, #tpu.memory_space<vmem>>, %arg5: memref<36x4xf32, #tpu.memory_space<vmem>>, %arg6: memref<1x4xf32, #tpu.memory_space<vmem>>, %arg7: memref<48x4xf32, #tpu.memory_space<vmem>>, %arg8: memref<48x1xf32, #tpu.memory_space<vmem>>, %arg9: memref<6x4x2xf32, #tpu.memory_space<vmem>>, %arg10: memref<6x1x2xf32, #tpu.memory_space<vmem>>, %arg11: memref<6x4x2xf32, #tpu.memory_space<vmem>>, %arg12: memref<6x4x1xf32, #tpu.memory_space<vmem>>, %arg13: memref<1x4x256xf32, #tpu.memory_space<vmem>>, %arg14: memref<18x18x4xf32, #tpu.memory_space<vmem>>, %arg15: memref<256x36xf32, #tpu.memory_space<vmem>>) attributes {dimension_semantics = [#tpu.dimension_semantics<parallel>], iteration_bounds = array<i64: 2>, scalar_prefetch = 0 : i64, scratch_operands = 2 : i64, tpu.core_type = #tpu.core_type<tc>, window_params = [{transform_indices = @transform_0, window_bounds = array<i64: 1, 4, 256>}, {transform_indices = @transform_1, window_bounds = array<i64: 1, 16, 16, 4>}, {pipeline_mode = #tpu.pipeline_mode<synchronous>, transform_indices = @transform_2, window_bounds = array<i64: 36, 4>}, {pipeline_mode = #tpu.pipeline_mode<synchronous>, transform_indices = @transform_3, window_bounds = array<i64: 1, 4>}, {pipeline_mode = #tpu.pipeline_mode<synchronous>, transform_indices = @transform_4, window_bounds = array<i64: 36, 4>}, {pipeline_mode = #tpu.pipeline_mode<synchronous>, transform_indices = @transform_5, window_bounds = array<i64: 1, 4>}, {pipeline_mode = #tpu.pipeline_mode<synchronous>, transform_indices = @transform_6, window_bounds = array<i64: 48, 4>}, {pipeline_mode = #tpu.pipeline_mode<synchronous>, transform_indices = @transform_7, window_bounds = array<i64: 48, 1>}, {pipeline_mode = #tpu.pipeline_mode<synchronous>, transform_indices = @transform_8, window_bounds = array<i64: 6, 4, 2>}, {pipeline_mode = #tpu.pipeline_mode<synchronous>, transform_indices = @transform_9, window_bounds = array<i64: 6, 1, 2>}, {pipeline_mode = #tpu.pipeline_mode<synchronous>, transform_indices = @transform_10, window_bounds = array<i64: 6, 4, 2>}, {pipeline_mode = #tpu.pipeline_mode<synchronous>, transform_indices = @transform_11, window_bounds = array<i64: 6, 4, 1>}, {transform_indices = @transform_12, window_bounds = array<i64: 1, 4, 256>}]} {
    %cst = arith.constant 0.000000e+00 : f32
    %0 = vector.broadcast %cst : f32 to vector<18x18x4xf32>
    %c0 = arith.constant 0 : index
    %c0_0 = arith.constant 0 : index
    %c0_1 = arith.constant 0 : index
    %1 = vector.load %arg14[%c0, %c0_0, %c0_1] : memref<18x18x4xf32, #tpu.memory_space<vmem>>, vector<18x18x4xf32>
    tpu.vector_store %arg14[%c0, %c0_0, %c0_1], %0 {strides = array<i32>} : memref<18x18x4xf32, #tpu.memory_space<vmem>>, vector<18x18x4xf32>,
    %c0_2 = arith.constant 0 : index
    %c0_3 = arith.constant 0 : index
    %c0_4 = arith.constant 0 : index
    %c0_5 = arith.constant 0 : index
    %2 = vector.load %arg2[%c0_2, %c0_3, %c0_4, %c0_5] : memref<1x16x16x4xf32, #tpu.memory_space<vmem>>, vector<1x16x16x4xf32>
    %3 = vector.shape_cast %2 : vector<1x16x16x4xf32> to vector<16x16x4xf32>
    %c1 = arith.constant 1 : index
    %c1_6 = arith.constant 1 : index
    %c0_7 = arith.constant 0 : index
    %4 = vector.load %arg14[%c1, %c1_6, %c0_7] : memref<18x18x4xf32, #tpu.memory_space<vmem>>, vector<16x16x4xf32>
    tpu.vector_store %arg14[%c1, %c1_6, %c0_7], %3 {strides = array<i32>} : memref<18x18x4xf32, #tpu.memory_space<vmem>>, vector<16x16x4xf32>,
    %c0_8 = arith.constant 0 : index
    %c0_9 = arith.constant 0 : index
    %5 = vector.load %arg3[%c0_8, %c0_9] : memref<36x4xf32, #tpu.memory_space<vmem>>, vector<36x4xf32>
    %c0_10 = arith.constant 0 : index
    %c0_11 = arith.constant 0 : index
    %6 = vector.load %arg4[%c0_10, %c0_11] : memref<1x4xf32, #tpu.memory_space<vmem>>, vector<1x4xf32>
    %c0_12 = arith.constant 0 : index
    %c0_13 = arith.constant 0 : index
    %c0_14 = arith.constant 0 : index
    %7 = vector.load %arg14[%c0_12, %c0_13, %c0_14] : memref<18x18x4xf32, #tpu.memory_space<vmem>>, vector<18x18x4xf32>
    %8 = vector.extract_strided_slice %7 {offsets = [0, 0, 0], sizes = [16, 16, 4], strides = [1, 1, 1]} : vector<18x18x4xf32> to vector<16x16x4xf32>
    %9 = vector.shape_cast %8 : vector<16x16x4xf32> to vector<256x4xf32>
    %c0_15 = arith.constant 0 : index
    %c0_16 = arith.constant 0 : index
    %10 = vector.load %arg15[%c0_15, %c0_16] : memref<256x36xf32, #tpu.memory_space<vmem>>, vector<256x4xf32>
    tpu.vector_store %arg15[%c0_15, %c0_16], %9 {strides = array<i32>} : memref<256x36xf32, #tpu.memory_space<vmem>>, vector<256x4xf32>,
    %11 = vector.extract_strided_slice %7 {offsets = [0, 1, 0], sizes = [16, 16, 4], strides = [1, 1, 1]} : vector<18x18x4xf32> to vector<16x16x4xf32>
    %12 = vector.shape_cast %11 : vector<16x16x4xf32> to vector<256x4xf32>
    %c0_17 = arith.constant 0 : index
    %c4 = arith.constant 4 : index
    %13 = vector.load %arg15[%c0_17, %c4] : memref<256x36xf32, #tpu.memory_space<vmem>>, vector<256x4xf32>
    tpu.vector_store %arg15[%c0_17, %c4], %12 {strides = array<i32>} : memref<256x36xf32, #tpu.memory_space<vmem>>, vector<256x4xf32>,
    %14 = vector.extract_strided_slice %7 {offsets = [0, 2, 0], sizes = [16, 16, 4], strides = [1, 1, 1]} : vector<18x18x4xf32> to vector<16x16x4xf32>
    %15 = vector.shape_cast %14 : vector<16x16x4xf32> to vector<256x4xf32>
    %c0_18 = arith.constant 0 : index
    %c8 = arith.constant 8 : index
    %16 = vector.load %arg15[%c0_18, %c8] : memref<256x36xf32, #tpu.memory_space<vmem>>, vector<256x4xf32>
    tpu.vector_store %arg15[%c0_18, %c8], %15 {strides = array<i32>} : memref<256x36xf32, #tpu.memory_space<vmem>>, vector<256x4xf32>,
    %17 = vector.extract_strided_slice %7 {offsets = [1, 0, 0], sizes = [16, 16, 4], strides = [1, 1, 1]} : vector<18x18x4xf32> to vector<16x16x4xf32>
    %18 = vector.shape_cast %17 : vector<16x16x4xf32> to vector<256x4xf32>
    %c0_19 = arith.constant 0 : index
    %c12 = arith.constant 12 : index
    %19 = vector.load %arg15[%c0_19, %c12] : memref<256x36xf32, #tpu.memory_space<vmem>>, vector<256x4xf32>
    tpu.vector_store %arg15[%c0_19, %c12], %18 {strides = array<i32>} : memref<256x36xf32, #tpu.memory_space<vmem>>, vector<256x4xf32>,
    %20 = vector.extract_strided_slice %7 {offsets = [1, 1, 0], sizes = [16, 16, 4], strides = [1, 1, 1]} : vector<18x18x4xf32> to vector<16x16x4xf32>
    %21 = vector.shape_cast %20 : vector<16x16x4xf32> to vector<256x4xf32>
    %c0_20 = arith.constant 0 : index
    %c16 = arith.constant 16 : index
    %22 = vector.load %arg15[%c0_20, %c16] : memref<256x36xf32, #tpu.memory_space<vmem>>, vector<256x4xf32>
    tpu.vector_store %arg15[%c0_20, %c16], %21 {strides = array<i32>} : memref<256x36xf32, #tpu.memory_space<vmem>>, vector<256x4xf32>,
    %23 = vector.extract_strided_slice %7 {offsets = [1, 2, 0], sizes = [16, 16, 4], strides = [1, 1, 1]} : vector<18x18x4xf32> to vector<16x16x4xf32>
    %24 = vector.shape_cast %23 : vector<16x16x4xf32> to vector<256x4xf32>
    %c0_21 = arith.constant 0 : index
    %c20 = arith.constant 20 : index
    %25 = vector.load %arg15[%c0_21, %c20] : memref<256x36xf32, #tpu.memory_space<vmem>>, vector<256x4xf32>
    tpu.vector_store %arg15[%c0_21, %c20], %24 {strides = array<i32>} : memref<256x36xf32, #tpu.memory_space<vmem>>, vector<256x4xf32>,
    %26 = vector.extract_strided_slice %7 {offsets = [2, 0, 0], sizes = [16, 16, 4], strides = [1, 1, 1]} : vector<18x18x4xf32> to vector<16x16x4xf32>
    %27 = vector.shape_cast %26 : vector<16x16x4xf32> to vector<256x4xf32>
    %c0_22 = arith.constant 0 : index
    %c24 = arith.constant 24 : index
    %28 = vector.load %arg15[%c0_22, %c24] : memref<256x36xf32, #tpu.memory_space<vmem>>, vector<256x4xf32>
    tpu.vector_store %arg15[%c0_22, %c24], %27 {strides = array<i32>} : memref<256x36xf32, #tpu.memory_space<vmem>>, vector<256x4xf32>,
    %29 = vector.extract_strided_slice %7 {offsets = [2, 1, 0], sizes = [16, 16, 4], strides = [1, 1, 1]} : vector<18x18x4xf32> to vector<16x16x4xf32>
    %30 = vector.shape_cast %29 : vector<16x16x4xf32> to vector<256x4xf32>
    %c0_23 = arith.constant 0 : index
    %c28 = arith.constant 28 : index
    %31 = vector.load %arg15[%c0_23, %c28] : memref<256x36xf32, #tpu.memory_space<vmem>>, vector<256x4xf32>
    tpu.vector_store %arg15[%c0_23, %c28], %30 {strides = array<i32>} : memref<256x36xf32, #tpu.memory_space<vmem>>, vector<256x4xf32>,
    %32 = vector.extract_strided_slice %7 {offsets = [2, 2, 0], sizes = [16, 16, 4], strides = [1, 1, 1]} : vector<18x18x4xf32> to vector<16x16x4xf32>
    %33 = vector.shape_cast %32 : vector<16x16x4xf32> to vector<256x4xf32>
    %c0_24 = arith.constant 0 : index
    %c32 = arith.constant 32 : index
    %34 = vector.load %arg15[%c0_24, %c32] : memref<256x36xf32, #tpu.memory_space<vmem>>, vector<256x4xf32>
    tpu.vector_store %arg15[%c0_24, %c32], %33 {strides = array<i32>} : memref<256x36xf32, #tpu.memory_space<vmem>>, vector<256x4xf32>,
    %c0_25 = arith.constant 0 : index
    %c0_26 = arith.constant 0 : index
    %35 = vector.load %arg15[%c0_25, %c0_26] : memref<256x36xf32, #tpu.memory_space<vmem>>, vector<256x36xf32>
    %36 = arith.truncf %35 : vector<256x36xf32> to vector<256x36xbf16>
    %37 = arith.truncf %5 : vector<36x4xf32> to vector<36x4xbf16>
    %cst_27 = arith.constant dense<0.000000e+00> : vector<256x4xf32>
    %38 = tpu.matmul %36, %37, %cst_27 {dimension_numbers = #tpu.dot_dimension_numbers<[1], [0], [0], [1], [0, 0, 1, 1], [], []>} : vector<256x36xbf16>, vector<36x4xbf16>, vector<256x4xf32> -> vector<256x4xf32>
    %39 = vector.broadcast %6 : vector<1x4xf32> to vector<256x4xf32>
    %40 = arith.addf %38, %39 : vector<256x4xf32>
    %cst_28 = arith.constant 0.000000e+00 : f32
    %41 = vector.broadcast %cst_28 : f32 to vector<256x4xf32>
    %42 = arith.maximumf %40, %41 : vector<256x4xf32>
    %43 = vector.shape_cast %42 : vector<256x4xf32> to vector<16x16x4xf32>
    %c1_29 = arith.constant 1 : index
    %c1_30 = arith.constant 1 : index
    %c0_31 = arith.constant 0 : index
    %44 = vector.load %arg14[%c1_29, %c1_30, %c0_31] : memref<18x18x4xf32, #tpu.memory_space<vmem>>, vector<16x16x4xf32>
    tpu.vector_store %arg14[%c1_29, %c1_30, %c0_31], %43 {strides = array<i32>} : memref<18x18x4xf32, #tpu.memory_space<vmem>>, vector<16x16x4xf32>,
    %c0_32 = arith.constant 0 : index
    %c0_33 = arith.constant 0 : index
    %45 = vector.load %arg5[%c0_32, %c0_33] : memref<36x4xf32, #tpu.memory_space<vmem>>, vector<36x4xf32>
    %c0_34 = arith.constant 0 : index
    %c0_35 = arith.constant 0 : index
    %46 = vector.load %arg6[%c0_34, %c0_35] : memref<1x4xf32, #tpu.memory_space<vmem>>, vector<1x4xf32>
    %c0_36 = arith.constant 0 : index
    %c0_37 = arith.constant 0 : index
    %c0_38 = arith.constant 0 : index
    %47 = vector.load %arg14[%c0_36, %c0_37, %c0_38] : memref<18x18x4xf32, #tpu.memory_space<vmem>>, vector<18x18x4xf32>
    %48 = vector.extract_strided_slice %47 {offsets = [0, 0, 0], sizes = [16, 16, 4], strides = [1, 1, 1]} : vector<18x18x4xf32> to vector<16x16x4xf32>
    %49 = vector.shape_cast %48 : vector<16x16x4xf32> to vector<256x4xf32>
    %c0_39 = arith.constant 0 : index
    %c0_40 = arith.constant 0 : index
    %50 = vector.load %arg15[%c0_39, %c0_40] : memref<256x36xf32, #tpu.memory_space<vmem>>, vector<256x4xf32>
    tpu.vector_store %arg15[%c0_39, %c0_40], %49 {strides = array<i32>} : memref<256x36xf32, #tpu.memory_space<vmem>>, vector<256x4xf32>,
    %51 = vector.extract_strided_slice %47 {offsets = [0, 1, 0], sizes = [16, 16, 4], strides = [1, 1, 1]} : vector<18x18x4xf32> to vector<16x16x4xf32>
    %52 = vector.shape_cast %51 : vector<16x16x4xf32> to vector<256x4xf32>
    %c0_41 = arith.constant 0 : index
    %c4_42 = arith.constant 4 : index
    %53 = vector.load %arg15[%c0_41, %c4_42] : memref<256x36xf32, #tpu.memory_space<vmem>>, vector<256x4xf32>
    tpu.vector_store %arg15[%c0_41, %c4_42], %52 {strides = array<i32>} : memref<256x36xf32, #tpu.memory_space<vmem>>, vector<256x4xf32>,
    %54 = vector.extract_strided_slice %47 {offsets = [0, 2, 0], sizes = [16, 16, 4], strides = [1, 1, 1]} : vector<18x18x4xf32> to vector<16x16x4xf32>
    %55 = vector.shape_cast %54 : vector<16x16x4xf32> to vector<256x4xf32>
    %c0_43 = arith.constant 0 : index
    %c8_44 = arith.constant 8 : index
    %56 = vector.load %arg15[%c0_43, %c8_44] : memref<256x36xf32, #tpu.memory_space<vmem>>, vector<256x4xf32>
    tpu.vector_store %arg15[%c0_43, %c8_44], %55 {strides = array<i32>} : memref<256x36xf32, #tpu.memory_space<vmem>>, vector<256x4xf32>,
    %57 = vector.extract_strided_slice %47 {offsets = [1, 0, 0], sizes = [16, 16, 4], strides = [1, 1, 1]} : vector<18x18x4xf32> to vector<16x16x4xf32>
    %58 = vector.shape_cast %57 : vector<16x16x4xf32> to vector<256x4xf32>
    %c0_45 = arith.constant 0 : index
    %c12_46 = arith.constant 12 : index
    %59 = vector.load %arg15[%c0_45, %c12_46] : memref<256x36xf32, #tpu.memory_space<vmem>>, vector<256x4xf32>
    tpu.vector_store %arg15[%c0_45, %c12_46], %58 {strides = array<i32>} : memref<256x36xf32, #tpu.memory_space<vmem>>, vector<256x4xf32>,
    %60 = vector.extract_strided_slice %47 {offsets = [1, 1, 0], sizes = [16, 16, 4], strides = [1, 1, 1]} : vector<18x18x4xf32> to vector<16x16x4xf32>
    %61 = vector.shape_cast %60 : vector<16x16x4xf32> to vector<256x4xf32>
    %c0_47 = arith.constant 0 : index
    %c16_48 = arith.constant 16 : index
    %62 = vector.load %arg15[%c0_47, %c16_48] : memref<256x36xf32, #tpu.memory_space<vmem>>, vector<256x4xf32>
    tpu.vector_store %arg15[%c0_47, %c16_48], %61 {strides = array<i32>} : memref<256x36xf32, #tpu.memory_space<vmem>>, vector<256x4xf32>,
    %63 = vector.extract_strided_slice %47 {offsets = [1, 2, 0], sizes = [16, 16, 4], strides = [1, 1, 1]} : vector<18x18x4xf32> to vector<16x16x4xf32>
    %64 = vector.shape_cast %63 : vector<16x16x4xf32> to vector<256x4xf32>
    %c0_49 = arith.constant 0 : index
    %c20_50 = arith.constant 20 : index
    %65 = vector.load %arg15[%c0_49, %c20_50] : memref<256x36xf32, #tpu.memory_space<vmem>>, vector<256x4xf32>
    tpu.vector_store %arg15[%c0_49, %c20_50], %64 {strides = array<i32>} : memref<256x36xf32, #tpu.memory_space<vmem>>, vector<256x4xf32>,
    %66 = vector.extract_strided_slice %47 {offsets = [2, 0, 0], sizes = [16, 16, 4], strides = [1, 1, 1]} : vector<18x18x4xf32> to vector<16x16x4xf32>
    %67 = vector.shape_cast %66 : vector<16x16x4xf32> to vector<256x4xf32>
    %c0_51 = arith.constant 0 : index
    %c24_52 = arith.constant 24 : index
    %68 = vector.load %arg15[%c0_51, %c24_52] : memref<256x36xf32, #tpu.memory_space<vmem>>, vector<256x4xf32>
    tpu.vector_store %arg15[%c0_51, %c24_52], %67 {strides = array<i32>} : memref<256x36xf32, #tpu.memory_space<vmem>>, vector<256x4xf32>,
    %69 = vector.extract_strided_slice %47 {offsets = [2, 1, 0], sizes = [16, 16, 4], strides = [1, 1, 1]} : vector<18x18x4xf32> to vector<16x16x4xf32>
    %70 = vector.shape_cast %69 : vector<16x16x4xf32> to vector<256x4xf32>
    %c0_53 = arith.constant 0 : index
    %c28_54 = arith.constant 28 : index
    %71 = vector.load %arg15[%c0_53, %c28_54] : memref<256x36xf32, #tpu.memory_space<vmem>>, vector<256x4xf32>
    tpu.vector_store %arg15[%c0_53, %c28_54], %70 {strides = array<i32>} : memref<256x36xf32, #tpu.memory_space<vmem>>, vector<256x4xf32>,
    %72 = vector.extract_strided_slice %47 {offsets = [2, 2, 0], sizes = [16, 16, 4], strides = [1, 1, 1]} : vector<18x18x4xf32> to vector<16x16x4xf32>
    %73 = vector.shape_cast %72 : vector<16x16x4xf32> to vector<256x4xf32>
    %c0_55 = arith.constant 0 : index
    %c32_56 = arith.constant 32 : index
    %74 = vector.load %arg15[%c0_55, %c32_56] : memref<256x36xf32, #tpu.memory_space<vmem>>, vector<256x4xf32>
    tpu.vector_store %arg15[%c0_55, %c32_56], %73 {strides = array<i32>} : memref<256x36xf32, #tpu.memory_space<vmem>>, vector<256x4xf32>,
    %c0_57 = arith.constant 0 : index
    %c0_58 = arith.constant 0 : index
    %75 = vector.load %arg15[%c0_57, %c0_58] : memref<256x36xf32, #tpu.memory_space<vmem>>, vector<256x36xf32>
    %76 = arith.truncf %75 : vector<256x36xf32> to vector<256x36xbf16>
    %77 = arith.truncf %45 : vector<36x4xf32> to vector<36x4xbf16>
    %cst_59 = arith.constant dense<0.000000e+00> : vector<256x4xf32>
    %78 = tpu.matmul %76, %77, %cst_59 {dimension_numbers = #tpu.dot_dimension_numbers<[1], [0], [0], [1], [0, 0, 1, 1], [], []>} : vector<256x36xbf16>, vector<36x4xbf16>, vector<256x4xf32> -> vector<256x4xf32>
    %79 = vector.broadcast %46 : vector<1x4xf32> to vector<256x4xf32>
    %80 = arith.addf %78, %79 : vector<256x4xf32>
    %c0_60 = arith.constant 0 : index
    %c0_61 = arith.constant 0 : index
    %81 = vector.load %arg7[%c0_60, %c0_61] : memref<48x4xf32, #tpu.memory_space<vmem>>, vector<48x4xf32>
    %82 = arith.truncf %81 : vector<48x4xf32> to vector<48x4xbf16>
    %83 = arith.truncf %80 : vector<256x4xf32> to vector<256x4xbf16>
    %cst_62 = arith.constant dense<0.000000e+00> : vector<48x256xf32>
    %84 = tpu.matmul %82, %83, %cst_62 {dimension_numbers = #tpu.dot_dimension_numbers<[1], [1], [0], [0], [0, 0, 1, 0], [], []>} : vector<48x4xbf16>, vector<256x4xbf16>, vector<48x256xf32> -> vector<48x256xf32>
    %c0_63 = arith.constant 0 : index
    %c0_64 = arith.constant 0 : index
    %85 = vector.load %arg8[%c0_63, %c0_64] : memref<48x1xf32, #tpu.memory_space<vmem>>, vector<48x1xf32>
    %86 = vector.broadcast %85 : vector<48x1xf32> to vector<48x256xf32>
    %87 = arith.addf %84, %86 : vector<48x256xf32>
    %cst_65 = arith.constant dense<0.000000e+00> : vector<48xf32>
    %88 = vector.multi_reduction <add>, %87, %cst_65 [1] : vector<48x256xf32> to vector<48xf32>
    %89 = vector.shape_cast %88 : vector<48xf32> to vector<48x1xf32>
    %cst_66 = arith.constant 3.906250e-03 : f32
    %90 = vector.broadcast %cst_66 : f32 to vector<48x1xf32>
    %91 = arith.mulf %89, %90 : vector<48x1xf32>
    %c0_67 = arith.constant 0 : index
    %c0_68 = arith.constant 0 : index
    %c0_69 = arith.constant 0 : index
    %92 = vector.load %arg1[%c0_67, %c0_68, %c0_69] : memref<1x4x256xf32, #tpu.memory_space<vmem>>, vector<1x4x256xf32>
    %93 = vector.shape_cast %92 : vector<1x4x256xf32> to vector<4x256xf32>
    %94 = vector.extract_strided_slice %87 {offsets = [0, 0], sizes = [4, 256], strides = [1, 1]} : vector<48x256xf32> to vector<4x256xf32>
    %95 = vector.extract_strided_slice %87 {offsets = [4, 0], sizes = [4, 256], strides = [1, 1]} : vector<48x256xf32> to vector<4x256xf32>
    %96 = vector.extract_strided_slice %91 {offsets = [0, 0], sizes = [4, 1], strides = [1, 1]} : vector<48x1xf32> to vector<4x1xf32>
    %97 = vector.extract_strided_slice %91 {offsets = [4, 0], sizes = [4, 1], strides = [1, 1]} : vector<48x1xf32> to vector<4x1xf32>
    %98 = arith.addf %96, %97 : vector<4x1xf32>
    %c0_70 = arith.constant 0 : index
    %c0_71 = arith.constant 0 : index
    %c0_72 = arith.constant 0 : index
    %99 = vector.load %arg9[%c0_70, %c0_71, %c0_72] : memref<6x4x2xf32, #tpu.memory_space<vmem>>, vector<1x4x2xf32>
    %100 = vector.shape_cast %99 : vector<1x4x2xf32> to vector<4x2xf32>
    %101 = vector.broadcast %98 : vector<4x1xf32> to vector<4x2xf32>
    %102 = arith.mulf %100, %101 : vector<4x2xf32>
    %cst_73 = arith.constant dense<0.000000e+00> : vector<2xf32>
    %103 = vector.multi_reduction <add>, %102, %cst_73 [0] : vector<4x2xf32> to vector<2xf32>
    %104 = vector.shape_cast %103 : vector<2xf32> to vector<1x2xf32>
    %c0_74 = arith.constant 0 : index
    %c0_75 = arith.constant 0 : index
    %c0_76 = arith.constant 0 : index
    %105 = vector.load %arg10[%c0_74, %c0_75, %c0_76] : memref<6x1x2xf32, #tpu.memory_space<vmem>>, vector<1x1x2xf32>
    %106 = vector.shape_cast %105 : vector<1x1x2xf32> to vector<1x2xf32>
    %107 = arith.addf %104, %106 : vector<1x2xf32>
    %cst_77 = arith.constant 0.000000e+00 : f32
    %108 = vector.broadcast %cst_77 : f32 to vector<1x2xf32>
    %109 = arith.maximumf %107, %108 : vector<1x2xf32>
    %c0_78 = arith.constant 0 : index
    %c0_79 = arith.constant 0 : index
    %c0_80 = arith.constant 0 : index
    %110 = vector.load %arg11[%c0_78, %c0_79, %c0_80] : memref<6x4x2xf32, #tpu.memory_space<vmem>>, vector<1x4x2xf32>
    %111 = vector.shape_cast %110 : vector<1x4x2xf32> to vector<4x2xf32>
    %112 = vector.broadcast %109 : vector<1x2xf32> to vector<4x2xf32>
    %113 = arith.mulf %111, %112 : vector<4x2xf32>
    %cst_81 = arith.constant dense<0.000000e+00> : vector<4xf32>
    %114 = vector.multi_reduction <add>, %113, %cst_81 [1] : vector<4x2xf32> to vector<4xf32>
    %115 = vector.shape_cast %114 : vector<4xf32> to vector<4x1xf32>
    %c0_82 = arith.constant 0 : index
    %c0_83 = arith.constant 0 : index
    %c0_84 = arith.constant 0 : index
    %116 = vector.load %arg12[%c0_82, %c0_83, %c0_84] : memref<6x4x1xf32, #tpu.memory_space<vmem>>, vector<1x4x1xf32>
    %117 = vector.shape_cast %116 : vector<1x4x1xf32> to vector<4x1xf32>
    %118 = arith.addf %115, %117 : vector<4x1xf32>
    %119 = arith.negf %118 : vector<4x1xf32>
    %120 = math.exp %119 : vector<4x1xf32>
    %cst_85 = arith.constant 1.000000e+00 : f32
    %121 = vector.broadcast %cst_85 : f32 to vector<4x1xf32>
    %122 = arith.addf %121, %120 : vector<4x1xf32>
    %123 = arith.divf %121, %122 : vector<4x1xf32>
    %124 = arith.addf %93, %95 : vector<4x256xf32>
    %125 = arith.subf %94, %95 : vector<4x256xf32>
    %126 = vector.broadcast %123 : vector<4x1xf32> to vector<4x256xf32>
    %127 = arith.mulf %126, %125 : vector<4x256xf32>
    %128 = arith.addf %124, %127 : vector<4x256xf32>
    %129 = vector.extract_strided_slice %87 {offsets = [8, 0], sizes = [4, 256], strides = [1, 1]} : vector<48x256xf32> to vector<4x256xf32>
    %130 = vector.extract_strided_slice %87 {offsets = [12, 0], sizes = [4, 256], strides = [1, 1]} : vector<48x256xf32> to vector<4x256xf32>
    %131 = vector.extract_strided_slice %91 {offsets = [8, 0], sizes = [4, 1], strides = [1, 1]} : vector<48x1xf32> to vector<4x1xf32>
    %132 = vector.extract_strided_slice %91 {offsets = [12, 0], sizes = [4, 1], strides = [1, 1]} : vector<48x1xf32> to vector<4x1xf32>
    %133 = arith.addf %131, %132 : vector<4x1xf32>
    %c1_86 = arith.constant 1 : index
    %c0_87 = arith.constant 0 : index
    %c0_88 = arith.constant 0 : index
    %134 = vector.load %arg9[%c1_86, %c0_87, %c0_88] : memref<6x4x2xf32, #tpu.memory_space<vmem>>, vector<1x4x2xf32>
    %135 = vector.shape_cast %134 : vector<1x4x2xf32> to vector<4x2xf32>
    %136 = vector.broadcast %133 : vector<4x1xf32> to vector<4x2xf32>
    %137 = arith.mulf %135, %136 : vector<4x2xf32>
    %cst_89 = arith.constant dense<0.000000e+00> : vector<2xf32>
    %138 = vector.multi_reduction <add>, %137, %cst_89 [0] : vector<4x2xf32> to vector<2xf32>
    %139 = vector.shape_cast %138 : vector<2xf32> to vector<1x2xf32>
    %c1_90 = arith.constant 1 : index
    %c0_91 = arith.constant 0 : index
    %c0_92 = arith.constant 0 : index
    %140 = vector.load %arg10[%c1_90, %c0_91, %c0_92] : memref<6x1x2xf32, #tpu.memory_space<vmem>>, vector<1x1x2xf32>
    %141 = vector.shape_cast %140 : vector<1x1x2xf32> to vector<1x2xf32>
    %142 = arith.addf %139, %141 : vector<1x2xf32>
    %cst_93 = arith.constant 0.000000e+00 : f32
    %143 = vector.broadcast %cst_93 : f32 to vector<1x2xf32>
    %144 = arith.maximumf %142, %143 : vector<1x2xf32>
    %c1_94 = arith.constant 1 : index
    %c0_95 = arith.constant 0 : index
    %c0_96 = arith.constant 0 : index
    %145 = vector.load %arg11[%c1_94, %c0_95, %c0_96] : memref<6x4x2xf32, #tpu.memory_space<vmem>>, vector<1x4x2xf32>
    %146 = vector.shape_cast %145 : vector<1x4x2xf32> to vector<4x2xf32>
    %147 = vector.broadcast %144 : vector<1x2xf32> to vector<4x2xf32>
    %148 = arith.mulf %146, %147 : vector<4x2xf32>
    %cst_97 = arith.constant dense<0.000000e+00> : vector<4xf32>
    %149 = vector.multi_reduction <add>, %148, %cst_97 [1] : vector<4x2xf32> to vector<4xf32>
    %150 = vector.shape_cast %149 : vector<4xf32> to vector<4x1xf32>
    %c1_98 = arith.constant 1 : index
    %c0_99 = arith.constant 0 : index
    %c0_100 = arith.constant 0 : index
    %151 = vector.load %arg12[%c1_98, %c0_99, %c0_100] : memref<6x4x1xf32, #tpu.memory_space<vmem>>, vector<1x4x1xf32>
    %152 = vector.shape_cast %151 : vector<1x4x1xf32> to vector<4x1xf32>
    %153 = arith.addf %150, %152 : vector<4x1xf32>
    %154 = arith.negf %153 : vector<4x1xf32>
    %155 = math.exp %154 : vector<4x1xf32>
    %cst_101 = arith.constant 1.000000e+00 : f32
    %156 = vector.broadcast %cst_101 : f32 to vector<4x1xf32>
    %157 = arith.addf %156, %155 : vector<4x1xf32>
    %158 = arith.divf %156, %157 : vector<4x1xf32>
    %159 = arith.addf %128, %130 : vector<4x256xf32>
    %160 = arith.subf %129, %130 : vector<4x256xf32>
    %161 = vector.broadcast %158 : vector<4x1xf32> to vector<4x256xf32>
    %162 = arith.mulf %161, %160 : vector<4x256xf32>
    %163 = arith.addf %159, %162 : vector<4x256xf32>
    %164 = vector.extract_strided_slice %87 {offsets = [16, 0], sizes = [4, 256], strides = [1, 1]} : vector<48x256xf32> to vector<4x256xf32>
    %165 = vector.extract_strided_slice %87 {offsets = [20, 0], sizes = [4, 256], strides = [1, 1]} : vector<48x256xf32> to vector<4x256xf32>
    %166 = vector.extract_strided_slice %91 {offsets = [16, 0], sizes = [4, 1], strides = [1, 1]} : vector<48x1xf32> to vector<4x1xf32>
    %167 = vector.extract_strided_slice %91 {offsets = [20, 0], sizes = [4, 1], strides = [1, 1]} : vector<48x1xf32> to vector<4x1xf32>
    %168 = arith.addf %166, %167 : vector<4x1xf32>
    %c2 = arith.constant 2 : index
    %c0_102 = arith.constant 0 : index
    %c0_103 = arith.constant 0 : index
    %169 = vector.load %arg9[%c2, %c0_102, %c0_103] : memref<6x4x2xf32, #tpu.memory_space<vmem>>, vector<1x4x2xf32>
    %170 = vector.shape_cast %169 : vector<1x4x2xf32> to vector<4x2xf32>
    %171 = vector.broadcast %168 : vector<4x1xf32> to vector<4x2xf32>
    %172 = arith.mulf %170, %171 : vector<4x2xf32>
    %cst_104 = arith.constant dense<0.000000e+00> : vector<2xf32>
    %173 = vector.multi_reduction <add>, %172, %cst_104 [0] : vector<4x2xf32> to vector<2xf32>
    %174 = vector.shape_cast %173 : vector<2xf32> to vector<1x2xf32>
    %c2_105 = arith.constant 2 : index
    %c0_106 = arith.constant 0 : index
    %c0_107 = arith.constant 0 : index
    %175 = vector.load %arg10[%c2_105, %c0_106, %c0_107] : memref<6x1x2xf32, #tpu.memory_space<vmem>>, vector<1x1x2xf32>
    %176 = vector.shape_cast %175 : vector<1x1x2xf32> to vector<1x2xf32>
    %177 = arith.addf %174, %176 : vector<1x2xf32>
    %cst_108 = arith.constant 0.000000e+00 : f32
    %178 = vector.broadcast %cst_108 : f32 to vector<1x2xf32>
    %179 = arith.maximumf %177, %178 : vector<1x2xf32>
    %c2_109 = arith.constant 2 : index
    %c0_110 = arith.constant 0 : index
    %c0_111 = arith.constant 0 : index
    %180 = vector.load %arg11[%c2_109, %c0_110, %c0_111] : memref<6x4x2xf32, #tpu.memory_space<vmem>>, vector<1x4x2xf32>
    %181 = vector.shape_cast %180 : vector<1x4x2xf32> to vector<4x2xf32>
    %182 = vector.broadcast %179 : vector<1x2xf32> to vector<4x2xf32>
    %183 = arith.mulf %181, %182 : vector<4x2xf32>
    %cst_112 = arith.constant dense<0.000000e+00> : vector<4xf32>
    %184 = vector.multi_reduction <add>, %183, %cst_112 [1] : vector<4x2xf32> to vector<4xf32>
    %185 = vector.shape_cast %184 : vector<4xf32> to vector<4x1xf32>
    %c2_113 = arith.constant 2 : index
    %c0_114 = arith.constant 0 : index
    %c0_115 = arith.constant 0 : index
    %186 = vector.load %arg12[%c2_113, %c0_114, %c0_115] : memref<6x4x1xf32, #tpu.memory_space<vmem>>, vector<1x4x1xf32>
    %187 = vector.shape_cast %186 : vector<1x4x1xf32> to vector<4x1xf32>
    %188 = arith.addf %185, %187 : vector<4x1xf32>
    %189 = arith.negf %188 : vector<4x1xf32>
    %190 = math.exp %189 : vector<4x1xf32>
    %cst_116 = arith.constant 1.000000e+00 : f32
    %191 = vector.broadcast %cst_116 : f32 to vector<4x1xf32>
    %192 = arith.addf %191, %190 : vector<4x1xf32>
    %193 = arith.divf %191, %192 : vector<4x1xf32>
    %194 = arith.addf %163, %165 : vector<4x256xf32>
    %195 = arith.subf %164, %165 : vector<4x256xf32>
    %196 = vector.broadcast %193 : vector<4x1xf32> to vector<4x256xf32>
    %197 = arith.mulf %196, %195 : vector<4x256xf32>
    %198 = arith.addf %194, %197 : vector<4x256xf32>
    %199 = vector.extract_strided_slice %87 {offsets = [24, 0], sizes = [4, 256], strides = [1, 1]} : vector<48x256xf32> to vector<4x256xf32>
    %200 = vector.extract_strided_slice %87 {offsets = [28, 0], sizes = [4, 256], strides = [1, 1]} : vector<48x256xf32> to vector<4x256xf32>
    %201 = vector.extract_strided_slice %91 {offsets = [24, 0], sizes = [4, 1], strides = [1, 1]} : vector<48x1xf32> to vector<4x1xf32>
    %202 = vector.extract_strided_slice %91 {offsets = [28, 0], sizes = [4, 1], strides = [1, 1]} : vector<48x1xf32> to vector<4x1xf32>
    %203 = arith.addf %201, %202 : vector<4x1xf32>
    %c3 = arith.constant 3 : index
    %c0_117 = arith.constant 0 : index
    %c0_118 = arith.constant 0 : index
    %204 = vector.load %arg9[%c3, %c0_117, %c0_118] : memref<6x4x2xf32, #tpu.memory_space<vmem>>, vector<1x4x2xf32>
    %205 = vector.shape_cast %204 : vector<1x4x2xf32> to vector<4x2xf32>
    %206 = vector.broadcast %203 : vector<4x1xf32> to vector<4x2xf32>
    %207 = arith.mulf %205, %206 : vector<4x2xf32>
    %cst_119 = arith.constant dense<0.000000e+00> : vector<2xf32>
    %208 = vector.multi_reduction <add>, %207, %cst_119 [0] : vector<4x2xf32> to vector<2xf32>
    %209 = vector.shape_cast %208 : vector<2xf32> to vector<1x2xf32>
    %c3_120 = arith.constant 3 : index
    %c0_121 = arith.constant 0 : index
    %c0_122 = arith.constant 0 : index
    %210 = vector.load %arg10[%c3_120, %c0_121, %c0_122] : memref<6x1x2xf32, #tpu.memory_space<vmem>>, vector<1x1x2xf32>
    %211 = vector.shape_cast %210 : vector<1x1x2xf32> to vector<1x2xf32>
    %212 = arith.addf %209, %211 : vector<1x2xf32>
    %cst_123 = arith.constant 0.000000e+00 : f32
    %213 = vector.broadcast %cst_123 : f32 to vector<1x2xf32>
    %214 = arith.maximumf %212, %213 : vector<1x2xf32>
    %c3_124 = arith.constant 3 : index
    %c0_125 = arith.constant 0 : index
    %c0_126 = arith.constant 0 : index
    %215 = vector.load %arg11[%c3_124, %c0_125, %c0_126] : memref<6x4x2xf32, #tpu.memory_space<vmem>>, vector<1x4x2xf32>
    %216 = vector.shape_cast %215 : vector<1x4x2xf32> to vector<4x2xf32>
    %217 = vector.broadcast %214 : vector<1x2xf32> to vector<4x2xf32>
    %218 = arith.mulf %216, %217 : vector<4x2xf32>
    %cst_127 = arith.constant dense<0.000000e+00> : vector<4xf32>
    %219 = vector.multi_reduction <add>, %218, %cst_127 [1] : vector<4x2xf32> to vector<4xf32>
    %220 = vector.shape_cast %219 : vector<4xf32> to vector<4x1xf32>
    %c3_128 = arith.constant 3 : index
    %c0_129 = arith.constant 0 : index
    %c0_130 = arith.constant 0 : index
    %221 = vector.load %arg12[%c3_128, %c0_129, %c0_130] : memref<6x4x1xf32, #tpu.memory_space<vmem>>, vector<1x4x1xf32>
    %222 = vector.shape_cast %221 : vector<1x4x1xf32> to vector<4x1xf32>
    %223 = arith.addf %220, %222 : vector<4x1xf32>
    %224 = arith.negf %223 : vector<4x1xf32>
    %225 = math.exp %224 : vector<4x1xf32>
    %cst_131 = arith.constant 1.000000e+00 : f32
    %226 = vector.broadcast %cst_131 : f32 to vector<4x1xf32>
    %227 = arith.addf %226, %225 : vector<4x1xf32>
    %228 = arith.divf %226, %227 : vector<4x1xf32>
    %229 = arith.addf %198, %200 : vector<4x256xf32>
    %230 = arith.subf %199, %200 : vector<4x256xf32>
    %231 = vector.broadcast %228 : vector<4x1xf32> to vector<4x256xf32>
    %232 = arith.mulf %231, %230 : vector<4x256xf32>
    %233 = arith.addf %229, %232 : vector<4x256xf32>
    %234 = vector.extract_strided_slice %87 {offsets = [32, 0], sizes = [4, 256], strides = [1, 1]} : vector<48x256xf32> to vector<4x256xf32>
    %235 = vector.extract_strided_slice %87 {offsets = [36, 0], sizes = [4, 256], strides = [1, 1]} : vector<48x256xf32> to vector<4x256xf32>
    %236 = vector.extract_strided_slice %91 {offsets = [32, 0], sizes = [4, 1], strides = [1, 1]} : vector<48x1xf32> to vector<4x1xf32>
    %237 = vector.extract_strided_slice %91 {offsets = [36, 0], sizes = [4, 1], strides = [1, 1]} : vector<48x1xf32> to vector<4x1xf32>
    %238 = arith.addf %236, %237 : vector<4x1xf32>
    %c4_132 = arith.constant 4 : index
    %c0_133 = arith.constant 0 : index
    %c0_134 = arith.constant 0 : index
    %239 = vector.load %arg9[%c4_132, %c0_133, %c0_134] : memref<6x4x2xf32, #tpu.memory_space<vmem>>, vector<1x4x2xf32>
    %240 = vector.shape_cast %239 : vector<1x4x2xf32> to vector<4x2xf32>
    %241 = vector.broadcast %238 : vector<4x1xf32> to vector<4x2xf32>
    %242 = arith.mulf %240, %241 : vector<4x2xf32>
    %cst_135 = arith.constant dense<0.000000e+00> : vector<2xf32>
    %243 = vector.multi_reduction <add>, %242, %cst_135 [0] : vector<4x2xf32> to vector<2xf32>
    %244 = vector.shape_cast %243 : vector<2xf32> to vector<1x2xf32>
    %c4_136 = arith.constant 4 : index
    %c0_137 = arith.constant 0 : index
    %c0_138 = arith.constant 0 : index
    %245 = vector.load %arg10[%c4_136, %c0_137, %c0_138] : memref<6x1x2xf32, #tpu.memory_space<vmem>>, vector<1x1x2xf32>
    %246 = vector.shape_cast %245 : vector<1x1x2xf32> to vector<1x2xf32>
    %247 = arith.addf %244, %246 : vector<1x2xf32>
    %cst_139 = arith.constant 0.000000e+00 : f32
    %248 = vector.broadcast %cst_139 : f32 to vector<1x2xf32>
    %249 = arith.maximumf %247, %248 : vector<1x2xf32>
    %c4_140 = arith.constant 4 : index
    %c0_141 = arith.constant 0 : index
    %c0_142 = arith.constant 0 : index
    %250 = vector.load %arg11[%c4_140, %c0_141, %c0_142] : memref<6x4x2xf32, #tpu.memory_space<vmem>>, vector<1x4x2xf32>
    %251 = vector.shape_cast %250 : vector<1x4x2xf32> to vector<4x2xf32>
    %252 = vector.broadcast %249 : vector<1x2xf32> to vector<4x2xf32>
    %253 = arith.mulf %251, %252 : vector<4x2xf32>
    %cst_143 = arith.constant dense<0.000000e+00> : vector<4xf32>
    %254 = vector.multi_reduction <add>, %253, %cst_143 [1] : vector<4x2xf32> to vector<4xf32>
    %255 = vector.shape_cast %254 : vector<4xf32> to vector<4x1xf32>
    %c4_144 = arith.constant 4 : index
    %c0_145 = arith.constant 0 : index
    %c0_146 = arith.constant 0 : index
    %256 = vector.load %arg12[%c4_144, %c0_145, %c0_146] : memref<6x4x1xf32, #tpu.memory_space<vmem>>, vector<1x4x1xf32>
    %257 = vector.shape_cast %256 : vector<1x4x1xf32> to vector<4x1xf32>
    %258 = arith.addf %255, %257 : vector<4x1xf32>
    %259 = arith.negf %258 : vector<4x1xf32>
    %260 = math.exp %259 : vector<4x1xf32>
    %cst_147 = arith.constant 1.000000e+00 : f32
    %261 = vector.broadcast %cst_147 : f32 to vector<4x1xf32>
    %262 = arith.addf %261, %260 : vector<4x1xf32>
    %263 = arith.divf %261, %262 : vector<4x1xf32>
    %264 = arith.addf %233, %235 : vector<4x256xf32>
    %265 = arith.subf %234, %235 : vector<4x256xf32>
    %266 = vector.broadcast %263 : vector<4x1xf32> to vector<4x256xf32>
    %267 = arith.mulf %266, %265 : vector<4x256xf32>
    %268 = arith.addf %264, %267 : vector<4x256xf32>
    %269 = vector.extract_strided_slice %87 {offsets = [40, 0], sizes = [4, 256], strides = [1, 1]} : vector<48x256xf32> to vector<4x256xf32>
    %270 = vector.extract_strided_slice %87 {offsets = [44, 0], sizes = [4, 256], strides = [1, 1]} : vector<48x256xf32> to vector<4x256xf32>
    %271 = vector.extract_strided_slice %91 {offsets = [40, 0], sizes = [4, 1], strides = [1, 1]} : vector<48x1xf32> to vector<4x1xf32>
    %272 = vector.extract_strided_slice %91 {offsets = [44, 0], sizes = [4, 1], strides = [1, 1]} : vector<48x1xf32> to vector<4x1xf32>
    %273 = arith.addf %271, %272 : vector<4x1xf32>
    %c5 = arith.constant 5 : index
    %c0_148 = arith.constant 0 : index
    %c0_149 = arith.constant 0 : index
    %274 = vector.load %arg9[%c5, %c0_148, %c0_149] : memref<6x4x2xf32, #tpu.memory_space<vmem>>, vector<1x4x2xf32>
    %275 = vector.shape_cast %274 : vector<1x4x2xf32> to vector<4x2xf32>
    %276 = vector.broadcast %273 : vector<4x1xf32> to vector<4x2xf32>
    %277 = arith.mulf %275, %276 : vector<4x2xf32>
    %cst_150 = arith.constant dense<0.000000e+00> : vector<2xf32>
    %278 = vector.multi_reduction <add>, %277, %cst_150 [0] : vector<4x2xf32> to vector<2xf32>
    %279 = vector.shape_cast %278 : vector<2xf32> to vector<1x2xf32>
    %c5_151 = arith.constant 5 : index
    %c0_152 = arith.constant 0 : index
    %c0_153 = arith.constant 0 : index
    %280 = vector.load %arg10[%c5_151, %c0_152, %c0_153] : memref<6x1x2xf32, #tpu.memory_space<vmem>>, vector<1x1x2xf32>
    %281 = vector.shape_cast %280 : vector<1x1x2xf32> to vector<1x2xf32>
    %282 = arith.addf %279, %281 : vector<1x2xf32>
    %cst_154 = arith.constant 0.000000e+00 : f32
    %283 = vector.broadcast %cst_154 : f32 to vector<1x2xf32>
    %284 = arith.maximumf %282, %283 : vector<1x2xf32>
    %c5_155 = arith.constant 5 : index
    %c0_156 = arith.constant 0 : index
    %c0_157 = arith.constant 0 : index
    %285 = vector.load %arg11[%c5_155, %c0_156, %c0_157] : memref<6x4x2xf32, #tpu.memory_space<vmem>>, vector<1x4x2xf32>
    %286 = vector.shape_cast %285 : vector<1x4x2xf32> to vector<4x2xf32>
    %287 = vector.broadcast %284 : vector<1x2xf32> to vector<4x2xf32>
    %288 = arith.mulf %286, %287 : vector<4x2xf32>
    %cst_158 = arith.constant dense<0.000000e+00> : vector<4xf32>
    %289 = vector.multi_reduction <add>, %288, %cst_158 [1] : vector<4x2xf32> to vector<4xf32>
    %290 = vector.shape_cast %289 : vector<4xf32> to vector<4x1xf32>
    %c5_159 = arith.constant 5 : index
    %c0_160 = arith.constant 0 : index
    %c0_161 = arith.constant 0 : index
    %291 = vector.load %arg12[%c5_159, %c0_160, %c0_161] : memref<6x4x1xf32, #tpu.memory_space<vmem>>, vector<1x4x1xf32>
    %292 = vector.shape_cast %291 : vector<1x4x1xf32> to vector<4x1xf32>
    %293 = arith.addf %290, %292 : vector<4x1xf32>
    %294 = arith.negf %293 : vector<4x1xf32>
    %295 = math.exp %294 : vector<4x1xf32>
    %cst_162 = arith.constant 1.000000e+00 : f32
    %296 = vector.broadcast %cst_162 : f32 to vector<4x1xf32>
    %297 = arith.addf %296, %295 : vector<4x1xf32>
    %298 = arith.divf %296, %297 : vector<4x1xf32>
    %299 = arith.addf %268, %270 : vector<4x256xf32>
    %300 = arith.subf %269, %270 : vector<4x256xf32>
    %301 = vector.broadcast %298 : vector<4x1xf32> to vector<4x256xf32>
    %302 = arith.mulf %301, %300 : vector<4x256xf32>
    %303 = arith.addf %299, %302 : vector<4x256xf32>
    %304 = vector.shape_cast %303 : vector<4x256xf32> to vector<1x4x256xf32>
    %c0_163 = arith.constant 0 : index
    %c0_164 = arith.constant 0 : index
    %c0_165 = arith.constant 0 : index
    %305 = vector.load %arg13[%c0_163, %c0_164, %c0_165] : memref<1x4x256xf32, #tpu.memory_space<vmem>>, vector<1x4x256xf32>
    tpu.vector_store %arg13[%c0_163, %c0_164, %c0_165], %304 {strides = array<i32>} : memref<1x4x256xf32, #tpu.memory_space<vmem>>, vector<1x4x256xf32>,
    return
  }
  func.func @transform_0(%arg0: i32) -> (i32, i32, i32) {
    %c0_i32 = arith.constant 0 : i32
    %c0_i32_0 = arith.constant 0 : i32
    %c0_i32_1 = arith.constant 0 : i32
    return %arg0, %c0_i32, %c0_i32_0 : i32, i32, i32
  }
  func.func @transform_1(%arg0: i32) -> (i32, i32, i32, i32) {
    %c0_i32 = arith.constant 0 : i32
    %c0_i32_0 = arith.constant 0 : i32
    %c0_i32_1 = arith.constant 0 : i32
    %c0_i32_2 = arith.constant 0 : i32
    return %arg0, %c0_i32, %c0_i32_0, %c0_i32_1 : i32, i32, i32, i32
  }
  func.func @transform_2(%arg0: i32) -> (i32, i32) {
    %c0_i32 = arith.constant 0 : i32
    %c0_i32_0 = arith.constant 0 : i32
    %c0_i32_1 = arith.constant 0 : i32
    return %c0_i32, %c0_i32_0 : i32, i32
  }
  func.func @transform_3(%arg0: i32) -> (i32, i32) {
    %c0_i32 = arith.constant 0 : i32
    %c0_i32_0 = arith.constant 0 : i32
    %c0_i32_1 = arith.constant 0 : i32
    return %c0_i32, %c0_i32_0 : i32, i32
  }
  func.func @transform_4(%arg0: i32) -> (i32, i32) {
    %c0_i32 = arith.constant 0 : i32
    %c0_i32_0 = arith.constant 0 : i32
    %c0_i32_1 = arith.constant 0 : i32
    return %c0_i32, %c0_i32_0 : i32, i32
  }
  func.func @transform_5(%arg0: i32) -> (i32, i32) {
    %c0_i32 = arith.constant 0 : i32
    %c0_i32_0 = arith.constant 0 : i32
    %c0_i32_1 = arith.constant 0 : i32
    return %c0_i32, %c0_i32_0 : i32, i32
  }
  func.func @transform_6(%arg0: i32) -> (i32, i32) {
    %c0_i32 = arith.constant 0 : i32
    %c0_i32_0 = arith.constant 0 : i32
    %c0_i32_1 = arith.constant 0 : i32
    return %c0_i32, %c0_i32_0 : i32, i32
  }
  func.func @transform_7(%arg0: i32) -> (i32, i32) {
    %c0_i32 = arith.constant 0 : i32
    %c0_i32_0 = arith.constant 0 : i32
    %c0_i32_1 = arith.constant 0 : i32
    return %c0_i32, %c0_i32_0 : i32, i32
  }
  func.func @transform_8(%arg0: i32) -> (i32, i32, i32) {
    %c0_i32 = arith.constant 0 : i32
    %c0_i32_0 = arith.constant 0 : i32
    %c0_i32_1 = arith.constant 0 : i32
    %c0_i32_2 = arith.constant 0 : i32
    return %c0_i32, %c0_i32_0, %c0_i32_1 : i32, i32, i32
  }
  func.func @transform_9(%arg0: i32) -> (i32, i32, i32) {
    %c0_i32 = arith.constant 0 : i32
    %c0_i32_0 = arith.constant 0 : i32
    %c0_i32_1 = arith.constant 0 : i32
    %c0_i32_2 = arith.constant 0 : i32
    return %c0_i32, %c0_i32_0, %c0_i32_1 : i32, i32, i32
  }
  func.func @transform_10(%arg0: i32) -> (i32, i32, i32) {
    %c0_i32 = arith.constant 0 : i32
    %c0_i32_0 = arith.constant 0 : i32
    %c0_i32_1 = arith.constant 0 : i32
    %c0_i32_2 = arith.constant 0 : i32
    return %c0_i32, %c0_i32_0, %c0_i32_1 : i32, i32, i32
  }
  func.func @transform_11(%arg0: i32) -> (i32, i32, i32) {
    %c0_i32 = arith.constant 0 : i32
    %c0_i32_0 = arith.constant 0 : i32
    %c0_i32_1 = arith.constant 0 : i32
    %c0_i32_2 = arith.constant 0 : i32
    return %c0_i32, %c0_i32_0, %c0_i32_1 : i32, i32, i32
  }
  func.func @transform_12(%arg0: i32) -> (i32, i32, i32) {
    %c0_i32 = arith.constant 0 : i32
    %c0_i32_0 = arith.constant 0 : i32
    %c0_i32_1 = arith.constant 0 : i32
    return %arg0, %c0_i32, %c0_i32_0 : i32, i32, i32
  }
}

module attributes {stable_mosaic.version = 11 : i64} {
  func.func @_rfab_aggr_kernel(%arg0: i32, %arg1: memref<1x4x256xf32, #tpu.memory_space<vmem>>, %arg2: memref<1x4x256xf32, #tpu.memory_space<vmem>>, %arg3: memref<1x4x256xf32, #tpu.memory_space<vmem>>, %arg4: memref<1x4x256xf32, #tpu.memory_space<vmem>>, %arg5: memref<3x4x4xf32, #tpu.memory_space<vmem>>, %arg6: memref<4x1xf32, #tpu.memory_space<vmem>>, %arg7: memref<1x4x256xf32, #tpu.memory_space<vmem>>) attributes {dimension_semantics = [#tpu.dimension_semantics<parallel>], iteration_bounds = array<i64: 2>, scalar_prefetch = 0 : i64, scratch_operands = 0 : i64, tpu.core_type = #tpu.core_type<tc>, window_params = [{transform_indices = @transform_0, window_bounds = array<i64: 1, 4, 256>}, {transform_indices = @transform_1, window_bounds = array<i64: 1, 4, 256>}, {transform_indices = @transform_2, window_bounds = array<i64: 1, 4, 256>}, {transform_indices = @transform_3, window_bounds = array<i64: 1, 4, 256>}, {pipeline_mode = #tpu.pipeline_mode<synchronous>, transform_indices = @transform_4, window_bounds = array<i64: 3, 4, 4>}, {pipeline_mode = #tpu.pipeline_mode<synchronous>, transform_indices = @transform_5, window_bounds = array<i64: 4, 1>}, {transform_indices = @transform_6, window_bounds = array<i64: 1, 4, 256>}]} {
    %c0 = arith.constant 0 : index
    %c0_0 = arith.constant 0 : index
    %c0_1 = arith.constant 0 : index
    %0 = vector.load %arg1[%c0, %c0_0, %c0_1] : memref<1x4x256xf32, #tpu.memory_space<vmem>>, vector<1x4x256xf32>
    %1 = vector.shape_cast %0 : vector<1x4x256xf32> to vector<4x256xf32>
    %c0_2 = arith.constant 0 : index
    %c0_3 = arith.constant 0 : index
    %2 = vector.load %arg6[%c0_2, %c0_3] : memref<4x1xf32, #tpu.memory_space<vmem>>, vector<4x1xf32>
    %3 = vector.broadcast %2 : vector<4x1xf32> to vector<4x256xf32>
    %4 = arith.addf %1, %3 : vector<4x256xf32>
    %c0_4 = arith.constant 0 : index
    %c0_5 = arith.constant 0 : index
    %c0_6 = arith.constant 0 : index
    %5 = vector.load %arg5[%c0_4, %c0_5, %c0_6] : memref<3x4x4xf32, #tpu.memory_space<vmem>>, vector<1x4x4xf32>
    %6 = vector.shape_cast %5 : vector<1x4x4xf32> to vector<4x4xf32>
    %7 = arith.truncf %6 : vector<4x4xf32> to vector<4x4xbf16>
    %c0_7 = arith.constant 0 : index
    %c0_8 = arith.constant 0 : index
    %c0_9 = arith.constant 0 : index
    %8 = vector.load %arg2[%c0_7, %c0_8, %c0_9] : memref<1x4x256xf32, #tpu.memory_space<vmem>>, vector<1x4x256xf32>
    %9 = vector.shape_cast %8 : vector<1x4x256xf32> to vector<4x256xf32>
    %10 = arith.truncf %9 : vector<4x256xf32> to vector<4x256xbf16>
    %cst = arith.constant dense<0.000000e+00> : vector<4x256xf32>
    %11 = tpu.matmul %7, %10, %cst {dimension_numbers = #tpu.dot_dimension_numbers<[1], [0], [0], [1], [0, 0, 1, 1], [], []>} : vector<4x4xbf16>, vector<4x256xbf16>, vector<4x256xf32> -> vector<4x256xf32>
    %12 = arith.addf %4, %11 : vector<4x256xf32>
    %c1 = arith.constant 1 : index
    %c0_10 = arith.constant 0 : index
    %c0_11 = arith.constant 0 : index
    %13 = vector.load %arg5[%c1, %c0_10, %c0_11] : memref<3x4x4xf32, #tpu.memory_space<vmem>>, vector<1x4x4xf32>
    %14 = vector.shape_cast %13 : vector<1x4x4xf32> to vector<4x4xf32>
    %15 = arith.truncf %14 : vector<4x4xf32> to vector<4x4xbf16>
    %c0_12 = arith.constant 0 : index
    %c0_13 = arith.constant 0 : index
    %c0_14 = arith.constant 0 : index
    %16 = vector.load %arg3[%c0_12, %c0_13, %c0_14] : memref<1x4x256xf32, #tpu.memory_space<vmem>>, vector<1x4x256xf32>
    %17 = vector.shape_cast %16 : vector<1x4x256xf32> to vector<4x256xf32>
    %18 = arith.truncf %17 : vector<4x256xf32> to vector<4x256xbf16>
    %cst_15 = arith.constant dense<0.000000e+00> : vector<4x256xf32>
    %19 = tpu.matmul %15, %18, %cst_15 {dimension_numbers = #tpu.dot_dimension_numbers<[1], [0], [0], [1], [0, 0, 1, 1], [], []>} : vector<4x4xbf16>, vector<4x256xbf16>, vector<4x256xf32> -> vector<4x256xf32>
    %20 = arith.addf %12, %19 : vector<4x256xf32>
    %c2 = arith.constant 2 : index
    %c0_16 = arith.constant 0 : index
    %c0_17 = arith.constant 0 : index
    %21 = vector.load %arg5[%c2, %c0_16, %c0_17] : memref<3x4x4xf32, #tpu.memory_space<vmem>>, vector<1x4x4xf32>
    %22 = vector.shape_cast %21 : vector<1x4x4xf32> to vector<4x4xf32>
    %23 = arith.truncf %22 : vector<4x4xf32> to vector<4x4xbf16>
    %c0_18 = arith.constant 0 : index
    %c0_19 = arith.constant 0 : index
    %c0_20 = arith.constant 0 : index
    %24 = vector.load %arg4[%c0_18, %c0_19, %c0_20] : memref<1x4x256xf32, #tpu.memory_space<vmem>>, vector<1x4x256xf32>
    %25 = vector.shape_cast %24 : vector<1x4x256xf32> to vector<4x256xf32>
    %26 = arith.truncf %25 : vector<4x256xf32> to vector<4x256xbf16>
    %cst_21 = arith.constant dense<0.000000e+00> : vector<4x256xf32>
    %27 = tpu.matmul %23, %26, %cst_21 {dimension_numbers = #tpu.dot_dimension_numbers<[1], [0], [0], [1], [0, 0, 1, 1], [], []>} : vector<4x4xbf16>, vector<4x256xbf16>, vector<4x256xf32> -> vector<4x256xf32>
    %28 = arith.addf %20, %27 : vector<4x256xf32>
    %29 = vector.shape_cast %28 : vector<4x256xf32> to vector<1x4x256xf32>
    %c0_22 = arith.constant 0 : index
    %c0_23 = arith.constant 0 : index
    %c0_24 = arith.constant 0 : index
    %30 = vector.load %arg7[%c0_22, %c0_23, %c0_24] : memref<1x4x256xf32, #tpu.memory_space<vmem>>, vector<1x4x256xf32>
    tpu.vector_store %arg7[%c0_22, %c0_23, %c0_24], %29 {strides = array<i32>} : memref<1x4x256xf32, #tpu.memory_space<vmem>>, vector<1x4x256xf32>,
    return
  }
  func.func @transform_0(%arg0: i32) -> (i32, i32, i32) {
    %c0_i32 = arith.constant 0 : i32
    %c0_i32_0 = arith.constant 0 : i32
    %c0_i32_1 = arith.constant 0 : i32
    return %arg0, %c0_i32, %c0_i32_0 : i32, i32, i32
  }
  func.func @transform_1(%arg0: i32) -> (i32, i32, i32) {
    %c0_i32 = arith.constant 0 : i32
    %c0_i32_0 = arith.constant 0 : i32
    %c0_i32_1 = arith.constant 0 : i32
    return %arg0, %c0_i32, %c0_i32_0 : i32, i32, i32
  }
  func.func @transform_2(%arg0: i32) -> (i32, i32, i32) {
    %c0_i32 = arith.constant 0 : i32
    %c0_i32_0 = arith.constant 0 : i32
    %c0_i32_1 = arith.constant 0 : i32
    return %arg0, %c0_i32, %c0_i32_0 : i32, i32, i32
  }
  func.func @transform_3(%arg0: i32) -> (i32, i32, i32) {
    %c0_i32 = arith.constant 0 : i32
    %c0_i32_0 = arith.constant 0 : i32
    %c0_i32_1 = arith.constant 0 : i32
    return %arg0, %c0_i32, %c0_i32_0 : i32, i32, i32
  }
  func.func @transform_4(%arg0: i32) -> (i32, i32, i32) {
    %c0_i32 = arith.constant 0 : i32
    %c0_i32_0 = arith.constant 0 : i32
    %c0_i32_1 = arith.constant 0 : i32
    %c0_i32_2 = arith.constant 0 : i32
    return %c0_i32, %c0_i32_0, %c0_i32_1 : i32, i32, i32
  }
  func.func @transform_5(%arg0: i32) -> (i32, i32) {
    %c0_i32 = arith.constant 0 : i32
    %c0_i32_0 = arith.constant 0 : i32
    %c0_i32_1 = arith.constant 0 : i32
    return %c0_i32, %c0_i32_0 : i32, i32
  }
  func.func @transform_6(%arg0: i32) -> (i32, i32, i32) {
    %c0_i32 = arith.constant 0 : i32
    %c0_i32_0 = arith.constant 0 : i32
    %c0_i32_1 = arith.constant 0 : i32
    return %arg0, %c0_i32, %c0_i32_0 : i32, i32, i32
  }
}

</mosaic_0001>

<bundles_post_ra>
// kernel: upsampling_forward.11
= control target key start
LH: loop header
LB: loop body
LE: loop exit
PB: predicated region body
PF: predicated region fallthrough
CT: control target
= control target key end

     0   :  { %s702_s21 = smov 0   ;;  %s753_s0 = inlined_call_operand.vmem [shape: f32[2,4,256], index: 0, kind: input, shape index: {}]   ;;  %s754_s1 = inlined_call_operand.vmem [shape: f32[2,4,256], index: 1, kind: input, shape index: {}]   ;;  %s755_s2 = inlined_call_operand.vmem [shape: f32[2,4,256], index: 2, kind: input, shape index: {}]   ;;  %s756_s3 = inlined_call_operand.vmem [shape: f32[2,4,256], index: 3, kind: input, shape index: {}]   ;;  %s757_s4 = inlined_call_operand.vmem [shape: f32[3,4,4], index: 4, kind: input, shape index: {}]   ;;  %s758_s5 = inlined_call_operand.vmem [shape: f32[4,1], index: 5, kind: input, shape index: {}]   ;;  %s759_s6 = inlined_call_operand.vmem [shape: f32[2,4,256], index: 6, kind: output, shape index: {}]  }
   0x1 LB: > { %s613_s22 = sadd.s32 4294967295, %s663_s21   ;;  %p617_p0 = scmp.ge.s32.totalorder %s663_s21, 1  ;;  %s663_s21 = sphi %s702_s21, %s16_s21  }
   0x2   : > { %p242_p1 = scmp.lt.s32.totalorder %s663_s21, 3 }
   0x4   : > { %p243_p2 = pnand %p617_p0, %p242_p1 }
   0x5   : > { %p287_p3 = scmp.lt.s32.totalorder (!%p243_p2), %s613_s22, 1 }
   0x6   : > { %246 = sbr.rel (%p243_p2) target bundleno = 231 (0xe7), region = 44 }
   0xb   : > { %v665_v0 = vmov 0   ;;  %v314_v1 = vld [vmem:[%s758_s5] sm:$0xf]  ;;  %s761_s22 = smov (!%p287_p3, %s613_s22), 1  ;;  %vm340_vm0 = vcmask 1041408   ;;  %vm336_vm1 = vcmask 31744   ;;  %v322_v25 = vlaneseq }
   0xc   : > { %379 = vmatprep.mubr.bf16.mxu0 %v665_v0  ;;  %443 = vmatprep.mubr.bf16.mxu1 %v665_v0  ;;  %s713_s25 = sshll.u32 %s761_s22, 3  ;;  %v328_v9 = vld [vmem:[%s757_s4] sm:$0xf]  ;;  %v630_v11 = vld [vmem:[%s757_s4 + $0x4] sm:$0xf] }
   0xd   : > { %653 = vset.pattern.permute.xlu0 %v665_v0  ;;  %s296_s28 = scalar_lea.vmem %s754_s1, %s713_s25  ;;  %s301_s7 = scalar_lea.vmem %s755_s2, %s713_s25  ;;  %v329_v18 = vpack.c.bf16 %v328_v9, %v328_v9  ;;  %v395_v19 = vpack.c.bf16 %v630_v11, %v630_v11  ;;  %v633_v21 = vld [vmem:[%s757_s4 + $0x8] sm:$0xf]  ;;  %v666_v23 = vmov 839922192   ;;  %v323_v27 = vshrl.u32 %v322_v25, 7 }
   0xe   : > { %317 = vperm.xlu0 %653, %v314_v1   ;;  %v330_v2 = vld [vmem:[%s296_s28] sm:$0xff]  ;;  %s306_s10 = scalar_lea.vmem %s756_s3, %s713_s25  ;;  %v459_v22 = vpack.c.bf16 %v633_v21, %v633_v21  ;;  %v320_v24 = vunpack.c.l.s4 %v666_v23  ;;  %s291_s19 = scalar_lea.vmem %s753_s0, %s713_s25 }
   0xf   : > { %v396_v3 = vld [vmem:[%s301_s7] sm:$0xff]  ;;  %v332_v4 = vcombine.high %v330_v2, %v330_v2  ;;  %v334_v5 = vpack.c.bf16 %v330_v2, %v330_v2  ;;  %s311_s23 = scalar_lea.vmem %s759_s6, %s713_s25 }
  0x10   : > { %v398_v6 = vcombine.high %v396_v3, %v396_v3  ;;  %v400_v7 = vpack.c.bf16 %v396_v3, %v396_v3  ;;  %v460_v8 = vld [vmem:[%s306_s10] sm:$0xff]  ;;  %v321_v26 = vunpack.c.0.s8 %v320_v24 }
  0x11   : > { %v462_v10 = vcombine.high %v460_v8, %v460_v8  ;;  %v464_v12 = vpack.c.bf16 %v460_v8, %v460_v8  ;;  %v335_v13 = vpack.c.bf16 %v332_v4, %v332_v4  ;;  %v342_v14 = vsel %vm340_vm0, %v334_v5, 0  ;;  %v313_v31 = vld [vmem:[%s291_s19] sm:$0xff] }
  0x12   : > { %v401_v15 = vpack.c.bf16 %v398_v6, %v398_v6  ;;  %v406_v16 = vsel %vm340_vm0, %v400_v7, 0  ;;  %v324_v28 = vsub.s32 %v321_v26, %v323_v27 }
  0x13   : > { %v465_v17 = vpack.c.bf16 %v462_v10, %v462_v10  ;;  %628 = vmatprep.subr.msk.bf16.mxu0 %vm340_vm0, %v335_v13  ;;  %v470_v20 = vsel %vm340_vm0, %v464_v12, 0 }
  0x14   : > { %631 = vmatprep.subr.msk.bf16.mxu1 %vm340_vm0, %v401_v15  ;;  %362 = vmatpush1.bf16.msra.mxu0 %v342_v14 }
  0x15   : > { %426 = vmatpush1.bf16.msra.mxu1 %v406_v16  ;;  %634 = vmatprep.subr.msk.bf16.mxu0 %vm340_vm0, %v465_v17 }
  0x17   : > { %629 = vmatmul.mubr.msk.bf16.vlgmr.msra.gmra.mxu0 %vm336_vm1, %v329_v18 }
  0x18   : > { %632 = vmatmul.mubr.msk.bf16.vlgmr.msra.gmra.mxu1 %vm336_vm1, %v395_v19  ;;  %490 = vmatpush1.bf16.msra.mxu0 %v470_v20 }
  0x19   : > { %507 = vmatprep.mubr.bf16.mxu0 %v665_v0 }
  0x1f   : > { %635 = vmatmul.mubr.msk.bf16.vlgmr.msra.gmra.mxu0 %vm336_vm1, %v459_v22 }
  0x89   : > { %v318_v29 = vpop.permute.xlu0 %317 }
  0x8a   : > { %v325_v30 = vrot.slane %v318_v29, %v324_v28 }
  0x8c   : > { %v327_v36 = vadd.f32 %v325_v30, %v313_v31 }
  0xd7   : > { %v381_v32 = vpop.f32.mrf.mxu0 }
  0xd8   : > { %v445_v33 = vpop.f32.mrf.mxu1 }
  0xd9   : > { %v383_v34 = vpop.f32.mrf.mxu0 }
  0xda   : > { %v447_v35 = vpop.f32.mrf.mxu1  ;;  %v390_v37 = vcombine.low %v381_v32, %v383_v34 }
  0xdb   : > { %v385_v38 = vpop.f32.mrf.mxu0  ;;  %v454_v43 = vcombine.low %v445_v33, %v447_v35 }
  0xdc   : > { %v449_v39 = vpop.f32.mrf.mxu1  ;;  %v392_v42 = vadd.f32 %v390_v37, %v327_v36 }
  0xdd   : > { %v386_v40 = vpop.f32.mrf.mxu0 }
  0xde   : > { %v450_v41 = vpop.f32.mrf.mxu1  ;;  %v456_v46 = vadd.f32 %v454_v43, %v392_v42 }
  0xdf   : > { %v509_v44 = vpop.f32.mrf.mxu0 }
  0xe1   : > { %v511_v45 = vpop.f32.mrf.mxu0 }
  0xe2   : > { %v518_v47 = vcombine.low %v509_v44, %v511_v45 }
  0xe3   : > { %v513_v48 = vpop.f32.mrf.mxu0 }
  0xe4   : > { %v520_v49 = vadd.f32 %v518_v47, %v456_v46 }
  0xe5   : > { %v514_v50 = vpop.f32.mrf.mxu0 }
  0xe6   : > { %521 = vst [vmem:[%s311_s23] sm:$0xff] %v520_v49 }
  0xe7 PF: > { %s16_s21 = sadd.s32 1, %s663_s21  }
  0xe8   : > { %p13_p4 = scmp.ge.s32.totalorder %s16_s21, 4  }
  0xea   :  { %15 = sbr.rel (!%p13_p4) target bundleno = 1 (0x1), region = 85 }

// kernel: upsampling_forward.8
= control target key start
LH: loop header
LB: loop body
LE: loop exit
PB: predicated region body
PF: predicated region fallthrough
CT: control target
= control target key end

     0   :  { %s4912_s21 = smov 0   ;;  %s7835_s0 = inlined_call_operand.vmem [shape: f32[2,4,256], index: 0, kind: input, shape index: {}]   ;;  %s7836_s1 = inlined_call_operand.vmem [shape: f32[2,16,16,4], index: 1, kind: input, shape index: {}]   ;;  %s7837_s2 = inlined_call_operand.vmem [shape: f32[36,4], index: 2, kind: input, shape index: {}]   ;;  %s7838_s3 = inlined_call_operand.vmem [shape: f32[1,4], index: 3, kind: input, shape index: {}]   ;;  %s7839_s4 = inlined_call_operand.vmem [shape: f32[36,4], index: 4, kind: input, shape index: {}]   ;;  %s7840_s5 = inlined_call_operand.vmem [shape: f32[1,4], index: 5, kind: input, shape index: {}]   ;;  %s7841_s6 = inlined_call_operand.vmem [shape: f32[48,4], index: 6, kind: input, shape index: {}]   ;;  %s7842_s7 = inlined_call_operand.vmem [shape: f32[48,1], index: 7, kind: input, shape index: {}]   ;;  %s7843_s8 = inlined_call_operand.vmem [shape: f32[6,4,2], index: 8, kind: input, shape index: {}]   ;;  %s7844_s9 = inlined_call_operand.vmem [shape: f32[6,1,2], index: 9, kind: input, shape index: {}]   ;;  %s7845_s10 = inlined_call_operand.vmem [shape: f32[6,4,2], index: 10, kind: input, shape index: {}]   ;;  %s7846_s11 = inlined_call_operand.vmem [shape: f32[6,4,1], index: 11, kind: input, shape index: {}]   ;;  %s7847_s12 = inlined_call_operand.vmem [shape: f32[2,4,256], index: 12, kind: output, shape index: {}]  }
   0x1 LB: > { %s4531_s22 = sadd.s32 4294967295, %s4835_s21   ;;  %p4535_p0 = scmp.ge.s32.totalorder %s4835_s21, 1  ;;  %s4835_s21 = sphi %s4912_s21, %s22_s21  }
   0x2   : > { %p372_p1 = scmp.lt.s32.totalorder %s4835_s21, 3 }
   0x4   : > { %p373_p2 = pnand %p4535_p0, %p372_p1 }
   0x6   : > { %376 = sbr.rel (%p373_p2) target bundleno = 2458 (0x99a), region = 68 }
   0xb   : > { %vm435_vm0 = vcmask 31744   ;;  %vm438_vm1 = vcmask 25600   ;;  %p4922_p3 = scmp.lt.s32.totalorder %s4531_s22, 1  ;;  %v4837_v0 = vmov 0.0   ;;  %vm696_vm2 = vcmask 1046528   ;;  %s4838_s28 = smov 4  }
   0xc   : > { %436 = vst.msk [vmem:[#allocation2] sm:$0xff] %vm435_vm0, %v4837_v0  ;;  %437 = vst.msk [vmem:[#allocation2 + $0x8] sm:$0xff] %vm435_vm0, %v4837_v0  ;;  %vm906_vm3 = vcmask 1045504   ;;  %s4839_s29 = smov 8   ;;  %s4840_s30 = smov 12   ;;  %vm873_vm4 = vcmask 64544  }
   0xd   : > { %440 = vst.msk [vmem:[#allocation2 + $0x18] sm:$0xff] %vm435_vm0, %v4837_v0  ;;  %441 = vst.msk [vmem:[#allocation2 + $0x20] sm:$0xff] %vm435_vm0, %v4837_v0  ;;  %s7944_s22 = smov (!%p4922_p3, %s4531_s22), 1  ;;  %s4841_s13 = smov 16   ;;  %vm2022_vm5 = vcmask 1041408   ;;  %vm1083_vm6 = vcmask 97344  }
   0xe   : > { %443 = vst.msk [vmem:[#allocation2 + $0x30] sm:$0xff] %vm435_vm0, %v4837_v0  ;;  %444 = vst.msk [vmem:[#allocation2 + $0x38] sm:$0xff] %vm435_vm0, %v4837_v0  ;;  %s4608_s24 = sshll.u32 %s7944_s22, 8  ;;  %s4842_s14 = smov 20   ;;  %vm1214_vm7 = vcmask 130144   ;;  %vm1349_vm8 = vcmask 162944  }
   0xf   : > { %446 = vst.msk [vmem:[#allocation2 + $0x48] sm:$0xff] %vm435_vm0, %v4837_v0  ;;  %447 = vst.msk [vmem:[#allocation2 + $0x50] sm:$0xff] %vm435_vm0, %v4837_v0  ;;  %s4990_s27 = scalar_lea.vmem %s7836_s1, %s4608_s24  ;;  %s4843_s15 = smov 24   ;;  %vm1483_vm9 = vcmask 195744   ;;  %vm1614_vm10 = vcmask 228544   ;;  %vm1749_vm11 = vcmask 261344  }
  0x10   : > { %449 = vst.msk [vmem:[#allocation2 + $0x60] sm:$0xff] %vm435_vm0, %v4837_v0  ;;  %450 = vst.msk [vmem:[#allocation2 + $0x68] sm:$0xff] %vm435_vm0, %v4837_v0  ;;  %v491_v1 = vld [vmem:[%s4990_s27] sm:$0xff]  ;;  %v492_v2 = vld [vmem:[%s4990_s27 + $0x8] sm:$0xff]  ;;  %s4844_s16 = smov 28   ;;  %s4845_s25 = smov 32  }
  0x11   : > { %452 = vst.msk [vmem:[#allocation2 + $0x78] sm:$0xff] %vm435_vm0, %v4837_v0  ;;  %453 = vst.msk [vmem:[#allocation2 + $0x80] sm:$0xff] %vm435_vm0, %v4837_v0  ;;  %v493_v3 = vld [vmem:[%s4990_s27 + $0x10] sm:$0xff]  ;;  %v494_v4 = vld [vmem:[%s4990_s27 + $0x18] sm:$0xff]  ;;  %vm1883_vm12 = vcmask 294144   ;;  %vm1973_vm13 = vcmask 293888  }
  0x12   : > { %455 = vst.msk [vmem:[#allocation2 + $0x90] sm:$0xff] %vm435_vm0, %v4837_v0  ;;  %456 = vst.msk [vmem:[#allocation2 + $0x98] sm:$0xff] %vm435_vm0, %v4837_v0  ;;  %v495_v5 = vld [vmem:[%s4990_s27 + $0x20] sm:$0xff]  ;;  %v496_v6 = vld [vmem:[%s4990_s27 + $0x28] sm:$0xff]  ;;  %vm4087_vm14 = vcmask 11264  }
  0x13   : > { %458 = vst.msk [vmem:[#allocation2 + $0xa8] sm:$0xff] %vm435_vm0, %v4837_v0  ;;  %459 = vst.msk [vmem:[#allocation2 + $0xb0] sm:$0xff] %vm435_vm0, %v4837_v0  ;;  %v562_v7 = vld [vmem:[#allocation2] sm:$0xff]  ;;  %v563_v8 = vld [vmem:[#allocation2 + $0x8] sm:$0xff] }
  0x14   : > { %461 = vst.msk [vmem:[#allocation2 + $0xc0] sm:$0xff] %vm435_vm0, %v4837_v0  ;;  %462 = vst.msk [vmem:[#allocation2 + $0xc8] sm:$0xff] %vm435_vm0, %v4837_v0  ;;  %v697_v10 = vrot.slane %v562_v7, 1  ;;  %v698_v11 = vrot.slane %v563_v8, 1  ;;  %v497_v13 = vld [vmem:[%s4990_s27 + $0x30] sm:$0xff]  ;;  %v498_v14 = vld [vmem:[%s4990_s27 + $0x38] sm:$0xff] }
  0x15   : > { %464 = vst.msk [vmem:[#allocation2 + $0xd8] sm:$0xff] %vm435_vm0, %v4837_v0  ;;  %465 = vst.msk [vmem:[#allocation2 + $0xe0] sm:$0xff] %vm435_vm0, %v4837_v0  ;;  %v499_v15 = vld [vmem:[%s4990_s27 + $0x40] sm:$0xff]  ;;  %v500_v16 = vld [vmem:[%s4990_s27 + $0x48] sm:$0xff]  ;;  %v907_v19 = vrot.slane %v562_v7, 2  ;;  %v908_v20 = vrot.slane %v563_v8, 2 }
  0x16   : > { %467 = vst.msk [vmem:[#allocation2 + $0xf0] sm:$0xff] %vm435_vm0, %v4837_v0  ;;  %468 = vst.msk [vmem:[#allocation2 + $0xf8] sm:$0xff] %vm435_vm0, %v4837_v0  ;;  %v501_v17 = vld [vmem:[%s4990_s27 + $0x50] sm:$0xff]  ;;  %v502_v18 = vld [vmem:[%s4990_s27 + $0x58] sm:$0xff]  ;;  %v699_v22 = vsel %vm696_vm2, %v697_v10, %v698_v11 }
  0x17   : > { %470 = vst.msk [vmem:[#allocation2 + $0x108] sm:$0xff] %vm435_vm0, %v4837_v0  ;;  %471 = vst.msk [vmem:[#allocation2 + $0x110] sm:$0xff] %vm435_vm0, %v4837_v0  ;;  %v503_v23 = vld [vmem:[%s4990_s27 + $0x60] sm:$0xff]  ;;  %v504_v24 = vld [vmem:[%s4990_s27 + $0x68] sm:$0xff]  ;;  %777 = vrot.lane.b32.xlu0 %v699_v22, %s4838_s28  ;;  %v5030_v29 = vsel %vm906_vm3, %v907_v19, %v908_v20 }
  0x18   : > { %473 = vst.msk [vmem:[#allocation2 + $0x120] sm:$0xff] %vm435_vm0, %v4837_v0  ;;  %474 = vst.msk [vmem:[#allocation2 + $0x128] sm:$0xff] %vm435_vm0, %v4837_v0  ;;  %v505_v25 = vld [vmem:[%s4990_s27 + $0x70] sm:$0xff]  ;;  %v506_v26 = vld [vmem:[%s4990_s27 + $0x78] sm:$0xff] }
  0x19   : > { %476 = vst.msk [vmem:[#allocation2 + $0x138] sm:$0xff] %vm435_vm0, %v4837_v0  ;;  %477 = vst.msk [vmem:[#allocation2 + $0x140] sm:$0xff] %vm435_vm0, %v4837_v0  ;;  %v507_v27 = vld [vmem:[%s4990_s27 + $0x80] sm:$0xff]  ;;  %v508_v28 = vld [vmem:[%s4990_s27 + $0x88] sm:$0xff] }
  0x1a   : > { %479 = vst.msk [vmem:[#allocation2 + $0x150] sm:$0xff] %vm435_vm0, %v4837_v0  ;;  %480 = vst.msk [vmem:[#allocation2 + $0x158] sm:$0xff] %vm435_vm0, %v4837_v0  ;;  %v509_v32 = vld [vmem:[%s4990_s27 + $0x90] sm:$0xff]  ;;  %v510_v33 = vld [vmem:[%s4990_s27 + $0x98] sm:$0xff] }
  0x1b   : > { %482 = vst.msk [vmem:[#allocation2 + $0x168] sm:$0xff] %vm435_vm0, %v4837_v0  ;;  %483 = vst.msk [vmem:[#allocation2 + $0x170] sm:$0xff] %vm435_vm0, %v4837_v0  ;;  %v511_v34 = vld [vmem:[%s4990_s27 + $0xa0] sm:$0xff]  ;;  %v517_v22 = vld [vmem:[%s4990_s27 + $0xd0] sm:$0xff] }
  0x1c   : > { %485 = vst.msk [vmem:[#allocation2 + $0x180] sm:$0xff] %vm435_vm0, %v4837_v0  ;;  %486 = vst.msk [vmem:[#allocation2 + $0x188] sm:$0xff] %vm435_vm0, %v4837_v0 }
  0x1d   : > { %488 = vst.msk [vmem:[#allocation2 + $0x198] sm:$0xff] %vm435_vm0, %v4837_v0  ;;  %489 = vst.msk [vmem:[#allocation2 + $0x1a0] sm:$0xff] %vm435_vm0, %v4837_v0 }
  0x1e   : > { %439 = vst.msk [vmem:[#allocation2 + $0x10] sm:$0x3] %vm438_vm1, %v4837_v0  ;;  %442 = vst.msk [vmem:[#allocation2 + $0x28] sm:$0x3] %vm438_vm1, %v4837_v0 }
  0x1f   : > { %445 = vst.msk [vmem:[#allocation2 + $0x40] sm:$0x3] %vm438_vm1, %v4837_v0  ;;  %448 = vst.msk [vmem:[#allocation2 + $0x58] sm:$0x3] %vm438_vm1, %v4837_v0 }
  0x20   : > { %451 = vst.msk [vmem:[#allocation2 + $0x70] sm:$0x3] %vm438_vm1, %v4837_v0  ;;  %454 = vst.msk [vmem:[#allocation2 + $0x88] sm:$0x3] %vm438_vm1, %v4837_v0 }
  0x21   : > { %457 = vst.msk [vmem:[#allocation2 + $0xa0] sm:$0x3] %vm438_vm1, %v4837_v0  ;;  %460 = vst.msk [vmem:[#allocation2 + $0xb8] sm:$0x3] %vm438_vm1, %v4837_v0 }
  0x22   : > { %463 = vst.msk [vmem:[#allocation2 + $0xd0] sm:$0x3] %vm438_vm1, %v4837_v0  ;;  %466 = vst.msk [vmem:[#allocation2 + $0xe8] sm:$0x3] %vm438_vm1, %v4837_v0 }
  0x23   : > { %469 = vst.msk [vmem:[#allocation2 + $0x100] sm:$0x3] %vm438_vm1, %v4837_v0  ;;  %472 = vst.msk [vmem:[#allocation2 + $0x118] sm:$0x3] %vm438_vm1, %v4837_v0 }
  0x24   : > { %475 = vst.msk [vmem:[#allocation2 + $0x130] sm:$0x3] %vm438_vm1, %v4837_v0  ;;  %478 = vst.msk [vmem:[#allocation2 + $0x148] sm:$0x3] %vm438_vm1, %v4837_v0 }
  0x25   : > { %481 = vst.msk [vmem:[#allocation2 + $0x160] sm:$0x3] %vm438_vm1, %v4837_v0  ;;  %484 = vst.msk [vmem:[#allocation2 + $0x178] sm:$0x3] %vm438_vm1, %v4837_v0  ;;  %v564_v9 = vld [vmem:[#allocation2 + $0x10] sm:$0x3] }
  0x26   : > { %487 = vst.msk [vmem:[#allocation2 + $0x190] sm:$0x3] %vm438_vm1, %v4837_v0  ;;  %490 = vst.msk [vmem:[#allocation2 + $0x1a8] sm:$0x3] %vm438_vm1, %v4837_v0  ;;  %v700_v12 = vrot.slane %v564_v9, 1  ;;  %v910_v21 = vrot.slane %v564_v9, 2 }
  0x27   : > { %524 = vst.msk [vmem:[#allocation2 + $0x19] sm:$0xff] %vm435_vm0, %v491_v1  ;;  %525 = vst.msk [vmem:[#allocation2 + $0x21] sm:$0xff] %vm435_vm0, %v492_v2 }
  0x28   : > { %526 = vst.msk [vmem:[#allocation2 + $0x31] sm:$0xff] %vm435_vm0, %v493_v3  ;;  %527 = vst.msk [vmem:[#allocation2 + $0x39] sm:$0xff] %vm435_vm0, %v494_v4  ;;  %v5033_v30 = vsel %vm906_vm3, %v908_v20, %v910_v21  ;;  %v701_v31 = vsel %vm696_vm2, %v698_v11, %v700_v12  ;;  %v512_v11 = vld [vmem:[%s4990_s27 + $0xa8] sm:$0xff] }
  0x29   : > { %528 = vst.msk [vmem:[#allocation2 + $0x49] sm:$0xff] %vm435_vm0, %v495_v5  ;;  %529 = vst.msk [vmem:[#allocation2 + $0x51] sm:$0xff] %vm435_vm0, %v496_v6  ;;  %779 = vrot.lane.b32.xlu0 %v701_v31, %s4838_s28  ;;  %v516_v21 = vld [vmem:[%s4990_s27 + $0xc8] sm:$0xff] }
  0x2a   : > { %616 = vst.msk [vmem:[#allocation3] sm:$0xff] %vm435_vm0, %v562_v7  ;;  %617 = vst.msk [vmem:[#allocation3 + $0x8] sm:$0xff] %vm435_vm0, %v563_v8 }
  0x2b   : > { %530 = vst.msk [vmem:[#allocation2 + $0x61] sm:$0xff] %vm435_vm0, %v497_v13  ;;  %531 = vst.msk [vmem:[#allocation2 + $0x69] sm:$0xff] %vm435_vm0, %v498_v14 }
  0x2c   : > { %532 = vst.msk [vmem:[#allocation2 + $0x79] sm:$0xff] %vm435_vm0, %v499_v15  ;;  %533 = vst.msk [vmem:[#allocation2 + $0x81] sm:$0xff] %vm435_vm0, %v500_v16  ;;  %v513_v16 = vld [vmem:[%s4990_s27 + $0xb0] sm:$0xff] }
  0x2d   : > { %534 = vst.msk [vmem:[#allocation2 + $0x91] sm:$0xff] %vm435_vm0, %v501_v17  ;;  %535 = vst.msk [vmem:[#allocation2 + $0x99] sm:$0xff] %vm435_vm0, %v502_v18  ;;  %v514_v17 = vld [vmem:[%s4990_s27 + $0xb8] sm:$0xff]  ;;  %v515_v18 = vld [vmem:[%s4990_s27 + $0xc0] sm:$0xff] }
  0x2e   : > { %536 = vst.msk [vmem:[#allocation2 + $0xa9] sm:$0xff] %vm435_vm0, %v503_v23  ;;  %537 = vst.msk [vmem:[#allocation2 + $0xb1] sm:$0xff] %vm435_vm0, %v504_v24  ;;  %v5042_v35 = vld [vmem:[#allocation2 + $0x18] sm:$0xff]  ;;  %v5044_v36 = vld [vmem:[#allocation2 + $0x20] sm:$0xff] }
  0x2f   : > { %538 = vst.msk [vmem:[#allocation2 + $0xc1] sm:$0xff] %vm435_vm0, %v505_v25  ;;  %539 = vst.msk [vmem:[#allocation2 + $0xc9] sm:$0xff] %vm435_vm0, %v506_v26  ;;  %v5046_v37 = vld [vmem:[#allocation2 + $0x30] sm:$0xff]  ;;  %v702_v38 = vrot.slane %v5042_v35, 1  ;;  %v703_v39 = vrot.slane %v5044_v36, 1  ;;  %v5057_v40 = vld [vmem:[#allocation2 + $0x38] sm:$0xff] }
  0x30   : > { %540 = vst.msk [vmem:[#allocation2 + $0xd9] sm:$0xff] %vm435_vm0, %v507_v27  ;;  %541 = vst.msk [vmem:[#allocation2 + $0xe1] sm:$0xff] %vm435_vm0, %v508_v28  ;;  %v707_v41 = vrot.slane %v5046_v37, 1  ;;  %v5062_v42 = vld [vmem:[#allocation2 + $0x28] sm:$0x3]  ;;  %v708_v43 = vrot.slane %v5057_v40, 1 }
  0x31   : > { %542 = vst.msk [vmem:[#allocation2 + $0xf1] sm:$0xff] %vm435_vm0, %v509_v32  ;;  %543 = vst.msk [vmem:[#allocation2 + $0xf9] sm:$0xff] %vm435_vm0, %v510_v33  ;;  %v705_v44 = vrot.slane %v5062_v42, 1  ;;  %v5069_v45 = vld [vmem:[#allocation2 + $0x48] sm:$0xff]  ;;  %v5071_v46 = vld [vmem:[#allocation2 + $0x50] sm:$0xff]  ;;  %v5076_v48 = vsel %vm696_vm2, %v702_v38, %v703_v39 }
  0x32   : > { %544 = vst.msk [vmem:[#allocation2 + $0x109] sm:$0xff] %vm435_vm0, %v511_v34  ;;  %618 = vst.msk [vmem:[#allocation3 + $0x10] sm:$0xff] %vm435_vm0, %v5042_v35  ;;  %v5073_v47 = vld [vmem:[#allocation2 + $0x40] sm:$0x3]  ;;  %v712_v49 = vrot.slane %v5069_v45, 1  ;;  %v713_v50 = vrot.slane %v5071_v46, 1  ;;  %781 = vrot.lane.b32.xlu1 %v5076_v48, %s4838_s28  ;;  %v5093_v54 = vsel %vm696_vm2, %v707_v41, %v708_v43 }
  0x33   : > { %619 = vst.msk [vmem:[#allocation3 + $0x18] sm:$0xff] %vm435_vm0, %v5044_v36  ;;  %620 = vst.msk [vmem:[#allocation3 + $0x20] sm:$0xff] %vm435_vm0, %v5046_v37  ;;  %v5084_v51 = vld [vmem:[#allocation2 + $0x60] sm:$0xff]  ;;  %v5086_v52 = vld [vmem:[#allocation2 + $0x68] sm:$0xff]  ;;  %v5106_v57 = vsel %vm696_vm2, %v703_v39, %v705_v44  ;;  %v710_v58 = vrot.slane %v5073_v47, 1  ;;  %785 = vrot.lane.b32.xlu0 %v5093_v54, %s4838_s28 }
  0x34   : > { %621 = vst.msk [vmem:[#allocation3 + $0x28] sm:$0xff] %vm435_vm0, %v5057_v40  ;;  %622 = vst.msk [vmem:[#allocation3 + $0x30] sm:$0xff] %vm435_vm0, %v5069_v45  ;;  %v5088_v53 = vld [vmem:[#allocation2 + $0x78] sm:$0xff]  ;;  %v5099_v55 = vld [vmem:[#allocation2 + $0x80] sm:$0xff]  ;;  %v5128_v63 = vsel %vm696_vm2, %v712_v49, %v713_v50  ;;  %v717_v0 = vrot.slane %v5084_v51, 1  ;;  %v718_v1 = vrot.slane %v5086_v52, 1 }
  0x35   : > { %623 = vst.msk [vmem:[#allocation3 + $0x38] sm:$0xff] %vm435_vm0, %v5071_v46  ;;  %624 = vst.msk [vmem:[#allocation3 + $0x40] sm:$0xff] %vm435_vm0, %v5084_v51  ;;  %v5103_v56 = vld [vmem:[#allocation2 + $0x90] sm:$0xff]  ;;  %v5111_v59 = vld [vmem:[#allocation2 + $0x98] sm:$0xff]  ;;  %v5145_v5 = vsel %vm696_vm2, %v708_v43, %v710_v58  ;;  %v722_v13 = vrot.slane %v5088_v53, 1  ;;  %v723_v14 = vrot.slane %v5099_v55, 1 }
  0x36   : > { %625 = vst.msk [vmem:[#allocation3 + $0x48] sm:$0xff] %vm435_vm0, %v5086_v52  ;;  %626 = vst.msk [vmem:[#allocation3 + $0x50] sm:$0xff] %vm435_vm0, %v5088_v53  ;;  %v5115_v60 = vld [vmem:[#allocation2 + $0xa8] sm:$0xff]  ;;  %v5119_v61 = vld [vmem:[#allocation2 + $0x58] sm:$0x3]  ;;  %783 = vrot.lane.b32.xlu1 %v5106_v57, %s4838_s28  ;;  %v5168_v12 = vsel %vm696_vm2, %v717_v0, %v718_v1  ;;  %v727_v28 = vrot.slane %v5103_v56, 1 }
  0x37   : > { %627 = vst.msk [vmem:[#allocation3 + $0x58] sm:$0xff] %vm435_vm0, %v5099_v55  ;;  %628 = vst.msk [vmem:[#allocation3 + $0x60] sm:$0xff] %vm435_vm0, %v5103_v56  ;;  %v5123_v62 = vld [vmem:[#allocation2 + $0xb0] sm:$0xff]  ;;  %v5134_v2 = vld [vmem:[#allocation2 + $0xc0] sm:$0xff]  ;;  %v715_v6 = vrot.slane %v5119_v61, 1  ;;  %789 = vrot.lane.b32.xlu0 %v5128_v63, %s4838_s28  ;;  %v5204_v27 = vsel %vm696_vm2, %v722_v13, %v723_v14  ;;  %v728_v31 = vrot.slane %v5111_v59, 1 }
  0x38   : > { %629 = vst.msk [vmem:[#allocation3 + $0x68] sm:$0xff] %vm435_vm0, %v5111_v59  ;;  %630 = vst.msk [vmem:[#allocation3 + $0x70] sm:$0xff] %vm435_vm0, %v5115_v60  ;;  %v5138_v3 = vld [vmem:[#allocation2 + $0xc8] sm:$0xff]  ;;  %v5142_v4 = vld [vmem:[#allocation2 + $0xd8] sm:$0xff]  ;;  %v732_v41 = vrot.slane %v5115_v60, 1  ;;  %v733_v43 = vrot.slane %v5123_v62, 1 }
  0x39   : > { %631 = vst.msk [vmem:[#allocation3 + $0x78] sm:$0xff] %vm435_vm0, %v5123_v62  ;;  %632 = vst.msk [vmem:[#allocation3 + $0x80] sm:$0xff] %vm435_vm0, %v5134_v2  ;;  %v5150_v7 = vld [vmem:[#allocation2 + $0xe0] sm:$0xff]  ;;  %v5154_v8 = vld [vmem:[#allocation2 + $0xf0] sm:$0xff]  ;;  %v5185_v19 = vsel %vm696_vm2, %v713_v50, %v715_v6  ;;  %v5223_v39 = vsel %vm696_vm2, %v727_v28, %v728_v31 }
  0x3a   : > { %633 = vst.msk [vmem:[#allocation3 + $0x88] sm:$0xff] %vm435_vm0, %v5138_v3  ;;  %634 = vst.msk [vmem:[#allocation3 + $0x90] sm:$0xff] %vm435_vm0, %v5142_v4  ;;  %v5158_v9 = vld [vmem:[#allocation2 + $0x70] sm:$0x3]  ;;  %v5162_v10 = vld [vmem:[#allocation2 + $0xf8] sm:$0xff]  ;;  %787 = vrot.lane.b32.xlu1 %v5145_v5, %s4838_s28  ;;  %v743_v28 = vrot.slane %v5150_v7, 1 }
  0x3b   : > { %7895 = vst [vmem:[#allocation4_spill] sm:$0xff] %v5154_v8  ;;  %635 = vst.msk [vmem:[#allocation3 + $0x98] sm:$0xff] %vm435_vm0, %v5150_v7  ;;  %v5175_v15 = vld [vmem:[#allocation2 + $0x108] sm:$0xff]  ;;  %v720_v20 = vrot.slane %v5158_v9, 1  ;;  %v518_v23 = vld [vmem:[%s4990_s27 + $0xd8] sm:$0xff]  ;;  %793 = vrot.lane.b32.xlu0 %v5168_v12, %s4838_s28 }
  0x3c   : > { %7896 = vst [vmem:[#allocation5_spill] sm:$0xff] %v5162_v10  ;;  %636 = vst.msk [vmem:[#allocation3 + $0xa0] sm:$0xff] %vm435_vm0, %v5154_v8  ;;  %v5196_v24 = vld [vmem:[#allocation2 + $0x88] sm:$0x3]  ;;  %v519_v25 = vld [vmem:[%s4990_s27 + $0xe0] sm:$0xff] }
  0x3d   : > { %637 = vst.msk [vmem:[#allocation3 + $0xa8] sm:$0xff] %vm435_vm0, %v5162_v10  ;;  %545 = vst.msk [vmem:[#allocation2 + $0x111] sm:$0xff] %vm435_vm0, %v512_v11  ;;  %v520_v26 = vld [vmem:[%s4990_s27 + $0xe8] sm:$0xff]  ;;  %v5213_v32 = vsel %vm696_vm2, %v718_v1, %v720_v20  ;;  %v725_v33 = vrot.slane %v5196_v24, 1  ;;  %v5218_v34 = vld [vmem:[#allocation2 + $0xa0] sm:$0x3] }
  0x3e   : > { %7897 = vst [vmem:[#allocation6_spill] sm:$0xff] %v5175_v15  ;;  %638 = vst.msk [vmem:[#allocation3 + $0xb0] sm:$0xff] %vm435_vm0, %v5175_v15  ;;  %791 = vrot.lane.b32.xlu1 %v5185_v19, %s4838_s28  ;;  %v730_v0 = vrot.slane %v5218_v34, 1  ;;  %v5253_v11 = vld [vmem:[#allocation2 + $0xb8] sm:$0x3] }
  0x3f   : > { %546 = vst.msk [vmem:[#allocation2 + $0x121] sm:$0xff] %vm435_vm0, %v513_v16  ;;  %547 = vst.msk [vmem:[#allocation2 + $0x129] sm:$0xff] %vm435_vm0, %v514_v17  ;;  %797 = vrot.lane.b32.xlu0 %v5204_v27, %s4838_s28  ;;  %v5238_v58 = vsel %vm696_vm2, %v723_v14, %v725_v33  ;;  %v5264_v16 = vsel %vm696_vm2, %v732_v41, %v733_v43  ;;  %v737_v17 = vrot.slane %v5134_v2, 1  ;;  %v5299_v41 = vld [vmem:[#allocation2 + $0xe8] sm:$0x3] }
  0x40   : > { %548 = vst.msk [vmem:[#allocation2 + $0x139] sm:$0xff] %vm435_vm0, %v515_v18  ;;  %549 = vst.msk [vmem:[#allocation2 + $0x141] sm:$0xff] %vm435_vm0, %v516_v21  ;;  %v738_v18 = vrot.slane %v5138_v3, 1  ;;  %v5279_v21 = vsel %vm696_vm2, %v728_v31, %v730_v0 }
  0x41   : > { %550 = vst.msk [vmem:[#allocation2 + $0x151] sm:$0xff] %vm435_vm0, %v517_v22  ;;  %551 = vst.msk [vmem:[#allocation2 + $0x159] sm:$0xff] %vm435_vm0, %v518_v23  ;;  %v735_v22 = vrot.slane %v5253_v11, 1  ;;  %v5284_v23 = vld [vmem:[#allocation2 + $0xd0] sm:$0x3] }
  0x42   : > { %552 = vst.msk [vmem:[#allocation2 + $0x169] sm:$0xff] %vm435_vm0, %v519_v25  ;;  %553 = vst.msk [vmem:[#allocation2 + $0x171] sm:$0xff] %vm435_vm0, %v520_v26  ;;  %795 = vrot.lane.b32.xlu1 %v5213_v32, %s4838_s28  ;;  %v5287_v25 = vsel %vm696_vm2, %v737_v17, %v738_v18  ;;  %v742_v26 = vrot.slane %v5142_v4, 1  ;;  %v740_v33 = vrot.slane %v5284_v23, 1  ;;  %v747_v17 = vrot.slane %v5154_v8, 1 }
  0x43   : > { %801 = vrot.lane.b32.xlu0 %v5223_v39, %s4838_s28  ;;  %7906 = vst [vmem:[#allocation15_spill] sm:$0xff] %v5264_v16  ;;  %7908 = vst [vmem:[#allocation17_spill] sm:$0xff] %v5287_v25  ;;  %v5294_v31 = vsel %vm696_vm2, %v733_v43, %v735_v22  ;;  %v745_v22 = vrot.slane %v5299_v41, 1  ;;  %v752_v8 = vrot.slane %v5175_v15, 1 }
  0x44   : > { %v5220_v38 = vld [vmem:[#allocation2 + $0x110] sm:$0xff]  ;;  %v5302_v0 = vsel %vm696_vm2, %v742_v26, %v743_v28  ;;  %v5309_v43 = vsel %vm696_vm2, %v738_v18, %v740_v33 }
  0x45   : > { %7898 = vst [vmem:[#allocation7_spill] sm:$0xff] %v5220_v38  ;;  %639 = vst.msk [vmem:[#allocation3 + $0xb8] sm:$0xff] %vm435_vm0, %v5220_v38  ;;  %v5324_v18 = vsel %vm696_vm2, %v743_v28, %v745_v22 }
  0x46   : > { %v5231_v44 = vld [vmem:[#allocation2 + $0x120] sm:$0xff]  ;;  %v5233_v49 = vld [vmem:[#allocation2 + $0x128] sm:$0xff]  ;;  %799 = vrot.lane.b32.xlu1 %v5238_v58, %s4838_s28  ;;  %7909 = vst [vmem:[#allocation18_spill] sm:$0xff] %v5302_v0 }
  0x47   : > { %7899 = vst [vmem:[#allocation8_spill] sm:$0xff] %v5231_v44  ;;  %7900 = vst [vmem:[#allocation9_spill] sm:$0xff] %v5233_v49  ;;  %v5235_v50 = vld [vmem:[#allocation2 + $0x138] sm:$0xff]  ;;  %v5245_v1 = vld [vmem:[#allocation2 + $0x140] sm:$0xff]  ;;  %805 = vrot.lane.b32.xlu0 %v5264_v16, %s4838_s28  ;;  %v748_v16 = vrot.slane %v5162_v10, 1  ;;  %v753_v10 = vrot.slane %v5220_v38, 1 }
  0x48   : > { %7901 = vst [vmem:[#allocation10_spill] sm:$0xff] %v5235_v50  ;;  %640 = vst.msk [vmem:[#allocation3 + $0xc0] sm:$0xff] %vm435_vm0, %v5231_v44  ;;  %v5249_v6 = vld [vmem:[#allocation2 + $0x150] sm:$0xff]  ;;  %v5257_v13 = vld [vmem:[#allocation2 + $0x158] sm:$0xff]  ;;  %v757_v15 = vrot.slane %v5231_v44, 1  ;;  %v758_v38 = vrot.slane %v5233_v49, 1 }
  0x49   : > { %641 = vst.msk [vmem:[#allocation3 + $0xc8] sm:$0xff] %vm435_vm0, %v5233_v49  ;;  %7902 = vst [vmem:[#allocation11_spill] sm:$0xff] %v5245_v1  ;;  %v5261_v14 = vld [vmem:[#allocation2 + $0x168] sm:$0xff]  ;;  %v5270_v20 = vld [vmem:[#allocation2 + $0x170] sm:$0xff]  ;;  %v5317_v26 = vsel %vm696_vm2, %v747_v17, %v748_v16  ;;  %v5332_v17 = vsel %vm696_vm2, %v752_v8, %v753_v10  ;;  %v762_v8 = vrot.slane %v5235_v50, 1  ;;  %v763_v44 = vrot.slane %v5245_v1, 1 }
  0x4a   : > { %642 = vst.msk [vmem:[#allocation3 + $0xd0] sm:$0xff] %vm435_vm0, %v5235_v50  ;;  %7903 = vst [vmem:[#allocation12_spill] sm:$0xff] %v5249_v6  ;;  %803 = vrot.lane.b32.xlu1 %v5279_v21, %s4838_s28  ;;  %v768_v50 = vrot.slane %v5257_v13, 1 }
  0x4b   : > { %643 = vst.msk [vmem:[#allocation3 + $0xd8] sm:$0xff] %vm435_vm0, %v5245_v1  ;;  %7904 = vst [vmem:[#allocation13_spill] sm:$0xff] %v5257_v13  ;;  %809 = vrot.lane.b32.xlu0 %v5287_v25, %s4838_s28  ;;  %v5314_v25 = vld [vmem:[#allocation2 + $0x100] sm:$0x3] }
  0x4c   : > { %644 = vst.msk [vmem:[#allocation3 + $0xe0] sm:$0xff] %vm435_vm0, %v5249_v6  ;;  %7905 = vst [vmem:[#allocation14_spill] sm:$0xff] %v5261_v14  ;;  %v750_v33 = vrot.slane %v5314_v25, 1 }
  0x4d   : > { %645 = vst.msk [vmem:[#allocation3 + $0xe8] sm:$0xff] %vm435_vm0, %v5257_v13  ;;  %7907 = vst [vmem:[#allocation16_spill] sm:$0xff] %v5270_v20 }
  0x4e   : > { %646 = vst.msk [vmem:[#allocation3 + $0xf0] sm:$0xff] %vm435_vm0, %v5261_v14  ;;  %647 = vst.msk [vmem:[#allocation3 + $0xf8] sm:$0xff] %vm435_vm0, %v5270_v20  ;;  %807 = vrot.lane.b32.xlu1 %v5294_v31, %s4838_s28  ;;  %v5339_v28 = vsel %vm696_vm2, %v748_v16, %v750_v33  ;;  %v603_v33 = vld [vmem:[#allocation2 + $0x148] sm:$0x3] }
  0x4f   : > { %813 = vrot.lane.b32.xlu0 %v5302_v0, %s4838_s28  ;;  %7910 = vst [vmem:[#allocation19_spill] sm:$0xff] %v5314_v25  ;;  %7911 = vst [vmem:[#allocation20_spill] sm:$0xff] %v5317_v26  ;;  %v5329_v0 = vld [vmem:[#allocation2 + $0x118] sm:$0x3]  ;;  %v600_v25 = vld [vmem:[#allocation2 + $0x130] sm:$0x3] }
  0x50   : > { %7912 = vst [vmem:[#allocation21_spill] sm:$0xff] %v5329_v0  ;;  %v755_v22 = vrot.slane %v5329_v0, 1  ;;  %v760_v16 = vrot.slane %v600_v25, 1  ;;  %v5357_v0 = vsel %vm696_vm2, %v762_v8, %v763_v44  ;;  %v606_v25 = vld [vmem:[#allocation2 + $0x160] sm:$0x3]  ;;  %v772_v8 = vrot.slane %v5261_v14, 1 }
  0x51   : > { %7913 = vst [vmem:[#allocation22_spill] sm:$0xff] %v5357_v0 }
  0x52   : > { %811 = vrot.lane.b32.xlu1 %v5309_v43, %s4838_s28  ;;  %v5352_v49 = vsel %vm696_vm2, %v753_v10, %v755_v22  ;;  %v5364_v1 = vsel %vm696_vm2, %v758_v38, %v760_v16  ;;  %v765_v10 = vrot.slane %v603_v33, 1  ;;  %v609_v16 = vld [vmem:[#allocation2 + $0x178] sm:$0x3] }
  0x53   : > { %817 = vrot.lane.b32.xlu0 %v5317_v26, %s4838_s28  ;;  %v5345_v26 = vsel %vm696_vm2, %v757_v15, %v758_v38  ;;  %v767_v15 = vrot.slane %v5249_v6, 1  ;;  %v773_v6 = vrot.slane %v5270_v20, 1  ;;  %v770_v38 = vrot.slane %v606_v25, 1 }
  0x54   : > { %v5376_v13 = vsel %vm696_vm2, %v763_v44, %v765_v10  ;;  %v775_v20 = vrot.slane %v609_v16, 1  ;;  %v912_v44 = vrot.slane %v5042_v35, 2  ;;  %v913_v10 = vrot.slane %v5044_v36, 2 }
  0x55   : > { %v5369_v22 = vsel %vm696_vm2, %v767_v15, %v768_v50  ;;  %7915 = vst [vmem:[#allocation24_spill] sm:$0xff] %v5376_v13  ;;  %v5381_v33 = vsel %vm696_vm2, %v772_v8, %v773_v6  ;;  %v5386_v15 = vsel %vm696_vm2, %v768_v50, %v770_v38  ;;  %v917_v8 = vrot.slane %v5046_v37, 2 }
  0x56   : > { %815 = vrot.lane.b32.xlu1 %v5324_v18, %s4838_s28  ;;  %7914 = vst [vmem:[#allocation23_spill] sm:$0xff] %v5369_v22  ;;  %7916 = vst [vmem:[#allocation25_spill] sm:$0xff] %v5381_v33  ;;  %v5395_v25 = vsel %vm696_vm2, %v773_v6, %v775_v20  ;;  %v5400_v50 = vsel %vm906_vm3, %v912_v44, %v913_v10  ;;  %v918_v38 = vrot.slane %v5057_v40, 2  ;;  %v915_v16 = vrot.slane %v5062_v42, 2 }
  0x57   : > { %821 = vrot.lane.b32.xlu0 %v5332_v17, %s4838_s28  ;;  %7917 = vst [vmem:[#allocation26_spill] sm:$0xff] %v5386_v15  ;;  %7918 = vst [vmem:[#allocation27_spill] sm:$0xff] %v5395_v25  ;;  %v923_v20 = vrot.slane %v5071_v46, 2 }
  0x58   : > { %v5410_v6 = vsel %vm906_vm3, %v917_v8, %v918_v38  ;;  %v5417_v44 = vsel %vm906_vm3, %v913_v10, %v915_v16  ;;  %v927_v8 = vrot.slane %v5084_v51, 2  ;;  %v925_v10 = vrot.slane %v5119_v61, 2 }
  0x59   : > { %v932_v16 = vrot.slane %v5088_v53, 2 }
  0x5a   : > { %819 = vrot.lane.b32.xlu1 %v5339_v28, %s4838_s28  ;;  %v5443_v14 = vsel %vm906_vm3, %v923_v20, %v925_v10  ;;  %v942_v10 = vrot.slane %v5115_v60, 2 }
  0x5b   : > { %825 = vrot.lane.b32.xlu0 %v5345_v26, %s4838_s28 }
  0x5e   : > { %823 = vrot.lane.b32.xlu1 %v5352_v49, %s4838_s28 }
  0x5f   : > { %829 = vrot.lane.b32.xlu0 %v5357_v0, %s4838_s28 }
  0x62   : > { %827 = vrot.lane.b32.xlu1 %v5364_v1, %s4838_s28 }
  0x63   : > { %833 = vrot.lane.b32.xlu0 %v5369_v22, %s4838_s28 }
  0x66   : > { %831 = vrot.lane.b32.xlu1 %v5376_v13, %s4838_s28 }
  0x67   : > { %837 = vrot.lane.b32.xlu0 %v5381_v33, %s4838_s28  ;;  %v928_v33 = vrot.slane %v5086_v52, 2 }
  0x6a   : > { %835 = vrot.lane.b32.xlu1 %v5386_v15, %s4838_s28 }
  0x6b   : > { %987 = vrot.lane.b32.xlu0 %v5030_v29, %s4839_s29  ;;  %v922_v29 = vrot.slane %v5069_v45, 2 }
  0x6d   : > { %v5423_v42 = vsel %vm906_vm3, %v922_v29, %v923_v20  ;;  %v933_v29 = vrot.slane %v5099_v55, 2  ;;  %v935_v20 = vrot.slane %v5196_v24, 2 }
  0x6e   : > { %839 = vrot.lane.b32.xlu1 %v5395_v25, %s4838_s28  ;;  %v920_v25 = vrot.slane %v5073_v47, 2  ;;  %v5436_v47 = vsel %vm906_vm3, %v927_v8, %v928_v33  ;;  %v938_v8 = vrot.slane %v5111_v59, 2 }
  0x6f   : > { %991 = vrot.lane.b32.xlu0 %v5400_v50, %s4839_s29  ;;  %v5449_v61 = vsel %vm906_vm3, %v932_v16, %v933_v29  ;;  %v943_v16 = vrot.slane %v5123_v62, 2  ;;  %v5469_v22 = vsel %vm906_vm3, %v933_v29, %v935_v20  ;;  %v945_v29 = vrot.slane %v5253_v11, 2 }
  0x70   : > { %v952_v20 = vrot.slane %v5142_v4, 2 }
  0x71   : > { %v5475_v24 = vsel %vm906_vm3, %v942_v10, %v943_v16  ;;  %v953_v10 = vrot.slane %v5150_v7, 2  ;;  %v5495_v0 = vsel %vm906_vm3, %v943_v16, %v945_v29 }
  0x72   : > { %989 = vrot.lane.b32.xlu1 %v5033_v30, %s4839_s29  ;;  %v5430_v30 = vsel %vm906_vm3, %v918_v38, %v920_v25  ;;  %v930_v25 = vrot.slane %v5158_v9, 2  ;;  %v937_v38 = vrot.slane %v5103_v56, 2 }
  0x73   : > { %995 = vrot.lane.b32.xlu0 %v5410_v6, %s4839_s29  ;;  %v5501_v11 = vsel %vm906_vm3, %v952_v20, %v953_v10  ;;  %v560_v20 = vld [vmem:[%s7837_s2 + $0x20] sm:$0xf] }
  0x74   : > { %v5456_v15 = vsel %vm906_vm3, %v928_v33, %v930_v25  ;;  %v5462_v9 = vsel %vm906_vm3, %v937_v38, %v938_v8  ;;  %v940_v33 = vrot.slane %v5218_v34, 2  ;;  %v947_v25 = vrot.slane %v5134_v2, 2 }
  0x75   : > { %v948_v38 = vrot.slane %v5138_v3, 2 }
  0x76   : > { %993 = vrot.lane.b32.xlu1 %v5417_v44, %s4839_s29  ;;  %v5482_v13 = vsel %vm906_vm3, %v938_v8, %v940_v33  ;;  %v950_v8 = vrot.slane %v5284_v23, 2 }
  0x77   : > { %999 = vrot.lane.b32.xlu0 %v5423_v42, %s4839_s29  ;;  %v5488_v34 = vsel %vm906_vm3, %v947_v25, %v948_v38  ;;  %v955_v25 = vrot.slane %v5299_v41, 2 }
  0x78   : > { %v5506_v33 = vsel %vm906_vm3, %v948_v38, %v950_v8 }
  0x79   : > { %v5514_v23 = vsel %vm906_vm3, %v953_v10, %v955_v25  ;;  %v1966_v10 = vpack.c.bf16 %v560_v20, %v560_v20  ;;  %v558_v25 = vld [vmem:[%s7837_s2 + $0x10] sm:$0xff] }
  0x7a   : > { %997 = vrot.lane.b32.xlu1 %v5430_v30, %s4839_s29 }
  0x7b   : > { %1003 = vrot.lane.b32.xlu0 %v5436_v47, %s4839_s29  ;;  %4762 = vmatprep.subr.msk.bf16.mxu0 %vm2022_vm5, %v1966_v10 }
  0x7e   : > { %1001 = vrot.lane.b32.xlu1 %v5443_v14, %s4839_s29 }
  0x7f   : > { %1007 = vrot.lane.b32.xlu0 %v5449_v61, %s4839_s29 }
  0x82   : > { %1005 = vrot.lane.b32.xlu1 %v5456_v15, %s4839_s29 }
  0x83   : > { %1011 = vrot.lane.b32.xlu0 %v5462_v9, %s4839_s29 }
  0x86   : > { %1009 = vrot.lane.b32.xlu1 %v5469_v22, %s4839_s29 }
  0x87   : > { %1015 = vrot.lane.b32.xlu0 %v5475_v24, %s4839_s29 }
  0x89   : > { %v778_v41 = vpop.permute.xlu0 %777 }
  0x8a   : > { %1013 = vrot.lane.b32.xlu1 %v5482_v13, %s4839_s29  ;;  %874 = vst.msk [vmem:[#allocation3] sm:$0xff] %vm873_vm4, %v778_v41  ;;  %v559_v41 = vld [vmem:[%s7837_s2 + $0x18] sm:$0xff] }
  0x8b   : > { %1019 = vrot.lane.b32.xlu0 %v5488_v34, %s4839_s29 }
  0x8e   : > { %1017 = vrot.lane.b32.xlu1 %v5495_v0, %s4839_s29 }
  0x8f   : > { %1023 = vrot.lane.b32.xlu0 %v5501_v11, %s4839_s29 }
  0x92   : > { %1021 = vrot.lane.b32.xlu1 %v5506_v33, %s4839_s29 }
  0x93   : > { %1118 = vrot.lane.b32.xlu0 %v5042_v35, %s4840_s30 }
  0x96   : > { %1025 = vrot.lane.b32.xlu1 %v5514_v23, %s4839_s29 }
  0x97   : > { %1122 = vrot.lane.b32.xlu0 %v5046_v37, %s4840_s30 }
  0x9a   : > { %1120 = vrot.lane.b32.xlu1 %v5044_v36, %s4840_s30 }
  0x9b   : > { %1253 = vrot.lane.b32.xlu0 %v5076_v48, %s4841_s13  ;;  %v780_v35 = vpop.permute.xlu0 %779 }
  0x9c   : > { %875 = vst.msk [vmem:[#allocation3 + $0x8] sm:$0xff] %vm873_vm4, %v780_v35  ;;  %v1965_v35 = vpack.c.bf16 %v559_v41, %v558_v25 }
  0x9e   : > { %1124 = vrot.lane.b32.xlu1 %v5057_v40, %s4840_s30 }
  0x9f   : > { %1257 = vrot.lane.b32.xlu0 %v5093_v54, %s4841_s13 }
  0xa2   : > { %1255 = vrot.lane.b32.xlu1 %v5106_v57, %s4841_s13 }
  0xa3   : > { %1387 = vrot.lane.b32.xlu0 %v5400_v50, %s4842_s14 }
  0xa4   : > { %v782_v36 = vpop.permute.xlu1 %781 }
  0xa5   : > { %876 = vst.msk [vmem:[#allocation3 + $0x10] sm:$0xff] %vm873_vm4, %v782_v36  ;;  %v786_v48 = vpop.permute.xlu0 %785 }
  0xa6   : > { %1259 = vrot.lane.b32.xlu1 %v5145_v5, %s4841_s13  ;;  %878 = vst.msk [vmem:[#allocation3 + $0x20] sm:$0xff] %vm873_vm4, %v786_v48 }
  0xa7   : > { %1391 = vrot.lane.b32.xlu0 %v5410_v6, %s4842_s14 }
  0xa8   : > { %v784_v16 = vpop.permute.xlu1 %783 }
  0xa9   : > { %877 = vst.msk [vmem:[#allocation3 + $0x18] sm:$0xff] %vm873_vm4, %v784_v16  ;;  %v790_v57 = vpop.permute.xlu0 %789  ;;  %v556_v16 = vld [vmem:[%s7837_s2] sm:$0xff] }
  0xaa   : > { %1389 = vrot.lane.b32.xlu1 %v5417_v44, %s4842_s14  ;;  %880 = vst.msk [vmem:[#allocation3 + $0x30] sm:$0xff] %vm873_vm4, %v790_v57  ;;  %v557_v57 = vld [vmem:[%s7837_s2 + $0x8] sm:$0xff] }
  0xab   : > { %1518 = vrot.lane.b32.xlu0 %v5046_v37, %s4843_s15 }
  0xac   : > { %v788_v50 = vpop.permute.xlu1 %787 }
  0xad   : > { %879 = vst.msk [vmem:[#allocation3 + $0x28] sm:$0xff] %vm873_vm4, %v788_v50  ;;  %v794_v38 = vpop.permute.xlu0 %793 }
  0xae   : > { %1393 = vrot.lane.b32.xlu1 %v5430_v30, %s4842_s14  ;;  %882 = vst.msk [vmem:[#allocation3 + $0x40] sm:$0xff] %vm873_vm4, %v794_v38 }
  0xaf   : > { %1522 = vrot.lane.b32.xlu0 %v5069_v45, %s4843_s15 }
  0xb0   : > { %v792_v29 = vpop.permute.xlu1 %791 }
  0xb1   : > { %881 = vst.msk [vmem:[#allocation3 + $0x38] sm:$0xff] %vm873_vm4, %v792_v29  ;;  %v798_v44 = vpop.permute.xlu0 %797 }
  0xb2   : > { %1520 = vrot.lane.b32.xlu1 %v5057_v40, %s4843_s15  ;;  %884 = vst.msk [vmem:[#allocation3 + $0x50] sm:$0xff] %vm873_vm4, %v798_v44  ;;  %v2024_v40 = vsel %vm2022_vm5, %v1966_v10, 0 }
  0xb3   : > { %1653 = vrot.lane.b32.xlu0 %v5093_v54, %s4844_s16  ;;  %4671 = vmatpush3.bf16.msra.mxu0 %v2024_v40 }
  0xb4   : > { %v796_v37 = vpop.permute.xlu1 %795  ;;  %4672 = vmatprep.subr.bf16.mxu0 %v1965_v35 }
  0xb5   : > { %883 = vst.msk [vmem:[#allocation3 + $0x48] sm:$0xff] %vm873_vm4, %v796_v37  ;;  %v802_v8 = vpop.permute.xlu0 %801 }
  0xb6   : > { %1524 = vrot.lane.b32.xlu1 %v5071_v46, %s4843_s15  ;;  %886 = vst.msk [vmem:[#allocation3 + $0x60] sm:$0xff] %vm873_vm4, %v802_v8 }
  0xb7   : > { %1657 = vrot.lane.b32.xlu0 %v5128_v63, %s4844_s16  ;;  %4673 = vmatpush3.bf16.msra.mxu0 %v1965_v35 }
  0xb8   : > { %v800_v54 = vpop.permute.xlu1 %799 }
  0xb9   : > { %885 = vst.msk [vmem:[#allocation3 + $0x58] sm:$0xff] %vm873_vm4, %v800_v54  ;;  %v806_v36 = vpop.permute.xlu0 %805 }
  0xba   : > { %1655 = vrot.lane.b32.xlu1 %v5145_v5, %s4844_s16  ;;  %888 = vst.msk [vmem:[#allocation3 + $0x70] sm:$0xff] %vm873_vm4, %v806_v36  ;;  %v1964_v5 = vpack.c.bf16 %v557_v57, %v556_v16 }
  0xbb   : > { %1787 = vrot.lane.b32.xlu0 %v5410_v6, %s4845_s25 }
  0xbc   : > { %v804_v48 = vpop.permute.xlu1 %803  ;;  %4674 = vmatprep.subr.bf16.mxu0 %v1964_v5 }
  0xbd   : > { %887 = vst.msk [vmem:[#allocation3 + $0x68] sm:$0xff] %vm873_vm4, %v804_v48  ;;  %v810_v50 = vpop.permute.xlu0 %809  ;;  %4675 = vmatpush3.bf16.msra.mxu0 %v1964_v5 }
  0xbe   : > { %1659 = vrot.lane.b32.xlu1 %v5185_v19, %s4844_s16  ;;  %890 = vst.msk [vmem:[#allocation3 + $0x80] sm:$0xff] %vm873_vm4, %v810_v50 }
  0xbf   : > { %1791 = vrot.lane.b32.xlu0 %v5423_v42, %s4845_s25 }
  0xc0   : > { %v808_v6 = vpop.permute.xlu1 %807 }
  0xc1   : > { %889 = vst.msk [vmem:[#allocation3 + $0x78] sm:$0xff] %vm873_vm4, %v808_v6  ;;  %v814_v38 = vpop.permute.xlu0 %813 }
  0xc2   : > { %1789 = vrot.lane.b32.xlu1 %v5430_v30, %s4845_s25  ;;  %892 = vst.msk [vmem:[#allocation3 + $0x90] sm:$0xff] %vm873_vm4, %v814_v38 }
  0xc3   : > { %1126 = vrot.lane.b32.xlu0 %v5069_v45, %s4840_s30 }
  0xc4   : > { %v812_v29 = vpop.permute.xlu1 %811 }
  0xc5   : > { %891 = vst.msk [vmem:[#allocation3 + $0x88] sm:$0xff] %vm873_vm4, %v812_v29  ;;  %v818_v44 = vpop.permute.xlu0 %817 }
  0xc6   : > { %1793 = vrot.lane.b32.xlu1 %v5443_v14, %s4845_s25  ;;  %894 = vst.msk [vmem:[#allocation3 + $0xa0] sm:$0xff] %vm873_vm4, %v818_v44 }
  0xc7   : > { %1130 = vrot.lane.b32.xlu0 %v5084_v51, %s4840_s30 }
  0xc8   : > { %v816_v37 = vpop.permute.xlu1 %815 }
  0xc9   : > { %893 = vst.msk [vmem:[#allocation3 + $0x98] sm:$0xff] %vm873_vm4, %v816_v37  ;;  %v822_v30 = vpop.permute.xlu0 %821 }
  0xca   : > { %1128 = vrot.lane.b32.xlu1 %v5071_v46, %s4840_s30  ;;  %896 = vst.msk [vmem:[#allocation3 + $0xb0] sm:$0xff] %vm873_vm4, %v822_v30  ;;  %v7919_v30 = vld [vmem:[#allocation15_spill] sm:$0xff] }
  0xcb   : > { %1261 = vrot.lane.b32.xlu0 %v5128_v63, %s4841_s13 }
  0xcc   : > { %v820_v45 = vpop.permute.xlu1 %819 }
  0xcd   : > { %895 = vst.msk [vmem:[#allocation3 + $0xa8] sm:$0xff] %vm873_vm4, %v820_v45  ;;  %v826_v20 = vpop.permute.xlu0 %825 }
  0xce   : > { %1132 = vrot.lane.b32.xlu1 %v5086_v52, %s4840_s30  ;;  %898 = vst.msk [vmem:[#allocation3 + $0xc0] sm:$0xff] %vm873_vm4, %v826_v20 }
  0xcf   : > { %1265 = vrot.lane.b32.xlu0 %v5168_v12, %s4841_s13 }
  0xd0   : > { %v824_v10 = vpop.permute.xlu1 %823 }
  0xd1   : > { %897 = vst.msk [vmem:[#allocation3 + $0xb8] sm:$0xff] %vm873_vm4, %v824_v10  ;;  %v830_v46 = vpop.permute.xlu0 %829 }
  0xd2   : > { %1263 = vrot.lane.b32.xlu1 %v5185_v19, %s4841_s13  ;;  %900 = vst.msk [vmem:[#allocation3 + $0xd0] sm:$0xff] %vm873_vm4, %v830_v46 }
  0xd3   : > { %1395 = vrot.lane.b32.xlu0 %v5423_v42, %s4842_s14 }
  0xd4   : > { %v828_v63 = vpop.permute.xlu1 %827 }
  0xd5   : > { %899 = vst.msk [vmem:[#allocation3 + $0xc8] sm:$0xff] %vm873_vm4, %v828_v63  ;;  %v834_v8 = vpop.permute.xlu0 %833 }
  0xd6   : > { %1267 = vrot.lane.b32.xlu1 %v5213_v32, %s4841_s13  ;;  %902 = vst.msk [vmem:[#allocation3 + $0xe0] sm:$0xff] %vm873_vm4, %v834_v8 }
  0xd7   : > { %1399 = vrot.lane.b32.xlu0 %v5436_v47, %s4842_s14 }
  0xd8   : > { %v832_v40 = vpop.permute.xlu1 %831 }
  0xd9   : > { %901 = vst.msk [vmem:[#allocation3 + $0xd8] sm:$0xff] %vm873_vm4, %v832_v40  ;;  %v838_v19 = vpop.permute.xlu0 %837  ;;  %v7920_v40 = vld [vmem:[#allocation17_spill] sm:$0xff] }
  0xda   : > { %1397 = vrot.lane.b32.xlu1 %v5443_v14, %s4842_s14  ;;  %904 = vst.msk [vmem:[#allocation3 + $0xf0] sm:$0xff] %vm873_vm4, %v838_v19 }
  0xdb   : > { %1526 = vrot.lane.b32.xlu0 %v5084_v51, %s4843_s15 }
  0xdc   : > { %v836_v42 = vpop.permute.xlu1 %835 }
  0xdd   : > { %903 = vst.msk [vmem:[#allocation3 + $0xe8] sm:$0xff] %vm873_vm4, %v836_v42  ;;  %v988_v54 = vpop.permute.xlu0 %987 }
  0xde   : > { %1401 = vrot.lane.b32.xlu1 %v5456_v15, %s4842_s14  ;;  %1084 = vst.msk [vmem:[#allocation3] sm:$0xff] %vm1083_vm6, %v988_v54 }
  0xdf   : > { %1530 = vrot.lane.b32.xlu0 %v5088_v53, %s4843_s15 }
  0xe0   : > { %v840_v25 = vpop.permute.xlu1 %839 }
  0xe1   : > { %905 = vst.msk [vmem:[#allocation3 + $0xf8] sm:$0xff] %vm873_vm4, %v840_v25  ;;  %v992_v14 = vpop.permute.xlu0 %991 }
  0xe2   : > { %1528 = vrot.lane.b32.xlu1 %v5086_v52, %s4843_s15  ;;  %1086 = vst.msk [vmem:[#allocation3 + $0x10] sm:$0xff] %vm1083_vm6, %v992_v14 }
  0xe3   : > { %1661 = vrot.lane.b32.xlu0 %v5168_v12, %s4844_s16 }
  0xe4   : > { %v990_v51 = vpop.permute.xlu1 %989 }
  0xe5   : > { %1085 = vst.msk [vmem:[#allocation3 + $0x8] sm:$0xff] %vm1083_vm6, %v990_v51  ;;  %v996_v41 = vpop.permute.xlu0 %995 }
  0xe6   : > { %1532 = vrot.lane.b32.xlu1 %v5099_v55, %s4843_s15  ;;  %1088 = vst.msk [vmem:[#allocation3 + $0x20] sm:$0xff] %vm1083_vm6, %v996_v41 }
  0xe7   : > { %1665 = vrot.lane.b32.xlu0 %v5204_v27, %s4844_s16 }
  0xe8   : > { %v994_v35 = vpop.permute.xlu1 %993 }
  0xe9   : > { %1087 = vst.msk [vmem:[#allocation3 + $0x18] sm:$0xff] %vm1083_vm6, %v994_v35  ;;  %v1000_v52 = vpop.permute.xlu0 %999 }
  0xea   : > { %1663 = vrot.lane.b32.xlu1 %v5213_v32, %s4844_s16  ;;  %1090 = vst.msk [vmem:[#allocation3 + $0x30] sm:$0xff] %vm1083_vm6, %v1000_v52 }
  0xeb   : > { %1795 = vrot.lane.b32.xlu0 %v5436_v47, %s4845_s25 }
  0xec   : > { %v998_v12 = vpop.permute.xlu1 %997 }
  0xed   : > { %1089 = vst.msk [vmem:[#allocation3 + $0x28] sm:$0xff] %vm1083_vm6, %v998_v12  ;;  %v1004_v36 = vpop.permute.xlu0 %1003 }
  0xee   : > { %1667 = vrot.lane.b32.xlu1 %v5238_v58, %s4844_s16  ;;  %1092 = vst.msk [vmem:[#allocation3 + $0x40] sm:$0xff] %vm1083_vm6, %v1004_v36 }
  0xef   : > { %1799 = vrot.lane.b32.xlu0 %v5449_v61, %s4845_s25 }
  0xf0   : > { %v1002_v48 = vpop.permute.xlu1 %1001 }
  0xf1   : > { %1091 = vst.msk [vmem:[#allocation3 + $0x38] sm:$0xff] %vm1083_vm6, %v1002_v48  ;;  %v1008_v32 = vpop.permute.xlu0 %1007 }
  0xf2   : > { %1797 = vrot.lane.b32.xlu1 %v5456_v15, %s4845_s25  ;;  %1094 = vst.msk [vmem:[#allocation3 + $0x50] sm:$0xff] %vm1083_vm6, %v1008_v32 }
  0xf3   : > { %1134 = vrot.lane.b32.xlu0 %v5088_v53, %s4840_s30 }
  0xf4   : > { %v1006_v47 = vpop.permute.xlu1 %1005 }
  0xf5   : > { %1093 = vst.msk [vmem:[#allocation3 + $0x48] sm:$0xff] %vm1083_vm6, %v1006_v47  ;;  %v1012_v16 = vpop.permute.xlu0 %1011  ;;  %v7921_v47 = vld [vmem:[#allocation18_spill] sm:$0xff] }
  0xf6   : > { %1801 = vrot.lane.b32.xlu1 %v5469_v22, %s4845_s25  ;;  %1096 = vst.msk [vmem:[#allocation3 + $0x60] sm:$0xff] %vm1083_vm6, %v1012_v16 }
  0xf7   : > { %1138 = vrot.lane.b32.xlu0 %v5103_v56, %s4840_s30 }
  0xf8   : > { %v1010_v57 = vpop.permute.xlu1 %1009 }
  0xf9   : > { %1095 = vst.msk [vmem:[#allocation3 + $0x58] sm:$0xff] %vm1083_vm6, %v1010_v57  ;;  %v1016_v15 = vpop.permute.xlu0 %1015 }
  0xfa   : > { %1136 = vrot.lane.b32.xlu1 %v5099_v55, %s4840_s30  ;;  %1098 = vst.msk [vmem:[#allocation3 + $0x70] sm:$0xff] %vm1083_vm6, %v1016_v15 }
  0xfb   : > { %1269 = vrot.lane.b32.xlu0 %v5204_v27, %s4841_s13 }
  0xfc   : > { %v1014_v53 = vpop.permute.xlu1 %1013 }
  0xfd   : > { %1097 = vst.msk [vmem:[#allocation3 + $0x68] sm:$0xff] %vm1083_vm6, %v1014_v53  ;;  %v1020_v5 = vpop.permute.xlu0 %1019 }
  0xfe   : > { %1140 = vrot.lane.b32.xlu1 %v5111_v59, %s4840_s30  ;;  %1100 = vst.msk [vmem:[#allocation3 + $0x80] sm:$0xff] %vm1083_vm6, %v1020_v5 }
  0xff   : > { %1273 = vrot.lane.b32.xlu0 %v5223_v39, %s4841_s13 }
 0x100   : > { %v1018_v50 = vpop.permute.xlu1 %1017 }
 0x101   : > { %1099 = vst.msk [vmem:[#allocation3 + $0x78] sm:$0xff] %vm1083_vm6, %v1018_v50  ;;  %v1024_v55 = vpop.permute.xlu0 %1023  ;;  %v7922_v50 = vld [vmem:[#allocation4_spill] sm:$0xff] }
 0x102   : > { %1271 = vrot.lane.b32.xlu1 %v5238_v58, %s4841_s13  ;;  %1102 = vst.msk [vmem:[#allocation3 + $0x90] sm:$0xff] %vm1083_vm6, %v1024_v55 }
 0x103   : > { %1403 = vrot.lane.b32.xlu0 %v5449_v61, %s4842_s14 }
 0x104   : > { %v1022_v27 = vpop.permute.xlu1 %1021 }
 0x105   : > { %1101 = vst.msk [vmem:[#allocation3 + $0x88] sm:$0xff] %vm1083_vm6, %v1022_v27  ;;  %v1119_v6 = vpop.permute.xlu0 %1118 }
 0x106   : > { %1275 = vrot.lane.b32.xlu1 %v5279_v21, %s4841_s13  ;;  %1215 = vst.msk [vmem:[#allocation3] sm:$0xff] %vm1214_vm7, %v1119_v6  ;;  %v7923_v6 = vld [vmem:[#allocation5_spill] sm:$0xff] }
 0x107   : > { %1407 = vrot.lane.b32.xlu0 %v5462_v9, %s4842_s14 }
 0x108   : > { %v1026_v38 = vpop.permute.xlu1 %1025 }
 0x109   : > { %1103 = vst.msk [vmem:[#allocation3 + $0x98] sm:$0xff] %vm1083_vm6, %v1026_v38  ;;  %v1123_v58 = vpop.permute.xlu0 %1122  ;;  %v7924_v38 = vld [vmem:[#allocation20_spill] sm:$0xff] }
 0x10a   : > { %1405 = vrot.lane.b32.xlu1 %v5469_v22, %s4842_s14  ;;  %1217 = vst.msk [vmem:[#allocation3 + $0x10] sm:$0xff] %vm1214_vm7, %v1123_v58 }
 0x10b   : > { %1534 = vrot.lane.b32.xlu0 %v5103_v56, %s4843_s15 }
 0x10c   : > { %v1121_v61 = vpop.permute.xlu1 %1120 }
 0x10d   : > { %1216 = vst.msk [vmem:[#allocation3 + $0x8] sm:$0xff] %vm1214_vm7, %v1121_v61  ;;  %v1254_v29 = vpop.permute.xlu0 %1253  ;;  %v958_v61 = vrot.slane %v7923_v6, 2 }
 0x10e   : > { %1409 = vrot.lane.b32.xlu1 %v5482_v13, %s4842_s14  ;;  %1350 = vst.msk [vmem:[#allocation3] sm:$0xff] %vm1349_vm8, %v1254_v29 }
 0x10f   : > { %1538 = vrot.lane.b32.xlu0 %v5115_v60, %s4843_s15 }
 0x110   : > { %v1125_v44 = vpop.permute.xlu1 %1124 }
 0x111   : > { %1218 = vst.msk [vmem:[#allocation3 + $0x18] sm:$0xff] %vm1214_vm7, %v1125_v44  ;;  %v1258_v22 = vpop.permute.xlu0 %1257 }
 0x112   : > { %1536 = vrot.lane.b32.xlu1 %v5111_v59, %s4843_s15  ;;  %1352 = vst.msk [vmem:[#allocation3 + $0x10] sm:$0xff] %vm1349_vm8, %v1258_v22 }
 0x113   : > { %1669 = vrot.lane.b32.xlu0 %v5223_v39, %s4844_s16 }
 0x114   : > { %v1256_v56 = vpop.permute.xlu1 %1255 }
 0x115   : > { %1351 = vst.msk [vmem:[#allocation3 + $0x8] sm:$0xff] %vm1349_vm8, %v1256_v56  ;;  %v1388_v37 = vpop.permute.xlu0 %1387 }
 0x116   : > { %1540 = vrot.lane.b32.xlu1 %v5123_v62, %s4843_s15  ;;  %1484 = vst.msk [vmem:[#allocation3] sm:$0xff] %vm1483_vm9, %v1388_v37  ;;  %v7925_v37 = vld [vmem:[#allocation19_spill] sm:$0xff] }
 0x117   : > { %1673 = vrot.lane.b32.xlu0 %v7919_v30, %s4844_s16 }
 0x118   : > { %v1260_v45 = vpop.permute.xlu1 %1259 }
 0x119   : > { %1353 = vst.msk [vmem:[#allocation3 + $0x18] sm:$0xff] %vm1349_vm8, %v1260_v45  ;;  %v1392_v59 = vpop.permute.xlu0 %1391 }
 0x11a   : > { %1671 = vrot.lane.b32.xlu1 %v5279_v21, %s4844_s16  ;;  %1486 = vst.msk [vmem:[#allocation3 + $0x10] sm:$0xff] %vm1483_vm9, %v1392_v59 }
 0x11b   : > { %1803 = vrot.lane.b32.xlu0 %v5462_v9, %s4845_s25 }
 0x11c   : > { %v1390_v39 = vpop.permute.xlu1 %1389 }
 0x11d   : > { %1485 = vst.msk [vmem:[#allocation3 + $0x8] sm:$0xff] %vm1483_vm9, %v1390_v39  ;;  %v1519_v20 = vpop.permute.xlu0 %1518 }
 0x11e   : > { %1675 = vrot.lane.b32.xlu1 %v5294_v31, %s4844_s16  ;;  %1615 = vst.msk [vmem:[#allocation3] sm:$0xff] %vm1614_vm10, %v1519_v20 }
 0x11f   : > { %1807 = vrot.lane.b32.xlu0 %v5475_v24, %s4845_s25 }
 0x120   : > { %v1394_v10 = vpop.permute.xlu1 %1393 }
 0x121   : > { %1487 = vst.msk [vmem:[#allocation3 + $0x18] sm:$0xff] %vm1483_vm9, %v1394_v10  ;;  %v1523_v21 = vpop.permute.xlu0 %1522 }
 0x122   : > { %1805 = vrot.lane.b32.xlu1 %v5482_v13, %s4845_s25  ;;  %1617 = vst.msk [vmem:[#allocation3 + $0x10] sm:$0xff] %vm1614_vm10, %v1523_v21 }
 0x123   : > { %1142 = vrot.lane.b32.xlu0 %v5115_v60, %s4840_s30 }
 0x124   : > { %v1521_v9 = vpop.permute.xlu1 %1520 }
 0x125   : > { %1616 = vst.msk [vmem:[#allocation3 + $0x8] sm:$0xff] %vm1614_vm10, %v1521_v9  ;;  %v1654_v46 = vpop.permute.xlu0 %1653 }
 0x126   : > { %1809 = vrot.lane.b32.xlu1 %v5495_v0, %s4845_s25  ;;  %1750 = vst.msk [vmem:[#allocation3] sm:$0xff] %vm1749_vm11, %v1654_v46 }
 0x127   : > { %1146 = vrot.lane.b32.xlu0 %v5134_v2, %s4840_s30 }
 0x128   : > { %v1525_v63 = vpop.permute.xlu1 %1524 }
 0x129   : > { %1618 = vst.msk [vmem:[#allocation3 + $0x18] sm:$0xff] %vm1614_vm10, %v1525_v63  ;;  %v1658_v13 = vpop.permute.xlu0 %1657 }
 0x12a   : > { %1144 = vrot.lane.b32.xlu1 %v5123_v62, %s4840_s30  ;;  %1752 = vst.msk [vmem:[#allocation3 + $0x10] sm:$0xff] %vm1749_vm11, %v1658_v13 }
 0x12b   : > { %1277 = vrot.lane.b32.xlu0 %v7919_v30, %s4841_s13  ;;  %v960_v30 = vrot.slane %v7925_v37, 2 }
 0x12c   : > { %v1656_v60 = vpop.permute.xlu1 %1655 }
 0x12d   : > { %1751 = vst.msk [vmem:[#allocation3 + $0x8] sm:$0xff] %vm1749_vm11, %v1656_v60  ;;  %v1788_v8 = vpop.permute.xlu0 %1787  ;;  %v961_v59 = vsel %vm906_vm3, %v958_v61, %v960_v30 }
 0x12e   : > { %1148 = vrot.lane.b32.xlu1 %v5138_v3, %s4840_s30  ;;  %1884 = vst.msk [vmem:[#allocation3] sm:$0xff] %vm1883_vm12, %v1788_v8 }
 0x12f   : > { %1281 = vrot.lane.b32.xlu0 %v7920_v40, %s4841_s13 }
 0x130   : > { %v1660_v19 = vpop.permute.xlu1 %1659 }
 0x131   : > { %1753 = vst.msk [vmem:[#allocation3 + $0x18] sm:$0xff] %vm1749_vm11, %v1660_v19  ;;  %v1792_v62 = vpop.permute.xlu0 %1791  ;;  %v7927_v19 = vld [vmem:[#allocation7_spill] sm:$0xff] }
 0x132   : > { %1279 = vrot.lane.b32.xlu1 %v5294_v31, %s4841_s13  ;;  %1886 = vst.msk [vmem:[#allocation3 + $0x10] sm:$0xff] %vm1883_vm12, %v1792_v62  ;;  %v521_v62 = vld [vmem:[%s4990_s27 + $0xf0] sm:$0xff] }
 0x133   : > { %1411 = vrot.lane.b32.xlu0 %v5475_v24, %s4842_s14  ;;  %554 = vst.msk [vmem:[#allocation2 + $0x181] sm:$0xff] %vm435_vm0, %v521_v62 }
 0x134   : > { %v1790_v42 = vpop.permute.xlu1 %1789 }
 0x135   : > { %1885 = vst.msk [vmem:[#allocation3 + $0x8] sm:$0xff] %vm1883_vm12, %v1790_v42  ;;  %v1127_v54 = vpop.permute.xlu0 %1126  ;;  %v1916_v24 = vld [vmem:[#allocation3] sm:$0xff] }
 0x136   : > { %1283 = vrot.lane.b32.xlu1 %v5309_v43, %s4841_s13  ;;  %1219 = vst.msk [vmem:[#allocation3 + $0x20] sm:$0xff] %vm1214_vm7, %v1127_v54 }
 0x137   : > { %1415 = vrot.lane.b32.xlu0 %v5488_v34, %s4842_s14 }
 0x138   : > { %v1794_v25 = vpop.permute.xlu1 %1793 }
 0x139   : > { %1887 = vst.msk [vmem:[#allocation3 + $0x18] sm:$0xff] %vm1883_vm12, %v1794_v25  ;;  %v1131_v31 = vpop.permute.xlu0 %1130  ;;  %v1918_v52 = vld [vmem:[#allocation3 + $0x10] sm:$0xff]  ;;  %v963_v25 = vrot.slane %v7927_v19, 2 }
 0x13a   : > { %1413 = vrot.lane.b32.xlu1 %v5495_v0, %s4842_s14  ;;  %1221 = vst.msk [vmem:[#allocation3 + $0x30] sm:$0xff] %vm1214_vm7, %v1131_v31 }
 0x13b   : > { %1542 = vrot.lane.b32.xlu0 %v5134_v2, %s4843_s15 }
 0x13c   : > { %v1129_v14 = vpop.permute.xlu1 %1128  ;;  %v1917_v51 = vld [vmem:[#allocation3 + $0x8] sm:$0xff] }
 0x13d   : > { %1220 = vst.msk [vmem:[#allocation3 + $0x28] sm:$0xff] %vm1214_vm7, %v1129_v14  ;;  %v1948_v41 = vpack.c.bf16 %v1917_v51, %v1916_v24  ;;  %v1262_v35 = vpop.permute.xlu0 %1261  ;;  %v522_v14 = vld [vmem:[%s4990_s27 + $0xf8] sm:$0xff] }
 0x13e   : > { %1417 = vrot.lane.b32.xlu1 %v5506_v33, %s4842_s14  ;;  %1354 = vst.msk [vmem:[#allocation3 + $0x20] sm:$0xff] %vm1349_vm8, %v1262_v35 }
 0x13f   : > { %4676 = vmatprep.mubr.msk.bf16.mxu0 %vm1973_vm13, %v1948_v41  ;;  %1546 = vrot.lane.b32.xlu0 %v5142_v4, %s4843_s15  ;;  %555 = vst.msk [vmem:[#allocation2 + $0x189] sm:$0xff] %vm435_vm0, %v522_v14 }
 0x140   : > { %v1133_v0 = vpop.permute.xlu1 %1132  ;;  %v1919_v2 = vld [vmem:[#allocation3 + $0x18] sm:$0xff] }
 0x141   : > { %1222 = vst.msk [vmem:[#allocation3 + $0x38] sm:$0xff] %vm1214_vm7, %v1133_v0  ;;  %v1949_v12 = vpack.c.bf16 %v1919_v2, %v1918_v52  ;;  %v1266_v36 = vpop.permute.xlu0 %1265 }
 0x142   : > { %1544 = vrot.lane.b32.xlu1 %v5138_v3, %s4843_s15  ;;  %1356 = vst.msk [vmem:[#allocation3 + $0x30] sm:$0xff] %vm1349_vm8, %v1266_v36 }
 0x143   : > { %4677 = vmatmul.mubr.msk.bf16.vlgmr.msra.gmra.mxu0 %vm1973_vm13, %v1949_v12  ;;  %1677 = vrot.lane.b32.xlu0 %v7920_v40, %s4844_s16 }
 0x144   : > { %v1264_v48 = vpop.permute.xlu1 %1263 }
 0x145   : > { %1355 = vst.msk [vmem:[#allocation3 + $0x28] sm:$0xff] %vm1349_vm8, %v1264_v48  ;;  %v1396_v32 = vpop.permute.xlu0 %1395 }
 0x146   : > { %1548 = vrot.lane.b32.xlu1 %v5150_v7, %s4843_s15  ;;  %1488 = vst.msk [vmem:[#allocation3 + $0x20] sm:$0xff] %vm1483_vm9, %v1396_v32 }
 0x147   : > { %1681 = vrot.lane.b32.xlu0 %v7921_v47, %s4844_s16 }
 0x148   : > { %v1268_v3 = vpop.permute.xlu1 %1267 }
 0x149   : > { %1357 = vst.msk [vmem:[#allocation3 + $0x38] sm:$0xff] %vm1349_vm8, %v1268_v3  ;;  %v1400_v16 = vpop.permute.xlu0 %1399 }
 0x14a   : > { %1679 = vrot.lane.b32.xlu1 %v5309_v43, %s4844_s16  ;;  %1490 = vst.msk [vmem:[#allocation3 + $0x30] sm:$0xff] %vm1483_vm9, %v1400_v16  ;;  %v7929_v16 = vld [vmem:[#allocation8_spill] sm:$0xff] }
 0x14b   : > { %1811 = vrot.lane.b32.xlu0 %v5488_v34, %s4845_s25 }
 0x14c   : > { %v1398_v57 = vpop.permute.xlu1 %1397 }
 0x14d   : > { %1489 = vst.msk [vmem:[#allocation3 + $0x28] sm:$0xff] %vm1483_vm9, %v1398_v57  ;;  %v1527_v15 = vpop.permute.xlu0 %1526 }
 0x14e   : > { %1683 = vrot.lane.b32.xlu1 %v5324_v18, %s4844_s16  ;;  %1619 = vst.msk [vmem:[#allocation3 + $0x20] sm:$0xff] %vm1614_vm10, %v1527_v15 }
 0x14f   : > { %1815 = vrot.lane.b32.xlu0 %v5501_v11, %s4845_s25 }
 0x150   : > { %v1402_v53 = vpop.permute.xlu1 %1401 }
 0x151   : > { %1491 = vst.msk [vmem:[#allocation3 + $0x38] sm:$0xff] %vm1483_vm9, %v1402_v53  ;;  %v1531_v43 = vpop.permute.xlu0 %1530 }
 0x152   : > { %1813 = vrot.lane.b32.xlu1 %v5506_v33, %s4845_s25  ;;  %1621 = vst.msk [vmem:[#allocation3 + $0x30] sm:$0xff] %vm1614_vm10, %v1531_v43 }
 0x153   : > { %1150 = vrot.lane.b32.xlu0 %v5142_v4, %s4840_s30 }
 0x154   : > { %v1529_v34 = vpop.permute.xlu1 %1528 }
 0x155   : > { %1620 = vst.msk [vmem:[#allocation3 + $0x28] sm:$0xff] %vm1614_vm10, %v1529_v34  ;;  %v1662_v5 = vpop.permute.xlu0 %1661  ;;  %v7930_v34 = vld [vmem:[#allocation9_spill] sm:$0xff] }
 0x156   : > { %1817 = vrot.lane.b32.xlu1 %v5514_v23, %s4845_s25  ;;  %1754 = vst.msk [vmem:[#allocation3 + $0x20] sm:$0xff] %vm1749_vm11, %v1662_v5 }
 0x157   : > { %1154 = vrot.lane.b32.xlu0 %v7922_v50, %s4840_s30 }
 0x158   : > { %v1533_v55 = vpop.permute.xlu1 %1532 }
 0x159   : > { %1622 = vst.msk [vmem:[#allocation3 + $0x38] sm:$0xff] %vm1614_vm10, %v1533_v55  ;;  %v1666_v33 = vpop.permute.xlu0 %1665  ;;  %v968_v55 = vrot.slane %v7930_v34, 2 }
 0x15a   : > { %1152 = vrot.lane.b32.xlu1 %v5150_v7, %s4840_s30  ;;  %1756 = vst.msk [vmem:[#allocation3 + $0x30] sm:$0xff] %vm1749_vm11, %v1666_v33  ;;  %v957_v7 = vrot.slane %v7922_v50, 2 }
 0x15b   : > { %1285 = vrot.lane.b32.xlu0 %v7921_v47, %s4841_s13 }
 0x15c   : > { %v1664_v4 = vpop.permute.xlu1 %1663  ;;  %v5847_v22 = vsel %vm906_vm3, %v957_v7, %v958_v61 }
 0x15d   : > { %1755 = vst.msk [vmem:[#allocation3 + $0x28] sm:$0xff] %vm1749_vm11, %v1664_v4  ;;  %v1796_v27 = vpop.permute.xlu0 %1795 }
 0x15e   : > { %1156 = vrot.lane.b32.xlu1 %v7923_v6, %s4840_s30  ;;  %1888 = vst.msk [vmem:[#allocation3 + $0x20] sm:$0xff] %vm1883_vm12, %v1796_v27 }
 0x15f   : > { %1289 = vrot.lane.b32.xlu0 %v7924_v38, %s4841_s13 }
 0x160   : > { %v1668_v58 = vpop.permute.xlu1 %1667 }
 0x161   : > { %1757 = vst.msk [vmem:[#allocation3 + $0x38] sm:$0xff] %vm1749_vm11, %v1668_v58  ;;  %v1800_v29 = vpop.permute.xlu0 %1799 }
 0x162   : > { %1287 = vrot.lane.b32.xlu1 %v5324_v18, %s4841_s13  ;;  %1890 = vst.msk [vmem:[#allocation3 + $0x30] sm:$0xff] %vm1883_vm12, %v1800_v29 }
 0x163   : > { %1419 = vrot.lane.b32.xlu0 %v5501_v11, %s4842_s14 }
 0x164   : > { %v1798_v44 = vpop.permute.xlu1 %1797 }
 0x165   : > { %1889 = vst.msk [vmem:[#allocation3 + $0x28] sm:$0xff] %vm1883_vm12, %v1798_v44  ;;  %v1135_v56 = vpop.permute.xlu0 %1134  ;;  %v1920_v45 = vld [vmem:[#allocation3 + $0x20] sm:$0xff] }
 0x166   : > { %1291 = vrot.lane.b32.xlu1 %v5339_v28, %s4841_s13  ;;  %1223 = vst.msk [vmem:[#allocation3 + $0x40] sm:$0xff] %vm1214_vm7, %v1135_v56 }
 0x167   : > { %1423 = vrot.lane.b32.xlu0 %v5847_v22, %s4842_s14 }
 0x168   : > { %v1802_v18 = vpop.permute.xlu1 %1801 }
 0x169   : > { %1891 = vst.msk [vmem:[#allocation3 + $0x38] sm:$0xff] %vm1883_vm12, %v1802_v18  ;;  %v1139_v11 = vpop.permute.xlu0 %1138  ;;  %v1922_v9 = vld [vmem:[#allocation3 + $0x30] sm:$0xff] }
 0x16a   : > { %1421 = vrot.lane.b32.xlu1 %v5514_v23, %s4842_s14  ;;  %1225 = vst.msk [vmem:[#allocation3 + $0x50] sm:$0xff] %vm1214_vm7, %v1139_v11  ;;  %v7926_v23 = vld [vmem:[#allocation6_spill] sm:$0xff] }
 0x16b   : > { %1550 = vrot.lane.b32.xlu0 %v7922_v50, %s4843_s15  ;;  %v962_v54 = vrot.slane %v7926_v23, 2  ;;  %v967_v50 = vrot.slane %v7929_v16, 2  ;;  %v7931_v11 = vld [vmem:[#allocation10_spill] sm:$0xff] }
 0x16c   : > { %v1137_v39 = vpop.permute.xlu1 %1136  ;;  %v1921_v20 = vld [vmem:[#allocation3 + $0x28] sm:$0xff] }
 0x16d   : > { %1224 = vst.msk [vmem:[#allocation3 + $0x48] sm:$0xff] %vm1214_vm7, %v1137_v39  ;;  %v1950_v10 = vpack.c.bf16 %v1921_v20, %v1920_v45  ;;  %v1270_v21 = vpop.permute.xlu0 %1269  ;;  %v964_v51 = vsel %vm906_vm3, %v962_v54, %v963_v25  ;;  %v5961_v39 = vld [vmem:[#allocation2 + $0x8] sm:$0xff] }
 0x16e   : > { %1425 = vrot.lane.b32.xlu1 %v961_v59, %s4842_s14  ;;  %1358 = vst.msk [vmem:[#allocation3 + $0x40] sm:$0xff] %vm1349_vm8, %v1270_v21 }
 0x16f   : > { %4680 = vmatprep.mubr.msk.bf16.mxu0 %vm1973_vm13, %v1950_v10  ;;  %1554 = vrot.lane.b32.xlu0 %v7926_v23, %s4843_s15  ;;  %v2392_v10 = vrot.slane %v5961_v39, 1  ;;  %2312 = vst.msk [vmem:[#allocation3 + $0x8] sm:$0xff] %vm435_vm0, %v5961_v39 }
 0x170   : > { %v1141_v46 = vpop.permute.xlu1 %1140  ;;  %v1923_v63 = vld [vmem:[#allocation3 + $0x38] sm:$0xff] }
 0x171   : > { %1226 = vst.msk [vmem:[#allocation3 + $0x58] sm:$0xff] %vm1214_vm7, %v1141_v46  ;;  %v1951_v13 = vpack.c.bf16 %v1923_v63, %v1922_v9  ;;  %v1274_v60 = vpop.permute.xlu0 %1273  ;;  %v7932_v63 = vld [vmem:[#allocation11_spill] sm:$0xff] }
 0x172   : > { %1552 = vrot.lane.b32.xlu1 %v7923_v6, %s4843_s15  ;;  %1360 = vst.msk [vmem:[#allocation3 + $0x50] sm:$0xff] %vm1349_vm8, %v1274_v60 }
 0x173   : > { %4681 = vmatmul.mubr.msk.bf16.gmra.mxu0 %vm1973_vm13, %v1951_v13  ;;  %1685 = vrot.lane.b32.xlu0 %v7924_v38, %s4844_s16  ;;  %v5941_v38 = vsel %vm906_vm3, %v967_v50, %v968_v55  ;;  %v7933_v13 = vld [vmem:[#allocation22_spill] sm:$0xff] }
 0x174   : > { %v1272_v8 = vpop.permute.xlu1 %1271 }
 0x175   : > { %1359 = vst.msk [vmem:[#allocation3 + $0x48] sm:$0xff] %vm1349_vm8, %v1272_v8  ;;  %v1404_v40 = vpop.permute.xlu0 %1403  ;;  %v972_v8 = vrot.slane %v7931_v11, 2 }
 0x176   : > { %1556 = vrot.lane.b32.xlu1 %v7927_v19, %s4843_s15  ;;  %1492 = vst.msk [vmem:[#allocation3 + $0x40] sm:$0xff] %vm1483_vm9, %v1404_v40  ;;  %v973_v40 = vrot.slane %v7932_v63, 2 }
 0x177   : > { %1689 = vrot.lane.b32.xlu0 %v5332_v17, %s4844_s16 }
 0x178   : > { %v1276_v42 = vpop.permute.xlu1 %1275 }
 0x179   : > { %1361 = vst.msk [vmem:[#allocation3 + $0x58] sm:$0xff] %vm1349_vm8, %v1276_v42  ;;  %v1408_v31 = vpop.permute.xlu0 %1407 }
 0x17a   : > { %1687 = vrot.lane.b32.xlu1 %v5339_v28, %s4844_s16  ;;  %1494 = vst.msk [vmem:[#allocation3 + $0x50] sm:$0xff] %vm1483_vm9, %v1408_v31  ;;  %v7928_v28 = vld [vmem:[#allocation21_spill] sm:$0xff] }
 0x17b   : > { %1819 = vrot.lane.b32.xlu0 %v5847_v22, %s4845_s25  ;;  %v965_v35 = vrot.slane %v7928_v28, 2 }
 0x17c   : > { %v1406_v24 = vpop.permute.xlu1 %1405 }
 0x17d   : > { %1493 = vst.msk [vmem:[#allocation3 + $0x48] sm:$0xff] %vm1483_vm9, %v1406_v24  ;;  %v1535_v41 = vpop.permute.xlu0 %1534  ;;  %v966_v2 = vsel %vm906_vm3, %v963_v25, %v965_v35  ;;  %v974_v25 = vsel %vm906_vm3, %v972_v8, %v973_v40  ;;  %v7934_v24 = vld [vmem:[#allocation24_spill] sm:$0xff] }
 0x17e   : > { %1691 = vrot.lane.b32.xlu1 %v5352_v49, %s4844_s16  ;;  %1623 = vst.msk [vmem:[#allocation3 + $0x40] sm:$0xff] %vm1614_vm10, %v1535_v41 }
 0x17f   : > { %1823 = vrot.lane.b32.xlu0 %v964_v51, %s4845_s25 }
 0x180   : > { %v1410_v52 = vpop.permute.xlu1 %1409 }
 0x181   : > { %1495 = vst.msk [vmem:[#allocation3 + $0x58] sm:$0xff] %vm1483_vm9, %v1410_v52  ;;  %v1539_v0 = vpop.permute.xlu0 %1538 }
 0x182   : > { %1821 = vrot.lane.b32.xlu1 %v961_v59, %s4845_s25  ;;  %1625 = vst.msk [vmem:[#allocation3 + $0x50] sm:$0xff] %vm1614_vm10, %v1539_v0 }
 0x183   : > { %1027 = vrot.lane.b32.xlu0 %v5847_v22, %s4839_s29 }
 0x184   : > { %v1537_v12 = vpop.permute.xlu1 %1536 }
 0x185   : > { %1624 = vst.msk [vmem:[#allocation3 + $0x48] sm:$0xff] %vm1614_vm10, %v1537_v12  ;;  %v1670_v36 = vpop.permute.xlu0 %1669 }
 0x186   : > { %1825 = vrot.lane.b32.xlu1 %v966_v2, %s4845_s25  ;;  %1758 = vst.msk [vmem:[#allocation3 + $0x40] sm:$0xff] %vm1749_vm11, %v1670_v36 }
 0x187   : > { %1031 = vrot.lane.b32.xlu0 %v964_v51, %s4839_s29 }
 0x188   : > { %v1541_v48 = vpop.permute.xlu1 %1540 }
 0x189   : > { %1626 = vst.msk [vmem:[#allocation3 + $0x58] sm:$0xff] %vm1614_vm10, %v1541_v48  ;;  %v1674_v32 = vpop.permute.xlu0 %1673  ;;  %v7935_v48 = vld [vmem:[#allocation12_spill] sm:$0xff] }
 0x18a   : > { %1029 = vrot.lane.b32.xlu1 %v961_v59, %s4839_s29  ;;  %1760 = vst.msk [vmem:[#allocation3 + $0x50] sm:$0xff] %vm1749_vm11, %v1674_v32  ;;  %v2257_v59 = vld [vmem:[#allocation2] sm:$0xff] }
 0x18b   : > { %1158 = vrot.lane.b32.xlu0 %v7926_v23, %s4840_s30  ;;  %v2391_v20 = vrot.slane %v2257_v59, 1  ;;  %2311 = vst.msk [vmem:[#allocation3] sm:$0xff] %vm435_vm0, %v2257_v59 }
 0x18c   : > { %v1672_v47 = vpop.permute.xlu1 %1671 }
 0x18d   : > { %1759 = vst.msk [vmem:[#allocation3 + $0x48] sm:$0xff] %vm1749_vm11, %v1672_v47  ;;  %v1804_v3 = vpop.permute.xlu0 %1803  ;;  %v5974_v9 = vsel %vm696_vm2, %v2391_v20, %v2392_v10  ;;  %v7940_v20 = vld [vmem:[#allocation16_spill] sm:$0xff] }
 0x18e   : > { %1033 = vrot.lane.b32.xlu1 %v966_v2, %s4839_s29  ;;  %1892 = vst.msk [vmem:[#allocation3 + $0x40] sm:$0xff] %vm1883_vm12, %v1804_v3 }
 0x18f   : > { %1162 = vrot.lane.b32.xlu0 %v7929_v16, %s4840_s30 }
 0x190   : > { %v1676_v57 = vpop.permute.xlu1 %1675 }
 0x191   : > { %1761 = vst.msk [vmem:[#allocation3 + $0x58] sm:$0xff] %vm1749_vm11, %v1676_v57  ;;  %v1808_v15 = vpop.permute.xlu0 %1807 }
 0x192   : > { %1160 = vrot.lane.b32.xlu1 %v7927_v19, %s4840_s30  ;;  %1894 = vst.msk [vmem:[#allocation3 + $0x50] sm:$0xff] %vm1883_vm12, %v1808_v15  ;;  %v2600_v19 = vrot.slane %v5961_v39, 2 }
 0x193   : > { %1293 = vrot.lane.b32.xlu0 %v5332_v17, %s4841_s13 }
 0x194   : > { %v1806_v53 = vpop.permute.xlu1 %1805 }
 0x195   : > { %1893 = vst.msk [vmem:[#allocation3 + $0x48] sm:$0xff] %vm1883_vm12, %v1806_v53  ;;  %v1143_v43 = vpop.permute.xlu0 %1142  ;;  %v1924_v33 = vld [vmem:[#allocation3 + $0x40] sm:$0xff] }
 0x196   : > { %1164 = vrot.lane.b32.xlu1 %v7930_v34, %s4840_s30  ;;  %1227 = vst.msk [vmem:[#allocation3 + $0x60] sm:$0xff] %vm1214_vm7, %v1143_v43  ;;  %v7936_v43 = vld [vmem:[#allocation13_spill] sm:$0xff] }
 0x197   : > { %1297 = vrot.lane.b32.xlu0 %v5345_v26, %s4841_s13 }
 0x198   : > { %v1810_v5 = vpop.permute.xlu1 %1809 }
 0x199   : > { %1895 = vst.msk [vmem:[#allocation3 + $0x58] sm:$0xff] %vm1883_vm12, %v1810_v5  ;;  %v1147_v17 = vpop.permute.xlu0 %1146  ;;  %v1926_v7 = vld [vmem:[#allocation3 + $0x50] sm:$0xff]  ;;  %v7937_v5 = vld [vmem:[#allocation23_spill] sm:$0xff] }
 0x19a   : > { %1295 = vrot.lane.b32.xlu1 %v5352_v49, %s4841_s13  ;;  %1229 = vst.msk [vmem:[#allocation3 + $0x70] sm:$0xff] %vm1214_vm7, %v1147_v17  ;;  %v4824_v49 = vld [vmem:[#allocation2 + $0x130] sm:$0x3] }
 0x19b   : > { %1427 = vrot.lane.b32.xlu0 %v964_v51, %s4842_s14  ;;  %v970_v61 = vrot.slane %v4824_v49, 2  ;;  %v4826_v49 = vld [vmem:[#allocation2 + $0x160] sm:$0x3] }
 0x19c   : > { %v1145_v4 = vpop.permute.xlu1 %1144  ;;  %v1925_v27 = vld [vmem:[#allocation3 + $0x48] sm:$0xff] }
 0x19d   : > { %1228 = vst.msk [vmem:[#allocation3 + $0x68] sm:$0xff] %vm1214_vm7, %v1145_v4  ;;  %v1952_v6 = vpack.c.bf16 %v1925_v27, %v1924_v33  ;;  %v1278_v58 = vpop.permute.xlu0 %1277  ;;  %v971_v37 = vsel %vm906_vm3, %v968_v55, %v970_v61  ;;  %v977_v33 = vrot.slane %v7935_v48, 2  ;;  %v978_v4 = vrot.slane %v7936_v43, 2 }
 0x19e   : > { %1299 = vrot.lane.b32.xlu1 %v5364_v1, %s4841_s13  ;;  %1362 = vst.msk [vmem:[#allocation3 + $0x60] sm:$0xff] %vm1349_vm8, %v1278_v58  ;;  %v980_v61 = vrot.slane %v4826_v49, 2 }
 0x19f   : > { %4684 = vmatprep.mubr.msk.bf16.mxu0 %vm1973_vm13, %v1952_v6  ;;  %1431 = vrot.lane.b32.xlu0 %v5941_v38, %s4842_s14 }
 0x1a0   : > { %v1149_v29 = vpop.permute.xlu1 %1148  ;;  %v1927_v44 = vld [vmem:[#allocation3 + $0x58] sm:$0xff] }
 0x1a1   : > { %1230 = vst.msk [vmem:[#allocation3 + $0x78] sm:$0xff] %vm1214_vm7, %v1149_v29  ;;  %v1953_v22 = vpack.c.bf16 %v1927_v44, %v1926_v7  ;;  %v1282_v56 = vpop.permute.xlu0 %1281  ;;  %v7938_v7 = vld [vmem:[#allocation26_spill] sm:$0xff] }
 0x1a2   : > { %1429 = vrot.lane.b32.xlu1 %v966_v2, %s4842_s14  ;;  %1364 = vst.msk [vmem:[#allocation3 + $0x70] sm:$0xff] %vm1349_vm8, %v1282_v56 }
 0x1a3   : > { %4685 = vmatmul.mubr.msk.bf16.gmra.mxu0 %vm1973_vm13, %v1953_v22  ;;  %1558 = vrot.lane.b32.xlu0 %v7929_v16, %s4843_s15  ;;  %v981_v22 = vsel %vm906_vm3, %v978_v4, %v980_v61 }
 0x1a4   : > { %v1280_v30 = vpop.permute.xlu1 %1279 }
 0x1a5   : > { %1363 = vst.msk [vmem:[#allocation3 + $0x68] sm:$0xff] %vm1349_vm8, %v1280_v30  ;;  %v1412_v18 = vpop.permute.xlu0 %1411  ;;  %v7939_v30 = vld [vmem:[#allocation14_spill] sm:$0xff] }
 0x1a6   : > { %1433 = vrot.lane.b32.xlu1 %v971_v37, %s4842_s14  ;;  %1496 = vst.msk [vmem:[#allocation3 + $0x60] sm:$0xff] %vm1483_vm9, %v1412_v18 }
 0x1a7   : > { %1562 = vrot.lane.b32.xlu0 %v7931_v11, %s4843_s15 }
 0x1a8   : > { %v1284_v45 = vpop.permute.xlu1 %1283 }
 0x1a9   : > { %1365 = vst.msk [vmem:[#allocation3 + $0x78] sm:$0xff] %vm1349_vm8, %v1284_v45  ;;  %v1416_v21 = vpop.permute.xlu0 %1415 }
 0x1aa   : > { %1560 = vrot.lane.b32.xlu1 %v7930_v34, %s4843_s15  ;;  %1498 = vst.msk [vmem:[#allocation3 + $0x70] sm:$0xff] %vm1483_vm9, %v1416_v21  ;;  %v7941_v21 = vld [vmem:[#allocation25_spill] sm:$0xff] }
 0x1ab   : > { %1693 = vrot.lane.b32.xlu0 %v5345_v26, %s4844_s16  ;;  %v2599_v26 = vrot.slane %v2257_v59, 2 }
 0x1ac   : > { %v1414_v23 = vpop.permute.xlu1 %1413 }
 0x1ad   : > { %1497 = vst.msk [vmem:[#allocation3 + $0x68] sm:$0xff] %vm1483_vm9, %v1414_v23  ;;  %v1543_v46 = vpop.permute.xlu0 %1542  ;;  %v5994_v42 = vsel %vm906_vm3, %v2599_v26, %v2600_v19  ;;  %v7942_v26 = vld [vmem:[#allocation27_spill] sm:$0xff] }
 0x1ae   : > { %1564 = vrot.lane.b32.xlu1 %v7932_v63, %s4843_s15  ;;  %1627 = vst.msk [vmem:[#allocation3 + $0x60] sm:$0xff] %vm1614_vm10, %v1543_v46  ;;  %v982_v46 = vrot.slane %v7939_v30, 2 }
 0x1af   : > { %1697 = vrot.lane.b32.xlu0 %v7933_v13, %s4844_s16 }
 0x1b0   : > { %v1418_v60 = vpop.permute.xlu1 %1417 }
 0x1b1   : > { %1499 = vst.msk [vmem:[#allocation3 + $0x78] sm:$0xff] %vm1483_vm9, %v1418_v60  ;;  %v1547_v62 = vpop.permute.xlu0 %1546 }
 0x1b2   : > { %1695 = vrot.lane.b32.xlu1 %v5364_v1, %s4844_s16  ;;  %1629 = vst.msk [vmem:[#allocation3 + $0x70] sm:$0xff] %vm1614_vm10, %v1547_v62  ;;  %v4825_v1 = vld [vmem:[#allocation2 + $0x148] sm:$0x3]  ;;  %v4827_v62 = vld [vmem:[#allocation2 + $0x178] sm:$0x3] }
 0x1b3   : > { %1827 = vrot.lane.b32.xlu0 %v5941_v38, %s4845_s25  ;;  %v975_v14 = vrot.slane %v4825_v1, 2 }
 0x1b4   : > { %v1545_v54 = vpop.permute.xlu1 %1544 }
 0x1b5   : > { %1628 = vst.msk [vmem:[#allocation3 + $0x68] sm:$0xff] %vm1614_vm10, %v1545_v54  ;;  %v1678_v31 = vpop.permute.xlu0 %1677  ;;  %v976_v28 = vsel %vm906_vm3, %v973_v40, %v975_v14  ;;  %v985_v54 = vrot.slane %v4827_v62, 2 }
 0x1b6   : > { %1699 = vrot.lane.b32.xlu1 %v7934_v24, %s4844_s16  ;;  %1762 = vst.msk [vmem:[#allocation3 + $0x60] sm:$0xff] %vm1749_vm11, %v1678_v31 }
 0x1b7   : > { %1831 = vrot.lane.b32.xlu0 %v974_v25, %s4845_s25 }
 0x1b8   : > { %v1549_v51 = vpop.permute.xlu1 %1548 }
 0x1b9   : > { %1630 = vst.msk [vmem:[#allocation3 + $0x78] sm:$0xff] %vm1614_vm10, %v1549_v51  ;;  %v1682_v41 = vpop.permute.xlu0 %1681 }
 0x1ba   : > { %1829 = vrot.lane.b32.xlu1 %v971_v37, %s4845_s25  ;;  %1764 = vst.msk [vmem:[#allocation3 + $0x70] sm:$0xff] %vm1749_vm11, %v1682_v41 }
 0x1bb   : > { %1035 = vrot.lane.b32.xlu0 %v5941_v38, %s4839_s29  ;;  %v979_v38 = vsel %vm906_vm3, %v977_v33, %v978_v4 }
 0x1bc   : > { %v1680_v35 = vpop.permute.xlu1 %1679 }
 0x1bd   : > { %1763 = vst.msk [vmem:[#allocation3 + $0x68] sm:$0xff] %vm1749_vm11, %v1680_v35  ;;  %v1812_v52 = vpop.permute.xlu0 %1811 }
 0x1be   : > { %1833 = vrot.lane.b32.xlu1 %v976_v28, %s4845_s25  ;;  %1896 = vst.msk [vmem:[#allocation3 + $0x60] sm:$0xff] %vm1883_vm12, %v1812_v52 }
 0x1bf   : > { %1039 = vrot.lane.b32.xlu0 %v974_v25, %s4839_s29 }
 0x1c0   : > { %v1684_v0 = vpop.permute.xlu1 %1683 }
 0x1c1   : > { %1765 = vst.msk [vmem:[#allocation3 + $0x78] sm:$0xff] %vm1749_vm11, %v1684_v0  ;;  %v1816_v2 = vpop.permute.xlu0 %1815 }
 0x1c2   : > { %1037 = vrot.lane.b32.xlu1 %v971_v37, %s4839_s29  ;;  %1898 = vst.msk [vmem:[#allocation3 + $0x70] sm:$0xff] %vm1883_vm12, %v1816_v2  ;;  %v6109_v2 = vld [vmem:[#allocation2 + $0x180] sm:$0xff] }
 0x1c3   : > { %1166 = vrot.lane.b32.xlu0 %v7931_v11, %s4840_s30 }
 0x1c4   : > { %v1814_v12 = vpop.permute.xlu1 %1813 }
 0x1c5   : > { %1897 = vst.msk [vmem:[#allocation3 + $0x68] sm:$0xff] %vm1883_vm12, %v1814_v12  ;;  %v1151_v36 = vpop.permute.xlu0 %1150  ;;  %v1928_v3 = vld [vmem:[#allocation3 + $0x60] sm:$0xff] }
 0x1c6   : > { %1041 = vrot.lane.b32.xlu1 %v976_v28, %s4839_s29  ;;  %1231 = vst.msk [vmem:[#allocation3 + $0x80] sm:$0xff] %vm1214_vm7, %v1151_v36 }
 0x1c7   : > { %1170 = vrot.lane.b32.xlu0 %v7935_v48, %s4840_s30 }
 0x1c8   : > { %v1818_v32 = vpop.permute.xlu1 %1817 }
 0x1c9   : > { %1899 = vst.msk [vmem:[#allocation3 + $0x78] sm:$0xff] %vm1883_vm12, %v1818_v32  ;;  %v1155_v47 = vpop.permute.xlu0 %1154  ;;  %v1930_v34 = vld [vmem:[#allocation3 + $0x70] sm:$0xff] }
 0x1ca   : > { %1168 = vrot.lane.b32.xlu1 %v7932_v63, %s4840_s30  ;;  %1233 = vst.msk [vmem:[#allocation3 + $0x90] sm:$0xff] %vm1214_vm7, %v1155_v47  ;;  %v983_v63 = vrot.slane %v7940_v20, 2 }
 0x1cb   : > { %1301 = vrot.lane.b32.xlu0 %v7933_v13, %s4841_s13 }
 0x1cc   : > { %v1153_v16 = vpop.permute.xlu1 %1152  ;;  %v1929_v57 = vld [vmem:[#allocation3 + $0x68] sm:$0xff]  ;;  %v6083_v8 = vsel %vm906_vm3, %v982_v46, %v983_v63 }
 0x1cd   : > { %1232 = vst.msk [vmem:[#allocation3 + $0x88] sm:$0xff] %vm1214_vm7, %v1153_v16  ;;  %v1954_v15 = vpack.c.bf16 %v1929_v57, %v1928_v3  ;;  %v1286_v53 = vpop.permute.xlu0 %1285  ;;  %v6123_v3 = vld [vmem:[%s7838_s3] ss:$0 sm:$0xff]  ;;  %v1248_v57 = vrot.slane %v6109_v2, 1 }
 0x1ce   : > { %1172 = vrot.lane.b32.xlu1 %v7936_v43, %s4840_s30  ;;  %1366 = vst.msk [vmem:[#allocation3 + $0x80] sm:$0xff] %vm1349_vm8, %v1286_v53 }
 0x1cf   : > { %4688 = vmatprep.mubr.msk.bf16.mxu0 %vm1973_vm13, %v1954_v15  ;;  %1305 = vrot.lane.b32.xlu0 %v7937_v5, %s4841_s13 }
 0x1d0   : > { %v1157_v50 = vpop.permute.xlu1 %1156  ;;  %v1931_v55 = vld [vmem:[#allocation3 + $0x78] sm:$0xff] }
 0x1d1   : > { %1234 = vst.msk [vmem:[#allocation3 + $0x98] sm:$0xff] %vm1214_vm7, %v1157_v50  ;;  %v1955_v17 = vpack.c.bf16 %v1931_v55, %v1930_v34  ;;  %v1290_v27 = vpop.permute.xlu0 %1289  ;;  %v612_v50 = vld [vmem:[#allocation2 + $0x190] sm:$0x3] }
 0x1d2   : > { %1303 = vrot.lane.b32.xlu1 %v7934_v24, %s4841_s13  ;;  %1368 = vst.msk [vmem:[#allocation3 + $0x90] sm:$0xff] %vm1349_vm8, %v1290_v27  ;;  %v6094_v24 = vsel %vm906_vm3, %v983_v63, %v985_v54  ;;  %v614_v54 = vld [vmem:[#allocation2 + $0x1a0] sm:$0xff] }
 0x1d3   : > { %4689 = vmatmul.mubr.msk.bf16.gmra.mxu0 %vm1973_vm13, %v1955_v17  ;;  %1435 = vrot.lane.b32.xlu0 %v974_v25, %s4842_s14 }
 0x1d4   : > { %v1288_v6 = vpop.permute.xlu1 %1287 }
 0x1d5   : > { %1367 = vst.msk [vmem:[#allocation3 + $0x88] sm:$0xff] %vm1349_vm8, %v1288_v6  ;;  %v1420_v58 = vpop.permute.xlu0 %1419 }
 0x1d6   : > { %1307 = vrot.lane.b32.xlu1 %v7938_v7, %s4841_s13  ;;  %1500 = vst.msk [vmem:[#allocation3 + $0x80] sm:$0xff] %vm1483_vm9, %v1420_v58 }
 0x1d7   : > { %1439 = vrot.lane.b32.xlu0 %v979_v38, %s4842_s14 }
 0x1d8   : > { %v1292_v29 = vpop.permute.xlu1 %1291 }
 0x1d9   : > { %1369 = vst.msk [vmem:[#allocation3 + $0x98] sm:$0xff] %vm1349_vm8, %v1292_v29  ;;  %v1424_v44 = vpop.permute.xlu0 %1423  ;;  %v1382_v29 = vrot.slane %v6109_v2, 2 }
 0x1da   : > { %1437 = vrot.lane.b32.xlu1 %v976_v28, %s4842_s14  ;;  %1502 = vst.msk [vmem:[#allocation3 + $0x90] sm:$0xff] %vm1483_vm9, %v1424_v44 }
 0x1db   : > { %1566 = vrot.lane.b32.xlu0 %v7935_v48, %s4843_s15  ;;  %v6113_v48 = vld [vmem:[#allocation2 + $0x188] sm:$0xff] }
 0x1dc   : > { %v1422_v56 = vpop.permute.xlu1 %1421  ;;  %v1249_v15 = vrot.slane %v6113_v48, 1  ;;  %v1383_v44 = vrot.slane %v6113_v48, 2 }
 0x1dd   : > { %1501 = vst.msk [vmem:[#allocation3 + $0x88] sm:$0xff] %vm1483_vm9, %v1422_v56  ;;  %v1551_v37 = vpop.permute.xlu0 %1550 }
 0x1de   : > { %1441 = vrot.lane.b32.xlu1 %v981_v22, %s4842_s14  ;;  %1631 = vst.msk [vmem:[#allocation3 + $0x80] sm:$0xff] %vm1614_vm10, %v1551_v37  ;;  %v6136_v17 = vsel %vm696_vm2, %v1248_v57, %v1249_v15 }
 0x1df   : > { %1570 = vrot.lane.b32.xlu0 %v7939_v30, %s4843_s15 }
 0x1e0   : > { %v1426_v18 = vpop.permute.xlu1 %1425 }
 0x1e1   : > { %1503 = vst.msk [vmem:[#allocation3 + $0x98] sm:$0xff] %vm1483_vm9, %v1426_v18  ;;  %v1555_v11 = vpop.permute.xlu0 %1554 }
 0x1e2   : > { %1568 = vrot.lane.b32.xlu1 %v7936_v43, %s4843_s15  ;;  %1633 = vst.msk [vmem:[#allocation3 + $0x90] sm:$0xff] %vm1614_vm10, %v1555_v11 }
 0x1e3   : > { %1701 = vrot.lane.b32.xlu0 %v7937_v5, %s4844_s16 }
 0x1e4   : > { %v1553_v45 = vpop.permute.xlu1 %1552 }
 0x1e5   : > { %1632 = vst.msk [vmem:[#allocation3 + $0x88] sm:$0xff] %vm1614_vm10, %v1553_v45  ;;  %v1686_v59 = vpop.permute.xlu0 %1685  ;;  %v1384_v45 = vsel %vm906_vm3, %v1382_v29, %v1383_v44 }
 0x1e6   : > { %1572 = vrot.lane.b32.xlu1 %v7940_v20, %s4843_s15  ;;  %1766 = vst.msk [vmem:[#allocation3 + $0x80] sm:$0xff] %vm1749_vm11, %v1686_v59 }
 0x1e7   : > { %1705 = vrot.lane.b32.xlu0 %v7941_v21, %s4844_s16 }
 0x1e8   : > { %v1557_v23 = vpop.permute.xlu1 %1556 }
 0x1e9   : > { %1634 = vst.msk [vmem:[#allocation3 + $0x98] sm:$0xff] %vm1614_vm10, %v1557_v23  ;;  %v1690_v13 = vpop.permute.xlu0 %1689 }
 0x1ea   : > { %1703 = vrot.lane.b32.xlu1 %v7938_v7, %s4844_s16  ;;  %1768 = vst.msk [vmem:[#allocation3 + $0x90] sm:$0xff] %vm1749_vm11, %v1690_v13 }
 0x1eb   : > { %1835 = vrot.lane.b32.xlu0 %v979_v38, %s4845_s25 }
 0x1ec   : > { %v1688_v60 = vpop.permute.xlu1 %1687 }
 0x1ed   : > { %1767 = vst.msk [vmem:[#allocation3 + $0x88] sm:$0xff] %vm1749_vm11, %v1688_v60  ;;  %v1820_v40 = vpop.permute.xlu0 %1819 }
 0x1ee   : > { %1707 = vrot.lane.b32.xlu1 %v7942_v26, %s4844_s16  ;;  %1900 = vst.msk [vmem:[#allocation3 + $0x80] sm:$0xff] %vm1883_vm12, %v1820_v40  ;;  %v613_v40 = vld [vmem:[#allocation2 + $0x198] sm:$0xff] }
 0x1ef   : > { %1839 = vrot.lane.b32.xlu0 %v6083_v8, %s4845_s25 }
 0x1f0   : > { %v1692_v25 = vpop.permute.xlu1 %1691 }
 0x1f1   : > { %1769 = vst.msk [vmem:[#allocation3 + $0x98] sm:$0xff] %vm1749_vm11, %v1692_v25  ;;  %v1824_v31 = vpop.permute.xlu0 %1823 }
 0x1f2   : > { %1837 = vrot.lane.b32.xlu1 %v981_v22, %s4845_s25  ;;  %1902 = vst.msk [vmem:[#allocation3 + $0x90] sm:$0xff] %vm1883_vm12, %v1824_v31  ;;  %v1648_v31 = vrot.slane %v613_v40, 1 }
 0x1f3   : > { %1043 = vrot.lane.b32.xlu0 %v979_v38, %s4839_s29  ;;  %v1251_v38 = vrot.slane %v612_v50, 1 }
 0x1f4   : > { %v1822_v1 = vpop.permute.xlu1 %1821 }
 0x1f5   : > { %1901 = vst.msk [vmem:[#allocation3 + $0x88] sm:$0xff] %vm1883_vm12, %v1822_v1  ;;  %v1028_v14 = vpop.permute.xlu0 %1027  ;;  %v1932_v28 = vld [vmem:[#allocation3 + $0x80] sm:$0xff] }
 0x1f6   : > { %1841 = vrot.lane.b32.xlu1 %v6094_v24, %s4845_s25  ;;  %1104 = vst.msk [vmem:[#allocation3 + $0xa0] sm:$0xff] %vm1083_vm6, %v1028_v14 }
 0x1f7   : > { %1047 = vrot.lane.b32.xlu0 %v6083_v8, %s4839_s29 }
 0x1f8   : > { %v1826_v51 = vpop.permute.xlu1 %1825 }
 0x1f9   : > { %1903 = vst.msk [vmem:[#allocation3 + $0x98] sm:$0xff] %vm1883_vm12, %v1826_v51  ;;  %v1032_v41 = vpop.permute.xlu0 %1031  ;;  %v1934_v36 = vld [vmem:[#allocation3 + $0x90] sm:$0xff]  ;;  %v615_v51 = vld [vmem:[#allocation2 + $0x1a8] sm:$0x3] }
 0x1fa   : > { %1045 = vrot.lane.b32.xlu1 %v981_v22, %s4839_s29  ;;  %1106 = vst.msk [vmem:[#allocation3 + $0xb0] sm:$0xff] %vm1083_vm6, %v1032_v41 }
 0x1fb   : > { %1174 = vrot.lane.b32.xlu0 %v7939_v30, %s4840_s30  ;;  %v1252_v30 = vsel %vm696_vm2, %v1249_v15, %v1251_v38  ;;  %v2259_v15 = vld [vmem:[#allocation2 + $0x10] sm:$0x3] }
 0x1fc   : > { %v1030_v35 = vpop.permute.xlu1 %1029  ;;  %v1933_v52 = vld [vmem:[#allocation3 + $0x88] sm:$0xff] }
 0x1fd   : > { %1105 = vst.msk [vmem:[#allocation3 + $0xa8] sm:$0xff] %vm1083_vm6, %v1030_v35  ;;  %v1956_v0 = vpack.c.bf16 %v1933_v52, %v1932_v28  ;;  %v1159_v12 = vpop.permute.xlu0 %1158  ;;  %v1651_v35 = vrot.slane %v615_v51, 1 }
 0x1fe   : > { %1049 = vrot.lane.b32.xlu1 %v6094_v24, %s4839_s29  ;;  %1235 = vst.msk [vmem:[#allocation3 + $0xa0] sm:$0xff] %vm1214_vm7, %v1159_v12 }
 0x1ff   : > { %4692 = vmatprep.mubr.msk.bf16.mxu0 %vm1973_vm13, %v1956_v0  ;;  %1178 = vrot.lane.b32.xlu0 %v6109_v2, %s4840_s30  ;;  %v1782_v0 = vrot.slane %v613_v40, 2 }
 0x200   : > { %v1034_v32 = vpop.permute.xlu1 %1033  ;;  %v1935_v47 = vld [vmem:[#allocation3 + $0x98] sm:$0xff] }
 0x201   : > { %1107 = vst.msk [vmem:[#allocation3 + $0xb8] sm:$0xff] %vm1083_vm6, %v1034_v32  ;;  %v1957_v16 = vpack.c.bf16 %v1935_v47, %v1934_v36  ;;  %v1163_v53 = vpop.permute.xlu0 %1162 }
 0x202   : > { %1176 = vrot.lane.b32.xlu1 %v7940_v20, %s4840_s30  ;;  %1237 = vst.msk [vmem:[#allocation3 + $0xb0] sm:$0xff] %vm1214_vm7, %v1163_v53  ;;  %v1385_v20 = vrot.slane %v612_v50, 2 }
 0x203   : > { %v4678_v43 = vpop.f32.mrf.mxu0  ;;  %4693 = vmatmul.mubr.msk.bf16.gmra.mxu0 %vm1973_vm13, %v1957_v16  ;;  %1309 = vrot.lane.b32.xlu0 %v7941_v21, %s4841_s13  ;;  %v1785_v16 = vrot.slane %v615_v51, 2 }
 0x204   : > { %v2069_v34 = vadd.f32 %v4678_v43, %v6123_v3  ;;  %v1161_v5 = vpop.permute.xlu1 %1160  ;;  %v1386_v13 = vsel %vm906_vm3, %v1383_v44, %v1385_v20 }
 0x205   : > { %1236 = vst.msk [vmem:[#allocation3 + $0xa8] sm:$0xff] %vm1214_vm7, %v1161_v5  ;;  %v2060_v55 = vpop.f32.mrf.mxu0  ;;  %v1294_v27 = vpop.permute.xlu0 %1293  ;;  %v2394_v5 = vrot.slane %v2259_v15, 1 }
 0x206   : > { %v2189_v33 = vmax.f32 %v2069_v34, 0.0  ;;  %v2061_v4 = vadd.f32 %v6123_v3, %v2060_v55  ;;  %1180 = vrot.lane.b32.xlu1 %v6113_v48, %s4840_s30  ;;  %1370 = vst.msk [vmem:[#allocation3 + $0xa0] sm:$0xff] %vm1349_vm8, %v1294_v27 }
 0x207   : > { %v4679_v6 = vpop.f32.mrf.mxu0  ;;  %1313 = vrot.lane.b32.xlu0 %v6136_v17, %s4841_s13  ;;  %v2395_v27 = vsel %vm696_vm2, %v2392_v10, %v2394_v5 }
 0x208   : > { %2221 = vst.msk [vmem:[#allocation2 + $0x31] sm:$0xff] %vm435_vm0, %v2189_v33  ;;  %v2187_v58 = vmax.f32 %v2061_v4, 0.0  ;;  %v2072_v7 = vadd.f32 %v4679_v6, %v6123_v3  ;;  %v1165_v49 = vpop.permute.xlu1 %1164 }
 0x209   : > { %1238 = vst.msk [vmem:[#allocation3 + $0xb8] sm:$0xff] %vm1214_vm7, %v1165_v49  ;;  %v2063_v61 = vpop.f32.mrf.mxu0  ;;  %v1298_v37 = vpop.permute.xlu0 %1297 }
 0x20a   : > { %2219 = vst.msk [vmem:[#allocation2 + $0x19] sm:$0xff] %vm435_vm0, %v2187_v58  ;;  %v2190_v22 = vmax.f32 %v2072_v7, 0.0  ;;  %v2064_v56 = vadd.f32 %v6123_v3, %v2063_v61  ;;  %1311 = vrot.lane.b32.xlu1 %v7942_v26, %s4841_s13  ;;  %v2602_v61 = vrot.slane %v2259_v15, 2 }
 0x20b   : > { %1372 = vst.msk [vmem:[#allocation3 + $0xb0] sm:$0xff] %vm1349_vm8, %v1298_v37  ;;  %1443 = vrot.lane.b32.xlu0 %v6083_v8, %s4842_s14 }
 0x20c   : > { %2222 = vst.msk [vmem:[#allocation2 + $0x39] sm:$0xff] %vm435_vm0, %v2190_v22  ;;  %v2188_v18 = vmax.f32 %v2064_v56, 0.0  ;;  %v1296_v11 = vpop.permute.xlu1 %1295 }
 0x20d   : > { %1371 = vst.msk [vmem:[#allocation3 + $0xa8] sm:$0xff] %vm1349_vm8, %v1296_v11  ;;  %v1428_v59 = vpop.permute.xlu0 %1427 }
 0x20e   : > { %2220 = vst.msk [vmem:[#allocation2 + $0x21] sm:$0xff] %vm435_vm0, %v2188_v18  ;;  %1315 = vrot.lane.b32.xlu1 %v1252_v30, %s4841_s13 }
 0x20f   : > { %1504 = vst.msk [vmem:[#allocation3 + $0xa0] sm:$0xff] %vm1483_vm9, %v1428_v59  ;;  %v6163_v21 = vld [vmem:[#allocation2 + $0x30] sm:$0xff]  ;;  %1447 = vrot.lane.b32.xlu0 %v1384_v45, %s4842_s14 }
 0x210   : > { %v1300_v23 = vpop.permute.xlu1 %1299  ;;  %2315 = vst.msk [vmem:[#allocation3 + $0x20] sm:$0xff] %vm435_vm0, %v6163_v21 }
 0x211   : > { %1373 = vst.msk [vmem:[#allocation3 + $0xb8] sm:$0xff] %vm1349_vm8, %v1300_v23  ;;  %v6169_v46 = vld [vmem:[#allocation2 + $0x18] sm:$0xff]  ;;  %v1432_v63 = vpop.permute.xlu0 %1431  ;;  %v2603_v23 = vsel %vm906_vm3, %v2600_v19, %v2602_v61 }
 0x212   : > { %1445 = vrot.lane.b32.xlu1 %v6094_v24, %s4842_s14  ;;  %2313 = vst.msk [vmem:[#allocation3 + $0x10] sm:$0xff] %vm435_vm0, %v6169_v46  ;;  %v1649_v24 = vrot.slane %v614_v54, 1  ;;  %v2396_v55 = vrot.slane %v6169_v46, 1 }
 0x213   : > { %1506 = vst.msk [vmem:[#allocation3 + $0xb0] sm:$0xff] %vm1483_vm9, %v1432_v63  ;;  %v6177_v60 = vld [vmem:[#allocation2 + $0x38] sm:$0xff]  ;;  %1574 = vrot.lane.b32.xlu0 %v6109_v2, %s4843_s15  ;;  %v1783_v2 = vrot.slane %v614_v54, 2 }
 0x214   : > { %v1430_v8 = vpop.permute.xlu1 %1429  ;;  %2316 = vst.msk [vmem:[#allocation3 + $0x28] sm:$0xff] %vm435_vm0, %v6177_v60  ;;  %v1650_v41 = vsel %vm696_vm2, %v1648_v31, %v1649_v24  ;;  %v1652_v36 = vsel %vm696_vm2, %v1649_v24, %v1651_v35  ;;  %v2610_v15 = vrot.slane %v6177_v60, 2 }
 0x215   : > { %1505 = vst.msk [vmem:[#allocation3 + $0xa8] sm:$0xff] %vm1483_vm9, %v1430_v8  ;;  %v6184_v26 = vld [vmem:[#allocation2 + $0x20] sm:$0xff]  ;;  %v1559_v62 = vpop.permute.xlu0 %1558  ;;  %v1784_v32 = vsel %vm906_vm3, %v1782_v0, %v1783_v2  ;;  %v1786_v43 = vsel %vm906_vm3, %v1783_v2, %v1785_v16  ;;  %v2262_v33 = vld [vmem:[#allocation2 + $0x28] sm:$0x3] }
 0x216   : > { %1449 = vrot.lane.b32.xlu1 %v1386_v13, %s4842_s14  ;;  %2314 = vst.msk [vmem:[#allocation3 + $0x18] sm:$0xff] %vm435_vm0, %v6184_v26  ;;  %v2397_v34 = vrot.slane %v6184_v26, 1  ;;  %v2605_v49 = vrot.slane %v6184_v26, 2 }
 0x217   : > { %1635 = vst.msk [vmem:[#allocation3 + $0xa0] sm:$0xff] %vm1614_vm10, %v1559_v62  ;;  %1578 = vrot.lane.b32.xlu0 %v613_v40, %s4843_s15 }
 0x218   : > { %v1434_v25 = vpop.permute.xlu1 %1433  ;;  %v6224_v4 = vsel %vm696_vm2, %v2396_v55, %v2397_v34 }
 0x219   : > { %1507 = vst.msk [vmem:[#allocation3 + $0xb8] sm:$0xff] %vm1483_vm9, %v1434_v25  ;;  %v1563_v1 = vpop.permute.xlu0 %1562  ;;  %v2607_v25 = vrot.slane %v2262_v33, 2 }
 0x21a   : > { %1576 = vrot.lane.b32.xlu1 %v6113_v48, %s4843_s15  ;;  %1637 = vst.msk [vmem:[#allocation3 + $0xb0] sm:$0xff] %vm1614_vm10, %v1563_v1 }
 0x21b   : > { %1709 = vrot.lane.b32.xlu0 %v6136_v17, %s4844_s16 }
 0x21c   : > { %v1561_v14 = vpop.permute.xlu1 %1560 }
 0x21d   : > { %1636 = vst.msk [vmem:[#allocation3 + $0xa8] sm:$0xff] %vm1614_vm10, %v1561_v14  ;;  %v1694_v28 = vpop.permute.xlu0 %1693  ;;  %v2608_v14 = vsel %vm906_vm3, %v2605_v49, %v2607_v25 }
 0x21e   : > { %1580 = vrot.lane.b32.xlu1 %v614_v54, %s4843_s15  ;;  %1770 = vst.msk [vmem:[#allocation3 + $0xa0] sm:$0xff] %vm1749_vm11, %v1694_v28 }
 0x21f   : > { %1713 = vrot.lane.b32.xlu0 %v1650_v41, %s4844_s16 }
 0x220   : > { %v1565_v52 = vpop.permute.xlu1 %1564 }
 0x221   : > { %1638 = vst.msk [vmem:[#allocation3 + $0xb8] sm:$0xff] %vm1614_vm10, %v1565_v52  ;;  %v1698_v12 = vpop.permute.xlu0 %1697  ;;  %v2402_v52 = vrot.slane %v6177_v60, 1 }
 0x222   : > { %1711 = vrot.lane.b32.xlu1 %v1252_v30, %s4844_s16  ;;  %1772 = vst.msk [vmem:[#allocation3 + $0xb0] sm:$0xff] %vm1749_vm11, %v1698_v12  ;;  %v2604_v30 = vrot.slane %v6169_v46, 2 }
 0x223   : > { %1843 = vrot.lane.b32.xlu0 %v1384_v45, %s4845_s25 }
 0x224   : > { %v1696_v48 = vpop.permute.xlu1 %1695  ;;  %v2606_v20 = vsel %vm906_vm3, %v2604_v30, %v2605_v49 }
 0x225   : > { %1771 = vst.msk [vmem:[#allocation3 + $0xa8] sm:$0xff] %vm1749_vm11, %v1696_v48  ;;  %v1828_v47 = vpop.permute.xlu0 %1827  ;;  %v2265_v48 = vld [vmem:[#allocation2 + $0x40] sm:$0x3] }
 0x226   : > { %1715 = vrot.lane.b32.xlu1 %v1652_v36, %s4844_s16  ;;  %1904 = vst.msk [vmem:[#allocation3 + $0xa0] sm:$0xff] %vm1883_vm12, %v1828_v47  ;;  %v2404_v16 = vrot.slane %v2265_v48, 1 }
 0x227   : > { %1847 = vrot.lane.b32.xlu0 %v1784_v32, %s4845_s25 }
 0x228   : > { %v1700_v57 = vpop.permute.xlu1 %1699 }
 0x229   : > { %1773 = vst.msk [vmem:[#allocation3 + $0xb8] sm:$0xff] %vm1749_vm11, %v1700_v57  ;;  %v1832_v53 = vpop.permute.xlu0 %1831 }
 0x22a   : > { %1845 = vrot.lane.b32.xlu1 %v1386_v13, %s4845_s25  ;;  %1906 = vst.msk [vmem:[#allocation3 + $0xb0] sm:$0xff] %vm1883_vm12, %v1832_v53 }
 0x22b   : > { %2471 = vrot.lane.b32.xlu0 %v5974_v9, %s4838_s28  ;;  %v2399_v9 = vrot.slane %v2262_v33, 1 }
 0x22c   : > { %v1830_v50 = vpop.permute.xlu1 %1829 }
 0x22d   : > { %1905 = vst.msk [vmem:[#allocation3 + $0xa8] sm:$0xff] %vm1883_vm12, %v1830_v50  ;;  %v1036_v17 = vpop.permute.xlu0 %1035  ;;  %v1936_v58 = vld [vmem:[#allocation3 + $0xa0] sm:$0xff]  ;;  %v6240_v56 = vsel %vm696_vm2, %v2397_v34, %v2399_v9  ;;  %v2609_v34 = vrot.slane %v6163_v21, 2 }
 0x22e   : > { %1849 = vrot.lane.b32.xlu1 %v1786_v43, %s4845_s25  ;;  %1108 = vst.msk [vmem:[#allocation3 + $0xc0] sm:$0xff] %vm1083_vm6, %v1036_v17  ;;  %v6312_v43 = vsel %vm696_vm2, %v2402_v52, %v2404_v16  ;;  %v2612_v17 = vrot.slane %v2265_v48, 2 }
 0x22f   : > { %2475 = vrot.lane.b32.xlu0 %v6224_v4, %s4838_s28  ;;  %v6319_v50 = vsel %vm906_vm3, %v2609_v34, %v2610_v15 }
 0x230   : > { %v1834_v6 = vpop.permute.xlu1 %1833 }
 0x231   : > { %1907 = vst.msk [vmem:[#allocation3 + $0xb8] sm:$0xff] %vm1883_vm12, %v1834_v6  ;;  %v1040_v38 = vpop.permute.xlu0 %1039  ;;  %v1938_v59 = vld [vmem:[#allocation3 + $0xb0] sm:$0xff] }
 0x232   : > { %2473 = vrot.lane.b32.xlu1 %v2395_v27, %s4838_s28  ;;  %1110 = vst.msk [vmem:[#allocation3 + $0xd0] sm:$0xff] %vm1083_vm6, %v1040_v38  ;;  %v6330_v27 = vsel %vm906_vm3, %v2610_v15, %v2612_v17 }
 0x233   : > { %v4682_v7 = vpop.f32.mrf.mxu0  ;;  %2679 = vrot.lane.b32.xlu0 %v5994_v42, %s4839_s29 }
 0x234   : > { %v2085_v29 = vadd.f32 %v4682_v7, %v6123_v3  ;;  %v1038_v10 = vpop.permute.xlu1 %1037  ;;  %v1937_v44 = vld [vmem:[#allocation3 + $0xa8] sm:$0xff] }
 0x235   : > { %1109 = vst.msk [vmem:[#allocation3 + $0xc8] sm:$0xff] %vm1083_vm6, %v1038_v10  ;;  %v2076_v22 = vpop.f32.mrf.mxu0  ;;  %v1958_v37 = vpack.c.bf16 %v1937_v44, %v1936_v58  ;;  %v1167_v45 = vpop.permute.xlu0 %1166  ;;  %v2255_v44 = vld [vmem:[%s7839_s4 + $0x20] sm:$0xf] }
 0x236   : > { %v2193_v18 = vmax.f32 %v2085_v29, 0.0  ;;  %v2077_v11 = vadd.f32 %v6123_v3, %v2076_v22  ;;  %2477 = vrot.lane.b32.xlu1 %v6240_v56, %s4838_s28  ;;  %1239 = vst.msk [vmem:[#allocation3 + $0xc0] sm:$0xff] %vm1214_vm7, %v1167_v45 }
 0x237   : > { %v4683_v42 = vpop.f32.mrf.mxu0  ;;  %4696 = vmatprep.mubr.msk.bf16.mxu0 %vm1973_vm13, %v1958_v37  ;;  %2683 = vrot.lane.b32.xlu0 %v2606_v20, %s4839_s29 }
 0x238   : > { %2225 = vst.msk [vmem:[#allocation2 + $0x61] sm:$0xff] %vm435_vm0, %v2193_v18  ;;  %v2191_v63 = vmax.f32 %v2077_v11, 0.0  ;;  %v2088_v13 = vadd.f32 %v4683_v42, %v6123_v3  ;;  %v1042_v8 = vpop.permute.xlu1 %1041  ;;  %v1939_v40 = vld [vmem:[#allocation3 + $0xb8] sm:$0xff]  ;;  %v2253_v42 = vld [vmem:[%s7839_s4 + $0x10] sm:$0xff] }
 0x239   : > { %1111 = vst.msk [vmem:[#allocation3 + $0xd8] sm:$0xff] %vm1083_vm6, %v1042_v8  ;;  %v2079_v62 = vpop.f32.mrf.mxu0  ;;  %v1959_v54 = vpack.c.bf16 %v1939_v40, %v1938_v59  ;;  %v1171_v19 = vpop.permute.xlu0 %1170 }
 0x23a   : > { %2223 = vst.msk [vmem:[#allocation2 + $0x49] sm:$0xff] %vm435_vm0, %v2191_v63  ;;  %v2194_v31 = vmax.f32 %v2088_v13, 0.0  ;;  %v2080_v39 = vadd.f32 %v6123_v3, %v2079_v62  ;;  %2681 = vrot.lane.b32.xlu1 %v2603_v23, %s4839_s29 }
 0x23b   : > { %1241 = vst.msk [vmem:[#allocation3 + $0xd0] sm:$0xff] %vm1214_vm7, %v1171_v19  ;;  %4697 = vmatmul.mubr.msk.bf16.gmra.mxu0 %vm1973_vm13, %v1959_v54  ;;  %2809 = vrot.lane.b32.xlu0 %v6169_v46, %s4840_s30 }
 0x23c   : > { %2226 = vst.msk [vmem:[#allocation2 + $0x69] sm:$0xff] %vm435_vm0, %v2194_v31  ;;  %v2192_v24 = vmax.f32 %v2080_v39, 0.0  ;;  %v1169_v1 = vpop.permute.xlu1 %1168 }
 0x23d   : > { %1240 = vst.msk [vmem:[#allocation3 + $0xc8] sm:$0xff] %vm1214_vm7, %v1169_v1  ;;  %v1302_v51 = vpop.permute.xlu0 %1301  ;;  %v2252_v1 = vld [vmem:[%s7839_s4 + $0x8] sm:$0xff] }
 0x23e   : > { %2224 = vst.msk [vmem:[#allocation2 + $0x51] sm:$0xff] %vm435_vm0, %v2192_v24  ;;  %2685 = vrot.lane.b32.xlu1 %v2608_v14, %s4839_s29  ;;  %v2251_v24 = vld [vmem:[%s7839_s4] sm:$0xff] }
 0x23f   : > { %1374 = vst.msk [vmem:[#allocation3 + $0xc0] sm:$0xff] %vm1349_vm8, %v1302_v51  ;;  %v6269_v41 = vld [vmem:[#allocation2 + $0x60] sm:$0xff]  ;;  %2813 = vrot.lane.b32.xlu0 %v6163_v21, %s4840_s30 }
 0x240   : > { %v1173_v28 = vpop.permute.xlu1 %1172  ;;  %2319 = vst.msk [vmem:[#allocation3 + $0x40] sm:$0xff] %vm435_vm0, %v6269_v41 }
 0x241   : > { %1242 = vst.msk [vmem:[#allocation3 + $0xd8] sm:$0xff] %vm1214_vm7, %v1173_v28  ;;  %v6276_v46 = vld [vmem:[#allocation2 + $0x48] sm:$0xff]  ;;  %v1306_v35 = vpop.permute.xlu0 %1305 }
 0x242   : > { %2811 = vrot.lane.b32.xlu1 %v6184_v26, %s4840_s30  ;;  %2317 = vst.msk [vmem:[#allocation3 + $0x30] sm:$0xff] %vm435_vm0, %v6276_v46  ;;  %v2401_v26 = vrot.slane %v6163_v21, 1  ;;  %v2406_v7 = vrot.slane %v6276_v46, 1  ;;  %v2614_v19 = vrot.slane %v6276_v46, 2 }
 0x243   : > { %1376 = vst.msk [vmem:[#allocation3 + $0xd0] sm:$0xff] %vm1349_vm8, %v1306_v35  ;;  %v6284_v0 = vld [vmem:[#allocation2 + $0x68] sm:$0xff]  ;;  %2943 = vrot.lane.b32.xlu0 %v6224_v4, %s4841_s13 }
 0x244   : > { %v1304_v2 = vpop.permute.xlu1 %1303  ;;  %2320 = vst.msk [vmem:[#allocation3 + $0x48] sm:$0xff] %vm435_vm0, %v6284_v0  ;;  %v6300_v32 = vsel %vm696_vm2, %v2401_v26, %v2402_v52  ;;  %v3649_v52 = vpack.c.bf16 %v2252_v1, %v2251_v24 }
 0x245   : > { %1375 = vst.msk [vmem:[#allocation3 + $0xc8] sm:$0xff] %vm1349_vm8, %v1304_v2  ;;  %v6292_v12 = vld [vmem:[#allocation2 + $0x50] sm:$0xff]  ;;  %v1436_v36 = vpop.permute.xlu0 %1435  ;;  %v6348_v61 = vld [vmem:[#allocation2 + $0x58] sm:$0x3] }
 0x246   : > { %2815 = vrot.lane.b32.xlu1 %v6177_v60, %s4840_s30  ;;  %2318 = vst.msk [vmem:[#allocation3 + $0x38] sm:$0xff] %vm435_vm0, %v6292_v12  ;;  %v2409_v10 = vrot.slane %v6348_v61, 1  ;;  %v2615_v62 = vrot.slane %v6292_v12, 2 }
 0x247   : > { %1508 = vst.msk [vmem:[#allocation3 + $0xc0] sm:$0xff] %vm1483_vm9, %v1436_v36  ;;  %2947 = vrot.lane.b32.xlu0 %v6300_v32, %s4841_s13 }
 0x248   : > { %v1308_v47 = vpop.permute.xlu1 %1307  ;;  %v6402_v2 = vsel %vm906_vm3, %v2614_v19, %v2615_v62 }
 0x249   : > { %1377 = vst.msk [vmem:[#allocation3 + $0xd8] sm:$0xff] %vm1349_vm8, %v1308_v47  ;;  %v1440_v57 = vpop.permute.xlu0 %1439  ;;  %v2617_v47 = vrot.slane %v6348_v61, 2  ;;  %v2411_v61 = vrot.slane %v6269_v41, 1 }
 0x24a   : > { %2945 = vrot.lane.b32.xlu1 %v6240_v56, %s4841_s13  ;;  %1510 = vst.msk [vmem:[#allocation3 + $0xd0] sm:$0xff] %vm1483_vm9, %v1440_v57  ;;  %v3651_v56 = vpack.c.bf16 %v2255_v44, %v2255_v44 }
 0x24b   : > { %3076 = vrot.lane.b32.xlu0 %v2606_v20, %s4842_s14  ;;  %v2254_v20 = vld [vmem:[%s7839_s4 + $0x18] sm:$0xff] }
 0x24c   : > { %v1438_v53 = vpop.permute.xlu1 %1437  ;;  %4763 = vmatprep.subr.msk.bf16.mxu1 %vm2022_vm5, %v3651_v56  ;;  %v3707_v11 = vsel %vm2022_vm5, %v3651_v56, 0  ;;  %v3650_v8 = vpack.c.bf16 %v2254_v20, %v2253_v42  ;;  %v2620_v56 = vrot.slane %v6284_v0, 2 }
 0x24d   : > { %1509 = vst.msk [vmem:[#allocation3 + $0xc8] sm:$0xff] %vm1483_vm9, %v1438_v53  ;;  %v1567_v5 = vpop.permute.xlu0 %1566  ;;  %4709 = vmatpush3.bf16.msra.mxu1 %v3707_v11 }
 0x24e   : > { %2949 = vrot.lane.b32.xlu1 %v6312_v43, %s4841_s13  ;;  %1639 = vst.msk [vmem:[#allocation3 + $0xc0] sm:$0xff] %vm1614_vm10, %v1567_v5  ;;  %4710 = vmatprep.subr.bf16.mxu1 %v3650_v8  ;;  %v6422_v5 = vsel %vm906_vm3, %v2615_v62, %v2617_v47 }
 0x24f   : > { %3080 = vrot.lane.b32.xlu0 %v6319_v50, %s4842_s14 }
 0x250   : > { %v1442_v55 = vpop.permute.xlu1 %1441 }
 0x251   : > { %1511 = vst.msk [vmem:[#allocation3 + $0xd8] sm:$0xff] %vm1483_vm9, %v1442_v55  ;;  %v1571_v33 = vpop.permute.xlu0 %1570  ;;  %4711 = vmatpush3.bf16.msra.mxu1 %v3650_v8 }
 0x252   : > { %3078 = vrot.lane.b32.xlu1 %v2608_v14, %s4842_s14  ;;  %1641 = vst.msk [vmem:[#allocation3 + $0xd0] sm:$0xff] %vm1614_vm10, %v1571_v33  ;;  %4712 = vmatprep.subr.bf16.mxu1 %v3649_v52 }
 0x253   : > { %3206 = vrot.lane.b32.xlu0 %v6163_v21, %s4843_s15  ;;  %v2407_v21 = vrot.slane %v6292_v12, 1 }
 0x254   : > { %v1569_v4 = vpop.permute.xlu1 %1568 }
 0x255   : > { %1640 = vst.msk [vmem:[#allocation3 + $0xc8] sm:$0xff] %vm1614_vm10, %v1569_v4  ;;  %v1702_v6 = vpop.permute.xlu0 %1701  ;;  %v6371_v59 = vsel %vm696_vm2, %v2407_v21, %v2409_v10  ;;  %4713 = vmatpush3.bf16.msra.mxu1 %v3649_v52  ;;  %v2271_v10 = vld [vmem:[#allocation2 + $0x70] sm:$0x3] }
 0x256   : > { %3082 = vrot.lane.b32.xlu1 %v6330_v27, %s4842_s14  ;;  %1774 = vst.msk [vmem:[#allocation3 + $0xc0] sm:$0xff] %vm1749_vm11, %v1702_v6  ;;  %v2622_v42 = vrot.slane %v2271_v10, 2 }
 0x257   : > { %3210 = vrot.lane.b32.xlu0 %v6276_v46, %s4843_s15 }
 0x258   : > { %v1573_v9 = vpop.permute.xlu1 %1572 }
 0x259   : > { %1642 = vst.msk [vmem:[#allocation3 + $0xd8] sm:$0xff] %vm1614_vm10, %v1573_v9  ;;  %v1706_v38 = vpop.permute.xlu0 %1705 }
 0x25a   : > { %3208 = vrot.lane.b32.xlu1 %v6177_v60, %s4843_s15  ;;  %1776 = vst.msk [vmem:[#allocation3 + $0xd0] sm:$0xff] %vm1749_vm11, %v1706_v38  ;;  %v6352_v60 = vsel %vm696_vm2, %v2406_v7, %v2407_v21 }
 0x25b   : > { %3340 = vrot.lane.b32.xlu0 %v6300_v32, %s4844_s16 }
 0x25c   : > { %v1704_v58 = vpop.permute.xlu1 %1703 }
 0x25d   : > { %1775 = vst.msk [vmem:[#allocation3 + $0xc8] sm:$0xff] %vm1749_vm11, %v1704_v58  ;;  %v1836_v49 = vpop.permute.xlu0 %1835 }
 0x25e   : > { %3212 = vrot.lane.b32.xlu1 %v6292_v12, %s4843_s15  ;;  %1908 = vst.msk [vmem:[#allocation3 + $0xc0] sm:$0xff] %vm1883_vm12, %v1836_v49 }
 0x25f   : > { %3344 = vrot.lane.b32.xlu0 %v6352_v60, %s4844_s16 }
 0x260   : > { %v1708_v29 = vpop.permute.xlu1 %1707 }
 0x261   : > { %1777 = vst.msk [vmem:[#allocation3 + $0xd8] sm:$0xff] %vm1749_vm11, %v1708_v29  ;;  %v1840_v22 = vpop.permute.xlu0 %1839 }
 0x262   : > { %3342 = vrot.lane.b32.xlu1 %v6312_v43, %s4844_s16  ;;  %1910 = vst.msk [vmem:[#allocation3 + $0xd0] sm:$0xff] %vm1883_vm12, %v1840_v22 }
 0x263   : > { %v4686_v37 = vpop.f32.mrf.mxu0  ;;  %3473 = vrot.lane.b32.xlu0 %v6319_v50, %s4845_s25 }
 0x264   : > { %v2101_v30 = vadd.f32 %v4686_v37, %v6123_v3  ;;  %v1838_v18 = vpop.permute.xlu1 %1837 }
 0x265   : > { %1909 = vst.msk [vmem:[#allocation3 + $0xc8] sm:$0xff] %vm1883_vm12, %v1838_v18  ;;  %v2092_v45 = vpop.f32.mrf.mxu0  ;;  %v1044_v13 = vpop.permute.xlu0 %1043  ;;  %v1940_v35 = vld [vmem:[#allocation3 + $0xc0] sm:$0xff]  ;;  %v2619_v18 = vrot.slane %v6269_v41, 2 }
 0x266   : > { %v2197_v23 = vmax.f32 %v2101_v30, 0.0  ;;  %v2093_v63 = vadd.f32 %v6123_v3, %v2092_v45  ;;  %3346 = vrot.lane.b32.xlu1 %v6371_v59, %s4844_s16  ;;  %1112 = vst.msk [vmem:[#allocation3 + $0xe0] sm:$0xff] %vm1083_vm6, %v1044_v13 }
 0x267   : > { %v4687_v40 = vpop.f32.mrf.mxu0  ;;  %2479 = vrot.lane.b32.xlu0 %v6300_v32, %s4838_s28  ;;  %v6493_v45 = vsel %vm906_vm3, %v2619_v18, %v2620_v56 }
 0x268   : > { %2229 = vst.msk [vmem:[#allocation2 + $0x91] sm:$0xff] %vm435_vm0, %v2197_v23  ;;  %v2195_v54 = vmax.f32 %v2093_v63, 0.0  ;;  %v2104_v25 = vadd.f32 %v4687_v40, %v6123_v3  ;;  %v1842_v31 = vpop.permute.xlu1 %1841  ;;  %v6506_v40 = vsel %vm906_vm3, %v2620_v56, %v2622_v42 }
 0x269   : > { %1911 = vst.msk [vmem:[#allocation3 + $0xd8] sm:$0xff] %vm1883_vm12, %v1842_v31  ;;  %v2095_v39 = vpop.f32.mrf.mxu0  ;;  %v1048_v28 = vpop.permute.xlu0 %1047  ;;  %v1942_v57 = vld [vmem:[#allocation3 + $0xd0] sm:$0xff] }
 0x26a   : > { %2227 = vst.msk [vmem:[#allocation2 + $0x79] sm:$0xff] %vm435_vm0, %v2195_v54  ;;  %v2198_v14 = vmax.f32 %v2104_v25, 0.0  ;;  %v2096_v51 = vadd.f32 %v6123_v3, %v2095_v39  ;;  %3475 = vrot.lane.b32.xlu1 %v6330_v27, %s4845_s25 }
 0x26b   : > { %1114 = vst.msk [vmem:[#allocation3 + $0xf0] sm:$0xff] %vm1083_vm6, %v1048_v28  ;;  %3477 = vrot.lane.b32.xlu0 %v6402_v2, %s4845_s25 }
 0x26c   : > { %2230 = vst.msk [vmem:[#allocation2 + $0x99] sm:$0xff] %vm435_vm0, %v2198_v14  ;;  %v2196_v26 = vmax.f32 %v2096_v51, 0.0  ;;  %v1046_v36 = vpop.permute.xlu1 %1045  ;;  %v1941_v48 = vld [vmem:[#allocation3 + $0xc8] sm:$0xff] }
 0x26d   : > { %1113 = vst.msk [vmem:[#allocation3 + $0xe8] sm:$0xff] %vm1083_vm6, %v1046_v36  ;;  %v1960_v32 = vpack.c.bf16 %v1941_v48, %v1940_v35  ;;  %v1175_v16 = vpop.permute.xlu0 %1174 }
 0x26e   : > { %2228 = vst.msk [vmem:[#allocation2 + $0x81] sm:$0xff] %vm435_vm0, %v2196_v26  ;;  %2481 = vrot.lane.b32.xlu1 %v6312_v43, %s4838_s28 }
 0x26f   : > { %1243 = vst.msk [vmem:[#allocation3 + $0xe0] sm:$0xff] %vm1214_vm7, %v1175_v16  ;;  %4700 = vmatprep.mubr.msk.bf16.mxu0 %vm1973_vm13, %v1960_v32  ;;  %v6414_v15 = vld [vmem:[#allocation2 + $0x90] sm:$0xff]  ;;  %2483 = vrot.lane.b32.xlu0 %v6352_v60, %s4838_s28 }
 0x270   : > { %v1050_v53 = vpop.permute.xlu1 %1049  ;;  %v1943_v34 = vld [vmem:[#allocation3 + $0xd8] sm:$0xff]  ;;  %2323 = vst.msk [vmem:[#allocation3 + $0x60] sm:$0xff] %vm435_vm0, %v6414_v15 }
 0x271   : > { %1115 = vst.msk [vmem:[#allocation3 + $0xf8] sm:$0xff] %vm1083_vm6, %v1050_v53  ;;  %v1961_v43 = vpack.c.bf16 %v1943_v34, %v1942_v57  ;;  %v6424_v55 = vld [vmem:[#allocation2 + $0x78] sm:$0xff]  ;;  %v1179_v17 = vpop.permute.xlu0 %1178 }
 0x272   : > { %3479 = vrot.lane.b32.xlu1 %v6422_v5, %s4845_s25  ;;  %2321 = vst.msk [vmem:[#allocation3 + $0x50] sm:$0xff] %vm435_vm0, %v6424_v55 }
 0x273   : > { %1245 = vst.msk [vmem:[#allocation3 + $0xf0] sm:$0xff] %vm1214_vm7, %v1179_v17  ;;  %4701 = vmatmul.mubr.msk.bf16.gmra.mxu0 %vm1973_vm13, %v1961_v43  ;;  %v6432_v33 = vld [vmem:[#allocation2 + $0x98] sm:$0xff]  ;;  %2687 = vrot.lane.b32.xlu0 %v6319_v50, %s4839_s29 }
 0x274   : > { %v1177_v4 = vpop.permute.xlu1 %1176  ;;  %2324 = vst.msk [vmem:[#allocation3 + $0x68] sm:$0xff] %vm435_vm0, %v6432_v33  ;;  %v2422_v42 = vrot.slane %v6432_v33, 1 }
 0x275   : > { %1244 = vst.msk [vmem:[#allocation3 + $0xe8] sm:$0xff] %vm1214_vm7, %v1177_v4  ;;  %v6439_v6 = vld [vmem:[#allocation2 + $0x80] sm:$0xff]  ;;  %v1310_v9 = vpop.permute.xlu0 %1309 }
 0x276   : > { %2485 = vrot.lane.b32.xlu1 %v6371_v59, %s4838_s28  ;;  %2322 = vst.msk [vmem:[#allocation3 + $0x58] sm:$0xff] %vm435_vm0, %v6439_v6  ;;  %v2417_v28 = vrot.slane %v6439_v6, 1 }
 0x277   : > { %1378 = vst.msk [vmem:[#allocation3 + $0xe0] sm:$0xff] %vm1349_vm8, %v1310_v9  ;;  %2691 = vrot.lane.b32.xlu0 %v6402_v2, %s4839_s29 }
 0x278   : > { %v1181_v38 = vpop.permute.xlu1 %1180 }
 0x279   : > { %1246 = vst.msk [vmem:[#allocation3 + $0xf8] sm:$0xff] %vm1214_vm7, %v1181_v38  ;;  %v1314_v50 = vpop.permute.xlu0 %1313 }
 0x27a   : > { %2689 = vrot.lane.b32.xlu1 %v6330_v27, %s4839_s29  ;;  %1380 = vst.msk [vmem:[#allocation3 + $0xf0] sm:$0xff] %vm1349_vm8, %v1314_v50  ;;  %v2625_v50 = vrot.slane %v6439_v6, 2 }
 0x27b   : > { %2817 = vrot.lane.b32.xlu0 %v6276_v46, %s4840_s30  ;;  %v2412_v46 = vrot.slane %v6284_v0, 1 }
 0x27c   : > { %v1312_v21 = vpop.permute.xlu1 %1311 }
 0x27d   : > { %1379 = vst.msk [vmem:[#allocation3 + $0xe8] sm:$0xff] %vm1349_vm8, %v1312_v21  ;;  %v1444_v58 = vpop.permute.xlu0 %1443 }
 0x27e   : > { %2693 = vrot.lane.b32.xlu1 %v6422_v5, %s4839_s29  ;;  %1512 = vst.msk [vmem:[#allocation3 + $0xe0] sm:$0xff] %vm1483_vm9, %v1444_v58 }
 0x27f   : > { %2821 = vrot.lane.b32.xlu0 %v6269_v41, %s4840_s30 }
 0x280   : > { %v1316_v7 = vpop.permute.xlu1 %1315 }
 0x281   : > { %1381 = vst.msk [vmem:[#allocation3 + $0xf8] sm:$0xff] %vm1349_vm8, %v1316_v7  ;;  %v1448_v27 = vpop.permute.xlu0 %1447 }
 0x282   : > { %2819 = vrot.lane.b32.xlu1 %v6292_v12, %s4840_s30  ;;  %1514 = vst.msk [vmem:[#allocation3 + $0xf0] sm:$0xff] %vm1483_vm9, %v1448_v27  ;;  %v6473_v12 = vsel %vm696_vm2, %v2411_v61, %v2412_v46  ;;  %v2624_v27 = vrot.slane %v6424_v55, 2 }
 0x283   : > { %2951 = vrot.lane.b32.xlu0 %v6352_v60, %s4841_s13  ;;  %v2414_v60 = vrot.slane %v2271_v10, 1 }
 0x284   : > { %v1446_v49 = vpop.permute.xlu1 %1445 }
 0x285   : > { %1513 = vst.msk [vmem:[#allocation3 + $0xe8] sm:$0xff] %vm1483_vm9, %v1446_v49  ;;  %v1575_v29 = vpop.permute.xlu0 %1574  ;;  %v6486_v30 = vsel %vm696_vm2, %v2412_v46, %v2414_v60  ;;  %v6577_v49 = vsel %vm906_vm3, %v2624_v27, %v2625_v50 }
 0x286   : > { %2823 = vrot.lane.b32.xlu1 %v6284_v0, %s4840_s30  ;;  %1643 = vst.msk [vmem:[#allocation3 + $0xe0] sm:$0xff] %vm1614_vm10, %v1575_v29 }
 0x287   : > { %2955 = vrot.lane.b32.xlu0 %v6473_v12, %s4841_s13 }
 0x288   : > { %v1450_v44 = vpop.permute.xlu1 %1449 }
 0x289   : > { %1515 = vst.msk [vmem:[#allocation3 + $0xf8] sm:$0xff] %vm1483_vm9, %v1450_v44  ;;  %v1579_v22 = vpop.permute.xlu0 %1578 }
 0x28a   : > { %2953 = vrot.lane.b32.xlu1 %v6371_v59, %s4841_s13  ;;  %1645 = vst.msk [vmem:[#allocation3 + $0xf0] sm:$0xff] %vm1614_vm10, %v1579_v22 }
 0x28b   : > { %3084 = vrot.lane.b32.xlu0 %v6402_v2, %s4842_s14  ;;  %v2416_v2 = vrot.slane %v6424_v55, 1 }
 0x28c   : > { %v1577_v37 = vpop.permute.xlu1 %1576 }
 0x28d   : > { %1644 = vst.msk [vmem:[#allocation3 + $0xe8] sm:$0xff] %vm1614_vm10, %v1577_v37  ;;  %v1710_v11 = vpop.permute.xlu0 %1709  ;;  %v6533_v26 = vsel %vm696_vm2, %v2416_v2, %v2417_v28 }
 0x28e   : > { %2957 = vrot.lane.b32.xlu1 %v6486_v30, %s4841_s13  ;;  %1778 = vst.msk [vmem:[#allocation3 + $0xe0] sm:$0xff] %vm1749_vm11, %v1710_v11 }
 0x28f   : > { %3088 = vrot.lane.b32.xlu0 %v6493_v45, %s4842_s14 }
 0x290   : > { %v1581_v59 = vpop.permute.xlu1 %1580 }
 0x291   : > { %1646 = vst.msk [vmem:[#allocation3 + $0xf8] sm:$0xff] %vm1614_vm10, %v1581_v59  ;;  %v1714_v20 = vpop.permute.xlu0 %1713 }
 0x292   : > { %3086 = vrot.lane.b32.xlu1 %v6422_v5, %s4842_s14  ;;  %1780 = vst.msk [vmem:[#allocation3 + $0xf0] sm:$0xff] %vm1749_vm11, %v1714_v20  ;;  %v6622_v20 = vld [vmem:[%s7838_s3] ss:$0 sm:$0xff] }
 0x293   : > { %v4690_v23 = vpop.f32.mrf.mxu0  ;;  %3214 = vrot.lane.b32.xlu0 %v6269_v41, %s4843_s15 }
 0x294   : > { %v2117_v63 = vadd.f32 %v4690_v23, %v6123_v3  ;;  %v1712_v13 = vpop.permute.xlu1 %1711 }
 0x295   : > { %1779 = vst.msk [vmem:[#allocation3 + $0xe8] sm:$0xff] %vm1749_vm11, %v1712_v13  ;;  %v2108_v8 = vpop.f32.mrf.mxu0  ;;  %v1844_v25 = vpop.permute.xlu0 %1843  ;;  %v2421_v13 = vrot.slane %v6414_v15, 1 }
 0x296   : > { %v2201_v62 = vmax.f32 %v2117_v63, 0.0  ;;  %v2109_v54 = vadd.f32 %v6123_v3, %v2108_v8  ;;  %3090 = vrot.lane.b32.xlu1 %v6506_v40, %s4842_s14  ;;  %1912 = vst.msk [vmem:[#allocation3 + $0xe0] sm:$0xff] %vm1883_vm12, %v1844_v25 }
 0x297   : > { %v4691_v31 = vpop.f32.mrf.mxu0  ;;  %3218 = vrot.lane.b32.xlu0 %v6424_v55, %s4843_s15 }
 0x298   : > { %2233 = vst.msk [vmem:[#allocation2 + $0xc1] sm:$0xff] %vm435_vm0, %v2201_v62  ;;  %v2199_v39 = vmax.f32 %v2109_v54, 0.0  ;;  %v2120_v41 = vadd.f32 %v4691_v31, %v6123_v3  ;;  %v1716_v19 = vpop.permute.xlu1 %1715  ;;  %v2277_v54 = vld [vmem:[#allocation2 + $0xa0] sm:$0x3]  ;;  %v6634_v31 = vsel %vm696_vm2, %v2421_v13, %v2422_v42 }
 0x299   : > { %1781 = vst.msk [vmem:[#allocation3 + $0xf8] sm:$0xff] %vm1749_vm11, %v1716_v19  ;;  %v2111_v24 = vpop.f32.mrf.mxu0  ;;  %v1848_v51 = vpop.permute.xlu0 %1847 }
 0x29a   : > { %2231 = vst.msk [vmem:[#allocation2 + $0xa9] sm:$0xff] %vm435_vm0, %v2199_v39  ;;  %v2202_v1 = vmax.f32 %v2120_v41, 0.0  ;;  %v2112_v14 = vadd.f32 %v6123_v3, %v2111_v24  ;;  %3216 = vrot.lane.b32.xlu1 %v6284_v0, %s4843_s15  ;;  %v2274_v0 = vld [vmem:[#allocation2 + $0x88] sm:$0x3] }
 0x29b   : > { %1914 = vst.msk [vmem:[#allocation3 + $0xf0] sm:$0xff] %vm1883_vm12, %v1848_v51  ;;  %3348 = vrot.lane.b32.xlu0 %v6473_v12, %s4844_s16  ;;  %v2419_v32 = vrot.slane %v2274_v0, 1  ;;  %v2627_v29 = vrot.slane %v2274_v0, 2  ;;  %v2629_v0 = vrot.slane %v6414_v15, 2 }
 0x29c   : > { %2234 = vst.msk [vmem:[#allocation2 + $0xc9] sm:$0xff] %vm435_vm0, %v2202_v1  ;;  %v2200_v35 = vmax.f32 %v2112_v14, 0.0  ;;  %v1846_v52 = vpop.permute.xlu1 %1845  ;;  %v2424_v1 = vrot.slane %v2277_v54, 1 }
 0x29d   : > { %1913 = vst.msk [vmem:[#allocation3 + $0xe8] sm:$0xff] %vm1883_vm12, %v1846_v52  ;;  %v2472_v3 = vpop.permute.xlu0 %2471  ;;  %v1944_v57 = vld [vmem:[#allocation3 + $0xe0] sm:$0xff]  ;;  %v6557_v43 = vsel %vm696_vm2, %v2417_v28, %v2419_v32  ;;  %v6589_v44 = vsel %vm906_vm3, %v2625_v50, %v2627_v29 }
 0x29e   : > { %2232 = vst.msk [vmem:[#allocation2 + $0xb1] sm:$0xff] %vm435_vm0, %v2200_v35  ;;  %3220 = vrot.lane.b32.xlu1 %v6439_v6, %s4843_s15  ;;  %v2630_v35 = vrot.slane %v6432_v33, 2 }
 0x29f   : > { %2567 = vst.msk [vmem:[#allocation3] sm:$0xff] %vm873_vm4, %v2472_v3  ;;  %v6535_v36 = vld [vmem:[#allocation2 + $0xc0] sm:$0xff]  ;;  %3352 = vrot.lane.b32.xlu0 %v6533_v26, %s4844_s16  ;;  %v6652_v3 = vsel %vm696_vm2, %v2422_v42, %v2424_v1 }
 0x2a0   : > { %v1850_v48 = vpop.permute.xlu1 %1849  ;;  %2327 = vst.msk [vmem:[#allocation3 + $0x80] sm:$0xff] %vm435_vm0, %v6535_v36 }
 0x2a1   : > { %1915 = vst.msk [vmem:[#allocation3 + $0xf8] sm:$0xff] %vm1883_vm12, %v1850_v48  ;;  %v6542_v47 = vld [vmem:[#allocation2 + $0xa8] sm:$0xff]  ;;  %v2476_v16 = vpop.permute.xlu0 %2475  ;;  %v6660_v48 = vsel %vm906_vm3, %v2629_v0, %v2630_v35 }
 0x2a2   : > { %3350 = vrot.lane.b32.xlu1 %v6486_v30, %s4844_s16  ;;  %2325 = vst.msk [vmem:[#allocation3 + $0x70] sm:$0xff] %vm435_vm0, %v6542_v47  ;;  %v1946_v38 = vld [vmem:[#allocation3 + $0xf0] sm:$0xff]  ;;  %v2426_v27 = vrot.slane %v6542_v47, 1 }
 0x2a3   : > { %2569 = vst.msk [vmem:[#allocation3 + $0x10] sm:$0xff] %vm873_vm4, %v2476_v16  ;;  %v6549_v53 = vld [vmem:[#allocation2 + $0xc8] sm:$0xff]  ;;  %3481 = vrot.lane.b32.xlu0 %v6493_v45, %s4845_s25 }
 0x2a4   : > { %v2474_v34 = vpop.permute.xlu1 %2473  ;;  %v1945_v5 = vld [vmem:[#allocation3 + $0xe8] sm:$0xff]  ;;  %2328 = vst.msk [vmem:[#allocation3 + $0x88] sm:$0xff] %vm435_vm0, %v6549_v53 }
 0x2a5   : > { %2568 = vst.msk [vmem:[#allocation3 + $0x8] sm:$0xff] %vm873_vm4, %v2474_v34  ;;  %v1962_v17 = vpack.c.bf16 %v1945_v5, %v1944_v57  ;;  %v6559_v4 = vld [vmem:[#allocation2 + $0xb0] sm:$0xff]  ;;  %v2680_v9 = vpop.permute.xlu0 %2679  ;;  %v2632_v57 = vrot.slane %v2277_v54, 2 }
 0x2a6   : > { %3354 = vrot.lane.b32.xlu1 %v6557_v43, %s4844_s16  ;;  %2326 = vst.msk [vmem:[#allocation3 + $0x78] sm:$0xff] %vm435_vm0, %v6559_v4 }
 0x2a7   : > { %2775 = vst.msk [vmem:[#allocation3] sm:$0xff] %vm1083_vm6, %v2680_v9  ;;  %4704 = vmatprep.mubr.msk.bf16.mxu0 %vm1973_vm13, %v1962_v17  ;;  %2487 = vrot.lane.b32.xlu0 %v6473_v12, %s4838_s28  ;;  %v6684_v9 = vsel %vm906_vm3, %v2630_v35, %v2632_v57 }
 0x2a8   : > { %v2478_v21 = vpop.permute.xlu1 %2477  ;;  %v1947_v58 = vld [vmem:[#allocation3 + $0xf8] sm:$0xff] }
 0x2a9   : > { %2570 = vst.msk [vmem:[#allocation3 + $0x18] sm:$0xff] %vm873_vm4, %v2478_v21  ;;  %v1963_v7 = vpack.c.bf16 %v1947_v58, %v1946_v38  ;;  %v2684_v46 = vpop.permute.xlu0 %2683  ;;  %v2427_v58 = vrot.slane %v6559_v4, 1 }
 0x2aa   : > { %3483 = vrot.lane.b32.xlu1 %v6506_v40, %s4845_s25  ;;  %2777 = vst.msk [vmem:[#allocation3 + $0x10] sm:$0xff] %vm1083_vm6, %v2684_v46 }
 0x2ab   : > { %4705 = vmatmul.mubr.msk.bf16.gmra.mxu0 %vm1973_vm13, %v1963_v7  ;;  %3485 = vrot.lane.b32.xlu0 %v6577_v49, %s4845_s25 }
 0x2ac   : > { %v2682_v61 = vpop.permute.xlu1 %2681 }
 0x2ad   : > { %2776 = vst.msk [vmem:[#allocation3 + $0x8] sm:$0xff] %vm1083_vm6, %v2682_v61  ;;  %v2810_v10 = vpop.permute.xlu0 %2809 }
 0x2ae   : > { %2489 = vrot.lane.b32.xlu1 %v6486_v30, %s4838_s28  ;;  %2905 = vst.msk [vmem:[#allocation3] sm:$0xff] %vm1214_vm7, %v2810_v10 }
 0x2af   : > { %2491 = vrot.lane.b32.xlu0 %v6533_v26, %s4838_s28 }
 0x2b0   : > { %v2686_v12 = vpop.permute.xlu1 %2685 }
 0x2b1   : > { %2778 = vst.msk [vmem:[#allocation3 + $0x18] sm:$0xff] %vm1083_vm6, %v2686_v12  ;;  %v2814_v60 = vpop.permute.xlu0 %2813 }
 0x2b2   : > { %3487 = vrot.lane.b32.xlu1 %v6589_v44, %s4845_s25  ;;  %2907 = vst.msk [vmem:[#allocation3 + $0x10] sm:$0xff] %vm1214_vm7, %v2814_v60 }
 0x2b3   : > { %2695 = vrot.lane.b32.xlu0 %v6493_v45, %s4839_s29 }
 0x2b4   : > { %v2812_v22 = vpop.permute.xlu1 %2811 }
 0x2b5   : > { %2906 = vst.msk [vmem:[#allocation3 + $0x8] sm:$0xff] %vm1214_vm7, %v2812_v22  ;;  %v2944_v56 = vpop.permute.xlu0 %2943 }
 0x2b6   : > { %2493 = vrot.lane.b32.xlu1 %v6557_v43, %s4838_s28  ;;  %3039 = vst.msk [vmem:[#allocation3] sm:$0xff] %vm1349_vm8, %v2944_v56 }
 0x2b7   : > { %2699 = vrot.lane.b32.xlu0 %v6577_v49, %s4839_s29 }
 0x2b8   : > { %v2816_v37 = vpop.permute.xlu1 %2815 }
 0x2b9   : > { %2908 = vst.msk [vmem:[#allocation3 + $0x18] sm:$0xff] %vm1214_vm7, %v2816_v37  ;;  %v2948_v30 = vpop.permute.xlu0 %2947 }
 0x2ba   : > { %2697 = vrot.lane.b32.xlu1 %v6506_v40, %s4839_s29  ;;  %3041 = vst.msk [vmem:[#allocation3 + $0x10] sm:$0xff] %vm1349_vm8, %v2948_v30  ;;  %v2635_v30 = vrot.slane %v6559_v4, 2 }
 0x2bb   : > { %2825 = vrot.lane.b32.xlu0 %v6424_v55, %s4840_s30 }
 0x2bc   : > { %v2946_v18 = vpop.permute.xlu1 %2945 }
 0x2bd   : > { %3040 = vst.msk [vmem:[#allocation3 + $0x8] sm:$0xff] %vm1349_vm8, %v2946_v18  ;;  %v3077_v11 = vpop.permute.xlu0 %3076 }
 0x2be   : > { %2701 = vrot.lane.b32.xlu1 %v6589_v44, %s4839_s29  ;;  %3172 = vst.msk [vmem:[#allocation3] sm:$0xff] %vm1483_vm9, %v3077_v11  ;;  %v2634_v11 = vrot.slane %v6542_v47, 2 }
 0x2bf   : > { %2829 = vrot.lane.b32.xlu0 %v6414_v15, %s4840_s30 }
 0x2c0   : > { %v2950_v45 = vpop.permute.xlu1 %2949 }
 0x2c1   : > { %3042 = vst.msk [vmem:[#allocation3 + $0x18] sm:$0xff] %vm1349_vm8, %v2950_v45  ;;  %v3081_v59 = vpop.permute.xlu0 %3080 }
 0x2c2   : > { %2827 = vrot.lane.b32.xlu1 %v6439_v6, %s4840_s30  ;;  %3174 = vst.msk [vmem:[#allocation3 + $0x10] sm:$0xff] %vm1483_vm9, %v3081_v59  ;;  %v6735_v59 = vsel %vm906_vm3, %v2634_v11, %v2635_v30 }
 0x2c3   : > { %v4694_v55 = vpop.f32.mrf.mxu0  ;;  %2959 = vrot.lane.b32.xlu0 %v6533_v26, %s4841_s13 }
 0x2c4   : > { %v2133_v23 = vadd.f32 %v6622_v20, %v4694_v55  ;;  %v3079_v63 = vpop.permute.xlu1 %3078 }
 0x2c5   : > { %3173 = vst.msk [vmem:[#allocation3 + $0x8] sm:$0xff] %vm1483_vm9, %v3079_v63  ;;  %v2124_v6 = vpop.f32.mrf.mxu0  ;;  %v3207_v62 = vpop.permute.xlu0 %3206 }
 0x2c6   : > { %v2205_v8 = vmax.f32 %v2133_v23, 0.0  ;;  %v2125_v40 = vadd.f32 %v6622_v20, %v2124_v6  ;;  %2831 = vrot.lane.b32.xlu1 %v6432_v33, %s4840_s30  ;;  %3302 = vst.msk [vmem:[#allocation3] sm:$0xff] %vm1614_vm10, %v3207_v62 }
 0x2c7   : > { %v4695_v25 = vpop.f32.mrf.mxu0  ;;  %2963 = vrot.lane.b32.xlu0 %v6634_v31, %s4841_s13 }
 0x2c8   : > { %2237 = vst.msk [vmem:[#allocation2 + $0xf1] sm:$0xff] %vm435_vm0, %v2205_v8  ;;  %v2203_v39 = vmax.f32 %v2125_v40, 0.0  ;;  %v2136_v41 = vadd.f32 %v6622_v20, %v4695_v25  ;;  %v3083_v19 = vpop.permute.xlu1 %3082 }
 0x2c9   : > { %3175 = vst.msk [vmem:[#allocation3 + $0x18] sm:$0xff] %vm1483_vm9, %v3083_v19  ;;  %v2127_v24 = vpop.f32.mrf.mxu0  ;;  %v3211_v28 = vpop.permute.xlu0 %3210 }
 0x2ca   : > { %2235 = vst.msk [vmem:[#allocation2 + $0xd9] sm:$0xff] %vm435_vm0, %v2203_v39  ;;  %v2206_v14 = vmax.f32 %v2136_v41, 0.0  ;;  %v2128_v51 = vadd.f32 %v6622_v20, %v2127_v24  ;;  %2961 = vrot.lane.b32.xlu1 %v6557_v43, %s4841_s13 }
 0x2cb   : > { %3304 = vst.msk [vmem:[#allocation3 + $0x10] sm:$0xff] %vm1614_vm10, %v3211_v28  ;;  %3092 = vrot.lane.b32.xlu0 %v6577_v49, %s4842_s14  ;;  %v2280_v49 = vld [vmem:[#allocation2 + $0xb8] sm:$0x3] }
 0x2cc   : > { %2238 = vst.msk [vmem:[#allocation2 + $0xf9] sm:$0xff] %vm435_vm0, %v2206_v14  ;;  %v2204_v52 = vmax.f32 %v2128_v51, 0.0  ;;  %v3209_v2 = vpop.permute.xlu1 %3208  ;;  %v2429_v29 = vrot.slane %v2280_v49, 1  ;;  %v2637_v6 = vrot.slane %v2280_v49, 2 }
 0x2cd   : > { %3303 = vst.msk [vmem:[#allocation3 + $0x8] sm:$0xff] %vm1614_vm10, %v3209_v2  ;;  %v3341_v26 = vpop.permute.xlu0 %3340 }
 0x2ce   : > { %2236 = vst.msk [vmem:[#allocation2 + $0xe1] sm:$0xff] %vm435_vm0, %v2204_v52  ;;  %2965 = vrot.lane.b32.xlu1 %v6652_v3, %s4841_s13  ;;  %v6720_v22 = vsel %vm696_vm2, %v2427_v58, %v2429_v29  ;;  %v6748_v40 = vsel %vm906_vm3, %v2635_v30, %v2637_v6  ;;  %v2639_v29 = vrot.slane %v6535_v36, 2 }
 0x2cf   : > { %3436 = vst.msk [vmem:[#allocation3] sm:$0xff] %vm1749_vm11, %v3341_v26  ;;  %v6662_v32 = vld [vmem:[#allocation2 + $0xf0] sm:$0xff]  ;;  %3096 = vrot.lane.b32.xlu0 %v6660_v48, %s4842_s14 }
 0x2d0   : > { %v3213_v16 = vpop.permute.xlu1 %3212  ;;  %2331 = vst.msk [vmem:[#allocation3 + $0xa0] sm:$0xff] %vm435_vm0, %v6662_v32 }
 0x2d1   : > { %3305 = vst.msk [vmem:[#allocation3 + $0x18] sm:$0xff] %vm1614_vm10, %v3213_v16  ;;  %v6669_v34 = vld [vmem:[#allocation2 + $0xd8] sm:$0xff]  ;;  %v3345_v5 = vpop.permute.xlu0 %3344  ;;  %v2432_v16 = vrot.slane %v6549_v53, 1 }
 0x2d2   : > { %3094 = vrot.lane.b32.xlu1 %v6589_v44, %s4842_s14  ;;  %2329 = vst.msk [vmem:[#allocation3 + $0x90] sm:$0xff] %vm435_vm0, %v6669_v34 }
 0x2d3   : > { %3438 = vst.msk [vmem:[#allocation3 + $0x10] sm:$0xff] %vm1749_vm11, %v3345_v5  ;;  %v6676_v43 = vld [vmem:[#allocation2 + $0xf8] sm:$0xff]  ;;  %3222 = vrot.lane.b32.xlu0 %v6414_v15, %s4843_s15 }
 0x2d4   : > { %v3343_v17 = vpop.permute.xlu1 %3342  ;;  %2332 = vst.msk [vmem:[#allocation3 + $0xa8] sm:$0xff] %vm435_vm0, %v6676_v43 }
 0x2d5   : > { %3437 = vst.msk [vmem:[#allocation3 + $0x8] sm:$0xff] %vm1749_vm11, %v3343_v17  ;;  %v6686_v38 = vld [vmem:[#allocation2 + $0xe0] sm:$0xff]  ;;  %v3474_v50 = vpop.permute.xlu0 %3473  ;;  %v2431_v17 = vrot.slane %v6535_v36, 1 }
 0x2d6   : > { %3098 = vrot.lane.b32.xlu1 %v6684_v9, %s4842_s14  ;;  %2330 = vst.msk [vmem:[#allocation3 + $0x98] sm:$0xff] %vm435_vm0, %v6686_v38 }
 0x2d7   : > { %3569 = vst.msk [vmem:[#allocation3] sm:$0xff] %vm1883_vm12, %v3474_v50  ;;  %3226 = vrot.lane.b32.xlu0 %v6542_v47, %s4843_s15  ;;  %v6794_v50 = vsel %vm696_vm2, %v2431_v17, %v2432_v16 }
 0x2d8   : > { %v3347_v15 = vpop.permute.xlu1 %3346 }
 0x2d9   : > { %3439 = vst.msk [vmem:[#allocation3 + $0x18] sm:$0xff] %vm1749_vm11, %v3347_v15  ;;  %v2480_v21 = vpop.permute.xlu0 %2479 }
 0x2da   : > { %3224 = vrot.lane.b32.xlu1 %v6432_v33, %s4843_s15  ;;  %2571 = vst.msk [vmem:[#allocation3 + $0x20] sm:$0xff] %vm873_vm4, %v2480_v21  ;;  %v6708_v33 = vsel %vm696_vm2, %v2426_v27, %v2427_v58 }
 0x2db   : > { %3356 = vrot.lane.b32.xlu0 %v6634_v31, %s4844_s16 }
 0x2dc   : > { %v3476_v7 = vpop.permute.xlu1 %3475 }
 0x2dd   : > { %3570 = vst.msk [vmem:[#allocation3 + $0x8] sm:$0xff] %vm1883_vm12, %v3476_v7  ;;  %v3478_v46 = vpop.permute.xlu0 %3477 }
 0x2de   : > { %3228 = vrot.lane.b32.xlu1 %v6559_v4, %s4843_s15  ;;  %3571 = vst.msk [vmem:[#allocation3 + $0x10] sm:$0xff] %vm1883_vm12, %v3478_v46  ;;  %v3601_v44 = vld [vmem:[#allocation3] sm:$0xff]  ;;  %v2640_v46 = vrot.slane %v6549_v53, 2 }
 0x2df   : > { %3360 = vrot.lane.b32.xlu0 %v6708_v33, %s4844_s16 }
 0x2e0   : > { %v2482_v61 = vpop.permute.xlu1 %2481 }
 0x2e1   : > { %2572 = vst.msk [vmem:[#allocation3 + $0x28] sm:$0xff] %vm873_vm4, %v2482_v61  ;;  %v2484_v10 = vpop.permute.xlu0 %2483 }
 0x2e2   : > { %3358 = vrot.lane.b32.xlu1 %v6652_v3, %s4844_s16  ;;  %2573 = vst.msk [vmem:[#allocation3 + $0x30] sm:$0xff] %vm873_vm4, %v2484_v10 }
 0x2e3   : > { %3489 = vrot.lane.b32.xlu0 %v6660_v48, %s4845_s25 }
 0x2e4   : > { %v3480_v12 = vpop.permute.xlu1 %3479  ;;  %v3602_v60 = vld [vmem:[#allocation3 + $0x8] sm:$0xff] }
 0x2e5   : > { %3572 = vst.msk [vmem:[#allocation3 + $0x18] sm:$0xff] %vm1883_vm12, %v3480_v12  ;;  %v3633_v56 = vpack.c.bf16 %v3602_v60, %v3601_v44  ;;  %v2688_v37 = vpop.permute.xlu0 %2687  ;;  %v3603_v42 = vld [vmem:[#allocation3 + $0x10] sm:$0xff]  ;;  %v6830_v44 = vsel %vm906_vm3, %v2639_v29, %v2640_v46 }
 0x2e6   : > { %3362 = vrot.lane.b32.xlu1 %v6720_v22, %s4844_s16  ;;  %2779 = vst.msk [vmem:[#allocation3 + $0x20] sm:$0xff] %vm1083_vm6, %v2688_v37 }
 0x2e7   : > { %4714 = vmatprep.mubr.msk.bf16.mxu1 %vm1973_vm13, %v3633_v56  ;;  %2495 = vrot.lane.b32.xlu0 %v6634_v31, %s4838_s28 }
 0x2e8   : > { %v2486_v18 = vpop.permute.xlu1 %2485 }
 0x2e9   : > { %2574 = vst.msk [vmem:[#allocation3 + $0x38] sm:$0xff] %vm873_vm4, %v2486_v18  ;;  %v2692_v45 = vpop.permute.xlu0 %2691 }
 0x2ea   : > { %3491 = vrot.lane.b32.xlu1 %v6684_v9, %s4845_s25  ;;  %2781 = vst.msk [vmem:[#allocation3 + $0x30] sm:$0xff] %vm1083_vm6, %v2692_v45  ;;  %v2437_v45 = vrot.slane %v6686_v38, 1 }
 0x2eb   : > { %3493 = vrot.lane.b32.xlu0 %v6735_v59, %s4845_s25 }
 0x2ec   : > { %v2690_v55 = vpop.permute.xlu1 %2689  ;;  %v3604_v23 = vld [vmem:[#allocation3 + $0x18] sm:$0xff] }
 0x2ed   : > { %2780 = vst.msk [vmem:[#allocation3 + $0x28] sm:$0xff] %vm1083_vm6, %v2690_v55  ;;  %v3634_v63 = vpack.c.bf16 %v3604_v23, %v3603_v42  ;;  %v2818_v13 = vpop.permute.xlu0 %2817  ;;  %v2436_v55 = vrot.slane %v6669_v34, 1  ;;  %v2286_v23 = vld [vmem:[#allocation2 + $0xe8] sm:$0x3] }
 0x2ee   : > { %2497 = vrot.lane.b32.xlu1 %v6652_v3, %s4838_s28  ;;  %2909 = vst.msk [vmem:[#allocation3 + $0x20] sm:$0xff] %vm1214_vm7, %v2818_v13  ;;  %v2439_v6 = vrot.slane %v2286_v23, 1 }
 0x2ef   : > { %4715 = vmatmul.mubr.msk.bf16.vlgmr.msra.gmra.mxu1 %vm1973_vm13, %v3634_v63  ;;  %2499 = vrot.lane.b32.xlu0 %v6708_v33, %s4838_s28 }
 0x2f0   : > { %v2694_v8 = vpop.permute.xlu1 %2693 }
 0x2f1   : > { %2782 = vst.msk [vmem:[#allocation3 + $0x38] sm:$0xff] %vm1083_vm6, %v2694_v8  ;;  %v2822_v62 = vpop.permute.xlu0 %2821 }
 0x2f2   : > { %3495 = vrot.lane.b32.xlu1 %v6748_v40, %s4845_s25  ;;  %2911 = vst.msk [vmem:[#allocation3 + $0x30] sm:$0xff] %vm1214_vm7, %v2822_v62 }
 0x2f3   : > { %2703 = vrot.lane.b32.xlu0 %v6660_v48, %s4839_s29 }
 0x2f4   : > { %v2820_v54 = vpop.permute.xlu1 %2819 }
 0x2f5   : > { %2910 = vst.msk [vmem:[#allocation3 + $0x28] sm:$0xff] %vm1214_vm7, %v2820_v54  ;;  %v2952_v25 = vpop.permute.xlu0 %2951  ;;  %v6874_v54 = vsel %vm696_vm2, %v2437_v45, %v2439_v6 }
 0x2f6   : > { %2501 = vrot.lane.b32.xlu1 %v6720_v22, %s4838_s28  ;;  %3043 = vst.msk [vmem:[#allocation3 + $0x20] sm:$0xff] %vm1349_vm8, %v2952_v25 }
 0x2f7   : > { %2707 = vrot.lane.b32.xlu0 %v6735_v59, %s4839_s29 }
 0x2f8   : > { %v2824_v31 = vpop.permute.xlu1 %2823 }
 0x2f9   : > { %2912 = vst.msk [vmem:[#allocation3 + $0x38] sm:$0xff] %vm1214_vm7, %v2824_v31  ;;  %v2956_v39 = vpop.permute.xlu0 %2955 }
 0x2fa   : > { %2705 = vrot.lane.b32.xlu1 %v6684_v9, %s4839_s29  ;;  %3045 = vst.msk [vmem:[#allocation3 + $0x30] sm:$0xff] %vm1349_vm8, %v2956_v39  ;;  %v2283_v9 = vld [vmem:[#allocation2 + $0xd0] sm:$0x3]  ;;  %v2645_v39 = vrot.slane %v6686_v38, 2 }
 0x2fb   : > { %v4698_v41 = vpop.f32.mrf.mxu0  ;;  %2833 = vrot.lane.b32.xlu0 %v6542_v47, %s4840_s30  ;;  %v2434_v58 = vrot.slane %v2283_v9, 1 }
 0x2fc   : > { %v2149_v19 = vadd.f32 %v6622_v20, %v4698_v41  ;;  %v2954_v24 = vpop.permute.xlu1 %2953 }
 0x2fd   : > { %3044 = vst.msk [vmem:[#allocation3 + $0x28] sm:$0xff] %vm1349_vm8, %v2954_v24  ;;  %v2140_v1 = vpop.f32.mrf.mxu0  ;;  %v3085_v28 = vpop.permute.xlu0 %3084  ;;  %v6819_v61 = vsel %vm696_vm2, %v2432_v16, %v2434_v58 }
 0x2fe   : > { %v2209_v14 = vmax.f32 %v2149_v19, 0.0  ;;  %v2141_v51 = vadd.f32 %v6622_v20, %v2140_v1  ;;  %2709 = vrot.lane.b32.xlu1 %v6748_v40, %s4839_s29  ;;  %3176 = vst.msk [vmem:[#allocation3 + $0x20] sm:$0xff] %vm1483_vm9, %v3085_v28  ;;  %v2644_v19 = vrot.slane %v6669_v34, 2 }
 0x2ff   : > { %v4699_v35 = vpop.f32.mrf.mxu0  ;;  %2837 = vrot.lane.b32.xlu0 %v6535_v36, %s4840_s30 }
 0x300   : > { %2241 = vst.msk [vmem:[#allocation2 + $0x121] sm:$0xff] %vm435_vm0, %v2209_v14  ;;  %v2207_v52 = vmax.f32 %v2141_v51, 0.0  ;;  %v2152_v2 = vadd.f32 %v6622_v20, %v4699_v35  ;;  %v2958_v3 = vpop.permute.xlu1 %2957  ;;  %v6889_v1 = vsel %vm906_vm3, %v2644_v19, %v2645_v39 }
 0x301   : > { %3046 = vst.msk [vmem:[#allocation3 + $0x38] sm:$0xff] %vm1349_vm8, %v2958_v3  ;;  %v2143_v47 = vpop.f32.mrf.mxu0  ;;  %v3089_v48 = vpop.permute.xlu0 %3088 }
 0x302   : > { %2239 = vst.msk [vmem:[#allocation2 + $0x109] sm:$0xff] %vm435_vm0, %v2207_v52  ;;  %v2210_v0 = vmax.f32 %v2152_v2, 0.0  ;;  %v2144_v26 = vadd.f32 %v6622_v20, %v2143_v47  ;;  %2835 = vrot.lane.b32.xlu1 %v6559_v4, %s4840_s30  ;;  %v2647_v52 = vrot.slane %v2286_v23, 2 }
 0x303   : > { %3178 = vst.msk [vmem:[#allocation3 + $0x30] sm:$0xff] %vm1483_vm9, %v3089_v48  ;;  %2967 = vrot.lane.b32.xlu0 %v6708_v33, %s4841_s13 }
 0x304   : > { %2242 = vst.msk [vmem:[#allocation2 + $0x129] sm:$0xff] %vm435_vm0, %v2210_v0  ;;  %v2208_v57 = vmax.f32 %v2144_v26, 0.0  ;;  %v3087_v5 = vpop.permute.xlu1 %3086  ;;  %v6902_v47 = vsel %vm906_vm3, %v2645_v39, %v2647_v52 }
 0x305   : > { %3177 = vst.msk [vmem:[#allocation3 + $0x28] sm:$0xff] %vm1483_vm9, %v3087_v5  ;;  %v3215_v4 = vpop.permute.xlu0 %3214 }
 0x306   : > { %2240 = vst.msk [vmem:[#allocation2 + $0x111] sm:$0xff] %vm435_vm0, %v2208_v57  ;;  %2839 = vrot.lane.b32.xlu1 %v6549_v53, %s4840_s30 }
 0x307   : > { %3306 = vst.msk [vmem:[#allocation3 + $0x20] sm:$0xff] %vm1614_vm10, %v3215_v4  ;;  %v6796_v15 = vld [vmem:[#allocation2 + $0x120] sm:$0xff]  ;;  %2971 = vrot.lane.b32.xlu0 %v6794_v50, %s4841_s13 }
 0x308   : > { %v3091_v21 = vpop.permute.xlu1 %3090  ;;  %2335 = vst.msk [vmem:[#allocation3 + $0xc0] sm:$0xff] %vm435_vm0, %v6796_v15 }
 0x309   : > { %3179 = vst.msk [vmem:[#allocation3 + $0x38] sm:$0xff] %vm1483_vm9, %v3091_v21  ;;  %v6803_v7 = vld [vmem:[#allocation2 + $0x108] sm:$0xff]  ;;  %v3219_v27 = vpop.permute.xlu0 %3218 }
 0x30a   : > { %2969 = vrot.lane.b32.xlu1 %v6720_v22, %s4841_s13  ;;  %2333 = vst.msk [vmem:[#allocation3 + $0xb0] sm:$0xff] %vm435_vm0, %v6803_v7  ;;  %v2642_v22 = vrot.slane %v2283_v9, 2 }
 0x30b   : > { %3308 = vst.msk [vmem:[#allocation3 + $0x30] sm:$0xff] %vm1614_vm10, %v3219_v27  ;;  %v6811_v49 = vld [vmem:[#allocation2 + $0x128] sm:$0xff]  ;;  %3100 = vrot.lane.b32.xlu0 %v6735_v59, %s4842_s14 }
 0x30c   : > { %v3217_v33 = vpop.permute.xlu1 %3216  ;;  %2336 = vst.msk [vmem:[#allocation3 + $0xc8] sm:$0xff] %vm435_vm0, %v6811_v49  ;;  %v6842_v30 = vsel %vm906_vm3, %v2640_v46, %v2642_v22 }
 0x30d   : > { %3307 = vst.msk [vmem:[#allocation3 + $0x28] sm:$0xff] %vm1614_vm10, %v3217_v33  ;;  %v6822_v10 = vld [vmem:[#allocation2 + $0x110] sm:$0xff]  ;;  %v3349_v12 = vpop.permute.xlu0 %3348 }
 0x30e   : > { %2973 = vrot.lane.b32.xlu1 %v6819_v61, %s4841_s13  ;;  %2334 = vst.msk [vmem:[#allocation3 + $0xb8] sm:$0xff] %vm435_vm0, %v6822_v10 }
 0x30f   : > { %3440 = vst.msk [vmem:[#allocation3 + $0x20] sm:$0xff] %vm1749_vm11, %v3349_v12  ;;  %3104 = vrot.lane.b32.xlu0 %v6830_v44, %s4842_s14 }
 0x310   : > { %v3221_v60 = vpop.permute.xlu1 %3220 }
 0x311   : > { %3309 = vst.msk [vmem:[#allocation3 + $0x38] sm:$0xff] %vm1614_vm10, %v3221_v60  ;;  %v3353_v56 = vpop.permute.xlu0 %3352 }
 0x312   : > { %3102 = vrot.lane.b32.xlu1 %v6748_v40, %s4842_s14  ;;  %3442 = vst.msk [vmem:[#allocation3 + $0x30] sm:$0xff] %vm1749_vm11, %v3353_v56 }
 0x313   : > { %3230 = vrot.lane.b32.xlu0 %v6535_v36, %s4843_s15 }
 0x314   : > { %v3351_v37 = vpop.permute.xlu1 %3350 }
 0x315   : > { %3441 = vst.msk [vmem:[#allocation3 + $0x28] sm:$0xff] %vm1749_vm11, %v3351_v37  ;;  %v3482_v18 = vpop.permute.xlu0 %3481  ;;  %v2442_v37 = vrot.slane %v6676_v43, 1 }
 0x316   : > { %3106 = vrot.lane.b32.xlu1 %v6842_v30, %s4842_s14  ;;  %3573 = vst.msk [vmem:[#allocation3 + $0x20] sm:$0xff] %vm1883_vm12, %v3482_v18 }
 0x317   : > { %3234 = vrot.lane.b32.xlu0 %v6669_v34, %s4843_s15 }
 0x318   : > { %v3355_v11 = vpop.permute.xlu1 %3354 }
 0x319   : > { %3443 = vst.msk [vmem:[#allocation3 + $0x38] sm:$0xff] %vm1749_vm11, %v3355_v11  ;;  %v2488_v36 = vpop.permute.xlu0 %2487 }
 0x31a   : > { %3232 = vrot.lane.b32.xlu1 %v6549_v53, %s4843_s15  ;;  %2575 = vst.msk [vmem:[#allocation3 + $0x40] sm:$0xff] %vm873_vm4, %v2488_v36  ;;  %v6862_v53 = vsel %vm696_vm2, %v2436_v55, %v2437_v45  ;;  %v2289_v45 = vld [vmem:[#allocation2 + $0x100] sm:$0x3] }
 0x31b   : > { %3364 = vrot.lane.b32.xlu0 %v6794_v50, %s4844_s16 }
 0x31c   : > { %v3484_v59 = vpop.permute.xlu1 %3483 }
 0x31d   : > { %3574 = vst.msk [vmem:[#allocation3 + $0x28] sm:$0xff] %vm1883_vm12, %v3484_v59  ;;  %v3486_v42 = vpop.permute.xlu0 %3485  ;;  %v3605_v40 = vld [vmem:[#allocation3 + $0x20] sm:$0xff] }
 0x31e   : > { %3236 = vrot.lane.b32.xlu1 %v6686_v38, %s4843_s15  ;;  %3575 = vst.msk [vmem:[#allocation3 + $0x30] sm:$0xff] %vm1883_vm12, %v3486_v42  ;;  %v2444_v42 = vrot.slane %v2289_v45, 1 }
 0x31f   : > { %3368 = vrot.lane.b32.xlu0 %v6862_v53, %s4844_s16 }
 0x320   : > { %v2490_v63 = vpop.permute.xlu1 %2489  ;;  %v6977_v6 = vsel %vm696_vm2, %v2442_v37, %v2444_v42 }
 0x321   : > { %2576 = vst.msk [vmem:[#allocation3 + $0x48] sm:$0xff] %vm873_vm4, %v2490_v63  ;;  %v2492_v13 = vpop.permute.xlu0 %2491 }
 0x322   : > { %3366 = vrot.lane.b32.xlu1 %v6819_v61, %s4844_s16  ;;  %2577 = vst.msk [vmem:[#allocation3 + $0x50] sm:$0xff] %vm873_vm4, %v2492_v13  ;;  %v2649_v13 = vrot.slane %v6662_v32, 2 }
 0x323   : > { %3497 = vrot.lane.b32.xlu0 %v6830_v44, %s4845_s25 }
 0x324   : > { %v3488_v8 = vpop.permute.xlu1 %3487  ;;  %v3606_v62 = vld [vmem:[#allocation3 + $0x28] sm:$0xff] }
 0x325   : > { %3576 = vst.msk [vmem:[#allocation3 + $0x38] sm:$0xff] %vm1883_vm12, %v3488_v8  ;;  %v3635_v25 = vpack.c.bf16 %v3606_v62, %v3605_v40  ;;  %v2696_v31 = vpop.permute.xlu0 %2695  ;;  %v3607_v51 = vld [vmem:[#allocation3 + $0x30] sm:$0xff] }
 0x326   : > { %3370 = vrot.lane.b32.xlu1 %v6874_v54, %s4844_s16  ;;  %2783 = vst.msk [vmem:[#allocation3 + $0x40] sm:$0xff] %vm1083_vm6, %v2696_v31 }
 0x327   : > { %4718 = vmatprep.mubr.msk.bf16.mxu1 %vm1973_vm13, %v3635_v25  ;;  %2503 = vrot.lane.b32.xlu0 %v6794_v50, %s4838_s28 }
 0x328   : > { %v2494_v41 = vpop.permute.xlu1 %2493 }
 0x329   : > { %2578 = vst.msk [vmem:[#allocation3 + $0x58] sm:$0xff] %vm873_vm4, %v2494_v41  ;;  %v2700_v24 = vpop.permute.xlu0 %2699 }
 0x32a   : > { %3499 = vrot.lane.b32.xlu1 %v6842_v30, %s4845_s25  ;;  %2785 = vst.msk [vmem:[#allocation3 + $0x50] sm:$0xff] %vm1083_vm6, %v2700_v24  ;;  %v2447_v24 = vrot.slane %v6822_v10, 1 }
 0x32b   : > { %3501 = vrot.lane.b32.xlu0 %v6889_v1, %s4845_s25 }
 0x32c   : > { %v2698_v14 = vpop.permute.xlu1 %2697  ;;  %v3608_v28 = vld [vmem:[#allocation3 + $0x38] sm:$0xff] }
 0x32d   : > { %2784 = vst.msk [vmem:[#allocation3 + $0x48] sm:$0xff] %vm1083_vm6, %v2698_v14  ;;  %v3636_v35 = vpack.c.bf16 %v3608_v28, %v3607_v51  ;;  %v2826_v2 = vpop.permute.xlu0 %2825  ;;  %v2446_v14 = vrot.slane %v6803_v7, 1  ;;  %v2292_v28 = vld [vmem:[#allocation2 + $0x118] sm:$0x3] }
 0x32e   : > { %2505 = vrot.lane.b32.xlu1 %v6819_v61, %s4838_s28  ;;  %2913 = vst.msk [vmem:[#allocation3 + $0x40] sm:$0xff] %vm1214_vm7, %v2826_v2  ;;  %v2449_v52 = vrot.slane %v2292_v28, 1 }
 0x32f   : > { %4719 = vmatmul.mubr.msk.bf16.gmra.mxu1 %vm1973_vm13, %v3636_v35  ;;  %2507 = vrot.lane.b32.xlu0 %v6862_v53, %s4838_s28 }
 0x330   : > { %v2702_v3 = vpop.permute.xlu1 %2701 }
 0x331   : > { %2786 = vst.msk [vmem:[#allocation3 + $0x58] sm:$0xff] %vm1083_vm6, %v2702_v3  ;;  %v2830_v0 = vpop.permute.xlu0 %2829 }
 0x332   : > { %3503 = vrot.lane.b32.xlu1 %v6902_v47, %s4845_s25  ;;  %2915 = vst.msk [vmem:[#allocation3 + $0x50] sm:$0xff] %vm1214_vm7, %v2830_v0 }
 0x333   : > { %v4702_v26 = vpop.f32.mrf.mxu0  ;;  %2711 = vrot.lane.b32.xlu0 %v6830_v44, %s4839_s29 }
 0x334   : > { %v2165_v48 = vadd.f32 %v6622_v20, %v4702_v26  ;;  %v2828_v16 = vpop.permute.xlu1 %2827  ;;  %v7028_v26 = vsel %vm696_vm2, %v2447_v24, %v2449_v52 }
 0x335   : > { %2914 = vst.msk [vmem:[#allocation3 + $0x48] sm:$0xff] %vm1214_vm7, %v2828_v16  ;;  %v2156_v57 = vpop.f32.mrf.mxu0  ;;  %v2960_v4 = vpop.permute.xlu0 %2959 }
 0x336   : > { %v2213_v5 = vmax.f32 %v2165_v48, 0.0  ;;  %v2157_v17 = vadd.f32 %v6622_v20, %v2156_v57  ;;  %2509 = vrot.lane.b32.xlu1 %v6874_v54, %s4838_s28  ;;  %3047 = vst.msk [vmem:[#allocation3 + $0x40] sm:$0xff] %vm1349_vm8, %v2960_v4  ;;  %v2655_v57 = vrot.slane %v6822_v10, 2 }
 0x337   : > { %v4703_v9 = vpop.f32.mrf.mxu0  ;;  %2715 = vrot.lane.b32.xlu0 %v6889_v1, %s4839_s29 }
 0x338   : > { %2245 = vst.msk [vmem:[#allocation2 + $0x151] sm:$0xff] %vm435_vm0, %v2213_v5  ;;  %v2211_v50 = vmax.f32 %v2157_v17, 0.0  ;;  %v2168_v21 = vadd.f32 %v6622_v20, %v4703_v9  ;;  %v2832_v58 = vpop.permute.xlu1 %2831  ;;  %v2654_v17 = vrot.slane %v6803_v7, 2 }
 0x339   : > { %2916 = vst.msk [vmem:[#allocation3 + $0x58] sm:$0xff] %vm1214_vm7, %v2832_v58  ;;  %v2159_v27 = vpop.f32.mrf.mxu0  ;;  %v2964_v61 = vpop.permute.xlu0 %2963 }
 0x33a   : > { %2243 = vst.msk [vmem:[#allocation2 + $0x139] sm:$0xff] %vm435_vm0, %v2211_v50  ;;  %v2214_v46 = vmax.f32 %v2168_v21, 0.0  ;;  %v2160_v33 = vadd.f32 %v6622_v20, %v2159_v27  ;;  %2713 = vrot.lane.b32.xlu1 %v6842_v30, %s4839_s29  ;;  %v7043_v50 = vsel %vm906_vm3, %v2654_v17, %v2655_v57 }
 0x33b   : > { %3049 = vst.msk [vmem:[#allocation3 + $0x50] sm:$0xff] %vm1349_vm8, %v2964_v61  ;;  %2841 = vrot.lane.b32.xlu0 %v6669_v34, %s4840_s30 }
 0x33c   : > { %2246 = vst.msk [vmem:[#allocation2 + $0x159] sm:$0xff] %vm435_vm0, %v2214_v46  ;;  %v2212_v29 = vmax.f32 %v2160_v33, 0.0  ;;  %v2962_v12 = vpop.permute.xlu1 %2961 }
 0x33d   : > { %3048 = vst.msk [vmem:[#allocation3 + $0x48] sm:$0xff] %vm1349_vm8, %v2962_v12  ;;  %v3093_v44 = vpop.permute.xlu0 %3092 }
 0x33e   : > { %2244 = vst.msk [vmem:[#allocation2 + $0x141] sm:$0xff] %vm435_vm0, %v2212_v29  ;;  %2717 = vrot.lane.b32.xlu1 %v6902_v47, %s4839_s29  ;;  %v2657_v29 = vrot.slane %v2292_v28, 2 }
 0x33f   : > { %3180 = vst.msk [vmem:[#allocation3 + $0x40] sm:$0xff] %vm1483_vm9, %v3093_v44  ;;  %v6933_v60 = vld [vmem:[#allocation2 + $0x150] sm:$0xff]  ;;  %2845 = vrot.lane.b32.xlu0 %v6662_v32, %s4840_s30 }
 0x340   : > { %v2966_v22 = vpop.permute.xlu1 %2965  ;;  %2339 = vst.msk [vmem:[#allocation3 + $0xe0] sm:$0xff] %vm435_vm0, %v6933_v60 }
 0x341   : > { %3050 = vst.msk [vmem:[#allocation3 + $0x58] sm:$0xff] %vm1349_vm8, %v2966_v22  ;;  %v6940_v34 = vld [vmem:[#allocation2 + $0x138] sm:$0xff]  ;;  %v3097_v56 = vpop.permute.xlu0 %3096 }
 0x342   : > { %2843 = vrot.lane.b32.xlu1 %v6686_v38, %s4840_s30  ;;  %2337 = vst.msk [vmem:[#allocation3 + $0xd0] sm:$0xff] %vm435_vm0, %v6940_v34  ;;  %v2441_v38 = vrot.slane %v6662_v32, 1  ;;  %v2456_v17 = vrot.slane %v6940_v34, 1 }
 0x343   : > { %3182 = vst.msk [vmem:[#allocation3 + $0x50] sm:$0xff] %vm1483_vm9, %v3097_v56  ;;  %v6948_v30 = vld [vmem:[#allocation2 + $0x158] sm:$0xff]  ;;  %2975 = vrot.lane.b32.xlu0 %v6862_v53, %s4841_s13  ;;  %v2650_v53 = vrot.slane %v6676_v43, 2 }
 0x344   : > { %v3095_v18 = vpop.permute.xlu1 %3094  ;;  %2340 = vst.msk [vmem:[#allocation3 + $0xe8] sm:$0xff] %vm435_vm0, %v6948_v30  ;;  %v6964_v59 = vsel %vm696_vm2, %v2441_v38, %v2442_v37 }
 0x345   : > { %3181 = vst.msk [vmem:[#allocation3 + $0x48] sm:$0xff] %vm1483_vm9, %v3095_v18  ;;  %v6956_v11 = vld [vmem:[#allocation2 + $0x140] sm:$0xff]  ;;  %v3223_v36 = vpop.permute.xlu0 %3222  ;;  %v6984_v40 = vsel %vm906_vm3, %v2649_v13, %v2650_v53 }
 0x346   : > { %2847 = vrot.lane.b32.xlu1 %v6676_v43, %s4840_s30  ;;  %2338 = vst.msk [vmem:[#allocation3 + $0xd8] sm:$0xff] %vm435_vm0, %v6956_v11 }
 0x347   : > { %3310 = vst.msk [vmem:[#allocation3 + $0x40] sm:$0xff] %vm1614_vm10, %v3223_v36  ;;  %2979 = vrot.lane.b32.xlu0 %v6964_v59, %s4841_s13 }
 0x348   : > { %v3099_v55 = vpop.permute.xlu1 %3098 }
 0x349   : > { %3183 = vst.msk [vmem:[#allocation3 + $0x58] sm:$0xff] %vm1483_vm9, %v3099_v55  ;;  %v3227_v23 = vpop.permute.xlu0 %3226 }
 0x34a   : > { %2977 = vrot.lane.b32.xlu1 %v6874_v54, %s4841_s13  ;;  %3312 = vst.msk [vmem:[#allocation3 + $0x50] sm:$0xff] %vm1614_vm10, %v3227_v23  ;;  %v2652_v54 = vrot.slane %v2289_v45, 2  ;;  %v7060_v45 = vsel %vm906_vm3, %v2655_v57, %v2657_v29  ;;  %v2457_v57 = vrot.slane %v6956_v11, 1 }
 0x34b   : > { %3108 = vrot.lane.b32.xlu0 %v6889_v1, %s4842_s14 }
 0x34c   : > { %v3225_v63 = vpop.permute.xlu1 %3224  ;;  %v6996_v39 = vsel %vm906_vm3, %v2650_v53, %v2652_v54 }
 0x34d   : > { %3311 = vst.msk [vmem:[#allocation3 + $0x48] sm:$0xff] %vm1614_vm10, %v3225_v63  ;;  %v3357_v8 = vpop.permute.xlu0 %3356 }
 0x34e   : > { %2981 = vrot.lane.b32.xlu1 %v6977_v6, %s4841_s13  ;;  %3444 = vst.msk [vmem:[#allocation3 + $0x40] sm:$0xff] %vm1749_vm11, %v3357_v8 }
 0x34f   : > { %3112 = vrot.lane.b32.xlu0 %v6984_v40, %s4842_s14 }
 0x350   : > { %v3229_v62 = vpop.permute.xlu1 %3228 }
 0x351   : > { %3313 = vst.msk [vmem:[#allocation3 + $0x58] sm:$0xff] %vm1614_vm10, %v3229_v62  ;;  %v3361_v25 = vpop.permute.xlu0 %3360 }
 0x352   : > { %3110 = vrot.lane.b32.xlu1 %v6902_v47, %s4842_s14  ;;  %3446 = vst.msk [vmem:[#allocation3 + $0x50] sm:$0xff] %vm1749_vm11, %v3361_v25  ;;  %v2452_v25 = vrot.slane %v6811_v49, 1 }
 0x353   : > { %3238 = vrot.lane.b32.xlu0 %v6662_v32, %s4843_s15 }
 0x354   : > { %v3359_v31 = vpop.permute.xlu1 %3358 }
 0x355   : > { %3445 = vst.msk [vmem:[#allocation3 + $0x48] sm:$0xff] %vm1749_vm11, %v3359_v31  ;;  %v3490_v41 = vpop.permute.xlu0 %3489 }
 0x356   : > { %3114 = vrot.lane.b32.xlu1 %v6996_v39, %s4842_s14  ;;  %3577 = vst.msk [vmem:[#allocation3 + $0x40] sm:$0xff] %vm1883_vm12, %v3490_v41 }
 0x357   : > { %3242 = vrot.lane.b32.xlu0 %v6803_v7, %s4843_s15 }
 0x358   : > { %v3363_v19 = vpop.permute.xlu1 %3362 }
 0x359   : > { %3447 = vst.msk [vmem:[#allocation3 + $0x58] sm:$0xff] %vm1749_vm11, %v3363_v19  ;;  %v2496_v32 = vpop.permute.xlu0 %2495  ;;  %v2295_v19 = vld [vmem:[#allocation2 + $0x130] sm:$0x3] }
 0x35a   : > { %3240 = vrot.lane.b32.xlu1 %v6676_v43, %s4843_s15  ;;  %2579 = vst.msk [vmem:[#allocation3 + $0x60] sm:$0xff] %vm873_vm4, %v2496_v32  ;;  %v7016_v43 = vsel %vm696_vm2, %v2446_v14, %v2447_v24  ;;  %v2454_v24 = vrot.slane %v2295_v19, 1  ;;  %v2660_v14 = vrot.slane %v6811_v49, 2 }
 0x35b   : > { %3372 = vrot.lane.b32.xlu0 %v6964_v59, %s4844_s16 }
 0x35c   : > { %v3492_v1 = vpop.permute.xlu1 %3491  ;;  %v7123_v28 = vsel %vm696_vm2, %v2452_v25, %v2454_v24 }
 0x35d   : > { %3578 = vst.msk [vmem:[#allocation3 + $0x48] sm:$0xff] %vm1883_vm12, %v3492_v1  ;;  %v3494_v51 = vpop.permute.xlu0 %3493  ;;  %v3609_v47 = vld [vmem:[#allocation3 + $0x40] sm:$0xff] }
 0x35e   : > { %3244 = vrot.lane.b32.xlu1 %v6822_v10, %s4843_s15  ;;  %3579 = vst.msk [vmem:[#allocation3 + $0x50] sm:$0xff] %vm1883_vm12, %v3494_v51 }
 0x35f   : > { %3376 = vrot.lane.b32.xlu0 %v7016_v43, %s4844_s16 }
 0x360   : > { %v2498_v35 = vpop.permute.xlu1 %2497 }
 0x361   : > { %2580 = vst.msk [vmem:[#allocation3 + $0x68] sm:$0xff] %vm873_vm4, %v2498_v35  ;;  %v2500_v2 = vpop.permute.xlu0 %2499 }
 0x362   : > { %3374 = vrot.lane.b32.xlu1 %v6977_v6, %s4844_s16  ;;  %2581 = vst.msk [vmem:[#allocation3 + $0x70] sm:$0xff] %vm873_vm4, %v2500_v2 }
 0x363   : > { %3505 = vrot.lane.b32.xlu0 %v6984_v40, %s4845_s25 }
 0x364   : > { %v3496_v3 = vpop.permute.xlu1 %3495  ;;  %v3610_v0 = vld [vmem:[#allocation3 + $0x48] sm:$0xff] }
 0x365   : > { %3580 = vst.msk [vmem:[#allocation3 + $0x58] sm:$0xff] %vm1883_vm12, %v3496_v3  ;;  %v3637_v48 = vpack.c.bf16 %v3610_v0, %v3609_v47  ;;  %v2704_v16 = vpop.permute.xlu0 %2703  ;;  %v3611_v27 = vld [vmem:[#allocation3 + $0x50] sm:$0xff]  ;;  %v2662_v3 = vrot.slane %v2295_v19, 2 }
 0x366   : > { %3378 = vrot.lane.b32.xlu1 %v7028_v26, %s4844_s16  ;;  %2787 = vst.msk [vmem:[#allocation3 + $0x60] sm:$0xff] %vm1083_vm6, %v2704_v16 }
 0x367   : > { %4722 = vmatprep.mubr.msk.bf16.mxu1 %vm1973_vm13, %v3637_v48  ;;  %2511 = vrot.lane.b32.xlu0 %v6964_v59, %s4838_s28 }
 0x368   : > { %v2502_v5 = vpop.permute.xlu1 %2501 }
 0x369   : > { %2582 = vst.msk [vmem:[#allocation3 + $0x78] sm:$0xff] %vm873_vm4, %v2502_v5  ;;  %v2708_v4 = vpop.permute.xlu0 %2707 }
 0x36a   : > { %3507 = vrot.lane.b32.xlu1 %v6996_v39, %s4845_s25  ;;  %2789 = vst.msk [vmem:[#allocation3 + $0x70] sm:$0xff] %vm1083_vm6, %v2708_v4 }
 0x36b   : > { %v4706_v9 = vpop.f32.mrf.mxu0  ;;  %3509 = vrot.lane.b32.xlu0 %v7043_v50, %s4845_s25 }
 0x36c   : > { %v2181_v21 = vadd.f32 %v6622_v20, %v4706_v9  ;;  %v2706_v58 = vpop.permute.xlu1 %2705  ;;  %v3612_v46 = vld [vmem:[#allocation3 + $0x58] sm:$0xff] }
 0x36d   : > { %2788 = vst.msk [vmem:[#allocation3 + $0x68] sm:$0xff] %vm1083_vm6, %v2706_v58  ;;  %v2172_v33 = vpop.f32.mrf.mxu0  ;;  %v3638_v61 = vpack.c.bf16 %v3612_v46, %v3611_v27  ;;  %v2834_v22 = vpop.permute.xlu0 %2833  ;;  %v2298_v9 = vld [vmem:[#allocation2 + $0x148] sm:$0x3] }
 0x36e   : > { %v2217_v12 = vmax.f32 %v2181_v21, 0.0  ;;  %v2173_v44 = vadd.f32 %v6622_v20, %v2172_v33  ;;  %2513 = vrot.lane.b32.xlu1 %v6977_v6, %s4838_s28  ;;  %2917 = vst.msk [vmem:[#allocation3 + $0x60] sm:$0xff] %vm1214_vm7, %v2834_v22  ;;  %v2459_v21 = vrot.slane %v2298_v9, 1 }
 0x36f   : > { %v4707_v56 = vpop.f32.mrf.mxu0  ;;  %4723 = vmatmul.mubr.msk.bf16.gmra.mxu1 %vm1973_vm13, %v3638_v61  ;;  %2515 = vrot.lane.b32.xlu0 %v7016_v43, %s4838_s28 }
 0x370   : > { %2249 = vst.msk [vmem:[#allocation2 + $0x181] sm:$0xff] %vm435_vm0, %v2217_v12  ;;  %v2215_v37 = vmax.f32 %v2173_v44, 0.0  ;;  %v2184_v18 = vadd.f32 %v6622_v20, %v4707_v56  ;;  %v2710_v38 = vpop.permute.xlu1 %2709  ;;  %v7174_v61 = vsel %vm696_vm2, %v2457_v57, %v2459_v21  ;;  %v2665_v44 = vrot.slane %v6956_v11, 2 }
 0x371   : > { %2790 = vst.msk [vmem:[#allocation3 + $0x78] sm:$0xff] %vm1083_vm6, %v2710_v38  ;;  %v2175_v36 = vpop.f32.mrf.mxu0  ;;  %v2838_v42 = vpop.permute.xlu0 %2837  ;;  %v2664_v56 = vrot.slane %v6940_v34, 2 }
 0x372   : > { %2247 = vst.msk [vmem:[#allocation2 + $0x169] sm:$0xff] %vm435_vm0, %v2215_v37  ;;  %v2218_v59 = vmax.f32 %v2184_v18, 0.0  ;;  %v2176_v55 = vadd.f32 %v6622_v20, %v2175_v36  ;;  %3511 = vrot.lane.b32.xlu1 %v7060_v45, %s4845_s25 }
 0x373   : > { %2919 = vst.msk [vmem:[#allocation3 + $0x70] sm:$0xff] %vm1214_vm7, %v2838_v42  ;;  %2719 = vrot.lane.b32.xlu0 %v6984_v40, %s4839_s29  ;;  %v7189_v18 = vsel %vm906_vm3, %v2664_v56, %v2665_v44 }
 0x374   : > { %2250 = vst.msk [vmem:[#allocation2 + $0x189] sm:$0xff] %vm435_vm0, %v2218_v59  ;;  %v2216_v23 = vmax.f32 %v2176_v55, 0.0  ;;  %v2836_v53 = vpop.permute.xlu1 %2835  ;;  %v2667_v55 = vrot.slane %v2298_v9, 2 }
 0x375   : > { %2918 = vst.msk [vmem:[#allocation3 + $0x68] sm:$0xff] %vm1214_vm7, %v2836_v53  ;;  %v2968_v20 = vpop.permute.xlu0 %2967 }
 0x376   : > { %2248 = vst.msk [vmem:[#allocation2 + $0x171] sm:$0xff] %vm435_vm0, %v2216_v23  ;;  %2517 = vrot.lane.b32.xlu1 %v7028_v26, %s4838_s28 }
 0x377   : > { %3051 = vst.msk [vmem:[#allocation3 + $0x60] sm:$0xff] %vm1349_vm8, %v2968_v20  ;;  %2723 = vrot.lane.b32.xlu0 %v7043_v50, %s4839_s29  ;;  %v7203_v20 = vld [vmem:[%s7840_s5] ss:$0 sm:$0xff] }
 0x378   : > { %v2840_v63 = vpop.permute.xlu1 %2839 }
 0x379   : > { %2920 = vst.msk [vmem:[#allocation3 + $0x78] sm:$0xff] %vm1214_vm7, %v2840_v63  ;;  %v7078_v6 = vld [vmem:[#allocation2 + $0x168] sm:$0xff]  ;;  %v2972_v13 = vpop.permute.xlu0 %2971 }
 0x37a   : > { %2721 = vrot.lane.b32.xlu1 %v6996_v39, %s4839_s29  ;;  %2341 = vst.msk [vmem:[#allocation3 + $0xf0] sm:$0xff] %vm435_vm0, %v7078_v6  ;;  %v2451_v39 = vrot.slane %v6796_v15, 1 }
 0x37b   : > { %3053 = vst.msk [vmem:[#allocation3 + $0x70] sm:$0xff] %vm1349_vm8, %v2972_v13  ;;  %2849 = vrot.lane.b32.xlu0 %v6803_v7, %s4840_s30  ;;  %v7207_v13 = vsel %vm906_vm3, %v2665_v44, %v2667_v55 }
 0x37c   : > { %v2970_v8 = vpop.permute.xlu1 %2969 }
 0x37d   : > { %3052 = vst.msk [vmem:[#allocation3 + $0x68] sm:$0xff] %vm1349_vm8, %v2970_v8  ;;  %v7088_v40 = vld [vmem:[#allocation2 + $0x170] sm:$0xff]  ;;  %v3101_v62 = vpop.permute.xlu0 %3100 }
 0x37e   : > { %2725 = vrot.lane.b32.xlu1 %v7060_v45, %s4839_s29  ;;  %2342 = vst.msk [vmem:[#allocation3 + $0xf8] sm:$0xff] %vm435_vm0, %v7088_v40  ;;  %v2675_v55 = vrot.slane %v7088_v40, 2 }
 0x37f   : > { %3184 = vst.msk [vmem:[#allocation3 + $0x60] sm:$0xff] %vm1483_vm9, %v3101_v62  ;;  %2853 = vrot.lane.b32.xlu0 %v6796_v15, %s4840_s30 }
 0x380   : > { %v2974_v54 = vpop.permute.xlu1 %2973 }
 0x381   : > { %3054 = vst.msk [vmem:[#allocation3 + $0x78] sm:$0xff] %vm1349_vm8, %v2974_v54  ;;  %v3105_v7 = vpop.permute.xlu0 %3104 }
 0x382   : > { %2851 = vrot.lane.b32.xlu1 %v6822_v10, %s4840_s30  ;;  %3186 = vst.msk [vmem:[#allocation3 + $0x70] sm:$0xff] %vm1483_vm9, %v3105_v7  ;;  %v7110_v10 = vsel %vm696_vm2, %v2451_v39, %v2452_v25 }
 0x383   : > { %2983 = vrot.lane.b32.xlu0 %v7016_v43, %s4841_s13  ;;  %v2659_v43 = vrot.slane %v6796_v15, 2 }
 0x384   : > { %v3103_v31 = vpop.permute.xlu1 %3102 }
 0x385   : > { %3185 = vst.msk [vmem:[#allocation3 + $0x68] sm:$0xff] %vm1483_vm9, %v3103_v31  ;;  %v3231_v41 = vpop.permute.xlu0 %3230  ;;  %v7130_v52 = vsel %vm906_vm3, %v2659_v43, %v2660_v14 }
 0x386   : > { %2855 = vrot.lane.b32.xlu1 %v6811_v49, %s4840_s30  ;;  %3314 = vst.msk [vmem:[#allocation3 + $0x60] sm:$0xff] %vm1614_vm10, %v3231_v41 }
 0x387   : > { %2987 = vrot.lane.b32.xlu0 %v7110_v10, %s4841_s13 }
 0x388   : > { %v3107_v32 = vpop.permute.xlu1 %3106 }
 0x389   : > { %3187 = vst.msk [vmem:[#allocation3 + $0x78] sm:$0xff] %vm1483_vm9, %v3107_v32  ;;  %v3235_v1 = vpop.permute.xlu0 %3234 }
 0x38a   : > { %2985 = vrot.lane.b32.xlu1 %v7028_v26, %s4841_s13  ;;  %3316 = vst.msk [vmem:[#allocation3 + $0x70] sm:$0xff] %vm1614_vm10, %v3235_v1  ;;  %v7142_v26 = vsel %vm906_vm3, %v2660_v14, %v2662_v3  ;;  %v2301_v3 = vld [vmem:[#allocation2 + $0x160] sm:$0x3] }
 0x38b   : > { %3116 = vrot.lane.b32.xlu0 %v7043_v50, %s4842_s14  ;;  %v2672_v9 = vrot.slane %v2301_v3, 2 }
 0x38c   : > { %v3233_v51 = vpop.permute.xlu1 %3232 }
 0x38d   : > { %3315 = vst.msk [vmem:[#allocation3 + $0x68] sm:$0xff] %vm1614_vm10, %v3233_v51  ;;  %v3365_v35 = vpop.permute.xlu0 %3364 }
 0x38e   : > { %2989 = vrot.lane.b32.xlu1 %v7123_v28, %s4841_s13  ;;  %3448 = vst.msk [vmem:[#allocation3 + $0x60] sm:$0xff] %vm1749_vm11, %v3365_v35 }
 0x38f   : > { %3120 = vrot.lane.b32.xlu0 %v7130_v52, %s4842_s14 }
 0x390   : > { %v3237_v2 = vpop.permute.xlu1 %3236 }
 0x391   : > { %3317 = vst.msk [vmem:[#allocation3 + $0x78] sm:$0xff] %vm1614_vm10, %v3237_v2  ;;  %v3369_v47 = vpop.permute.xlu0 %3368 }
 0x392   : > { %3118 = vrot.lane.b32.xlu1 %v7060_v45, %s4842_s14  ;;  %3450 = vst.msk [vmem:[#allocation3 + $0x70] sm:$0xff] %vm1749_vm11, %v3369_v47 }
 0x393   : > { %3246 = vrot.lane.b32.xlu0 %v6796_v15, %s4843_s15 }
 0x394   : > { %v3367_v0 = vpop.permute.xlu1 %3366 }
 0x395   : > { %3449 = vst.msk [vmem:[#allocation3 + $0x68] sm:$0xff] %vm1749_vm11, %v3367_v0  ;;  %v3498_v48 = vpop.permute.xlu0 %3497  ;;  %v2464_v0 = vrot.slane %v2301_v3, 1 }
 0x396   : > { %3122 = vrot.lane.b32.xlu1 %v7142_v26, %s4842_s14  ;;  %3581 = vst.msk [vmem:[#allocation3 + $0x60] sm:$0xff] %vm1883_vm12, %v3498_v48  ;;  %v2670_v48 = vrot.slane %v6948_v30, 2 }
 0x397   : > { %3250 = vrot.lane.b32.xlu0 %v6940_v34, %s4843_s15 }
 0x398   : > { %v3371_v16 = vpop.permute.xlu1 %3370  ;;  %v7293_v21 = vsel %vm906_vm3, %v2670_v48, %v2672_v9 }
 0x399   : > { %3451 = vst.msk [vmem:[#allocation3 + $0x78] sm:$0xff] %vm1749_vm11, %v3371_v16  ;;  %v2504_v15 = vpop.permute.xlu0 %2503 }
 0x39a   : > { %3248 = vrot.lane.b32.xlu1 %v6811_v49, %s4843_s15  ;;  %2583 = vst.msk [vmem:[#allocation3 + $0x80] sm:$0xff] %vm873_vm4, %v2504_v15  ;;  %v7162_v49 = vsel %vm696_vm2, %v2456_v17, %v2457_v57  ;;  %v2669_v57 = vrot.slane %v6933_v60, 2 }
 0x39b   : > { %3380 = vrot.lane.b32.xlu0 %v7110_v10, %s4844_s16 }
 0x39c   : > { %v3500_v5 = vpop.permute.xlu1 %3499  ;;  %v7281_v17 = vsel %vm906_vm3, %v2669_v57, %v2670_v48 }
 0x39d   : > { %3582 = vst.msk [vmem:[#allocation3 + $0x68] sm:$0xff] %vm1883_vm12, %v3500_v5  ;;  %v3502_v4 = vpop.permute.xlu0 %3501  ;;  %v3613_v46 = vld [vmem:[#allocation3 + $0x60] sm:$0xff] }
 0x39e   : > { %3252 = vrot.lane.b32.xlu1 %v6956_v11, %s4843_s15  ;;  %3583 = vst.msk [vmem:[#allocation3 + $0x70] sm:$0xff] %vm1883_vm12, %v3502_v4 }
 0x39f   : > { %3384 = vrot.lane.b32.xlu0 %v7162_v49, %s4844_s16 }
 0x3a0   : > { %v2506_v50 = vpop.permute.xlu1 %2505 }
 0x3a1   : > { %2584 = vst.msk [vmem:[#allocation3 + $0x88] sm:$0xff] %vm873_vm4, %v2506_v50  ;;  %v2508_v58 = vpop.permute.xlu0 %2507 }
 0x3a2   : > { %3382 = vrot.lane.b32.xlu1 %v7123_v28, %s4844_s16  ;;  %2585 = vst.msk [vmem:[#allocation3 + $0x90] sm:$0xff] %vm873_vm4, %v2508_v58 }
 0x3a3   : > { %3513 = vrot.lane.b32.xlu0 %v7130_v52, %s4845_s25 }
 0x3a4   : > { %v3504_v27 = vpop.permute.xlu1 %3503  ;;  %v3614_v33 = vld [vmem:[#allocation3 + $0x68] sm:$0xff] }
 0x3a5   : > { %3584 = vst.msk [vmem:[#allocation3 + $0x78] sm:$0xff] %vm1883_vm12, %v3504_v27  ;;  %v3639_v29 = vpack.c.bf16 %v3614_v33, %v3613_v46  ;;  %v2712_v12 = vpop.permute.xlu0 %2711  ;;  %v3615_v36 = vld [vmem:[#allocation3 + $0x70] sm:$0xff]  ;;  %v2467_v46 = vrot.slane %v7088_v40, 1 }
 0x3a6   : > { %3386 = vrot.lane.b32.xlu1 %v7174_v61, %s4844_s16  ;;  %2791 = vst.msk [vmem:[#allocation3 + $0x80] sm:$0xff] %vm1083_vm6, %v2712_v12  ;;  %v2304_v12 = vld [vmem:[#allocation2 + $0x178] sm:$0x3] }
 0x3a7   : > { %4726 = vmatprep.mubr.msk.bf16.mxu1 %vm1973_vm13, %v3639_v29  ;;  %2519 = vrot.lane.b32.xlu0 %v7110_v10, %s4838_s28 }
 0x3a8   : > { %v2510_v22 = vpop.permute.xlu1 %2509 }
 0x3a9   : > { %2586 = vst.msk [vmem:[#allocation3 + $0x98] sm:$0xff] %vm873_vm4, %v2510_v22  ;;  %v2716_v37 = vpop.permute.xlu0 %2715  ;;  %v2469_v22 = vrot.slane %v2304_v12, 1 }
 0x3aa   : > { %3515 = vrot.lane.b32.xlu1 %v7142_v26, %s4845_s25  ;;  %2793 = vst.msk [vmem:[#allocation3 + $0x90] sm:$0xff] %vm1083_vm6, %v2716_v37 }
 0x3ab   : > { %3517 = vrot.lane.b32.xlu0 %v7189_v18, %s4845_s25 }
 0x3ac   : > { %v2714_v38 = vpop.permute.xlu1 %2713  ;;  %v3616_v45 = vld [vmem:[#allocation3 + $0x78] sm:$0xff] }
 0x3ad   : > { %2792 = vst.msk [vmem:[#allocation3 + $0x88] sm:$0xff] %vm1083_vm6, %v2714_v38  ;;  %v3640_v59 = vpack.c.bf16 %v3616_v45, %v3615_v36  ;;  %v2842_v42 = vpop.permute.xlu0 %2841  ;;  %v7325_v36 = vsel %vm696_vm2, %v2467_v46, %v2469_v22 }
 0x3ae   : > { %2521 = vrot.lane.b32.xlu1 %v7123_v28, %s4838_s28  ;;  %2921 = vst.msk [vmem:[#allocation3 + $0x80] sm:$0xff] %vm1214_vm7, %v2842_v42 }
 0x3af   : > { %v4716_v23 = vpop.f32.mrf.mxu1  ;;  %4727 = vmatmul.mubr.msk.bf16.gmra.mxu1 %vm1973_vm13, %v3640_v59  ;;  %2523 = vrot.lane.b32.xlu0 %v7162_v49, %s4838_s28 }
 0x3b0   : > { %v2718_v53 = vpop.permute.xlu1 %2717  ;;  %v7213_v54 = vadd.f32 %v4716_v23, %v7203_v20  ;;  %v2674_v23 = vrot.slane %v7078_v6, 2 }
 0x3b1   : > { %2794 = vst.msk [vmem:[#allocation3 + $0x98] sm:$0xff] %vm1083_vm6, %v2718_v53  ;;  %v3743_v63 = vpop.f32.mrf.mxu1  ;;  %v2846_v8 = vpop.permute.xlu0 %2845 }
 0x3b2   : > { %3519 = vrot.lane.b32.xlu1 %v7207_v13, %s4845_s25  ;;  %2923 = vst.msk [vmem:[#allocation3 + $0x90] sm:$0xff] %vm1214_vm7, %v2846_v8  ;;  %v7222_v39 = vadd.f32 %v7203_v20, %v3743_v63  ;;  %v7340_v63 = vsel %vm906_vm3, %v2674_v23, %v2675_v55 }
 0x3b3   : > { %v4717_v62 = vpop.f32.mrf.mxu1  ;;  %2727 = vrot.lane.b32.xlu0 %v7130_v52, %s4839_s29  ;;  %v2461_v52 = vrot.slane %v6933_v60, 1 }
 0x3b4   : > { %v7216_v7 = vadd.f32 %v4717_v62, %v7203_v20  ;;  %v2844_v25 = vpop.permute.xlu1 %2843 }
 0x3b5   : > { %2922 = vst.msk [vmem:[#allocation3 + $0x88] sm:$0xff] %vm1214_vm7, %v2844_v25  ;;  %v3746_v31 = vpop.f32.mrf.mxu1  ;;  %v2976_v10 = vpop.permute.xlu0 %2975 }
 0x3b6   : > { %v3880_v41 = vpack.c.bf16 %v7216_v7, %v7213_v54  ;;  %v7227_v19 = vadd.f32 %v7203_v20, %v3746_v31  ;;  %2525 = vrot.lane.b32.xlu1 %v7174_v61, %s4838_s28  ;;  %3055 = vst.msk [vmem:[#allocation3 + $0x80] sm:$0xff] %vm1349_vm8, %v2976_v10  ;;  %v2677_v31 = vrot.slane %v2304_v12, 2  ;;  %v3874_v54 = vld [vmem:[%s7841_s6 + $0x20] sm:$0xff]  ;;  %v3875_v7 = vld [vmem:[%s7841_s6 + $0x28] sm:$0xff] }
 0x3b7   : > { %2731 = vrot.lane.b32.xlu0 %v7189_v18, %s4839_s29 }
 0x3b8   : > { %v3879_v32 = vpack.c.bf16 %v7227_v19, %v7222_v39  ;;  %v2848_v24 = vpop.permute.xlu1 %2847 }
 0x3b9   : > { %2924 = vst.msk [vmem:[#allocation3 + $0x98] sm:$0xff] %vm1214_vm7, %v2848_v24  ;;  %v2980_v1 = vpop.permute.xlu0 %2979 }
 0x3ba   : > { %2729 = vrot.lane.b32.xlu1 %v7142_v26, %s4839_s29  ;;  %3057 = vst.msk [vmem:[#allocation3 + $0x90] sm:$0xff] %vm1349_vm8, %v2980_v1 }
 0x3bb   : > { %2857 = vrot.lane.b32.xlu0 %v6940_v34, %s4840_s30  ;;  %v2462_v34 = vrot.slane %v6948_v30, 1 }
 0x3bc   : > { %v2978_v14 = vpop.permute.xlu1 %2977 }
 0x3bd   : > { %3056 = vst.msk [vmem:[#allocation3 + $0x88] sm:$0xff] %vm1349_vm8, %v2978_v14  ;;  %v3109_v51 = vpop.permute.xlu0 %3108  ;;  %v7274_v15 = vsel %vm696_vm2, %v2462_v34, %v2464_v0 }
 0x3be   : > { %2733 = vrot.lane.b32.xlu1 %v7207_v13, %s4839_s29  ;;  %3188 = vst.msk [vmem:[#allocation3 + $0x80] sm:$0xff] %vm1483_vm9, %v3109_v51  ;;  %v7353_v51 = vsel %vm906_vm3, %v2675_v55, %v2677_v31 }
 0x3bf   : > { %2861 = vrot.lane.b32.xlu0 %v6933_v60, %s4840_s30 }
 0x3c0   : > { %v2982_v28 = vpop.permute.xlu1 %2981 }
 0x3c1   : > { %3058 = vst.msk [vmem:[#allocation3 + $0x98] sm:$0xff] %vm1349_vm8, %v2982_v28  ;;  %v3113_v43 = vpop.permute.xlu0 %3112 }
 0x3c2   : > { %2859 = vrot.lane.b32.xlu1 %v6956_v11, %s4840_s30  ;;  %3190 = vst.msk [vmem:[#allocation3 + $0x90] sm:$0xff] %vm1483_vm9, %v3113_v43  ;;  %v7261_v11 = vsel %vm696_vm2, %v2461_v52, %v2462_v34 }
 0x3c3   : > { %2991 = vrot.lane.b32.xlu0 %v7162_v49, %s4841_s13 }
 0x3c4   : > { %v3111_v35 = vpop.permute.xlu1 %3110 }
 0x3c5   : > { %3189 = vst.msk [vmem:[#allocation3 + $0x88] sm:$0xff] %vm1483_vm9, %v3111_v35  ;;  %v3239_v2 = vpop.permute.xlu0 %3238 }
 0x3c6   : > { %2863 = vrot.lane.b32.xlu1 %v6948_v30, %s4840_s30  ;;  %3318 = vst.msk [vmem:[#allocation3 + $0x80] sm:$0xff] %vm1614_vm10, %v3239_v2 }
 0x3c7   : > { %2995 = vrot.lane.b32.xlu0 %v7261_v11, %s4841_s13 }
 0x3c8   : > { %v3115_v47 = vpop.permute.xlu1 %3114 }
 0x3c9   : > { %3191 = vst.msk [vmem:[#allocation3 + $0x98] sm:$0xff] %vm1483_vm9, %v3115_v47  ;;  %v3243_v26 = vpop.permute.xlu0 %3242 }
 0x3ca   : > { %2993 = vrot.lane.b32.xlu1 %v7174_v61, %s4841_s13  ;;  %3320 = vst.msk [vmem:[#allocation3 + $0x90] sm:$0xff] %vm1614_vm10, %v3243_v26  ;;  %v2466_v61 = vrot.slane %v7078_v6, 1 }
 0x3cb   : > { %3124 = vrot.lane.b32.xlu0 %v7189_v18, %s4842_s14 }
 0x3cc   : > { %v3241_v16 = vpop.permute.xlu1 %3240 }
 0x3cd   : > { %3319 = vst.msk [vmem:[#allocation3 + $0x88] sm:$0xff] %vm1614_vm10, %v3241_v16  ;;  %v3373_v5 = vpop.permute.xlu0 %3372 }
 0x3ce   : > { %2997 = vrot.lane.b32.xlu1 %v7274_v15, %s4841_s13  ;;  %3452 = vst.msk [vmem:[#allocation3 + $0x80] sm:$0xff] %vm1749_vm11, %v3373_v5  ;;  %v2305_v5 = vld [vmem:[#allocation2 + $0x180] sm:$0xff] }
 0x3cf   : > { %3128 = vrot.lane.b32.xlu0 %v7281_v17, %s4842_s14 }
 0x3d0   : > { %v3245_v4 = vpop.permute.xlu1 %3244 }
 0x3d1   : > { %3321 = vst.msk [vmem:[#allocation3 + $0x98] sm:$0xff] %vm1614_vm10, %v3245_v4  ;;  %v3377_v49 = vpop.permute.xlu0 %3376  ;;  %v2306_v4 = vld [vmem:[#allocation2 + $0x188] sm:$0xff] }
 0x3d2   : > { %3126 = vrot.lane.b32.xlu1 %v7207_v13, %s4842_s14  ;;  %3454 = vst.msk [vmem:[#allocation3 + $0x90] sm:$0xff] %vm1749_vm11, %v3377_v49 }
 0x3d3   : > { %3254 = vrot.lane.b32.xlu0 %v6933_v60, %s4843_s15 }
 0x3d4   : > { %v3375_v50 = vpop.permute.xlu1 %3374 }
 0x3d5   : > { %3453 = vst.msk [vmem:[#allocation3 + $0x88] sm:$0xff] %vm1749_vm11, %v3375_v50  ;;  %v3506_v58 = vpop.permute.xlu0 %3505  ;;  %v2938_v50 = vrot.slane %v2305_v5, 1 }
 0x3d6   : > { %3130 = vrot.lane.b32.xlu1 %v7293_v21, %s4842_s14  ;;  %3585 = vst.msk [vmem:[#allocation3 + $0x80] sm:$0xff] %vm1883_vm12, %v3506_v58  ;;  %v2307_v58 = vld [vmem:[#allocation2 + $0x190] sm:$0x3] }
 0x3d7   : > { %3258 = vrot.lane.b32.xlu0 %v7078_v6, %s4843_s15 }
 0x3d8   : > { %v3379_v27 = vpop.permute.xlu1 %3378 }
 0x3d9   : > { %3455 = vst.msk [vmem:[#allocation3 + $0x98] sm:$0xff] %vm1749_vm11, %v3379_v27  ;;  %v2512_v60 = vpop.permute.xlu0 %2511 }
 0x3da   : > { %3256 = vrot.lane.b32.xlu1 %v6948_v30, %s4843_s15  ;;  %2587 = vst.msk [vmem:[#allocation3 + $0xa0] sm:$0xff] %vm873_vm4, %v2512_v60  ;;  %v7313_v30 = vsel %vm696_vm2, %v2466_v61, %v2467_v46  ;;  %v2941_v60 = vrot.slane %v2307_v58, 1 }
 0x3db   : > { %3388 = vrot.lane.b32.xlu0 %v7261_v11, %s4844_s16 }
 0x3dc   : > { %v3508_v33 = vpop.permute.xlu1 %3507 }
 0x3dd   : > { %3586 = vst.msk [vmem:[#allocation3 + $0x88] sm:$0xff] %vm1883_vm12, %v3508_v33  ;;  %v3510_v29 = vpop.permute.xlu0 %3509  ;;  %v3617_v18 = vld [vmem:[#allocation3 + $0x80] sm:$0xff]  ;;  %v3072_v33 = vrot.slane %v2306_v4, 2 }
 0x3de   : > { %3260 = vrot.lane.b32.xlu1 %v7088_v40, %s4843_s15  ;;  %3587 = vst.msk [vmem:[#allocation3 + $0x90] sm:$0xff] %vm1883_vm12, %v3510_v29  ;;  %v3071_v29 = vrot.slane %v2305_v5, 2 }
 0x3df   : > { %3392 = vrot.lane.b32.xlu0 %v7313_v30, %s4844_s16 }
 0x3e0   : > { %v2514_v44 = vpop.permute.xlu1 %2513 }
 0x3e1   : > { %2588 = vst.msk [vmem:[#allocation3 + $0xa8] sm:$0xff] %vm873_vm4, %v2514_v44  ;;  %v2516_v56 = vpop.permute.xlu0 %2515  ;;  %v3073_v44 = vsel %vm906_vm3, %v3071_v29, %v3072_v33 }
 0x3e2   : > { %3390 = vrot.lane.b32.xlu1 %v7274_v15, %s4844_s16  ;;  %2589 = vst.msk [vmem:[#allocation3 + $0xb0] sm:$0xff] %vm873_vm4, %v2516_v56  ;;  %v3074_v56 = vrot.slane %v2307_v58, 2 }
 0x3e3   : > { %3521 = vrot.lane.b32.xlu0 %v7281_v17, %s4845_s25 }
 0x3e4   : > { %v3512_v37 = vpop.permute.xlu1 %3511  ;;  %v3618_v38 = vld [vmem:[#allocation3 + $0x88] sm:$0xff] }
 0x3e5   : > { %3588 = vst.msk [vmem:[#allocation3 + $0x98] sm:$0xff] %vm1883_vm12, %v3512_v37  ;;  %v3641_v45 = vpack.c.bf16 %v3618_v38, %v3617_v18  ;;  %v2720_v59 = vpop.permute.xlu0 %2719  ;;  %v3619_v8 = vld [vmem:[#allocation3 + $0x90] sm:$0xff]  ;;  %v3075_v38 = vsel %vm906_vm3, %v3072_v33, %v3074_v56 }
 0x3e6   : > { %3394 = vrot.lane.b32.xlu1 %v7325_v36, %s4844_s16  ;;  %2795 = vst.msk [vmem:[#allocation3 + $0xa0] sm:$0xff] %vm1083_vm6, %v2720_v59  ;;  %v2309_v59 = vld [vmem:[#allocation2 + $0x1a0] sm:$0xff] }
 0x3e7   : > { %4730 = vmatprep.mubr.msk.bf16.mxu1 %vm1973_vm13, %v3641_v45  ;;  %2527 = vrot.lane.b32.xlu0 %v7261_v11, %s4838_s28  ;;  %v3336_v23 = vrot.slane %v2309_v59, 1 }
 0x3e8   : > { %v2518_v42 = vpop.permute.xlu1 %2517 }
 0x3e9   : > { %2590 = vst.msk [vmem:[#allocation3 + $0xb8] sm:$0xff] %vm873_vm4, %v2518_v42  ;;  %v2724_v53 = vpop.permute.xlu0 %2723 }
 0x3ea   : > { %3523 = vrot.lane.b32.xlu1 %v7293_v21, %s4845_s25  ;;  %2797 = vst.msk [vmem:[#allocation3 + $0xb0] sm:$0xff] %vm1083_vm6, %v2724_v53 }
 0x3eb   : > { %3525 = vrot.lane.b32.xlu0 %v7340_v63, %s4845_s25 }
 0x3ec   : > { %v2722_v13 = vpop.permute.xlu1 %2721  ;;  %v3620_v62 = vld [vmem:[#allocation3 + $0x98] sm:$0xff] }
 0x3ed   : > { %2796 = vst.msk [vmem:[#allocation3 + $0xa8] sm:$0xff] %vm1083_vm6, %v2722_v13  ;;  %v3642_v25 = vpack.c.bf16 %v3620_v62, %v3619_v8  ;;  %v2850_v10 = vpop.permute.xlu0 %2849  ;;  %v2310_v13 = vld [vmem:[#allocation2 + $0x1a8] sm:$0x3] }
 0x3ee   : > { %2529 = vrot.lane.b32.xlu1 %v7274_v15, %s4838_s28  ;;  %2925 = vst.msk [vmem:[#allocation3 + $0xa0] sm:$0xff] %vm1214_vm7, %v2850_v10 }
 0x3ef   : > { %v4720_v24 = vpop.f32.mrf.mxu1  ;;  %4731 = vmatmul.mubr.msk.bf16.gmra.mxu1 %vm1973_vm13, %v3642_v25  ;;  %2531 = vrot.lane.b32.xlu0 %v7313_v30, %s4838_s28  ;;  %v3338_v25 = vrot.slane %v2310_v13, 1 }
 0x3f0   : > { %v2726_v1 = vpop.permute.xlu1 %2725  ;;  %v7359_v34 = vadd.f32 %v4720_v24, %v7203_v20  ;;  %v3469_v24 = vrot.slane %v2309_v59, 2 }
 0x3f1   : > { %2798 = vst.msk [vmem:[#allocation3 + $0xb8] sm:$0xff] %vm1083_vm6, %v2726_v1  ;;  %v3759_v14 = vpop.f32.mrf.mxu1  ;;  %v2854_v28 = vpop.permute.xlu0 %2853 }
 0x3f2   : > { %3527 = vrot.lane.b32.xlu1 %v7353_v51, %s4845_s25  ;;  %2927 = vst.msk [vmem:[#allocation3 + $0xb0] sm:$0xff] %vm1214_vm7, %v2854_v28  ;;  %v7368_v3 = vadd.f32 %v7203_v20, %v3759_v14  ;;  %v3339_v14 = vsel %vm696_vm2, %v3336_v23, %v3338_v25 }
 0x3f3   : > { %v4721_v43 = vpop.f32.mrf.mxu1  ;;  %2735 = vrot.lane.b32.xlu0 %v7281_v17, %s4839_s29 }
 0x3f4   : > { %v7362_v35 = vadd.f32 %v4721_v43, %v7203_v20  ;;  %v2852_v52 = vpop.permute.xlu1 %2851 }
 0x3f5   : > { %2926 = vst.msk [vmem:[#allocation3 + $0xa8] sm:$0xff] %vm1214_vm7, %v2852_v52  ;;  %v3762_v2 = vpop.f32.mrf.mxu1  ;;  %v2984_v0 = vpop.permute.xlu0 %2983 }
 0x3f6   : > { %v3882_v11 = vpack.c.bf16 %v7362_v35, %v7359_v34  ;;  %v7373_v47 = vadd.f32 %v7203_v20, %v3762_v2  ;;  %2533 = vrot.lane.b32.xlu1 %v7325_v36, %s4838_s28  ;;  %3059 = vst.msk [vmem:[#allocation3 + $0xa0] sm:$0xff] %vm1349_vm8, %v2984_v0  ;;  %v3941_v34 = vsel %vm435_vm0, %v3879_v32, 0 }
 0x3f7   : > { %2739 = vrot.lane.b32.xlu0 %v7340_v63, %s4839_s29 }
 0x3f8   : > { %v3881_v26 = vpack.c.bf16 %v7373_v47, %v7368_v3  ;;  %v2856_v48 = vpop.permute.xlu1 %2855 }
 0x3f9   : > { %2928 = vst.msk [vmem:[#allocation3 + $0xb8] sm:$0xff] %vm1214_vm7, %v2856_v48  ;;  %v2988_v16 = vpop.permute.xlu0 %2987  ;;  %v3471_v48 = vrot.slane %v2310_v13, 2 }
 0x3fa   : > { %2737 = vrot.lane.b32.xlu1 %v7293_v21, %s4839_s29  ;;  %3061 = vst.msk [vmem:[#allocation3 + $0xb0] sm:$0xff] %vm1349_vm8, %v2988_v16 }
 0x3fb   : > { %2865 = vrot.lane.b32.xlu0 %v7078_v6, %s4840_s30  ;;  %v2939_v6 = vrot.slane %v2306_v4, 1 }
 0x3fc   : > { %v2986_v15 = vpop.permute.xlu1 %2985 }
 0x3fd   : > { %3060 = vst.msk [vmem:[#allocation3 + $0xa8] sm:$0xff] %vm1349_vm8, %v2986_v15  ;;  %v3117_v57 = vpop.permute.xlu0 %3116  ;;  %v2940_v27 = vsel %vm696_vm2, %v2938_v50, %v2939_v6  ;;  %v2942_v12 = vsel %vm696_vm2, %v2939_v6, %v2941_v60 }
 0x3fe   : > { %2741 = vrot.lane.b32.xlu1 %v7353_v51, %s4839_s29  ;;  %3192 = vst.msk [vmem:[#allocation3 + $0xa0] sm:$0xff] %vm1483_vm9, %v3117_v57  ;;  %v3472_v57 = vsel %vm906_vm3, %v3469_v24, %v3471_v48 }
 0x3ff   : > { %2869 = vrot.lane.b32.xlu0 %v2305_v5, %s4840_s30 }
 0x400   : > { %v2990_v17 = vpop.permute.xlu1 %2989 }
 0x401   : > { %3062 = vst.msk [vmem:[#allocation3 + $0xb8] sm:$0xff] %vm1349_vm8, %v2990_v17  ;;  %v3121_v9 = vpop.permute.xlu0 %3120 }
 0x402   : > { %2867 = vrot.lane.b32.xlu1 %v7088_v40, %s4840_s30  ;;  %3194 = vst.msk [vmem:[#allocation3 + $0xb0] sm:$0xff] %vm1483_vm9, %v3121_v9 }
 0x403   : > { %2999 = vrot.lane.b32.xlu0 %v7313_v30, %s4841_s13 }
 0x404   : > { %v3119_v49 = vpop.permute.xlu1 %3118 }
 0x405   : > { %3193 = vst.msk [vmem:[#allocation3 + $0xa8] sm:$0xff] %vm1483_vm9, %v3119_v49  ;;  %v3247_v21 = vpop.permute.xlu0 %3246 }
 0x406   : > { %2871 = vrot.lane.b32.xlu1 %v2306_v4, %s4840_s30  ;;  %3322 = vst.msk [vmem:[#allocation3 + $0xa0] sm:$0xff] %vm1614_vm10, %v3247_v21 }
 0x407   : > { %3003 = vrot.lane.b32.xlu0 %v2940_v27, %s4841_s13 }
 0x408   : > { %v3123_v40 = vpop.permute.xlu1 %3122 }
 0x409   : > { %3195 = vst.msk [vmem:[#allocation3 + $0xb8] sm:$0xff] %vm1483_vm9, %v3123_v40  ;;  %v3251_v46 = vpop.permute.xlu0 %3250 }
 0x40a   : > { %3001 = vrot.lane.b32.xlu1 %v7325_v36, %s4841_s13  ;;  %3324 = vst.msk [vmem:[#allocation3 + $0xb0] sm:$0xff] %vm1614_vm10, %v3251_v46  ;;  %v2308_v36 = vld [vmem:[#allocation2 + $0x198] sm:$0xff] }
 0x40b   : > { %3132 = vrot.lane.b32.xlu0 %v7340_v63, %s4842_s14  ;;  %v3335_v42 = vrot.slane %v2308_v36, 1  ;;  %v3468_v10 = vrot.slane %v2308_v36, 2 }
 0x40c   : > { %v3249_v61 = vpop.permute.xlu1 %3248 }
 0x40d   : > { %3323 = vst.msk [vmem:[#allocation3 + $0xa8] sm:$0xff] %vm1614_vm10, %v3249_v61  ;;  %v3381_v30 = vpop.permute.xlu0 %3380  ;;  %v3337_v8 = vsel %vm696_vm2, %v3335_v42, %v3336_v23  ;;  %v3470_v2 = vsel %vm906_vm3, %v3468_v10, %v3469_v24 }
 0x40e   : > { %3005 = vrot.lane.b32.xlu1 %v2942_v12, %s4841_s13  ;;  %3456 = vst.msk [vmem:[#allocation3 + $0xa0] sm:$0xff] %vm1749_vm11, %v3381_v30 }
 0x40f   : > { %3136 = vrot.lane.b32.xlu0 %v3073_v44, %s4842_s14 }
 0x410   : > { %v3253_v22 = vpop.permute.xlu1 %3252 }
 0x411   : > { %3325 = vst.msk [vmem:[#allocation3 + $0xb8] sm:$0xff] %vm1614_vm10, %v3253_v22  ;;  %v3385_v37 = vpop.permute.xlu0 %3384 }
 0x412   : > { %3134 = vrot.lane.b32.xlu1 %v7353_v51, %s4842_s14  ;;  %3458 = vst.msk [vmem:[#allocation3 + $0xb0] sm:$0xff] %vm1749_vm11, %v3385_v37 }
 0x413   : > { %3262 = vrot.lane.b32.xlu0 %v2305_v5, %s4843_s15 }
 0x414   : > { %v3383_v18 = vpop.permute.xlu1 %3382 }
 0x415   : > { %3457 = vst.msk [vmem:[#allocation3 + $0xa8] sm:$0xff] %vm1749_vm11, %v3383_v18  ;;  %v3514_v45 = vpop.permute.xlu0 %3513 }
 0x416   : > { %3138 = vrot.lane.b32.xlu1 %v3075_v38, %s4842_s14  ;;  %3589 = vst.msk [vmem:[#allocation3 + $0xa0] sm:$0xff] %vm1883_vm12, %v3514_v45 }
 0x417   : > { %3266 = vrot.lane.b32.xlu0 %v2308_v36, %s4843_s15 }
 0x418   : > { %v3387_v55 = vpop.permute.xlu1 %3386 }
 0x419   : > { %3459 = vst.msk [vmem:[#allocation3 + $0xb8] sm:$0xff] %vm1749_vm11, %v3387_v55  ;;  %v2520_v53 = vpop.permute.xlu0 %2519 }
 0x41a   : > { %3264 = vrot.lane.b32.xlu1 %v2306_v4, %s4843_s15  ;;  %2591 = vst.msk [vmem:[#allocation3 + $0xc0] sm:$0xff] %vm873_vm4, %v2520_v53 }
 0x41b   : > { %3396 = vrot.lane.b32.xlu0 %v2940_v27, %s4844_s16 }
 0x41c   : > { %v3516_v63 = vpop.permute.xlu1 %3515 }
 0x41d   : > { %3590 = vst.msk [vmem:[#allocation3 + $0xa8] sm:$0xff] %vm1883_vm12, %v3516_v63  ;;  %v3518_v62 = vpop.permute.xlu0 %3517  ;;  %v3621_v28 = vld [vmem:[#allocation3 + $0xa0] sm:$0xff] }
 0x41e   : > { %3268 = vrot.lane.b32.xlu1 %v2309_v59, %s4843_s15  ;;  %3591 = vst.msk [vmem:[#allocation3 + $0xb0] sm:$0xff] %vm1883_vm12, %v3518_v62 }
 0x41f   : > { %3400 = vrot.lane.b32.xlu0 %v3337_v8, %s4844_s16 }
 0x420   : > { %v2522_v31 = vpop.permute.xlu1 %2521 }
 0x421   : > { %2592 = vst.msk [vmem:[#allocation3 + $0xc8] sm:$0xff] %vm873_vm4, %v2522_v31  ;;  %v2524_v1 = vpop.permute.xlu0 %2523 }
 0x422   : > { %3398 = vrot.lane.b32.xlu1 %v2942_v12, %s4844_s16  ;;  %2593 = vst.msk [vmem:[#allocation3 + $0xd0] sm:$0xff] %vm873_vm4, %v2524_v1 }
 0x423   : > { %3529 = vrot.lane.b32.xlu0 %v3073_v44, %s4845_s25 }
 0x424   : > { %v3520_v51 = vpop.permute.xlu1 %3519  ;;  %v3622_v43 = vld [vmem:[#allocation3 + $0xa8] sm:$0xff] }
 0x425   : > { %3592 = vst.msk [vmem:[#allocation3 + $0xb8] sm:$0xff] %vm1883_vm12, %v3520_v51  ;;  %v3643_v52 = vpack.c.bf16 %v3622_v43, %v3621_v28  ;;  %v2728_v0 = vpop.permute.xlu0 %2727  ;;  %v3623_v17 = vld [vmem:[#allocation3 + $0xb0] sm:$0xff] }
 0x426   : > { %3402 = vrot.lane.b32.xlu1 %v3339_v14, %s4844_s16  ;;  %2799 = vst.msk [vmem:[#allocation3 + $0xc0] sm:$0xff] %vm1083_vm6, %v2728_v0  ;;  %s4607_s16 = sshll.u32 %s7944_s22, 3 }
 0x427   : > { %4734 = vmatprep.mubr.msk.bf16.mxu1 %vm1973_vm13, %v3643_v52  ;;  %3533 = vrot.lane.b32.xlu0 %v3470_v2, %s4845_s25  ;;  %s423_s20 = scalar_lea.vmem %s7835_s0, %s4607_s16  ;;  %s433_s18 = scalar_lea.vmem %s7847_s12, %s4607_s16 }
 0x428   : > { %v2526_v16 = vpop.permute.xlu1 %2525 }
 0x429   : > { %2594 = vst.msk [vmem:[#allocation3 + $0xd8] sm:$0xff] %vm873_vm4, %v2526_v16  ;;  %v2732_v15 = vpop.permute.xlu0 %2731 }
 0x42a   : > { %3531 = vrot.lane.b32.xlu1 %v3075_v38, %s4845_s25  ;;  %2801 = vst.msk [vmem:[#allocation3 + $0xd0] sm:$0xff] %vm1083_vm6, %v2732_v15 }
 0x42c   : > { %v2730_v5 = vpop.permute.xlu1 %2729  ;;  %v3624_v4 = vld [vmem:[#allocation3 + $0xb8] sm:$0xff] }
 0x42d   : > { %2800 = vst.msk [vmem:[#allocation3 + $0xc8] sm:$0xff] %vm1083_vm6, %v2730_v5  ;;  %v3644_v9 = vpack.c.bf16 %v3624_v4, %v3623_v17  ;;  %v2858_v6 = vpop.permute.xlu0 %2857 }
 0x42e   : > { %3535 = vrot.lane.b32.xlu1 %v3472_v57, %s4845_s25  ;;  %2929 = vst.msk [vmem:[#allocation3 + $0xc0] sm:$0xff] %vm1214_vm7, %v2858_v6 }
 0x42f   : > { %4735 = vmatmul.mubr.msk.bf16.gmra.mxu1 %vm1973_vm13, %v3644_v9 }
 0x430   : > { %v2734_v49 = vpop.permute.xlu1 %2733 }
 0x431   : > { %2802 = vst.msk [vmem:[#allocation3 + $0xd8] sm:$0xff] %vm1083_vm6, %v2734_v49  ;;  %v2862_v50 = vpop.permute.xlu0 %2861 }
 0x432   : > { %2931 = vst.msk [vmem:[#allocation3 + $0xd0] sm:$0xff] %vm1214_vm7, %v2862_v50 }
 0x434   : > { %v2860_v21 = vpop.permute.xlu1 %2859 }
 0x435   : > { %2930 = vst.msk [vmem:[#allocation3 + $0xc8] sm:$0xff] %vm1214_vm7, %v2860_v21  ;;  %v2992_v58 = vpop.permute.xlu0 %2991 }
 0x436   : > { %3063 = vst.msk [vmem:[#allocation3 + $0xc0] sm:$0xff] %vm1349_vm8, %v2992_v58 }
 0x438   : > { %v2864_v27 = vpop.permute.xlu1 %2863 }
 0x439   : > { %2932 = vst.msk [vmem:[#allocation3 + $0xd8] sm:$0xff] %vm1214_vm7, %v2864_v27  ;;  %v2996_v40 = vpop.permute.xlu0 %2995 }
 0x43a   : > { %3065 = vst.msk [vmem:[#allocation3 + $0xd0] sm:$0xff] %vm1349_vm8, %v2996_v40  ;;  %v7505_v40 = vpop.f32.mrf.mxu1 }
 0x43c   : > { %v2994_v60 = vpop.permute.xlu1 %2993 }
 0x43d   : > { %3064 = vst.msk [vmem:[#allocation3 + $0xc8] sm:$0xff] %vm1349_vm8, %v2994_v60  ;;  %v3125_v46 = vpop.permute.xlu0 %3124 }
 0x43e   : > { %3196 = vst.msk [vmem:[#allocation3 + $0xc0] sm:$0xff] %vm1483_vm9, %v3125_v46 }
 0x440   : > { %v2998_v33 = vpop.permute.xlu1 %2997 }
 0x441   : > { %3066 = vst.msk [vmem:[#allocation3 + $0xd8] sm:$0xff] %vm1349_vm8, %v2998_v33  ;;  %v3129_v61 = vpop.permute.xlu0 %3128  ;;  %v7509_v33 = vpop.f32.mrf.mxu1 }
 0x442   : > { %3198 = vst.msk [vmem:[#allocation3 + $0xd0] sm:$0xff] %vm1483_vm9, %v3129_v61 }
 0x444   : > { %v3127_v29 = vpop.permute.xlu1 %3126 }
 0x445   : > { %3197 = vst.msk [vmem:[#allocation3 + $0xc8] sm:$0xff] %vm1483_vm9, %v3127_v29  ;;  %v3255_v12 = vpop.permute.xlu0 %3254 }
 0x446   : > { %3326 = vst.msk [vmem:[#allocation3 + $0xc0] sm:$0xff] %vm1614_vm10, %v3255_v12  ;;  %v7513_v12 = vpop.f32.mrf.mxu1 }
 0x448   : > { %v3131_v30 = vpop.permute.xlu1 %3130 }
 0x449   : > { %3199 = vst.msk [vmem:[#allocation3 + $0xd8] sm:$0xff] %vm1483_vm9, %v3131_v30  ;;  %v3259_v44 = vpop.permute.xlu0 %3258 }
 0x44a   : > { %3328 = vst.msk [vmem:[#allocation3 + $0xd0] sm:$0xff] %vm1614_vm10, %v3259_v44  ;;  %v7517_v44 = vpop.f32.mrf.mxu1 }
 0x44c   : > { %v3257_v22 = vpop.permute.xlu1 %3256 }
 0x44d   : > { %3327 = vst.msk [vmem:[#allocation3 + $0xc8] sm:$0xff] %vm1614_vm10, %v3257_v22  ;;  %v3389_v56 = vpop.permute.xlu0 %3388 }
 0x44e   : > { %3460 = vst.msk [vmem:[#allocation3 + $0xc0] sm:$0xff] %vm1749_vm11, %v3389_v56 }
 0x450   : > { %v3261_v37 = vpop.permute.xlu1 %3260 }
 0x451   : > { %3329 = vst.msk [vmem:[#allocation3 + $0xd8] sm:$0xff] %vm1614_vm10, %v3261_v37  ;;  %v3393_v18 = vpop.permute.xlu0 %3392 }
 0x452   : > { %3462 = vst.msk [vmem:[#allocation3 + $0xd0] sm:$0xff] %vm1749_vm11, %v3393_v18 }
 0x454   : > { %v3391_v38 = vpop.permute.xlu1 %3390 }
 0x455   : > { %3461 = vst.msk [vmem:[#allocation3 + $0xc8] sm:$0xff] %vm1749_vm11, %v3391_v38  ;;  %v3522_v36 = vpop.permute.xlu0 %3521 }
 0x456   : > { %3593 = vst.msk [vmem:[#allocation3 + $0xc0] sm:$0xff] %vm1883_vm12, %v3522_v36 }
 0x458   : > { %v3395_v45 = vpop.permute.xlu1 %3394 }
 0x459   : > { %3463 = vst.msk [vmem:[#allocation3 + $0xd8] sm:$0xff] %vm1749_vm11, %v3395_v45  ;;  %v2528_v59 = vpop.permute.xlu0 %2527 }
 0x45a   : > { %2595 = vst.msk [vmem:[#allocation3 + $0xe0] sm:$0xff] %vm873_vm4, %v2528_v59 }
 0x45c   : > { %v3524_v55 = vpop.permute.xlu1 %3523 }
 0x45d   : > { %3594 = vst.msk [vmem:[#allocation3 + $0xc8] sm:$0xff] %vm1883_vm12, %v3524_v55  ;;  %v3526_v42 = vpop.permute.xlu0 %3525  ;;  %v3625_v13 = vld [vmem:[#allocation3 + $0xc0] sm:$0xff] }
 0x45e   : > { %3595 = vst.msk [vmem:[#allocation3 + $0xd0] sm:$0xff] %vm1883_vm12, %v3526_v42 }
 0x460   : > { %v2530_v23 = vpop.permute.xlu1 %2529 }
 0x461   : > { %2596 = vst.msk [vmem:[#allocation3 + $0xe8] sm:$0xff] %vm873_vm4, %v2530_v23  ;;  %v2532_v53 = vpop.permute.xlu0 %2531 }
 0x462   : > { %2597 = vst.msk [vmem:[#allocation3 + $0xf0] sm:$0xff] %vm873_vm4, %v2532_v53 }
 0x464   : > { %v3528_v63 = vpop.permute.xlu1 %3527  ;;  %v3626_v8 = vld [vmem:[#allocation3 + $0xc8] sm:$0xff] }
 0x465   : > { %3596 = vst.msk [vmem:[#allocation3 + $0xd8] sm:$0xff] %vm1883_vm12, %v3528_v63  ;;  %v3645_v62 = vpack.c.bf16 %v3626_v8, %v3625_v13  ;;  %v2736_v25 = vpop.permute.xlu0 %2735  ;;  %v3627_v1 = vld [vmem:[#allocation3 + $0xd0] sm:$0xff] }
 0x466   : > { %2803 = vst.msk [vmem:[#allocation3 + $0xe0] sm:$0xff] %vm1083_vm6, %v2736_v25 }
 0x467   : > { %4738 = vmatprep.mubr.msk.bf16.mxu1 %vm1973_vm13, %v3645_v62 }
 0x468   : > { %v2534_v31 = vpop.permute.xlu1 %2533 }
 0x469   : > { %2598 = vst.msk [vmem:[#allocation3 + $0xf8] sm:$0xff] %vm873_vm4, %v2534_v31  ;;  %v2740_v10 = vpop.permute.xlu0 %2739 }
 0x46a   : > { %2805 = vst.msk [vmem:[#allocation3 + $0xf0] sm:$0xff] %vm1083_vm6, %v2740_v10 }
 0x46c   : > { %v2738_v24 = vpop.permute.xlu1 %2737  ;;  %v3628_v14 = vld [vmem:[#allocation3 + $0xd8] sm:$0xff] }
 0x46d   : > { %2804 = vst.msk [vmem:[#allocation3 + $0xe8] sm:$0xff] %vm1083_vm6, %v2738_v24  ;;  %v3646_v51 = vpack.c.bf16 %v3628_v14, %v3627_v1  ;;  %v2866_v28 = vpop.permute.xlu0 %2865  ;;  %v3870_v14 = vld [vmem:[%s7841_s6] sm:$0xff] }
 0x46e   : > { %2933 = vst.msk [vmem:[#allocation3 + $0xe0] sm:$0xff] %vm1214_vm7, %v2866_v28  ;;  %v3872_v28 = vld [vmem:[%s7841_s6 + $0x10] sm:$0xff] }
 0x46f   : > { %4739 = vmatmul.mubr.msk.bf16.gmra.mxu1 %vm1973_vm13, %v3646_v51  ;;  %v4728_v56 = vpop.f32.mrf.mxu1  ;;  %v3871_v51 = vld [vmem:[%s7841_s6 + $0x8] sm:$0xff] }
 0x470   : > { %v2742_v43 = vpop.permute.xlu1 %2741 }
 0x471   : > { %2806 = vst.msk [vmem:[#allocation3 + $0xf8] sm:$0xff] %vm1083_vm6, %v2742_v43  ;;  %v2870_v52 = vpop.permute.xlu0 %2869  ;;  %v7520_v38 = vpop.f32.mrf.mxu1  ;;  %v7541_v43 = vpack.c.bf16 %v3871_v51, %v3870_v14 }
 0x472   : > { %2935 = vst.msk [vmem:[#allocation3 + $0xf0] sm:$0xff] %vm1214_vm7, %v2870_v52  ;;  %v3873_v52 = vld [vmem:[%s7841_s6 + $0x18] sm:$0xff] }
 0x473   : > { %v4729_v55 = vpop.f32.mrf.mxu1  ;;  %4664 = vmatprep.mubr.msk.bf16.mxu0 %vm435_vm0, %v7541_v43 }
 0x474   : > { %v2868_v2 = vpop.permute.xlu1 %2867 }
 0x475   : > { %2934 = vst.msk [vmem:[#allocation3 + $0xe8] sm:$0xff] %vm1214_vm7, %v2868_v2  ;;  %v3000_v0 = vpop.permute.xlu0 %2999  ;;  %v3794_v23 = vpop.f32.mrf.mxu1  ;;  %v7546_v2 = vpack.c.bf16 %v3873_v52, %v3872_v28 }
 0x476   : > { %3067 = vst.msk [vmem:[#allocation3 + $0xe0] sm:$0xff] %vm1349_vm8, %v3000_v0  ;;  %v3895_v0 = vld [vmem:[%s7842_s7] sm:$0xff] }
 0x478   : > { %v2872_v48 = vpop.permute.xlu1 %2871 }
 0x479   : > { %2936 = vst.msk [vmem:[#allocation3 + $0xf8] sm:$0xff] %vm1214_vm7, %v2872_v48  ;;  %v3004_v16 = vpop.permute.xlu0 %3003  ;;  %v4846_v48 = vmov 0  }
 0x47a   : > { %3069 = vst.msk [vmem:[#allocation3 + $0xf0] sm:$0xff] %vm1349_vm8, %v3004_v16  ;;  %4798 = vset.pattern.permute.xlu0 %v4846_v48  ;;  %4799 = vset.pattern.permute.xlu1 %v4846_v48  ;;  %v3896_v16 = vld [vmem:[%s7842_s7 + $0x8] sm:$0xff] }
 0x47b   : > { %3903 = vperm.xlu0 %4798, %v3895_v0   ;;  %3908 = vperm.xlu1 %4799, %v3896_v16  }
 0x47c   : > { %v3002_v15 = vpop.permute.xlu1 %3001 }
 0x47d   : > { %3068 = vst.msk [vmem:[#allocation3 + $0xe8] sm:$0xff] %vm1349_vm8, %v3002_v15  ;;  %v3133_v57 = vpop.permute.xlu0 %3132  ;;  %v3898_v15 = vld [vmem:[%s7842_s7 + $0x18] sm:$0xff] }
 0x47e   : > { %3200 = vst.msk [vmem:[#allocation3 + $0xe0] sm:$0xff] %vm1483_vm9, %v3133_v57  ;;  %v3897_v57 = vld [vmem:[%s7842_s7 + $0x10] sm:$0xff] }
 0x47f   : > { %3918 = vperm.xlu0 %4798, %v3898_v15   ;;  %3913 = vperm.xlu1 %4799, %v3897_v57  }
 0x480   : > { %v3006_v5 = vpop.permute.xlu1 %3005 }
 0x481   : > { %3070 = vst.msk [vmem:[#allocation3 + $0xf8] sm:$0xff] %vm1349_vm8, %v3006_v5  ;;  %v3137_v17 = vpop.permute.xlu0 %3136  ;;  %v3900_v5 = vld [vmem:[%s7842_s7 + $0x28] sm:$0xff] }
 0x482   : > { %3202 = vst.msk [vmem:[#allocation3 + $0xf0] sm:$0xff] %vm1483_vm9, %v3137_v17  ;;  %v3899_v17 = vld [vmem:[%s7842_s7 + $0x20] sm:$0xff] }
 0x483   : > { %3928 = vperm.xlu0 %4798, %v3900_v5   ;;  %3923 = vperm.xlu1 %4799, %v3899_v17   ;;  %v3950_v17 = vsel %vm435_vm0, %v3882_v11, 0 }
 0x484   : > { %v3135_v4 = vpop.permute.xlu1 %3134 }
 0x485   : > { %3201 = vst.msk [vmem:[#allocation3 + $0xe8] sm:$0xff] %vm1483_vm9, %v3135_v4  ;;  %v3263_v9 = vpop.permute.xlu0 %3262 }
 0x486   : > { %3330 = vst.msk [vmem:[#allocation3 + $0xe0] sm:$0xff] %vm1614_vm10, %v3263_v9 }
 0x488   : > { %v3139_v6 = vpop.permute.xlu1 %3138 }
 0x489   : > { %3203 = vst.msk [vmem:[#allocation3 + $0xf8] sm:$0xff] %vm1483_vm9, %v3139_v6  ;;  %v3267_v49 = vpop.permute.xlu0 %3266 }
 0x48a   : > { %3332 = vst.msk [vmem:[#allocation3 + $0xf0] sm:$0xff] %vm1614_vm10, %v3267_v49 }
 0x48c   : > { %v3265_v50 = vpop.permute.xlu1 %3264 }
 0x48d   : > { %3331 = vst.msk [vmem:[#allocation3 + $0xe8] sm:$0xff] %vm1614_vm10, %v3265_v50  ;;  %v3397_v21 = vpop.permute.xlu0 %3396 }
 0x48e   : > { %3464 = vst.msk [vmem:[#allocation3 + $0xe0] sm:$0xff] %vm1749_vm11, %v3397_v21 }
 0x490   : > { %v3269_v58 = vpop.permute.xlu1 %3268 }
 0x491   : > { %3333 = vst.msk [vmem:[#allocation3 + $0xf8] sm:$0xff] %vm1614_vm10, %v3269_v58  ;;  %v3401_v27 = vpop.permute.xlu0 %3400 }
 0x492   : > { %3466 = vst.msk [vmem:[#allocation3 + $0xf0] sm:$0xff] %vm1749_vm11, %v3401_v27 }
 0x494   : > { %v3399_v60 = vpop.permute.xlu1 %3398 }
 0x495   : > { %3465 = vst.msk [vmem:[#allocation3 + $0xe8] sm:$0xff] %vm1749_vm11, %v3399_v60  ;;  %v3530_v46 = vpop.permute.xlu0 %3529 }
 0x496   : > { %3597 = vst.msk [vmem:[#allocation3 + $0xe0] sm:$0xff] %vm1883_vm12, %v3530_v46  ;;  %v3803_v46 = vadd.f32 %v4729_v55, %v7203_v20  ;;  %v3792_v55 = vadd.f32 %v7203_v20, %v7520_v38  ;;  %v3784_v38 = vadd.f32 %v7505_v40, %v7203_v20  ;;  %v3776_v40 = vadd.f32 %v7203_v20, %v7509_v33 }
 0x498   : > { %v3403_v61 = vpop.permute.xlu1 %3402 }
 0x499   : > { %3467 = vst.msk [vmem:[#allocation3 + $0xf8] sm:$0xff] %vm1749_vm11, %v3403_v61  ;;  %v3534_v29 = vpop.permute.xlu0 %3533 }
 0x49a   : > { %3599 = vst.msk [vmem:[#allocation3 + $0xf0] sm:$0xff] %vm1883_vm12, %v3534_v29  ;;  %v3800_v29 = vadd.f32 %v4728_v56, %v7203_v20 }
 0x49c   : > { %v3532_v30 = vpop.permute.xlu1 %3531 }
 0x49d   : > { %3598 = vst.msk [vmem:[#allocation3 + $0xe8] sm:$0xff] %vm1883_vm12, %v3532_v30  ;;  %v3629_v37 = vld [vmem:[#allocation3 + $0xe0] sm:$0xff] }
 0x4a0   : > { %v3536_v22 = vpop.permute.xlu1 %3535 }
 0x4a1   : > { %3600 = vst.msk [vmem:[#allocation3 + $0xf8] sm:$0xff] %vm1883_vm12, %v3536_v22  ;;  %v3631_v45 = vld [vmem:[#allocation3 + $0xf0] sm:$0xff]  ;;  %v3886_v22 = vpack.c.bf16 %v3803_v46, %v3800_v29 }
 0x4a3   : > { %v3962_v56 = vsel %vm435_vm0, %v3886_v22, 0 }
 0x4a4   : > { %v3630_v18 = vld [vmem:[#allocation3 + $0xe8] sm:$0xff] }
 0x4a5   : > { %v3647_v36 = vpack.c.bf16 %v3630_v18, %v3629_v37 }
 0x4a7   : > { %4742 = vmatprep.mubr.msk.bf16.mxu1 %vm1973_vm13, %v3647_v36 }
 0x4a8   : > { %v3632_v59 = vld [vmem:[#allocation3 + $0xf8] sm:$0xff] }
 0x4a9   : > { %v3648_v42 = vpack.c.bf16 %v3632_v59, %v3631_v45 }
 0x4ab   : > { %4743 = vmatmul.mubr.msk.bf16.gmra.mxu1 %vm1973_vm13, %v3648_v42 }
 0x4ac   : > { %4666 = vmatprep.mubr.msk.bf16.mxu1 %vm435_vm0, %v7546_v2 }
 0x4af   : > { %v4732_v53 = vpop.f32.mrf.mxu1 }
 0x4b0   : > { %v3816_v8 = vadd.f32 %v4732_v53, %v7203_v20  ;;  %v3795_v53 = vadd.f32 %v7203_v20, %v3794_v23 }
 0x4b1   : > { %v3807_v63 = vpop.f32.mrf.mxu1 }
 0x4b2   : > { %v3808_v31 = vadd.f32 %v7203_v20, %v3807_v63 }
 0x4b3   : > { %v4733_v13 = vpop.f32.mrf.mxu1 }
 0x4b4   : > { %v3819_v62 = vadd.f32 %v4733_v13, %v7203_v20  ;;  %v3885_v13 = vpack.c.bf16 %v3795_v53, %v3792_v55 }
 0x4b5   : > { %v3810_v25 = vpop.f32.mrf.mxu1 }
 0x4b6   : > { %v7527_v10 = vpack.c.bf16 %v3819_v62, %v3816_v8  ;;  %v3811_v24 = vadd.f32 %v7203_v20, %v3810_v25  ;;  %v3787_v62 = vadd.f32 %v7513_v12, %v7203_v20  ;;  %v3779_v12 = vadd.f32 %v7203_v20, %v7517_v44 }
 0x4b8   : > { %v7530_v1 = vpack.c.bf16 %v3811_v24, %v3808_v31  ;;  %v3959_v31 = vsel %vm435_vm0, %v3885_v13, 0  ;;  %v3884_v24 = vpack.c.bf16 %v3787_v62, %v3784_v38  ;;  %v3883_v0 = vpack.c.bf16 %v3779_v12, %v3776_v40 }
 0x4ba   : > { %v3956_v52 = vsel %vm435_vm0, %v3884_v24, 0  ;;  %v3953_v44 = vsel %vm435_vm0, %v3883_v0, 0 }
 0x4ef   : > { %v4736_v4 = vpop.f32.mrf.mxu1 }
 0x4f0   : > { %v3832_v16 = vadd.f32 %v4736_v4, %v7203_v20  ;;  %v3947_v4 = vsel %vm435_vm0, %v3881_v26, 0 }
 0x4f1   : > { %v3823_v9 = vpop.f32.mrf.mxu1 }
 0x4f2   : > { %v3824_v57 = vadd.f32 %v7203_v20, %v3823_v9 }
 0x4f3   : > { %v4737_v6 = vpop.f32.mrf.mxu1 }
 0x4f4   : > { %v3835_v48 = vadd.f32 %v4737_v6, %v7203_v20 }
 0x4f5   : > { %v3826_v49 = vpop.f32.mrf.mxu1 }
 0x4f6   : > { %v3890_v15 = vpack.c.bf16 %v3835_v48, %v3832_v16  ;;  %v3827_v33 = vadd.f32 %v7203_v20, %v3826_v49  ;;  %v3909_v39 = vpop.permute.xlu1 %3908  ;;  %v3904_v19 = vpop.permute.xlu0 %3903 }
 0x4f8   : > { %v3889_v5 = vpack.c.bf16 %v3827_v33, %v3824_v57 }
 0x4fa   : > { %v3914_v3 = vpop.permute.xlu1 %3913  ;;  %v3919_v6 = vpop.permute.xlu0 %3918 }
 0x4fe   : > { %v3924_v22 = vpop.permute.xlu1 %3923  ;;  %v3929_v13 = vpop.permute.xlu0 %3928 }
 0x52f   : > { %v4740_v50 = vpop.f32.mrf.mxu1 }
 0x530   : > { %v3848_v23 = vadd.f32 %v4740_v50, %v7203_v20 }
 0x531   : > { %v3839_v21 = vpop.f32.mrf.mxu1 }
 0x532   : > { %v3840_v51 = vadd.f32 %v7203_v20, %v3839_v21 }
 0x533   : > { %v4741_v58 = vpop.f32.mrf.mxu1 }
 0x534   : > { %v3851_v8 = vadd.f32 %v4741_v58, %v7203_v20 }
 0x535   : > { %v3842_v27 = vpop.f32.mrf.mxu1 }
 0x536   : > { %v3892_v25 = vpack.c.bf16 %v3851_v8, %v3848_v23  ;;  %v3843_v14 = vadd.f32 %v7203_v20, %v3842_v27 }
 0x538   : > { %v3891_v28 = vpack.c.bf16 %v3843_v14, %v3840_v51 }
 0x56b   : > { %v4744_v60 = vpop.f32.mrf.mxu1 }
 0x56c   : > { %v3864_v37 = vadd.f32 %v4744_v60, %v7203_v20 }
 0x56d   : > { %v3855_v61 = vpop.f32.mrf.mxu1 }
 0x56e   : > { %v3856_v45 = vadd.f32 %v7203_v20, %v3855_v61 }
 0x56f   : > { %v4745_v30 = vpop.f32.mrf.mxu1 }
 0x570   : > { %v3867_v18 = vadd.f32 %v4745_v30, %v7203_v20 }
 0x571   : > { %v3858_v36 = vpop.f32.mrf.mxu1 }
 0x572   : > { %v3894_v59 = vpack.c.bf16 %v3867_v18, %v3864_v37  ;;  %v3859_v42 = vadd.f32 %v7203_v20, %v3858_v36  ;;  %v3944_v20 = vsel %vm435_vm0, %v3880_v41, 0  ;;  %v3878_v41 = vpack.c.bf16 %v3875_v7, %v3874_v54 }
 0x574   : > { %v3893_v63 = vpack.c.bf16 %v3859_v42, %v3856_v45  ;;  %4764 = vmatprep.subr.msk.bf16.mxu0 %vm435_vm0, %v3894_v59  ;;  %4765 = vmatprep.subr.msk.bf16.mxu1 %vm435_vm0, %v3894_v59 }
 0x575   : > { %4649 = vmatpush3.bf16.xpose.msra.mxu0 %v3962_v56  ;;  %4754 = vmatpush3.bf16.xpose.msra.mxu1 %v3962_v56 }
 0x576   : > { %4766 = vmatprep.subr.msk.bf16.mxu0 %vm435_vm0, %v3893_v63  ;;  %4767 = vmatprep.subr.msk.bf16.mxu1 %vm435_vm0, %v3893_v63 }
 0x57d   : > { %4651 = vmatpush3.bf16.xpose.msra.mxu0 %v3959_v31  ;;  %4755 = vmatpush3.bf16.xpose.msra.mxu1 %v3959_v31 }
 0x57e   : > { %4768 = vmatprep.subr.msk.bf16.mxu0 %vm435_vm0, %v3892_v25  ;;  %4769 = vmatprep.subr.msk.bf16.mxu1 %vm435_vm0, %v3892_v25 }
 0x585   : > { %4653 = vmatpush3.bf16.xpose.msra.mxu0 %v3956_v52  ;;  %4756 = vmatpush3.bf16.xpose.msra.mxu1 %v3956_v52 }
 0x586   : > { %4770 = vmatprep.subr.msk.bf16.mxu0 %vm435_vm0, %v3891_v28  ;;  %4771 = vmatprep.subr.msk.bf16.mxu1 %vm435_vm0, %v3891_v28 }
 0x58d   : > { %4655 = vmatpush3.bf16.xpose.msra.mxu0 %v3953_v44  ;;  %4757 = vmatpush3.bf16.xpose.msra.mxu1 %v3953_v44 }
 0x58e   : > { %4772 = vmatprep.subr.msk.bf16.mxu0 %vm435_vm0, %v3890_v15  ;;  %4773 = vmatprep.subr.msk.bf16.mxu1 %vm435_vm0, %v3890_v15 }
 0x595   : > { %4657 = vmatpush3.bf16.xpose.msra.mxu0 %v3950_v17  ;;  %4758 = vmatpush3.bf16.xpose.msra.mxu1 %v3950_v17 }
 0x596   : > { %4774 = vmatprep.subr.msk.bf16.mxu0 %vm435_vm0, %v3889_v5  ;;  %4775 = vmatprep.subr.msk.bf16.mxu1 %vm435_vm0, %v3889_v5 }
 0x59d   : > { %4659 = vmatpush3.bf16.xpose.msra.mxu0 %v3947_v4  ;;  %4759 = vmatpush3.bf16.xpose.msra.mxu1 %v3947_v4 }
 0x59e   : > { %4776 = vmatprep.subr.msk.bf16.mxu0 %vm435_vm0, %v7527_v10  ;;  %4777 = vmatprep.subr.msk.bf16.mxu1 %vm435_vm0, %v7527_v10 }
 0x5a5   : > { %4661 = vmatpush3.bf16.xpose.msra.mxu0 %v3944_v20  ;;  %4760 = vmatpush3.bf16.xpose.msra.mxu1 %v3944_v20 }
 0x5a6   : > { %4778 = vmatprep.subr.msk.bf16.mxu0 %vm435_vm0, %v7530_v1  ;;  %4779 = vmatprep.subr.msk.bf16.mxu1 %vm435_vm0, %v7530_v1 }
 0x5ad   : > { %4663 = vmatpush3.bf16.xpose.msra.mxu0 %v3941_v34  ;;  %4761 = vmatpush3.bf16.xpose.msra.mxu1 %v3941_v34 }
 0x5b4   : > { %4665 = vmatmul.mubr.msk.bf16.vlgmr.msra.gmra.mxu0 %vm435_vm0, %v7541_v43  ;;  %4667 = vmatmul.mubr.msk.bf16.vlgmr.msra.gmra.mxu1 %vm435_vm0, %v7546_v2 }
 0x5b5   : > { %4668 = vmatprep.mubr.msk.bf16.mxu1 %vm435_vm0, %v3878_v41 }
 0x5bc   : > { %4669 = vmatmul.mubr.msk.bf16.gmra.mxu1 %vm435_vm0, %v3878_v41 }
 0x674   : > { %v4022_v32 = vpop.f32.mrf.mxu0  ;;  %v4032_v35 = vpop.f32.mrf.mxu1 }
 0x675   : > { %v7647_v26 = vadd.f32 %v4022_v32, %v3904_v19  ;;  %v7651_v9 = vadd.f32 %v4032_v35, %v3914_v3  ;;  %v4080_v32 = vld [vmem:[%s7843_s8] sm:$0xf] }
 0x676   : > { %v4024_v11 = vpop.f32.mrf.mxu0  ;;  %v4034_v47 = vpop.f32.mrf.mxu1 }
 0x677   : > { %v7649_v10 = vadd.f32 %v4024_v11, %v3904_v19  ;;  %v7653_v2 = vadd.f32 %v4034_v47, %v3914_v3  ;;  %v4590_v11 = vld [vmem:[%s7843_s8 + $0xc] sm:$0xf]  ;;  %v4580_v47 = vld [vmem:[%s7843_s8 + $0x4] sm:$0xf] }
 0x678   : > { %v4026_v1 = vpop.f32.mrf.mxu0  ;;  %v4036_v43 = vpop.f32.mrf.mxu1 }
 0x679   : > { %v4117_v49 = vcombine.high %v7647_v26, %v7649_v10  ;;  %v4051_v50 = vadd.f32 %v7649_v10, %v7647_v26  ;;  %v4247_v27 = vcombine.high %v7651_v9, %v7653_v2  ;;  %v7661_v60 = vadd.f32 %v4026_v1, %v3909_v39 }
 0x67a   : > { %v4028_v21 = vpop.f32.mrf.mxu0  ;;  %v4038_v58 = vpop.f32.mrf.mxu1  ;;  %v7663_v46 = vadd.f32 %v4036_v43, %v3919_v6  ;;  %v4057_v63 = vadd.f32 %v7653_v2, %v7651_v9 }
 0x67b   : > { %v7665_v61 = vadd.f32 %v4028_v21, %v3909_v39  ;;  %v7667_v29 = vadd.f32 %v4038_v58, %v3919_v6  ;;  %4052 = vadd.xlane.f32.xlu1 %v4051_v50 }
 0x67c   : > { %v4042_v30 = vpop.f32.mrf.mxu1 }
 0x67d   : > { %v4182_v37 = vcombine.high %v7661_v60, %v7665_v61  ;;  %v4312_v18 = vcombine.high %v7663_v46, %v7667_v29  ;;  %v4054_v36 = vadd.f32 %v7665_v61, %v7661_v60  ;;  %v4060_v45 = vadd.f32 %v7667_v29, %v7663_v46 }
 0x67e   : > { %v4044_v59 = vpop.f32.mrf.mxu1  ;;  %v7677_v42 = vadd.f32 %v4042_v30, %v3924_v22 }
 0x67f   : > { %4055 = vadd.xlane.f32.xlu0 %v4054_v36  ;;  %4061 = vadd.xlane.f32.xlu1 %v4060_v45  ;;  %v7679_v53 = vadd.f32 %v4044_v59, %v3924_v22  ;;  %v4585_v22 = vld [vmem:[%s7843_s8 + $0x8] sm:$0xf] }
 0x680   : > { %v4046_v56 = vpop.f32.mrf.mxu1 }
 0x681   : > { %v4377_v55 = vcombine.high %v7677_v42, %v7679_v53  ;;  %v7685_v23 = vadd.f32 %v4046_v56, %v3929_v13  ;;  %v4063_v25 = vadd.f32 %v7679_v53, %v7677_v42 }
 0x682   : > { %v4048_v8 = vpop.f32.mrf.mxu1 }
 0x683   : > { %v7687_v62 = vadd.f32 %v4048_v8, %v3929_v13  ;;  %4058 = vadd.xlane.f32.xlu0 %v4057_v63 }
 0x685   : > { %v4066_v31 = vadd.f32 %v7687_v62, %v7685_v23  ;;  %v4442_v38 = vcombine.high %v7685_v23, %v7687_v62 }
 0x687   : > { %4064 = vadd.xlane.f32.xlu0 %v4063_v25  ;;  %4067 = vadd.xlane.f32.xlu1 %v4066_v31  ;;  %v4099_v25 = vlaneseq }
 0x704   : > { %v4053_v24 = vpop.xlane.xlu1 %4052 }
 0x705   : > { %v4069_v14 = vmul.f32 0.00390625, %v4053_v24 }
 0x707   : > { %v4077_v51 = vrot.slane %v4069_v14, 4 }
 0x708   : > { %v4056_v12 = vpop.xlane.xlu0 %4055  ;;  %v4062_v28 = vpop.xlane.xlu1 %4061 }
 0x709   : > { %v4079_v52 = vadd.f32 %v4077_v51, %v4069_v14  ;;  %v4070_v40 = vmul.f32 0.00390625, %v4056_v12  ;;  %v4072_v0 = vmul.f32 0.00390625, %v4062_v28  ;;  %v4600_v51 = vld [vmem:[%s7843_s8 + $0x14] sm:$0xf]  ;;  %v4595_v12 = vld [vmem:[%s7843_s8 + $0x10] sm:$0xf] }
 0x70b   : > { %v4139_v48 = vrot.slane %v4070_v40, 4  ;;  %v4269_v16 = vrot.slane %v4072_v0, 4  ;;  %4083 = vperm.xlu0 %4798, %v4079_v52  }
 0x70c   : > { %v4059_v15 = vpop.xlane.xlu0 %4058 }
 0x70d   : > { %v4141_v44 = vadd.f32 %v4139_v48, %v4070_v40  ;;  %v4271_v33 = vadd.f32 %v4269_v16, %v4072_v0  ;;  %v4071_v57 = vmul.f32 0.00390625, %v4059_v15 }
 0x70f   : > { %v4204_v5 = vrot.slane %v4071_v57, 4  ;;  %4146 = vperm.xlu1 %4799, %v4141_v44   ;;  %4276 = vperm.xlu0 %4798, %v4271_v33  }
 0x710   : > { %v4065_v17 = vpop.xlane.xlu0 %4064  ;;  %v4068_v4 = vpop.xlane.xlu1 %4067 }
 0x711   : > { %v4206_v20 = vadd.f32 %v4204_v5, %v4071_v57  ;;  %v4073_v34 = vmul.f32 0.00390625, %v4065_v17  ;;  %v4074_v54 = vmul.f32 0.00390625, %v4068_v4  ;;  %v4100_v57 = vshrl.u32 %v4099_v25, 7 }
 0x713   : > { %v4334_v7 = vrot.slane %v4073_v34, 4  ;;  %v4399_v41 = vrot.slane %v4074_v54, 4  ;;  %4211 = vperm.xlu1 %4799, %v4206_v20  }
 0x715   : > { %v4336_v39 = vadd.f32 %v4334_v7, %v4073_v34  ;;  %v4401_v19 = vadd.f32 %v4399_v41, %v4074_v54  ;;  %v4095_v34 = vld [vmem:[%s7844_s9] sm:$0x1] }
 0x717   : > { %4341 = vperm.xlu1 %4799, %v4336_v39   ;;  %4406 = vperm.xlu0 %4798, %v4401_v19  }
 0x786   : > { %v4084_v35 = vpop.permute.xlu0 %4083 }
 0x787   : > { %v4086_v3 = vmul.f32 %v4084_v35, %v4080_v32 }
 0x789   : > { %v4088_v1 = vsel %vm4087_vm14, %v4086_v3, 0.0 }
 0x78a   : > { %v4089_v43 = vrot.slane %v4088_v1, 4  ;;  %v4277_v6 = vpop.permute.xlu0 %4276  ;;  %v4147_v50 = vpop.permute.xlu1 %4146 }
 0x78b   : > { %v4279_v21 = vmul.f32 %v4590_v11, %v4277_v6  ;;  %v4149_v58 = vmul.f32 %v4580_v47, %v4147_v50  ;;  %v4101_v11 = vsub.s32 0, %v4100_v57  ;;  %v4581_v47 = vld [vmem:[%s7844_s9 + $0x1] sm:$0x1] }
 0x78c   : > { %v4090_v30 = vadd.f32 %v4089_v43, %v4088_v1  ;;  %v4591_v1 = vld [vmem:[%s7844_s9 + $0x3] sm:$0x1] }
 0x78d   : > { %v4280_v36 = vsel %vm4087_vm14, %v4279_v21, 0.0  ;;  %v4150_v45 = vsel %vm4087_vm14, %v4149_v58, 0.0 }
 0x78e   : > { %v4091_v59 = vrot.slane %v4090_v30, 2  ;;  %v4281_v63 = vrot.slane %v4280_v36, 4  ;;  %v4151_v56 = vrot.slane %v4150_v45, 4  ;;  %v4212_v13 = vpop.permute.xlu1 %4211 }
 0x78f   : > { %v4214_v8 = vmul.f32 %v4585_v22, %v4212_v13 }
 0x790   : > { %v4092_v31 = vadd.f32 %v4091_v59, %v4090_v30  ;;  %v4282_v24 = vadd.f32 %v4281_v63, %v4280_v36  ;;  %v4152_v14 = vadd.f32 %v4151_v56, %v4150_v45  ;;  %v4098_v45 = vld [vmem:[%s7845_s10] sm:$0xf] }
 0x791   : > { %v4215_v28 = vsel %vm4087_vm14, %v4214_v8, 0.0  ;;  %v4586_v8 = vld [vmem:[%s7844_s9 + $0x2] sm:$0x1] }
 0x792   : > { %v4093_v52 = vrot.slane %v4092_v31, 1  ;;  %v4283_v40 = vrot.slane %v4282_v24, 2  ;;  %v4153_v0 = vrot.slane %v4152_v14, 2  ;;  %v4216_v48 = vrot.slane %v4215_v28, 4  ;;  %v4407_v16 = vpop.permute.xlu0 %4406  ;;  %v4342_v15 = vpop.permute.xlu1 %4341 }
 0x793   : > { %v4409_v44 = vmul.f32 %v4600_v51, %v4407_v16  ;;  %v4344_v33 = vmul.f32 %v4595_v12, %v4342_v15 }
 0x794   : > { %v4094_v5 = vadd.f32 %v4093_v52, %v4092_v31  ;;  %v4284_v17 = vadd.f32 %v4283_v40, %v4282_v24  ;;  %v4154_v4 = vadd.f32 %v4153_v0, %v4152_v14  ;;  %v4217_v20 = vadd.f32 %v4216_v48, %v4215_v28  ;;  %v4582_v28 = vld [vmem:[%s7845_s10 + $0x4] sm:$0xf] }
 0x795   : > { %v4410_v54 = vsel %vm4087_vm14, %v4409_v44, 0.0  ;;  %v4345_v7 = vsel %vm4087_vm14, %v4344_v33, 0.0  ;;  %v4592_v44 = vld [vmem:[%s7845_s10 + $0xc] sm:$0xf]  ;;  %v4601_v33 = vld [vmem:[%s7844_s9 + $0x5] sm:$0x1] }
 0x796   : > { %v4285_v41 = vrot.slane %v4284_v17, 1  ;;  %v4155_v39 = vrot.slane %v4154_v4, 1  ;;  %v4218_v19 = vrot.slane %v4217_v20, 2  ;;  %v4411_v32 = vrot.slane %v4410_v54, 4 }
 0x797   : > { %v4346_v35 = vrot.slane %v4345_v7, 4  ;;  %v4096_v3 = vadd.f32 %v4095_v34, %v4094_v5  ;;  %v4587_v34 = vld [vmem:[%s7845_s10 + $0x8] sm:$0xf] }
 0x798   : > { %v4286_v43 = vadd.f32 %v4285_v41, %v4284_v17  ;;  %v4156_v6 = vadd.f32 %v4155_v39, %v4154_v4  ;;  %v4219_v50 = vadd.f32 %v4218_v19, %v4217_v20  ;;  %v4412_v21 = vadd.f32 %v4411_v32, %v4410_v54  ;;  %v4596_v4 = vld [vmem:[%s7844_s9 + $0x4] sm:$0x1] }
 0x799   : > { %v4347_v58 = vadd.f32 %v4346_v35, %v4345_v7  ;;  %v4097_v30 = vmax.f32 %v4096_v3, 0.0 }
 0x79a   : > { %v4220_v22 = vrot.slane %v4219_v50, 1  ;;  %v4413_v36 = vrot.slane %v4412_v21, 2  ;;  %v4159_v59 = vadd.f32 %v4581_v47, %v4156_v6  ;;  %v4289_v63 = vadd.f32 %v4591_v1, %v4286_v43  ;;  %v4602_v47 = vld [vmem:[%s7845_s10 + $0x14] sm:$0xf]  ;;  %v4597_v6 = vld [vmem:[%s7845_s10 + $0x10] sm:$0xf] }
 0x79b   : > { %v4348_v56 = vrot.slane %v4347_v58, 2  ;;  %v4102_v13 = vrot.slane %v4097_v30, %v4101_v11 }
 0x79c   : > { %v4221_v25 = vadd.f32 %v4220_v22, %v4219_v50  ;;  %v4414_v31 = vadd.f32 %v4413_v36, %v4412_v21  ;;  %v4160_v24 = vmax.f32 %v4159_v59, 0.0  ;;  %v4290_v14 = vmax.f32 %v4289_v63, 0.0 }
 0x79d   : > { %v4349_v51 = vadd.f32 %v4348_v56, %v4347_v58  ;;  %v4103_v12 = vmul.f32 %v4102_v13, %v4098_v45  ;;  %v4107_v45 = vld [vmem:[%s7846_s11] sm:$0xf]  ;;  %v4583_v56 = vld [vmem:[%s7846_s11 + $0x4] sm:$0xf] }
 0x79e   : > { %v4415_v52 = vrot.slane %v4414_v31, 1  ;;  %v4166_v40 = vrot.slane %v4160_v24, %v4101_v11  ;;  %v4296_v0 = vrot.slane %v4290_v14, %v4101_v11  ;;  %v4224_v48 = vadd.f32 %v4586_v8, %v4221_v25  ;;  %v4593_v25 = vld [vmem:[%s7846_s11 + $0xc] sm:$0xf] }
 0x79f   : > { %v4350_v16 = vrot.slane %v4349_v51, 1  ;;  %v4104_v15 = vsel %vm4087_vm14, %v4103_v12, 0.0 }
 0x7a0   : > { %v4416_v57 = vadd.f32 %v4415_v52, %v4414_v31  ;;  %4105 = vadd.xlane.f32.xlu1 %v4104_v15  ;;  %v4167_v5 = vmul.f32 %v4582_v28, %v4166_v40  ;;  %v4225_v17 = vmax.f32 %v4224_v48, 0.0  ;;  %v4297_v7 = vmul.f32 %v4592_v44, %v4296_v0  ;;  %v4598_v28 = vld [vmem:[%s7846_s11 + $0x10] sm:$0xf] }
 0x7a1   : > { %v4351_v20 = vadd.f32 %v4350_v16, %v4349_v51 }
 0x7a2   : > { %v4168_v54 = vsel %vm4087_vm14, %v4167_v5, 0.0  ;;  %v4231_v41 = vrot.slane %v4225_v17, %v4101_v11  ;;  %v4419_v39 = vadd.f32 %v4601_v33, %v4416_v57  ;;  %v4298_v1 = vsel %vm4087_vm14, %v4297_v7, 0.0 }
 0x7a3   : > { %4169 = vadd.xlane.f32.xlu0 %v4168_v54  ;;  %v4354_v19 = vadd.f32 %v4596_v4, %v4351_v20  ;;  %v4588_v54 = vld [vmem:[%s7846_s11 + $0x8] sm:$0xf] }
 0x7a4   : > { %v4232_v32 = vmul.f32 %v4587_v34, %v4231_v41  ;;  %v4420_v35 = vmax.f32 %v4419_v39, 0.0 }
 0x7a5   : > { %v4355_v3 = vmax.f32 %v4354_v19, 0.0 }
 0x7a6   : > { %v4233_v43 = vsel %vm4087_vm14, %v4232_v32, 0.0  ;;  %v4426_v50 = vrot.slane %v4420_v35, %v4101_v11 }
 0x7a7   : > { %4299 = vadd.xlane.f32.xlu0 %v4298_v1  ;;  %4234 = vadd.xlane.f32.xlu1 %v4233_v43  ;;  %v4361_v21 = vrot.slane %v4355_v3, %v4101_v11  ;;  %v4120_v3 = vrot.slane %v7647_v26, 4  ;;  %v4185_v1 = vrot.slane %v7661_v60, 4  ;;  %v4186_v43 = vrot.slane %v7665_v61, 4 }
 0x7a8   : > { %v4427_v58 = vmul.f32 %v4602_v47, %v4426_v50  ;;  %v4121_v47 = vrot.slane %v7649_v10, 4 }
 0x7a9   : > { %v4362_v30 = vmul.f32 %v4597_v6, %v4361_v21  ;;  %v4124_v6 = vsub.f32 %v7647_v26, %v4120_v3  ;;  %v4381_v26 = vrot.slane %v7679_v53, 4 }
 0x7aa   : > { %v4428_v22 = vsel %vm4087_vm14, %v4427_v58, 0.0  ;;  %v4125_v50 = vsub.f32 %v7649_v10, %v4121_v47  ;;  %v4075_v58 = vld [vmem:[%s423_s20] sm:$0xff] }
 0x7ab   : > { %v4363_v36 = vsel %vm4087_vm14, %v4362_v30, 0.0 }
 0x7ac   : > { %4364 = vadd.xlane.f32.xlu1 %v4363_v36  ;;  %v4189_v36 = vsub.f32 %v7661_v60, %v4185_v1 }
 0x829   : > { %v4106_v59 = vpop.xlane.xlu1 %4105 }
 0x82a   : > { %v4108_v63 = vadd.f32 %v4107_v45, %v4106_v59  ;;  %v4190_v45 = vsub.f32 %v7665_v61, %v4186_v43  ;;  %v4315_v59 = vrot.slane %v7663_v46, 4 }
 0x82c   : > { %v4579_v13 = vmul.f32 -1.442695, %v4108_v63  ;;  %v4170_v8 = vpop.xlane.xlu0 %4169  ;;  %v4316_v63 = vrot.slane %v7667_v29, 4 }
 0x82d   : > { %v4173_v11 = vadd.f32 %v4583_v56, %v4170_v8  ;;  %v4119_v56 = vadd.f32 %v4117_v49, %v4075_v58 }
 0x82e   : > { %4800 = vpow2.f32 %v4579_v13 }
 0x82f   : > { %v4584_v31 = vmul.f32 -1.442695, %v4173_v11 }
 0x830   : > { %v4300_v24 = vpop.xlane.xlu0 %4299  ;;  %v4235_v14 = vpop.xlane.xlu1 %4234 }
 0x831   : > { %4802 = vpow2.f32 %v4584_v31  ;;  %v4303_v51 = vadd.f32 %v4593_v25, %v4300_v24  ;;  %v4238_v41 = vadd.f32 %v4588_v54, %v4235_v14  ;;  %v4319_v14 = vsub.f32 %v7663_v46, %v4315_v59 }
 0x832   : > { %v4446_v46 = vrot.slane %v7687_v62, 4 }
 0x833   : > { %v4594_v12 = vmul.f32 -1.442695, %v4303_v51  ;;  %v4589_v39 = vmul.f32 -1.442695, %v4238_v41  ;;  %v4320_v51 = vsub.f32 %v7667_v29, %v4316_v63 }
 0x835   : > { %4804 = vpow2.f32 %v4594_v12  ;;  %v4365_v52 = vpop.xlane.xlu1 %4364 }
 0x836   : > { %v4368_v40 = vadd.f32 %v4598_v28, %v4365_v52  ;;  %v4380_v52 = vrot.slane %v7677_v42, 4 }
 0x838   : > { %v4599_v0 = vmul.f32 -1.442695, %v4368_v40 }
 0x83a   : > { %4806 = vpow2.f32 %v4599_v0 }
 0x83b   : > { %v4801_v48 = vpop.eup %4800 }
 0x83c   : > { %v4112_v16 = vadd.f32 1.0, %v4801_v48  ;;  %v4384_v48 = vsub.f32 %v7677_v42, %v4380_v52 }
 0x83e   : > { %v4803_v15 = vpop.eup %4802  ;;  %4808 = vrcp.f32 %v4112_v16  ;;  %v4385_v16 = vsub.f32 %v7679_v53, %v4381_v26 }
 0x83f   : > { %v4177_v44 = vadd.f32 1.0, %v4803_v15 }
 0x841   : > { %4810 = vrcp.f32 %v4177_v44 }
 0x842   : > { %v4805_v33 = vpop.eup %4804 }
 0x843   : > { %v4307_v57 = vadd.f32 1.0, %v4805_v33  ;;  %v4603_v33 = vld [vmem:[%s7846_s11 + $0x14] sm:$0xf] }
 0x845   : > { %4812 = vrcp.f32 %v4307_v57 }
 0x847   : > { %v4807_v5 = vpop.eup %4806 }
 0x848   : > { %v4372_v17 = vadd.f32 1.0, %v4807_v5 }
 0x84a   : > { %4814 = vrcp.f32 %v4372_v17 }
 0x84b   : > { %v4809_v4 = vpop.eup %4808  ;;  %4816 = vpow2.f32 %v4589_v39 }
 0x84c   : > { %4128 = vperm.xlu0 %4798, %v4809_v4   ;;  %v4250_v4 = vrot.slane %v7651_v9, 4 }
 0x84e   : > { %v4811_v20 = vpop.eup %4810 }
 0x84f   : > { %4193 = vperm.xlu1 %4799, %v4811_v20   ;;  %v4251_v20 = vrot.slane %v7653_v2, 4 }
 0x852   : > { %v4813_v34 = vpop.eup %4812 }
 0x853   : > { %4323 = vperm.xlu1 %4799, %v4813_v34   ;;  %v4254_v34 = vsub.f32 %v7651_v9, %v4250_v4 }
 0x857   : > { %v4815_v7 = vpop.eup %4814 }
 0x858   : > { %4388 = vperm.xlu1 %4799, %v4815_v7   ;;  %v4817_v19 = vpop.eup %4816 }
 0x859   : > { %v4242_v32 = vadd.f32 1.0, %v4817_v19 }
 0x85b   : > { %4818 = vrcp.f32 %v4242_v32 }
 0x868   : > { %v4819_v35 = vpop.eup %4818 }
 0x86b   : > { %4429 = vadd.xlane.f32.xlu0 %v4428_v22 }
 0x881   : > { %4258 = vperm.xlu0 %4798, %v4819_v35  }
 0x8c7   : > { %v4129_v21 = vpop.permute.xlu0 %4128 }
 0x8c8   : > { %v4131_v30 = vmul.f32 %v4129_v21, %v4124_v6  ;;  %v4132_v22 = vmul.f32 %v4129_v21, %v4125_v50  ;;  %v4445_v6 = vrot.slane %v7685_v23, 4 }
 0x8ca   : > { %v4135_v13 = vcombine.low %v4131_v30, %v4132_v22  ;;  %v4194_v8 = vpop.permute.xlu1 %4193  ;;  %v4449_v29 = vsub.f32 %v7685_v23, %v4445_v6 }
 0x8cb   : > { %v4196_v11 = vmul.f32 %v4194_v8, %v4189_v36  ;;  %v4197_v25 = vmul.f32 %v4194_v8, %v4190_v45 }
 0x8cc   : > { %v4137_v31 = vadd.f32 %v4135_v13, %v4119_v56 }
 0x8cd   : > { %v4200_v24 = vcombine.low %v4196_v11, %v4197_v25 }
 0x8ce   : > { %v4184_v12 = vadd.f32 %v4182_v37, %v4137_v31  ;;  %v4324_v28 = vpop.permute.xlu1 %4323 }
 0x8cf   : > { %v4326_v10 = vmul.f32 %v4324_v28, %v4319_v14  ;;  %v4327_v49 = vmul.f32 %v4324_v28, %v4320_v51 }
 0x8d0   : > { %v4202_v40 = vadd.f32 %v4200_v24, %v4184_v12 }
 0x8d1   : > { %v4330_v0 = vcombine.low %v4326_v10, %v4327_v49 }
 0x8d2   : > { %v4249_v15 = vadd.f32 %v4247_v27, %v4202_v40  ;;  %v4255_v27 = vsub.f32 %v7653_v2, %v4251_v20 }
 0x8d3   : > { %v4389_v44 = vpop.permute.xlu1 %4388 }
 0x8d4   : > { %v4391_v60 = vmul.f32 %v4389_v44, %v4384_v48  ;;  %v4392_v61 = vmul.f32 %v4389_v44, %v4385_v16 }
 0x8d6   : > { %v4395_v37 = vcombine.low %v4391_v60, %v4392_v61 }
 0x8f4   : > { %v4430_v57 = vpop.xlane.xlu0 %4429 }
 0x8f5   : > { %v4433_v5 = vadd.f32 %v4603_v33, %v4430_v57 }
 0x8f7   : > { %v4604_v17 = vmul.f32 -1.442695, %v4433_v5 }
 0x8f9   : > { %4820 = vpow2.f32 %v4604_v17 }
 0x8fc   : > { %v4259_v54 = vpop.permute.xlu0 %4258 }
 0x8fd   : > { %v4261_v7 = vmul.f32 %v4259_v54, %v4254_v34  ;;  %v4262_v41 = vmul.f32 %v4259_v54, %v4255_v27 }
 0x8ff   : > { %v4265_v39 = vcombine.low %v4261_v7, %v4262_v41 }
 0x901   : > { %v4267_v19 = vadd.f32 %v4265_v39, %v4249_v15 }
 0x903   : > { %v4314_v32 = vadd.f32 %v4312_v18, %v4267_v19  ;;  %v4450_v18 = vsub.f32 %v7687_v62, %v4446_v46 }
 0x905   : > { %v4332_v35 = vadd.f32 %v4330_v0, %v4314_v32 }
 0x906   : > { %v4821_v3 = vpop.eup %4820 }
 0x907   : > { %v4437_v47 = vadd.f32 1.0, %v4821_v3  ;;  %v4379_v1 = vadd.f32 %v4377_v55, %v4332_v35 }
 0x909   : > { %4822 = vrcp.f32 %v4437_v47  ;;  %v4397_v9 = vadd.f32 %v4395_v37, %v4379_v1 }
 0x90b   : > { %v4444_v2 = vadd.f32 %v4442_v38, %v4397_v9 }
 0x916   : > { %v4823_v43 = vpop.eup %4822 }
 0x917   : > { %4453 = vperm.xlu0 %4798, %v4823_v43  }
 0x992   : > { %v4454_v50 = vpop.permute.xlu0 %4453 }
 0x993   : > { %v4456_v21 = vmul.f32 %v4454_v50, %v4449_v29  ;;  %v4457_v42 = vmul.f32 %v4454_v50, %v4450_v18 }
 0x995   : > { %v4460_v53 = vcombine.low %v4456_v21, %v4457_v42 }
 0x997   : > { %v4462_v55 = vadd.f32 %v4460_v53, %v4444_v2 }
 0x999   : > { %4463 = vst [vmem:[%s433_s18] sm:$0xff] %v4462_v55 }
 0x99a PF: > { %s22_s21 = sadd.s32 1, %s4835_s21  }
 0x99b   : > { %p19_p4 = scmp.ge.s32.totalorder %s22_s21, 4  }
 0x99d   :  { %21 = sbr.rel (!%p19_p4) target bundleno = 1 (0x1), region = 122 }

</bundles_post_ra>
